<compile_context>
chip_gen: v5e
topology: v5e:2x2
jax: 0.10.0
libtpu: 0.0.40
codegen_flags: <defaults>
</compile_context>

<pallas_src>
import jax
import jax.numpy as jnp
from jax.experimental import pallas as pl
from jax.experimental.pallas import tpu as pltpu

_EPS = 1e-5


# ----------------------------------------------------------------------------
# In-kernel helpers
# ----------------------------------------------------------------------------
def _zero_halo(buf):
    """Zero ONLY the 1-pixel halo strips of a padded (Hp, Wp, C) VMEM scratch buffer.

    The interior is fully rewritten every grid step, so stale data never leaks; zeroing only
    the halo removes ~half of the scratch store traffic vs. a full-buffer zero.
    """
    hp, wp, c = buf.shape
    zrow = jnp.zeros((1, wp, c), buf.dtype)
    buf[0:1, :, :] = zrow                   # top halo row
    buf[hp - 1:hp, :, :] = zrow             # bottom halo row
    zcol = jnp.zeros((hp, 1, c), buf.dtype)
    buf[:, 0:1, :] = zcol                   # left halo column
    buf[:, wp - 1:wp, :] = zcol             # right halo column


def _im2col(pad_ref, *, hout, wout, stride):
    """Build a (hout*wout, 9*Cin) bf16 im2col patch from a zero-halo padded scratch.

    The 9 shifted views are materialized ONCE and concatenated along the lane dim so the
    conv becomes a single MXU dot with K = 9*Cin.
    """
    cin = pad_ref.shape[-1]
    taps = []
    for kh in range(3):
        for kw in range(3):
            if stride == 1:
                t = pad_ref[kh:kh + hout, kw:kw + wout, :]
            else:
                # strided output computed directly (no full-res compute + subsample)
                t = pad_ref[pl.ds(kh, hout, stride=stride),
                            pl.ds(kw, wout, stride=stride), :]
            taps.append(t.reshape(hout * wout, cin))
    return jnp.concatenate(taps, axis=-1).astype(jnp.bfloat16)


def _conv_bn(patch, w_ref, b_ref, relu):
    """patch (P, 9*Cin) bf16 @ w (9*Cin, Cout) bf16 -> f32, + folded-BN bias, optional ReLU."""
    y = jnp.dot(patch, w_ref[...], preferred_element_type=jnp.float32) + b_ref[...]
    if relu:
        y = jnp.maximum(y, 0.0)
    return y


def _make_fused_kernel(H, W, Ho, Wo, stride, has_downsample):
    def kernel(*refs):
        if has_downsample:
            (x_ref, w1, b1, w2, b2, w3, b3, wse1, wse2, wd, bd,
             out_ref, xpad, ypad1, ypad2) = refs
        else:
            (x_ref, w1, b1, w2, b2, w3, b3, wse1, wse2,
             out_ref, xpad, ypad1, ypad2) = refs
            wd = bd = None

        cin = x_ref.shape[-1]
        cbt = ypad1.shape[-1]
        cout = ypad2.shape[-1]

        # Halo-only zeroing (interiors are fully rewritten each step).
        _zero_halo(xpad)
        _zero_halo(ypad1)
        _zero_halo(ypad2)

        # Padded input built in VMEM (f32, keeps the identity skip path exact).
        xpad[1:H + 1, 1:W + 1, :] = x_ref[0]

        # conv1 + bn1 + relu   (stride 1) : one K=9*Cin dot
        xpatch = _im2col(xpad, hout=H, wout=W, stride=1)
        y1 = _conv_bn(xpatch, w1, b1, relu=True)
        ypad1[1:H + 1, 1:W + 1, :] = y1.reshape(H, W, cbt)

        # conv2 + bn2 + relu   (stride = `stride`)
        p2 = _im2col(ypad1, hout=Ho, wout=Wo, stride=stride)
        y2 = _conv_bn(p2, w2, b2, relu=True)
        ypad2[1:Ho + 1, 1:Wo + 1, :] = y2.reshape(Ho, Wo, cout)

        # conv3 + bn3          (stride 1, no relu)
        p3 = _im2col(ypad2, hout=Ho, wout=Wo, stride=1)
        y3 = _conv_bn(p3, w3, b3, relu=False)

        # --- SE module: global-avg-pool -> 1x1 -> relu -> 1x1 -> sigmoid -> scale ---
        # (3x3 convs on a 1x1 map with pad=1 reduce to the center tap == 1x1 conv)
        pooled = jnp.mean(y3, axis=0, keepdims=True).astype(jnp.bfloat16)     # (1, cout)
        h = jnp.dot(pooled, wse1[...], preferred_element_type=jnp.float32)
        h = jnp.maximum(h, 0.0).astype(jnp.bfloat16)                          # (1, S)
        g = jnp.dot(h, wse2[...], preferred_element_type=jnp.float32)
        g = 1.0 / (1.0 + jnp.exp(-g))                                         # sigmoid, (1, cout)

        # --- residual branch ---
        if has_downsample:
            if stride == 1:
                pd = xpatch                                   # reuse conv1's im2col patch
            else:
                pd = _im2col(xpad, hout=Ho, wout=Wo, stride=stride)
            res = _conv_bn(pd, wd, bd, relu=False)
        else:
            # identity residual, exact f32 (requires Cin == Cout, stride == 1; asserted in wrapper)
            res = x_ref[0].reshape(H * W, cin)

        out = jnp.maximum(y3 * g + res, 0.0)
        out_ref[0] = out.astype(out_ref.dtype)                # (Ho*Wo, Cout) bf16 writeback

    return kernel


# ----------------------------------------------------------------------------
# Wrapper: BN folding, layout transposes, pallas_call
# ----------------------------------------------------------------------------
def _fold_bn_into_w(w_oihw, bn):
    gamma, beta, mean, var = bn
    scale = gamma * jax.lax.rsqrt(var + _EPS)          # (Cout,)
    bias = beta - mean * scale
    return w_oihw * scale[:, None, None, None], bias


def _nbytes(shape, dtype):
    n = 1
    for d in shape:
        n *= int(d)
    return n * jnp.dtype(dtype).itemsize


def se_bottleneck_forward(x_nchw, params, *, stride=1, has_downsample=False):
    N, Cin, H, W = x_nchw.shape
    Cbt = params["w1"].shape[0]
    Cout = params["w3"].shape[0]
    S = params["se_w1"].shape[0]
    Ho = (H - 1) // stride + 1
    Wo = (W - 1) // stride + 1

    if not has_downsample:
        assert stride == 1 and Cin == Cout, \
            "identity residual requires stride == 1 and Cin == Cout"

    # NCHW -> NHWC (lane = channel).  Kept f32 so the identity skip path is exact.
    x = jnp.transpose(x_nchw, (0, 2, 3, 1))

    def prep(w_key, bn_key):
        w, b = _fold_bn_into_w(params[w_key], params[bn_key])
        co, ci = w.shape[0], w.shape[1]
        # (Cout, Cin, 3, 3) -> (kh, kw, Cin, Cout) -> (9*Cin, Cout): matches im2col column order.
        wk = jnp.transpose(w, (2, 3, 1, 0)).reshape(9 * ci, co).astype(jnp.bfloat16)
        return wk, b.reshape(1, co).astype(jnp.float32)

    w1, b1 = prep("w1", "bn1")
    w2, b2 = prep("w2", "bn2")
    w3, b3 = prep("w3", "bn3")
    # SE 3x3 convs on a 1x1 map (pad=1) reduce to the center tap; bf16 for the MXU path.
    wse1 = jnp.transpose(params["se_w1"][:, :, 1, 1], (1, 0)).astype(jnp.bfloat16)  # (Cout, S)
    wse2 = jnp.transpose(params["se_w2"][:, :, 1, 1], (1, 0)).astype(jnp.bfloat16)  # (S, Cout)

    args = [x, w1, b1, w2, b2, w3, b3, wse1, wse2]
    in_specs = [
        pl.BlockSpec((1, H, W, Cin), lambda n: (n, 0, 0, 0)),
        pl.BlockSpec((9 * Cin, Cbt), lambda n: (0, 0)),
        pl.BlockSpec((1, Cbt), lambda n: (0, 0)),
        pl.BlockSpec((9 * Cbt, Cout), lambda n: (0, 0)),
        pl.BlockSpec((1, Cout), lambda n: (0, 0)),
        pl.BlockSpec((9 * Cout, Cout), lambda n: (0, 0)),
        pl.BlockSpec((1, Cout), lambda n: (0, 0)),
        pl.BlockSpec((Cout, S), lambda n: (0, 0)),
        pl.BlockSpec((S, Cout), lambda n: (0, 0)),
    ]
    if has_downsample:
        wd, bd = prep("wd", "bnd")
        args += [wd, bd]
        in_specs += [
            pl.BlockSpec((9 * Cin, Cout), lambda n: (0, 0)),
            pl.BlockSpec((1, Cout), lambda n: (0, 0)),
        ]

    scratch_shapes = [
        pltpu.VMEM((H + 2, W + 2, Cin), jnp.float32),     # padded x
        pltpu.VMEM((H + 2, W + 2, Cbt), jnp.float32),     # padded conv1 out
        pltpu.VMEM((Ho + 2, Wo + 2, Cout), jnp.float32),  # padded conv2 out
    ]

    # Explicit scoped-VMEM budget: scratch + 2x (input blocks + output block) + headroom.
    scratch_bytes = (_nbytes((H + 2, W + 2, Cin), jnp.float32)
                     + _nbytes((H + 2, W + 2, Cbt), jnp.float32)
                     + _nbytes((Ho + 2, Wo + 2, Cout), jnp.float32))
    in_block_bytes = (_nbytes((1, H, W, Cin), jnp.float32)
                      + sum(_nbytes(a.shape, a.dtype) for a in args[1:]))
    out_block_bytes = _nbytes((1, Ho * Wo, Cout), jnp.bfloat16)
    vmem_limit = int(min(64 * 1024 * 1024,
                         max(32 * 1024 * 1024,
                             scratch_bytes + 2 * (in_block_bytes + out_block_bytes)
                             + 4 * 1024 * 1024)))

    kernel = _make_fused_kernel(H, W, Ho, Wo, stride, has_downsample)
    out = pl.pallas_call(
        kernel,
        out_shape=jax.ShapeDtypeStruct((N, Ho * Wo, Cout), jnp.bfloat16),
        grid_spec=pltpu.PrefetchScalarGridSpec(
            num_scalar_prefetch=0,
            grid=(N,),
            in_specs=in_specs,
            out_specs=pl.BlockSpec((1, Ho * Wo, Cout), lambda n: (n, 0, 0)),
            scratch_shapes=scratch_shapes,
        ),
        compiler_params=pltpu.CompilerParams(
            dimension_semantics=("parallel",),
            vmem_limit_bytes=vmem_limit,
        ),
    )(*args)

    out = out.astype(jnp.float32).reshape(N, Ho, Wo, Cout)
    return jnp.transpose(out, (0, 3, 1, 2))                       # NHWC -> NCHW


# ----------------------------------------------------------------------------
# Parameter setup
# ----------------------------------------------------------------------------
def init_params(key, kernels_in, kernels_bt, kernels_out, se_size, has_downsample):
    ks = jax.random.split(key, 10)

    def w(k, co, ci):
        return jax.random.normal(k, (co, ci, 3, 3), jnp.float32) * 0.1

    def bn(k, c):
        k1, k2, k3, k4 = jax.random.split(k, 4)
        gamma = 1.0 + 0.1 * jax.random.normal(k1, (c,), jnp.float32)
        beta = 0.1 * jax.random.normal(k2, (c,), jnp.float32)
        mean = 0.1 * jax.random.normal(k3, (c,), jnp.float32)
        var = jnp.abs(jax.random.normal(k4, (c,), jnp.float32)) * 0.1 + 0.5
        return (gamma, beta, mean, var)

    p = {
        "w1": w(ks[0], kernels_bt, kernels_in),   "bn1": bn(ks[1], kernels_bt),
        "w2": w(ks[2], kernels_out, kernels_bt),  "bn2": bn(ks[3], kernels_out),
        "w3": w(ks[4], kernels_out, kernels_out), "bn3": bn(ks[5], kernels_out),
        "se_w1": w(ks[6], se_size, kernels_out),
        "se_w2": w(ks[7], kernels_out, se_size),
    }
    if has_downsample:
        p["wd"] = w(ks[8], kernels_out, kernels_in)
        p["bnd"] = bn(ks[9], kernels_out)
    return p


# ----------------------------------------------------------------------------
# Pure-JAX reference (NCHW, mirrors the PyTorch forward in eval mode)
# ----------------------------------------------------------------------------
def _ref_conv(x, w, stride=1):
    return jax.lax.conv_general_dilated(
        x, w, (stride, stride), ((1, 1), (1, 1)),
        dimension_numbers=("NCHW", "OIHW", "NCHW"))


def _ref_bn(x, bn):
    g, b, m, v = bn
    return ((x - m[None, :, None, None]) / jnp.sqrt(v[None, :, None, None] + _EPS)
            * g[None, :, None, None] + b[None, :, None, None])


def ref_forward(x, params, *, stride=1, has_downsample=False):
    x1 = jax.nn.relu(_ref_bn(_ref_conv(x, params["w1"]), params["bn1"]))
    x1 = jax.nn.relu(_ref_bn(_ref_conv(x1, params["w2"], stride), params["bn2"]))
    x1 = _ref_bn(_ref_conv(x1, params["w3"]), params["bn3"])
    # SEModule
    p = jnp.mean(x1, axis=(2, 3), keepdims=True)
    h = jax.nn.relu(_ref_conv(p, params["se_w1"]))
    g = jax.nn.sigmoid(_ref_conv(h, params["se_w2"]))
    x1 = x1 * g
    if has_downsample:
        res = _ref_bn(_ref_conv(x, params["wd"], stride), params["bnd"])
    else:
        res = x
    return jax.nn.relu(x1 + res)


# ----------------------------------------------------------------------------
if __name__ == "__main__":
    key = jax.random.PRNGKey(0)

    def run_case(name, N, H, W, cin, cbt, cout, se, stride, has_ds, k):
        kx, kp = jax.random.split(k)
        x = jax.random.normal(kx, (N, cin, H, W), jnp.float32)
        params = init_params(kp, cin, cbt, cout, se, has_ds)
        out = jax.block_until_ready(
            se_bottleneck_forward(x, params, stride=stride, has_downsample=has_ds))
        ref = jax.block_until_ready(
            ref_forward(x, params, stride=stride, has_downsample=has_ds))
        Ho = (H - 1) // stride + 1
        Wo = (W - 1) // stride + 1
        assert out.shape == ref.shape == (N, cout, Ho, Wo), (out.shape, ref.shape)
        err = float(jnp.max(jnp.abs(out - ref)))
        # bf16 MXU operands + bf16 HBM writeback vs. f32 reference -> a few e-3 abs error.
        assert jnp.allclose(out, ref, rtol=3e-2, atol=3e-2), \
            f"{name}: max abs diff {err}"

    k1, k2 = jax.random.split(key)
    # identity residual (Cin == Cout, stride 1)
    run_case("identity", 2, 16, 16, 4, 8, 4, 16, 1, False, k1)
    # downsample branch (conv+bn residual), different in/out channels
    run_case("downsample", 2, 16, 16, 3, 8, 16, 8, 1, True, k2)

    print("KERNEL_OK")
</pallas_src>

<mosaic_0001>
module attributes {stable_mosaic.version = 11 : i64} {
  func.func @kernel(%arg0: i32, %arg1: memref<1x16x16x4xf32, #tpu.memory_space<vmem>>, %arg2: memref<36x8xbf16, #tpu.memory_space<vmem>>, %arg3: memref<1x8xf32, #tpu.memory_space<vmem>>, %arg4: memref<72x4xbf16, #tpu.memory_space<vmem>>, %arg5: memref<1x4xf32, #tpu.memory_space<vmem>>, %arg6: memref<36x4xbf16, #tpu.memory_space<vmem>>, %arg7: memref<1x4xf32, #tpu.memory_space<vmem>>, %arg8: memref<4x16xbf16, #tpu.memory_space<vmem>>, %arg9: memref<16x4xbf16, #tpu.memory_space<vmem>>, %arg10: memref<1x256x4xbf16, #tpu.memory_space<vmem>>, %arg11: memref<18x18x4xf32, #tpu.memory_space<vmem>>, %arg12: memref<18x18x8xf32, #tpu.memory_space<vmem>>, %arg13: memref<18x18x4xf32, #tpu.memory_space<vmem>>) attributes {dimension_semantics = [#tpu.dimension_semantics<parallel>], iteration_bounds = array<i64: 2>, scalar_prefetch = 0 : i64, scratch_operands = 3 : i64, tpu.core_type = #tpu.core_type<tc>, window_params = [{transform_indices = @transform_0, window_bounds = array<i64: 1, 16, 16, 4>}, {pipeline_mode = #tpu.pipeline_mode<synchronous>, transform_indices = @transform_1, window_bounds = array<i64: 36, 8>}, {pipeline_mode = #tpu.pipeline_mode<synchronous>, transform_indices = @transform_2, window_bounds = array<i64: 1, 8>}, {pipeline_mode = #tpu.pipeline_mode<synchronous>, transform_indices = @transform_3, window_bounds = array<i64: 72, 4>}, {pipeline_mode = #tpu.pipeline_mode<synchronous>, transform_indices = @transform_4, window_bounds = array<i64: 1, 4>}, {pipeline_mode = #tpu.pipeline_mode<synchronous>, transform_indices = @transform_5, window_bounds = array<i64: 36, 4>}, {pipeline_mode = #tpu.pipeline_mode<synchronous>, transform_indices = @transform_6, window_bounds = array<i64: 1, 4>}, {pipeline_mode = #tpu.pipeline_mode<synchronous>, transform_indices = @transform_7, window_bounds = array<i64: 4, 16>}, {pipeline_mode = #tpu.pipeline_mode<synchronous>, transform_indices = @transform_8, window_bounds = array<i64: 16, 4>}, {transform_indices = @transform_9, window_bounds = array<i64: 1, 256, 4>}]} {
    %cst = arith.constant 0.000000e+00 : f32
    %0 = vector.broadcast %cst : f32 to vector<1x18x4xf32>
    %c0 = arith.constant 0 : index
    %c0_0 = arith.constant 0 : index
    %c0_1 = arith.constant 0 : index
    %1 = vector.load %arg11[%c0, %c0_0, %c0_1] : memref<18x18x4xf32, #tpu.memory_space<vmem>>, vector<1x18x4xf32>
    tpu.vector_store %arg11[%c0, %c0_0, %c0_1], %0 {strides = array<i32>} : memref<18x18x4xf32, #tpu.memory_space<vmem>>, vector<1x18x4xf32>,
    %c17 = arith.constant 17 : index
    %c0_2 = arith.constant 0 : index
    %c0_3 = arith.constant 0 : index
    %2 = vector.load %arg11[%c17, %c0_2, %c0_3] : memref<18x18x4xf32, #tpu.memory_space<vmem>>, vector<1x18x4xf32>
    tpu.vector_store %arg11[%c17, %c0_2, %c0_3], %0 {strides = array<i32>} : memref<18x18x4xf32, #tpu.memory_space<vmem>>, vector<1x18x4xf32>,
    %cst_4 = arith.constant 0.000000e+00 : f32
    %3 = vector.broadcast %cst_4 : f32 to vector<18x1x4xf32>
    %c0_5 = arith.constant 0 : index
    %c0_6 = arith.constant 0 : index
    %c0_7 = arith.constant 0 : index
    %4 = vector.load %arg11[%c0_5, %c0_6, %c0_7] : memref<18x18x4xf32, #tpu.memory_space<vmem>>, vector<18x1x4xf32>
    tpu.vector_store %arg11[%c0_5, %c0_6, %c0_7], %3 {strides = array<i32>} : memref<18x18x4xf32, #tpu.memory_space<vmem>>, vector<18x1x4xf32>,
    %c0_8 = arith.constant 0 : index
    %c17_9 = arith.constant 17 : index
    %c0_10 = arith.constant 0 : index
    %5 = vector.load %arg11[%c0_8, %c17_9, %c0_10] : memref<18x18x4xf32, #tpu.memory_space<vmem>>, vector<18x1x4xf32>
    tpu.vector_store %arg11[%c0_8, %c17_9, %c0_10], %3 {strides = array<i32>} : memref<18x18x4xf32, #tpu.memory_space<vmem>>, vector<18x1x4xf32>,
    %cst_11 = arith.constant 0.000000e+00 : f32
    %6 = vector.broadcast %cst_11 : f32 to vector<1x18x8xf32>
    %c0_12 = arith.constant 0 : index
    %c0_13 = arith.constant 0 : index
    %c0_14 = arith.constant 0 : index
    %7 = vector.load %arg12[%c0_12, %c0_13, %c0_14] : memref<18x18x8xf32, #tpu.memory_space<vmem>>, vector<1x18x8xf32>
    tpu.vector_store %arg12[%c0_12, %c0_13, %c0_14], %6 {strides = array<i32>} : memref<18x18x8xf32, #tpu.memory_space<vmem>>, vector<1x18x8xf32>,
    %c17_15 = arith.constant 17 : index
    %c0_16 = arith.constant 0 : index
    %c0_17 = arith.constant 0 : index
    %8 = vector.load %arg12[%c17_15, %c0_16, %c0_17] : memref<18x18x8xf32, #tpu.memory_space<vmem>>, vector<1x18x8xf32>
    tpu.vector_store %arg12[%c17_15, %c0_16, %c0_17], %6 {strides = array<i32>} : memref<18x18x8xf32, #tpu.memory_space<vmem>>, vector<1x18x8xf32>,
    %cst_18 = arith.constant 0.000000e+00 : f32
    %9 = vector.broadcast %cst_18 : f32 to vector<18x1x8xf32>
    %c0_19 = arith.constant 0 : index
    %c0_20 = arith.constant 0 : index
    %c0_21 = arith.constant 0 : index
    %10 = vector.load %arg12[%c0_19, %c0_20, %c0_21] : memref<18x18x8xf32, #tpu.memory_space<vmem>>, vector<18x1x8xf32>
    tpu.vector_store %arg12[%c0_19, %c0_20, %c0_21], %9 {strides = array<i32>} : memref<18x18x8xf32, #tpu.memory_space<vmem>>, vector<18x1x8xf32>,
    %c0_22 = arith.constant 0 : index
    %c17_23 = arith.constant 17 : index
    %c0_24 = arith.constant 0 : index
    %11 = vector.load %arg12[%c0_22, %c17_23, %c0_24] : memref<18x18x8xf32, #tpu.memory_space<vmem>>, vector<18x1x8xf32>
    tpu.vector_store %arg12[%c0_22, %c17_23, %c0_24], %9 {strides = array<i32>} : memref<18x18x8xf32, #tpu.memory_space<vmem>>, vector<18x1x8xf32>,
    %cst_25 = arith.constant 0.000000e+00 : f32
    %12 = vector.broadcast %cst_25 : f32 to vector<1x18x4xf32>
    %c0_26 = arith.constant 0 : index
    %c0_27 = arith.constant 0 : index
    %c0_28 = arith.constant 0 : index
    %13 = vector.load %arg13[%c0_26, %c0_27, %c0_28] : memref<18x18x4xf32, #tpu.memory_space<vmem>>, vector<1x18x4xf32>
    tpu.vector_store %arg13[%c0_26, %c0_27, %c0_28], %12 {strides = array<i32>} : memref<18x18x4xf32, #tpu.memory_space<vmem>>, vector<1x18x4xf32>,
    %c17_29 = arith.constant 17 : index
    %c0_30 = arith.constant 0 : index
    %c0_31 = arith.constant 0 : index
    %14 = vector.load %arg13[%c17_29, %c0_30, %c0_31] : memref<18x18x4xf32, #tpu.memory_space<vmem>>, vector<1x18x4xf32>
    tpu.vector_store %arg13[%c17_29, %c0_30, %c0_31], %12 {strides = array<i32>} : memref<18x18x4xf32, #tpu.memory_space<vmem>>, vector<1x18x4xf32>,
    %cst_32 = arith.constant 0.000000e+00 : f32
    %15 = vector.broadcast %cst_32 : f32 to vector<18x1x4xf32>
    %c0_33 = arith.constant 0 : index
    %c0_34 = arith.constant 0 : index
    %c0_35 = arith.constant 0 : index
    %16 = vector.load %arg13[%c0_33, %c0_34, %c0_35] : memref<18x18x4xf32, #tpu.memory_space<vmem>>, vector<18x1x4xf32>
    tpu.vector_store %arg13[%c0_33, %c0_34, %c0_35], %15 {strides = array<i32>} : memref<18x18x4xf32, #tpu.memory_space<vmem>>, vector<18x1x4xf32>,
    %c0_36 = arith.constant 0 : index
    %c17_37 = arith.constant 17 : index
    %c0_38 = arith.constant 0 : index
    %17 = vector.load %arg13[%c0_36, %c17_37, %c0_38] : memref<18x18x4xf32, #tpu.memory_space<vmem>>, vector<18x1x4xf32>
    tpu.vector_store %arg13[%c0_36, %c17_37, %c0_38], %15 {strides = array<i32>} : memref<18x18x4xf32, #tpu.memory_space<vmem>>, vector<18x1x4xf32>,
    %c0_39 = arith.constant 0 : index
    %c0_40 = arith.constant 0 : index
    %c0_41 = arith.constant 0 : index
    %c0_42 = arith.constant 0 : index
    %18 = vector.load %arg1[%c0_39, %c0_40, %c0_41, %c0_42] : memref<1x16x16x4xf32, #tpu.memory_space<vmem>>, vector<1x16x16x4xf32>
    %19 = vector.shape_cast %18 : vector<1x16x16x4xf32> to vector<16x16x4xf32>
    %c1 = arith.constant 1 : index
    %c1_43 = arith.constant 1 : index
    %c0_44 = arith.constant 0 : index
    %20 = vector.load %arg11[%c1, %c1_43, %c0_44] : memref<18x18x4xf32, #tpu.memory_space<vmem>>, vector<16x16x4xf32>
    tpu.vector_store %arg11[%c1, %c1_43, %c0_44], %19 {strides = array<i32>} : memref<18x18x4xf32, #tpu.memory_space<vmem>>, vector<16x16x4xf32>,
    %c0_45 = arith.constant 0 : index
    %c0_46 = arith.constant 0 : index
    %c0_47 = arith.constant 0 : index
    %21 = vector.load %arg11[%c0_45, %c0_46, %c0_47] : memref<18x18x4xf32, #tpu.memory_space<vmem>>, vector<16x16x4xf32>
    %22 = vector.shape_cast %21 : vector<16x16x4xf32> to vector<256x4xf32>
    %c0_48 = arith.constant 0 : index
    %c1_49 = arith.constant 1 : index
    %c0_50 = arith.constant 0 : index
    %23 = vector.load %arg11[%c0_48, %c1_49, %c0_50] : memref<18x18x4xf32, #tpu.memory_space<vmem>>, vector<16x16x4xf32>
    %24 = vector.shape_cast %23 : vector<16x16x4xf32> to vector<256x4xf32>
    %c0_51 = arith.constant 0 : index
    %c2 = arith.constant 2 : index
    %c0_52 = arith.constant 0 : index
    %25 = vector.load %arg11[%c0_51, %c2, %c0_52] : memref<18x18x4xf32, #tpu.memory_space<vmem>>, vector<16x16x4xf32>
    %26 = vector.shape_cast %25 : vector<16x16x4xf32> to vector<256x4xf32>
    %c1_53 = arith.constant 1 : index
    %c0_54 = arith.constant 0 : index
    %c0_55 = arith.constant 0 : index
    %27 = vector.load %arg11[%c1_53, %c0_54, %c0_55] : memref<18x18x4xf32, #tpu.memory_space<vmem>>, vector<16x16x4xf32>
    %28 = vector.shape_cast %27 : vector<16x16x4xf32> to vector<256x4xf32>
    %c1_56 = arith.constant 1 : index
    %c1_57 = arith.constant 1 : index
    %c0_58 = arith.constant 0 : index
    %29 = vector.load %arg11[%c1_56, %c1_57, %c0_58] : memref<18x18x4xf32, #tpu.memory_space<vmem>>, vector<16x16x4xf32>
    %30 = vector.shape_cast %29 : vector<16x16x4xf32> to vector<256x4xf32>
    %c1_59 = arith.constant 1 : index
    %c2_60 = arith.constant 2 : index
    %c0_61 = arith.constant 0 : index
    %31 = vector.load %arg11[%c1_59, %c2_60, %c0_61] : memref<18x18x4xf32, #tpu.memory_space<vmem>>, vector<16x16x4xf32>
    %32 = vector.shape_cast %31 : vector<16x16x4xf32> to vector<256x4xf32>
    %c2_62 = arith.constant 2 : index
    %c0_63 = arith.constant 0 : index
    %c0_64 = arith.constant 0 : index
    %33 = vector.load %arg11[%c2_62, %c0_63, %c0_64] : memref<18x18x4xf32, #tpu.memory_space<vmem>>, vector<16x16x4xf32>
    %34 = vector.shape_cast %33 : vector<16x16x4xf32> to vector<256x4xf32>
    %c2_65 = arith.constant 2 : index
    %c1_66 = arith.constant 1 : index
    %c0_67 = arith.constant 0 : index
    %35 = vector.load %arg11[%c2_65, %c1_66, %c0_67] : memref<18x18x4xf32, #tpu.memory_space<vmem>>, vector<16x16x4xf32>
    %36 = vector.shape_cast %35 : vector<16x16x4xf32> to vector<256x4xf32>
    %c2_68 = arith.constant 2 : index
    %c2_69 = arith.constant 2 : index
    %c0_70 = arith.constant 0 : index
    %37 = vector.load %arg11[%c2_68, %c2_69, %c0_70] : memref<18x18x4xf32, #tpu.memory_space<vmem>>, vector<16x16x4xf32>
    %38 = vector.shape_cast %37 : vector<16x16x4xf32> to vector<256x4xf32>
    %39 = tpu.concatenate %22, %24, %26, %28, %30, %32, %34, %36, %38 in 1 : vector<256x4xf32>, vector<256x4xf32>, vector<256x4xf32>, vector<256x4xf32>, vector<256x4xf32>, vector<256x4xf32>, vector<256x4xf32>, vector<256x4xf32>, vector<256x4xf32> -> vector<256x36xf32>
    %40 = arith.truncf %39 : vector<256x36xf32> to vector<256x36xbf16>
    %c0_71 = arith.constant 0 : index
    %c0_72 = arith.constant 0 : index
    %41 = vector.load %arg2[%c0_71, %c0_72] : memref<36x8xbf16, #tpu.memory_space<vmem>>, vector<36x8xbf16>
    %cst_73 = arith.constant dense<0.000000e+00> : vector<256x8xf32>
    %42 = tpu.matmul %40, %41, %cst_73 {dimension_numbers = #tpu.dot_dimension_numbers<[1], [0], [0], [1], [0, 0, 1, 1], [], []>} : vector<256x36xbf16>, vector<36x8xbf16>, vector<256x8xf32> -> vector<256x8xf32>
    %c0_74 = arith.constant 0 : index
    %c0_75 = arith.constant 0 : index
    %43 = vector.load %arg3[%c0_74, %c0_75] : memref<1x8xf32, #tpu.memory_space<vmem>>, vector<1x8xf32>
    %44 = vector.broadcast %43 : vector<1x8xf32> to vector<256x8xf32>
    %45 = arith.addf %42, %44 : vector<256x8xf32>
    %cst_76 = arith.constant 0.000000e+00 : f32
    %46 = vector.broadcast %cst_76 : f32 to vector<256x8xf32>
    %47 = arith.maximumf %45, %46 : vector<256x8xf32>
    %48 = vector.shape_cast %47 : vector<256x8xf32> to vector<16x16x8xf32>
    %c1_77 = arith.constant 1 : index
    %c1_78 = arith.constant 1 : index
    %c0_79 = arith.constant 0 : index
    %49 = vector.load %arg12[%c1_77, %c1_78, %c0_79] : memref<18x18x8xf32, #tpu.memory_space<vmem>>, vector<16x16x8xf32>
    tpu.vector_store %arg12[%c1_77, %c1_78, %c0_79], %48 {strides = array<i32>} : memref<18x18x8xf32, #tpu.memory_space<vmem>>, vector<16x16x8xf32>,
    %c0_80 = arith.constant 0 : index
    %c0_81 = arith.constant 0 : index
    %c0_82 = arith.constant 0 : index
    %50 = vector.load %arg12[%c0_80, %c0_81, %c0_82] : memref<18x18x8xf32, #tpu.memory_space<vmem>>, vector<16x16x8xf32>
    %51 = vector.shape_cast %50 : vector<16x16x8xf32> to vector<256x8xf32>
    %c0_83 = arith.constant 0 : index
    %c1_84 = arith.constant 1 : index
    %c0_85 = arith.constant 0 : index
    %52 = vector.load %arg12[%c0_83, %c1_84, %c0_85] : memref<18x18x8xf32, #tpu.memory_space<vmem>>, vector<16x16x8xf32>
    %53 = vector.shape_cast %52 : vector<16x16x8xf32> to vector<256x8xf32>
    %c0_86 = arith.constant 0 : index
    %c2_87 = arith.constant 2 : index
    %c0_88 = arith.constant 0 : index
    %54 = vector.load %arg12[%c0_86, %c2_87, %c0_88] : memref<18x18x8xf32, #tpu.memory_space<vmem>>, vector<16x16x8xf32>
    %55 = vector.shape_cast %54 : vector<16x16x8xf32> to vector<256x8xf32>
    %c1_89 = arith.constant 1 : index
    %c0_90 = arith.constant 0 : index
    %c0_91 = arith.constant 0 : index
    %56 = vector.load %arg12[%c1_89, %c0_90, %c0_91] : memref<18x18x8xf32, #tpu.memory_space<vmem>>, vector<16x16x8xf32>
    %57 = vector.shape_cast %56 : vector<16x16x8xf32> to vector<256x8xf32>
    %c1_92 = arith.constant 1 : index
    %c1_93 = arith.constant 1 : index
    %c0_94 = arith.constant 0 : index
    %58 = vector.load %arg12[%c1_92, %c1_93, %c0_94] : memref<18x18x8xf32, #tpu.memory_space<vmem>>, vector<16x16x8xf32>
    %59 = vector.shape_cast %58 : vector<16x16x8xf32> to vector<256x8xf32>
    %c1_95 = arith.constant 1 : index
    %c2_96 = arith.constant 2 : index
    %c0_97 = arith.constant 0 : index
    %60 = vector.load %arg12[%c1_95, %c2_96, %c0_97] : memref<18x18x8xf32, #tpu.memory_space<vmem>>, vector<16x16x8xf32>
    %61 = vector.shape_cast %60 : vector<16x16x8xf32> to vector<256x8xf32>
    %c2_98 = arith.constant 2 : index
    %c0_99 = arith.constant 0 : index
    %c0_100 = arith.constant 0 : index
    %62 = vector.load %arg12[%c2_98, %c0_99, %c0_100] : memref<18x18x8xf32, #tpu.memory_space<vmem>>, vector<16x16x8xf32>
    %63 = vector.shape_cast %62 : vector<16x16x8xf32> to vector<256x8xf32>
    %c2_101 = arith.constant 2 : index
    %c1_102 = arith.constant 1 : index
    %c0_103 = arith.constant 0 : index
    %64 = vector.load %arg12[%c2_101, %c1_102, %c0_103] : memref<18x18x8xf32, #tpu.memory_space<vmem>>, vector<16x16x8xf32>
    %65 = vector.shape_cast %64 : vector<16x16x8xf32> to vector<256x8xf32>
    %c2_104 = arith.constant 2 : index
    %c2_105 = arith.constant 2 : index
    %c0_106 = arith.constant 0 : index
    %66 = vector.load %arg12[%c2_104, %c2_105, %c0_106] : memref<18x18x8xf32, #tpu.memory_space<vmem>>, vector<16x16x8xf32>
    %67 = vector.shape_cast %66 : vector<16x16x8xf32> to vector<256x8xf32>
    %68 = tpu.concatenate %51, %53, %55, %57, %59, %61, %63, %65, %67 in 1 : vector<256x8xf32>, vector<256x8xf32>, vector<256x8xf32>, vector<256x8xf32>, vector<256x8xf32>, vector<256x8xf32>, vector<256x8xf32>, vector<256x8xf32>, vector<256x8xf32> -> vector<256x72xf32>
    %69 = arith.truncf %68 : vector<256x72xf32> to vector<256x72xbf16>
    %c0_107 = arith.constant 0 : index
    %c0_108 = arith.constant 0 : index
    %70 = vector.load %arg4[%c0_107, %c0_108] : memref<72x4xbf16, #tpu.memory_space<vmem>>, vector<72x4xbf16>
    %cst_109 = arith.constant dense<0.000000e+00> : vector<256x4xf32>
    %71 = tpu.matmul %69, %70, %cst_109 {dimension_numbers = #tpu.dot_dimension_numbers<[1], [0], [0], [1], [0, 0, 1, 1], [], []>} : vector<256x72xbf16>, vector<72x4xbf16>, vector<256x4xf32> -> vector<256x4xf32>
    %c0_110 = arith.constant 0 : index
    %c0_111 = arith.constant 0 : index
    %72 = vector.load %arg5[%c0_110, %c0_111] : memref<1x4xf32, #tpu.memory_space<vmem>>, vector<1x4xf32>
    %73 = vector.broadcast %72 : vector<1x4xf32> to vector<256x4xf32>
    %74 = arith.addf %71, %73 : vector<256x4xf32>
    %cst_112 = arith.constant 0.000000e+00 : f32
    %75 = vector.broadcast %cst_112 : f32 to vector<256x4xf32>
    %76 = arith.maximumf %74, %75 : vector<256x4xf32>
    %77 = vector.shape_cast %76 : vector<256x4xf32> to vector<16x16x4xf32>
    %c1_113 = arith.constant 1 : index
    %c1_114 = arith.constant 1 : index
    %c0_115 = arith.constant 0 : index
    %78 = vector.load %arg13[%c1_113, %c1_114, %c0_115] : memref<18x18x4xf32, #tpu.memory_space<vmem>>, vector<16x16x4xf32>
    tpu.vector_store %arg13[%c1_113, %c1_114, %c0_115], %77 {strides = array<i32>} : memref<18x18x4xf32, #tpu.memory_space<vmem>>, vector<16x16x4xf32>,
    %c0_116 = arith.constant 0 : index
    %c0_117 = arith.constant 0 : index
    %c0_118 = arith.constant 0 : index
    %79 = vector.load %arg13[%c0_116, %c0_117, %c0_118] : memref<18x18x4xf32, #tpu.memory_space<vmem>>, vector<16x16x4xf32>
    %80 = vector.shape_cast %79 : vector<16x16x4xf32> to vector<256x4xf32>
    %c0_119 = arith.constant 0 : index
    %c1_120 = arith.constant 1 : index
    %c0_121 = arith.constant 0 : index
    %81 = vector.load %arg13[%c0_119, %c1_120, %c0_121] : memref<18x18x4xf32, #tpu.memory_space<vmem>>, vector<16x16x4xf32>
    %82 = vector.shape_cast %81 : vector<16x16x4xf32> to vector<256x4xf32>
    %c0_122 = arith.constant 0 : index
    %c2_123 = arith.constant 2 : index
    %c0_124 = arith.constant 0 : index
    %83 = vector.load %arg13[%c0_122, %c2_123, %c0_124] : memref<18x18x4xf32, #tpu.memory_space<vmem>>, vector<16x16x4xf32>
    %84 = vector.shape_cast %83 : vector<16x16x4xf32> to vector<256x4xf32>
    %c1_125 = arith.constant 1 : index
    %c0_126 = arith.constant 0 : index
    %c0_127 = arith.constant 0 : index
    %85 = vector.load %arg13[%c1_125, %c0_126, %c0_127] : memref<18x18x4xf32, #tpu.memory_space<vmem>>, vector<16x16x4xf32>
    %86 = vector.shape_cast %85 : vector<16x16x4xf32> to vector<256x4xf32>
    %c1_128 = arith.constant 1 : index
    %c1_129 = arith.constant 1 : index
    %c0_130 = arith.constant 0 : index
    %87 = vector.load %arg13[%c1_128, %c1_129, %c0_130] : memref<18x18x4xf32, #tpu.memory_space<vmem>>, vector<16x16x4xf32>
    %88 = vector.shape_cast %87 : vector<16x16x4xf32> to vector<256x4xf32>
    %c1_131 = arith.constant 1 : index
    %c2_132 = arith.constant 2 : index
    %c0_133 = arith.constant 0 : index
    %89 = vector.load %arg13[%c1_131, %c2_132, %c0_133] : memref<18x18x4xf32, #tpu.memory_space<vmem>>, vector<16x16x4xf32>
    %90 = vector.shape_cast %89 : vector<16x16x4xf32> to vector<256x4xf32>
    %c2_134 = arith.constant 2 : index
    %c0_135 = arith.constant 0 : index
    %c0_136 = arith.constant 0 : index
    %91 = vector.load %arg13[%c2_134, %c0_135, %c0_136] : memref<18x18x4xf32, #tpu.memory_space<vmem>>, vector<16x16x4xf32>
    %92 = vector.shape_cast %91 : vector<16x16x4xf32> to vector<256x4xf32>
    %c2_137 = arith.constant 2 : index
    %c1_138 = arith.constant 1 : index
    %c0_139 = arith.constant 0 : index
    %93 = vector.load %arg13[%c2_137, %c1_138, %c0_139] : memref<18x18x4xf32, #tpu.memory_space<vmem>>, vector<16x16x4xf32>
    %94 = vector.shape_cast %93 : vector<16x16x4xf32> to vector<256x4xf32>
    %c2_140 = arith.constant 2 : index
    %c2_141 = arith.constant 2 : index
    %c0_142 = arith.constant 0 : index
    %95 = vector.load %arg13[%c2_140, %c2_141, %c0_142] : memref<18x18x4xf32, #tpu.memory_space<vmem>>, vector<16x16x4xf32>
    %96 = vector.shape_cast %95 : vector<16x16x4xf32> to vector<256x4xf32>
    %97 = tpu.concatenate %80, %82, %84, %86, %88, %90, %92, %94, %96 in 1 : vector<256x4xf32>, vector<256x4xf32>, vector<256x4xf32>, vector<256x4xf32>, vector<256x4xf32>, vector<256x4xf32>, vector<256x4xf32>, vector<256x4xf32>, vector<256x4xf32> -> vector<256x36xf32>
    %98 = arith.truncf %97 : vector<256x36xf32> to vector<256x36xbf16>
    %c0_143 = arith.constant 0 : index
    %c0_144 = arith.constant 0 : index
    %99 = vector.load %arg6[%c0_143, %c0_144] : memref<36x4xbf16, #tpu.memory_space<vmem>>, vector<36x4xbf16>
    %cst_145 = arith.constant dense<0.000000e+00> : vector<256x4xf32>
    %100 = tpu.matmul %98, %99, %cst_145 {dimension_numbers = #tpu.dot_dimension_numbers<[1], [0], [0], [1], [0, 0, 1, 1], [], []>} : vector<256x36xbf16>, vector<36x4xbf16>, vector<256x4xf32> -> vector<256x4xf32>
    %c0_146 = arith.constant 0 : index
    %c0_147 = arith.constant 0 : index
    %101 = vector.load %arg7[%c0_146, %c0_147] : memref<1x4xf32, #tpu.memory_space<vmem>>, vector<1x4xf32>
    %102 = vector.broadcast %101 : vector<1x4xf32> to vector<256x4xf32>
    %103 = arith.addf %100, %102 : vector<256x4xf32>
    %cst_148 = arith.constant dense<0.000000e+00> : vector<4xf32>
    %104 = vector.multi_reduction <add>, %103, %cst_148 [0] : vector<256x4xf32> to vector<4xf32>
    %105 = vector.shape_cast %104 : vector<4xf32> to vector<1x4xf32>
    %cst_149 = arith.constant 2.560000e+02 : f32
    %106 = vector.broadcast %cst_149 : f32 to vector<1x4xf32>
    %107 = arith.divf %105, %106 : vector<1x4xf32>
    %108 = arith.truncf %107 : vector<1x4xf32> to vector<1x4xbf16>
    %c0_150 = arith.constant 0 : index
    %c0_151 = arith.constant 0 : index
    %109 = vector.load %arg8[%c0_150, %c0_151] : memref<4x16xbf16, #tpu.memory_space<vmem>>, vector<4x16xbf16>
    %cst_152 = arith.constant dense<0.000000e+00> : vector<1x16xf32>
    %110 = tpu.matmul %108, %109, %cst_152 {dimension_numbers = #tpu.dot_dimension_numbers<[1], [0], [0], [1], [0, 0, 1, 1], [], []>} : vector<1x4xbf16>, vector<4x16xbf16>, vector<1x16xf32> -> vector<1x16xf32>
    %cst_153 = arith.constant 0.000000e+00 : f32
    %111 = vector.broadcast %cst_153 : f32 to vector<1x16xf32>
    %112 = arith.maximumf %110, %111 : vector<1x16xf32>
    %113 = arith.truncf %112 : vector<1x16xf32> to vector<1x16xbf16>
    %c0_154 = arith.constant 0 : index
    %c0_155 = arith.constant 0 : index
    %114 = vector.load %arg9[%c0_154, %c0_155] : memref<16x4xbf16, #tpu.memory_space<vmem>>, vector<16x4xbf16>
    %cst_156 = arith.constant dense<0.000000e+00> : vector<1x4xf32>
    %115 = tpu.matmul %113, %114, %cst_156 {dimension_numbers = #tpu.dot_dimension_numbers<[1], [0], [0], [1], [0, 0, 1, 1], [], []>} : vector<1x16xbf16>, vector<16x4xbf16>, vector<1x4xf32> -> vector<1x4xf32>
    %cst_157 = arith.constant 0.000000e+00 : f32
    %116 = vector.broadcast %cst_157 : f32 to vector<1x4xf32>
    %117 = arith.subf %116, %115 : vector<1x4xf32>
    %118 = math.exp %117 : vector<1x4xf32>
    %cst_158 = arith.constant 1.000000e+00 : f32
    %119 = vector.broadcast %cst_158 : f32 to vector<1x4xf32>
    %120 = arith.addf %119, %118 : vector<1x4xf32>
    %cst_159 = arith.constant 1.000000e+00 : f32
    %121 = vector.broadcast %cst_159 : f32 to vector<1x4xf32>
    %122 = arith.divf %121, %120 : vector<1x4xf32>
    %c0_160 = arith.constant 0 : index
    %c0_161 = arith.constant 0 : index
    %c0_162 = arith.constant 0 : index
    %c0_163 = arith.constant 0 : index
    %123 = vector.load %arg1[%c0_160, %c0_161, %c0_162, %c0_163] : memref<1x16x16x4xf32, #tpu.memory_space<vmem>>, vector<1x16x16x4xf32>
    %124 = vector.shape_cast %123 : vector<1x16x16x4xf32> to vector<16x16x4xf32>
    %125 = vector.shape_cast %124 : vector<16x16x4xf32> to vector<256x4xf32>
    %126 = vector.broadcast %122 : vector<1x4xf32> to vector<256x4xf32>
    %127 = arith.mulf %103, %126 : vector<256x4xf32>
    %128 = arith.addf %127, %125 : vector<256x4xf32>
    %cst_164 = arith.constant 0.000000e+00 : f32
    %129 = vector.broadcast %cst_164 : f32 to vector<256x4xf32>
    %130 = arith.maximumf %128, %129 : vector<256x4xf32>
    %131 = arith.truncf %130 : vector<256x4xf32> to vector<256x4xbf16>
    %c0_165 = arith.constant 0 : index
    %c0_166 = arith.constant 0 : index
    %c0_167 = arith.constant 0 : index
    %132 = vector.load %arg10[%c0_165, %c0_166, %c0_167] : memref<1x256x4xbf16, #tpu.memory_space<vmem>>, vector<1x256x4xbf16>
    %133 = vector.shape_cast %132 : vector<1x256x4xbf16> to vector<256x4xbf16>
    %134 = vector.shape_cast %131 : vector<256x4xbf16> to vector<1x256x4xbf16>
    tpu.vector_store %arg10[%c0_165, %c0_166, %c0_167], %134 {strides = array<i32>} : memref<1x256x4xbf16, #tpu.memory_space<vmem>>, vector<1x256x4xbf16>,
    return
  }
  func.func @transform_0(%arg0: i32) -> (i32, i32, i32, i32) {
    %c0_i32 = arith.constant 0 : i32
    %c0_i32_0 = arith.constant 0 : i32
    %c0_i32_1 = arith.constant 0 : i32
    %c0_i32_2 = arith.constant 0 : i32
    return %arg0, %c0_i32, %c0_i32_0, %c0_i32_1 : i32, i32, i32, i32
  }
  func.func @transform_1(%arg0: i32) -> (i32, i32) {
    %c0_i32 = arith.constant 0 : i32
    %c0_i32_0 = arith.constant 0 : i32
    %c0_i32_1 = arith.constant 0 : i32
    return %c0_i32, %c0_i32_0 : i32, i32
  }
  func.func @transform_2(%arg0: i32) -> (i32, i32) {
    %c0_i32 = arith.constant 0 : i32
    %c0_i32_0 = arith.constant 0 : i32
    %c0_i32_1 = arith.constant 0 : i32
    return %c0_i32, %c0_i32_0 : i32, i32
  }
  func.func @transform_3(%arg0: i32) -> (i32, i32) {
    %c0_i32 = arith.constant 0 : i32
    %c0_i32_0 = arith.constant 0 : i32
    %c0_i32_1 = arith.constant 0 : i32
    return %c0_i32, %c0_i32_0 : i32, i32
  }
  func.func @transform_4(%arg0: i32) -> (i32, i32) {
    %c0_i32 = arith.constant 0 : i32
    %c0_i32_0 = arith.constant 0 : i32
    %c0_i32_1 = arith.constant 0 : i32
    return %c0_i32, %c0_i32_0 : i32, i32
  }
  func.func @transform_5(%arg0: i32) -> (i32, i32) {
    %c0_i32 = arith.constant 0 : i32
    %c0_i32_0 = arith.constant 0 : i32
    %c0_i32_1 = arith.constant 0 : i32
    return %c0_i32, %c0_i32_0 : i32, i32
  }
  func.func @transform_6(%arg0: i32) -> (i32, i32) {
    %c0_i32 = arith.constant 0 : i32
    %c0_i32_0 = arith.constant 0 : i32
    %c0_i32_1 = arith.constant 0 : i32
    return %c0_i32, %c0_i32_0 : i32, i32
  }
  func.func @transform_7(%arg0: i32) -> (i32, i32) {
    %c0_i32 = arith.constant 0 : i32
    %c0_i32_0 = arith.constant 0 : i32
    %c0_i32_1 = arith.constant 0 : i32
    return %c0_i32, %c0_i32_0 : i32, i32
  }
  func.func @transform_8(%arg0: i32) -> (i32, i32) {
    %c0_i32 = arith.constant 0 : i32
    %c0_i32_0 = arith.constant 0 : i32
    %c0_i32_1 = arith.constant 0 : i32
    return %c0_i32, %c0_i32_0 : i32, i32
  }
  func.func @transform_9(%arg0: i32) -> (i32, i32, i32) {
    %c0_i32 = arith.constant 0 : i32
    %c0_i32_0 = arith.constant 0 : i32
    %c0_i32_1 = arith.constant 0 : i32
    return %arg0, %c0_i32, %c0_i32_0 : i32, i32, i32
  }
}

</mosaic_0001>

<bundles_post_ra>
// kernel: tpu_custom_call.1
= control target key start
LH: loop header
LB: loop body
LE: loop exit
PB: predicated region body
PF: predicated region fallthrough
CT: control target
= control target key end

     0   :  { %s8496_s30 = smov 0   ;;  %s12674_s0 = inlined_call_operand.vmem [shape: f32[2,16,16,4], index: 0, kind: input, shape index: {}]   ;;  %s12675_s1 = inlined_call_operand.vmem [shape: bf16[36,8], index: 1, kind: input, shape index: {}]   ;;  %s12676_s2 = inlined_call_operand.vmem [shape: f32[1,8], index: 2, kind: input, shape index: {}]   ;;  %s12677_s3 = inlined_call_operand.vmem [shape: bf16[72,4], index: 3, kind: input, shape index: {}]   ;;  %s12678_s4 = inlined_call_operand.vmem [shape: f32[1,4], index: 4, kind: input, shape index: {}]   ;;  %s12679_s5 = inlined_call_operand.vmem [shape: bf16[36,4], index: 5, kind: input, shape index: {}]   ;;  %s12680_s6 = inlined_call_operand.vmem [shape: f32[1,4], index: 6, kind: input, shape index: {}]   ;;  %s12681_s7 = inlined_call_operand.vmem [shape: bf16[4,16], index: 7, kind: input, shape index: {}]   ;;  %s12682_s8 = inlined_call_operand.vmem [shape: bf16[16,4], index: 8, kind: input, shape index: {}]   ;;  %s12683_s9 = inlined_call_operand.vmem [shape: bf16[2,256,4], index: 9, kind: output, shape index: {}]  }
   0x1 LB: > { %s6333_s10 = sadd.s32 4294967295, %s8430_s30   ;;  %p6337_p0 = scmp.ge.s32.totalorder %s8430_s30, 1  ;;  %s8430_s30 = sphi %s8496_s30, %s19_s30  }
   0x2   : > { %p287_p1 = scmp.lt.s32.totalorder %s8430_s30, 3 }
   0x4   : > { %p288_p2 = pnand %p6337_p0, %p287_p1 }
   0x6   : > { %291 = sbr.rel (%p288_p2) target bundleno = 2304 (0x900), region = 56 }
   0xb   : > { %vm334_vm0 = vcmask 31744   ;;  %vm337_vm1 = vcmask 25600   ;;  %v12689_v0 = vmov 0.0   ;;  %vm343_vm2 = vcmask 24576   ;;  %s8433_s11 = smov 4   ;;  %p323_p3 = scmp.lt.s32.totalorder %s6333_s10, 1 }
   0xc   : > { %335 = vst.msk [vmem:[#allocation2] sm:$0xff] %vm334_vm0, %v12689_v0  ;;  %s8434_s16 = smov 8   ;;  %s8435_s17 = smov 12   ;;  %vm380_vm3 = vcmask 64512   ;;  %vm2198_vm4 = vcmask 1041408   ;;  %vm1911_vm5 = vcmask 97280  }
   0xd   : > { %336 = vst.msk [vmem:[#allocation2 + $0x8] sm:$0xff] %vm334_vm0, %v12689_v0  ;;  %s13161_s10 = smov (!%p323_p3, %s6333_s10), 1  ;;  %s8436_s18 = smov 16   ;;  %vm1944_vm6 = vcmask 130048   ;;  %vm1977_vm7 = vcmask 162816   ;;  %vm2010_vm8 = vcmask 195584  }
   0xe   : > { %338 = vst.msk [vmem:[#allocation2 + $0x10] sm:$0x3] %vm337_vm1, %v12689_v0  ;;  %s6430_s12 = sshll.u32 %s13161_s10, 8  ;;  %s8437_s19 = smov 20   ;;  %vm2043_vm9 = vcmask 228352   ;;  %vm2076_vm10 = vcmask 261120  }
   0xf   : > { %362 = vst.msk [vmem:[#allocation2 + $0x11] sm:$0x1] %vm343_vm2, %v12689_v0  ;;  %s8661_s15 = scalar_lea.vmem %s12674_s0, %s6430_s12  ;;  %s8438_s20 = smov 24   ;;  %vm2149_vm11 = vcmask 293888   ;;  %vm389_vm12 = vcmask 57344   ;;  %vm383_vm13 = vcmask 58368  }
  0x10   : > { %344 = vst.msk [vmem:[#allocation2] sm:$0x1] %vm343_vm2, %v12689_v0  ;;  %v475_v4 = vld [vmem:[%s8661_s15 + $0x30] sm:$0xff]  ;;  %v476_v5 = vld [vmem:[%s8661_s15 + $0x38] sm:$0xff]  ;;  %v469_v9 = vld [vmem:[%s8661_s15] sm:$0xff]  ;;  %s8439_s21 = smov 28  }
  0x11   : > { %340 = vst.msk [vmem:[#allocation2 + $0x198] sm:$0xff] %vm334_vm0, %v12689_v0  ;;  %v471_v6 = vld [vmem:[%s8661_s15 + $0x10] sm:$0xff]  ;;  %v472_v7 = vld [vmem:[%s8661_s15 + $0x18] sm:$0xff]  ;;  %v470_v11 = vld [vmem:[%s8661_s15 + $0x8] sm:$0xff]  ;;  %s8440_s22 = smov 32   ;;  %s8441_s13 = smov 40  }
  0x12   : > { %341 = vst.msk [vmem:[#allocation2 + $0x1a0] sm:$0xff] %vm334_vm0, %v12689_v0  ;;  %v477_v13 = vld [vmem:[%s8661_s15 + $0x40] sm:$0xff]  ;;  %v478_v14 = vld [vmem:[%s8661_s15 + $0x48] sm:$0xff]  ;;  %v479_v17 = vld [vmem:[%s8661_s15 + $0x50] sm:$0xff]  ;;  %s8442_s14 = smov 48   ;;  %s8443_s23 = smov 56  }
  0x13   : > { %342 = vst.msk [vmem:[#allocation2 + $0x1a8] sm:$0x3] %vm337_vm1, %v12689_v0  ;;  %v473_v15 = vld [vmem:[%s8661_s15 + $0x20] sm:$0xff]  ;;  %v474_v16 = vld [vmem:[%s8661_s15 + $0x28] sm:$0xff]  ;;  %v480_v18 = vld [vmem:[%s8661_s15 + $0x58] sm:$0xff]  ;;  %s8444_s24 = smov 64  }
  0x14   : > { %v566_v1 = vld [vmem:[#allocation2 + $0x1] sm:$0xff]  ;;  %345 = vst.msk [vmem:[#allocation2 + $0x18] sm:$0x1] %vm343_vm2, %v12689_v0  ;;  %v483_v20 = vld [vmem:[%s8661_s15 + $0x70] sm:$0xff]  ;;  %v484_v22 = vld [vmem:[%s8661_s15 + $0x78] sm:$0xff]  ;;  %vm4034_vm14 = vcmask 1043456  }
  0x15   : > { %v567_v2 = vld [vmem:[#allocation2 + $0x9] sm:$0xff]  ;;  %346 = vst.msk [vmem:[#allocation2 + $0x30] sm:$0x1] %vm343_vm2, %v12689_v0  ;;  %v481_v25 = vld [vmem:[%s8661_s15 + $0x60] sm:$0xff]  ;;  %v488_v42 = vld [vmem:[%s8661_s15 + $0x98] sm:$0xff]  ;;  %vm3797_vm15 = vcmask 326656  }
  0x16   : > { %v6474_v3 = vpack.i.bf16 %v567_v2, %v566_v1  ;;  %347 = vst.msk [vmem:[#allocation2 + $0x48] sm:$0x1] %vm343_vm2, %v12689_v0  ;;  %v482_v27 = vld [vmem:[%s8661_s15 + $0x68] sm:$0xff]  ;;  %v485_v30 = vld [vmem:[%s8661_s15 + $0x80] sm:$0xff]  ;;  %v487_v40 = vld [vmem:[%s8661_s15 + $0x90] sm:$0xff] }
  0x17   : > { %348 = vst.msk [vmem:[#allocation2 + $0x60] sm:$0x1] %vm343_vm2, %v12689_v0  ;;  %v486_v32 = vld [vmem:[%s8661_s15 + $0x88] sm:$0xff]  ;;  %v489_v35 = vld [vmem:[%s8661_s15 + $0xa0] sm:$0xff]  ;;  %v491_v45 = vld [vmem:[%s8661_s15 + $0xb0] sm:$0xff] }
  0x18   : > { %6475 = vrot.lane.b32.xlu0 %v6474_v3, %s8433_s11  ;;  %349 = vst.msk [vmem:[#allocation2 + $0x78] sm:$0x1] %vm343_vm2, %v12689_v0  ;;  %v490_v37 = vld [vmem:[%s8661_s15 + $0xa8] sm:$0xff]  ;;  %v492_v47 = vld [vmem:[%s8661_s15 + $0xb8] sm:$0xff]  ;;  %v495_v49 = vld [vmem:[%s8661_s15 + $0xd0] sm:$0xff] }
  0x19   : > { %350 = vst.msk [vmem:[#allocation2 + $0x90] sm:$0x1] %vm343_vm2, %v12689_v0  ;;  %v496_v52 = vld [vmem:[%s8661_s15 + $0xd8] sm:$0xff]  ;;  %v493_v53 = vld [vmem:[%s8661_s15 + $0xc0] sm:$0xff]  ;;  %v494_v56 = vld [vmem:[%s8661_s15 + $0xc8] sm:$0xff] }
  0x1a   : > { %351 = vst.msk [vmem:[#allocation2 + $0xa8] sm:$0x1] %vm343_vm2, %v12689_v0  ;;  %v497_v58 = vld [vmem:[%s8661_s15 + $0xe0] sm:$0xff]  ;;  %v498_v61 = vld [vmem:[%s8661_s15 + $0xe8] sm:$0xff] }
  0x1b   : > { %352 = vst.msk [vmem:[#allocation2 + $0xc0] sm:$0x1] %vm343_vm2, %v12689_v0 }
  0x1c   : > { %353 = vst.msk [vmem:[#allocation2 + $0xd8] sm:$0x1] %vm343_vm2, %v12689_v0 }
  0x1d   : > { %354 = vst.msk [vmem:[#allocation2 + $0xf0] sm:$0x1] %vm343_vm2, %v12689_v0 }
  0x1e   : > { %355 = vst.msk [vmem:[#allocation2 + $0x108] sm:$0x1] %vm343_vm2, %v12689_v0 }
  0x1f   : > { %356 = vst.msk [vmem:[#allocation2 + $0x120] sm:$0x1] %vm343_vm2, %v12689_v0 }
  0x20   : > { %357 = vst.msk [vmem:[#allocation2 + $0x138] sm:$0x1] %vm343_vm2, %v12689_v0 }
  0x21   : > { %358 = vst.msk [vmem:[#allocation2 + $0x150] sm:$0x1] %vm343_vm2, %v12689_v0 }
  0x22   : > { %359 = vst.msk [vmem:[#allocation2 + $0x168] sm:$0x1] %vm343_vm2, %v12689_v0 }
  0x23   : > { %360 = vst.msk [vmem:[#allocation2 + $0x180] sm:$0x1] %vm343_vm2, %v12689_v0 }
  0x24   : > { %363 = vst.msk [vmem:[#allocation2 + $0x29] sm:$0x1] %vm343_vm2, %v12689_v0 }
  0x25   : > { %364 = vst.msk [vmem:[#allocation2 + $0x41] sm:$0x1] %vm343_vm2, %v12689_v0 }
  0x26   : > { %365 = vst.msk [vmem:[#allocation2 + $0x59] sm:$0x1] %vm343_vm2, %v12689_v0 }
  0x27   : > { %366 = vst.msk [vmem:[#allocation2 + $0x71] sm:$0x1] %vm343_vm2, %v12689_v0 }
  0x28   : > { %367 = vst.msk [vmem:[#allocation2 + $0x89] sm:$0x1] %vm343_vm2, %v12689_v0 }
  0x29   : > { %368 = vst.msk [vmem:[#allocation2 + $0xa1] sm:$0x1] %vm343_vm2, %v12689_v0 }
  0x2a   : > { %369 = vst.msk [vmem:[#allocation2 + $0xb9] sm:$0x1] %vm343_vm2, %v12689_v0 }
  0x2b   : > { %370 = vst.msk [vmem:[#allocation2 + $0xd1] sm:$0x1] %vm343_vm2, %v12689_v0 }
  0x2c   : > { %371 = vst.msk [vmem:[#allocation2 + $0xe9] sm:$0x1] %vm343_vm2, %v12689_v0 }
  0x2d   : > { %372 = vst.msk [vmem:[#allocation2 + $0x101] sm:$0x1] %vm343_vm2, %v12689_v0 }
  0x2e   : > { %373 = vst.msk [vmem:[#allocation2 + $0x119] sm:$0x1] %vm343_vm2, %v12689_v0 }
  0x2f   : > { %374 = vst.msk [vmem:[#allocation2 + $0x131] sm:$0x1] %vm343_vm2, %v12689_v0 }
  0x30   : > { %375 = vst.msk [vmem:[#allocation2 + $0x149] sm:$0x1] %vm343_vm2, %v12689_v0 }
  0x31   : > { %376 = vst.msk [vmem:[#allocation2 + $0x161] sm:$0x1] %vm343_vm2, %v12689_v0 }
  0x32   : > { %377 = vst.msk [vmem:[#allocation2 + $0x179] sm:$0x1] %vm343_vm2, %v12689_v0 }
  0x33   : > { %378 = vst.msk [vmem:[#allocation2 + $0x191] sm:$0x1] %vm343_vm2, %v12689_v0 }
  0x34   : > { %426 = vst.msk [vmem:[#allocation4] sm:$0xff] %vm334_vm0, %v12689_v0 }
  0x35   : > { %427 = vst.msk [vmem:[#allocation4 + $0x8] sm:$0xff] %vm334_vm0, %v12689_v0 }
  0x36   : > { %428 = vst.msk [vmem:[#allocation4 + $0x10] sm:$0x3] %vm337_vm1, %v12689_v0 }
  0x37   : > { %430 = vst.msk [vmem:[#allocation4 + $0x198] sm:$0xff] %vm334_vm0, %v12689_v0 }
  0x38   : > { %431 = vst.msk [vmem:[#allocation4 + $0x1a0] sm:$0xff] %vm334_vm0, %v12689_v0 }
  0x39   : > { %432 = vst.msk [vmem:[#allocation4 + $0x1a8] sm:$0x3] %vm337_vm1, %v12689_v0  ;;  %vm3830_vm1 = vcmask 392192  }
  0x3a   : > { %434 = vst.msk [vmem:[#allocation4 + $0x18] sm:$0x1] %vm343_vm2, %v12689_v0 }
  0x3b   : > { %435 = vst.msk [vmem:[#allocation4 + $0x30] sm:$0x1] %vm343_vm2, %v12689_v0 }
  0x3c   : > { %436 = vst.msk [vmem:[#allocation4 + $0x48] sm:$0x1] %vm343_vm2, %v12689_v0 }
  0x3d   : > { %437 = vst.msk [vmem:[#allocation4 + $0x60] sm:$0x1] %vm343_vm2, %v12689_v0 }
  0x3e   : > { %438 = vst.msk [vmem:[#allocation4 + $0x78] sm:$0x1] %vm343_vm2, %v12689_v0 }
  0x3f   : > { %439 = vst.msk [vmem:[#allocation4 + $0x90] sm:$0x1] %vm343_vm2, %v12689_v0 }
  0x40   : > { %440 = vst.msk [vmem:[#allocation4 + $0xa8] sm:$0x1] %vm343_vm2, %v12689_v0 }
  0x41   : > { %441 = vst.msk [vmem:[#allocation4 + $0xc0] sm:$0x1] %vm343_vm2, %v12689_v0 }
  0x42   : > { %442 = vst.msk [vmem:[#allocation4 + $0xd8] sm:$0x1] %vm343_vm2, %v12689_v0 }
  0x43   : > { %443 = vst.msk [vmem:[#allocation4 + $0xf0] sm:$0x1] %vm343_vm2, %v12689_v0 }
  0x44   : > { %444 = vst.msk [vmem:[#allocation4 + $0x108] sm:$0x1] %vm343_vm2, %v12689_v0 }
  0x45   : > { %445 = vst.msk [vmem:[#allocation4 + $0x120] sm:$0x1] %vm343_vm2, %v12689_v0 }
  0x46   : > { %446 = vst.msk [vmem:[#allocation4 + $0x138] sm:$0x1] %vm343_vm2, %v12689_v0 }
  0x47   : > { %447 = vst.msk [vmem:[#allocation4 + $0x150] sm:$0x1] %vm343_vm2, %v12689_v0 }
  0x48   : > { %448 = vst.msk [vmem:[#allocation4 + $0x168] sm:$0x1] %vm343_vm2, %v12689_v0 }
  0x49   : > { %449 = vst.msk [vmem:[#allocation4 + $0x180] sm:$0x1] %vm343_vm2, %v12689_v0 }
  0x4a   : > { %452 = vst.msk [vmem:[#allocation4 + $0x29] sm:$0x1] %vm343_vm2, %v12689_v0 }
  0x4b   : > { %453 = vst.msk [vmem:[#allocation4 + $0x41] sm:$0x1] %vm343_vm2, %v12689_v0 }
  0x4c   : > { %454 = vst.msk [vmem:[#allocation4 + $0x59] sm:$0x1] %vm343_vm2, %v12689_v0 }
  0x4d   : > { %455 = vst.msk [vmem:[#allocation4 + $0x71] sm:$0x1] %vm343_vm2, %v12689_v0 }
  0x4e   : > { %456 = vst.msk [vmem:[#allocation4 + $0x89] sm:$0x1] %vm343_vm2, %v12689_v0 }
  0x4f   : > { %457 = vst.msk [vmem:[#allocation4 + $0xa1] sm:$0x1] %vm343_vm2, %v12689_v0 }
  0x50   : > { %458 = vst.msk [vmem:[#allocation4 + $0xb9] sm:$0x1] %vm343_vm2, %v12689_v0 }
  0x51   : > { %459 = vst.msk [vmem:[#allocation4 + $0xd1] sm:$0x1] %vm343_vm2, %v12689_v0 }
  0x52   : > { %460 = vst.msk [vmem:[#allocation4 + $0xe9] sm:$0x1] %vm343_vm2, %v12689_v0 }
  0x53   : > { %461 = vst.msk [vmem:[#allocation4 + $0x101] sm:$0x1] %vm343_vm2, %v12689_v0 }
  0x54   : > { %462 = vst.msk [vmem:[#allocation4 + $0x119] sm:$0x1] %vm343_vm2, %v12689_v0 }
  0x55   : > { %463 = vst.msk [vmem:[#allocation4 + $0x131] sm:$0x1] %vm343_vm2, %v12689_v0 }
  0x56   : > { %464 = vst.msk [vmem:[#allocation4 + $0x149] sm:$0x1] %vm343_vm2, %v12689_v0 }
  0x57   : > { %465 = vst.msk [vmem:[#allocation4 + $0x161] sm:$0x1] %vm343_vm2, %v12689_v0 }
  0x58   : > { %466 = vst.msk [vmem:[#allocation4 + $0x179] sm:$0x1] %vm343_vm2, %v12689_v0 }
  0x59   : > { %467 = vst.msk [vmem:[#allocation4 + $0x191] sm:$0x1] %vm343_vm2, %v12689_v0 }
  0x5a   : > { %508 = vst.msk [vmem:[#allocation2 + $0x61] sm:$0xff] %vm334_vm0, %v475_v4 }
  0x5b   : > { %509 = vst.msk [vmem:[#allocation2 + $0x69] sm:$0xff] %vm334_vm0, %v476_v5 }
  0x5c   : > { %361 = vst.msk [vmem:[#allocation2 + $0x198] sm:$0x1] %vm343_vm2, %v12689_v0 }
  0x5d   : > { %379 = vst.msk [vmem:[#allocation2 + $0x1a9] sm:$0x1] %vm343_vm2, %v12689_v0 }
  0x5e   : > { %433 = vst.msk [vmem:[#allocation4] sm:$0x1] %vm343_vm2, %v12689_v0 }
  0x5f   : > { %450 = vst.msk [vmem:[#allocation4 + $0x198] sm:$0x1] %vm343_vm2, %v12689_v0 }
  0x60   : > { %451 = vst.msk [vmem:[#allocation4 + $0x11] sm:$0x1] %vm343_vm2, %v12689_v0 }
  0x61   : > { %v574_v8 = vld [vmem:[#allocation2 + $0x61] sm:$0xff]  ;;  %468 = vst.msk [vmem:[#allocation4 + $0x1a9] sm:$0x1] %vm343_vm2, %v12689_v0  ;;  %vm3863_vm2 = vcmask 457728  }
  0x62   : > { %v575_v10 = vld [vmem:[#allocation2 + $0x69] sm:$0xff]  ;;  %504 = vst.msk [vmem:[#allocation2 + $0x31] sm:$0xff] %vm334_vm0, %v471_v6 }
  0x63   : > { %v8694_v12 = vpack.i.bf16 %v575_v10, %v574_v8  ;;  %505 = vst.msk [vmem:[#allocation2 + $0x39] sm:$0xff] %vm334_vm0, %v472_v7 }
  0x64   : > { %502 = vst.msk [vmem:[#allocation2 + $0x19] sm:$0xff] %vm334_vm0, %v469_v9 }
  0x65   : > { %6495 = vrot.lane.b32.xlu2 %v8694_v12, %s8433_s11  ;;  %503 = vst.msk [vmem:[#allocation2 + $0x21] sm:$0xff] %vm334_vm0, %v470_v11 }
  0x66   : > { %510 = vst.msk [vmem:[#allocation2 + $0x79] sm:$0xff] %vm334_vm0, %v477_v13 }
  0x67   : > { %511 = vst.msk [vmem:[#allocation2 + $0x81] sm:$0xff] %vm334_vm0, %v478_v14 }
  0x68   : > { %506 = vst.msk [vmem:[#allocation2 + $0x49] sm:$0xff] %vm334_vm0, %v473_v15 }
  0x69   : > { %v570_v19 = vld [vmem:[#allocation2 + $0x31] sm:$0xff]  ;;  %507 = vst.msk [vmem:[#allocation2 + $0x51] sm:$0xff] %vm334_vm0, %v474_v16 }
  0x6a   : > { %v571_v21 = vld [vmem:[#allocation2 + $0x39] sm:$0xff]  ;;  %512 = vst.msk [vmem:[#allocation2 + $0x91] sm:$0xff] %vm334_vm0, %v479_v17 }
  0x6b   : > { %v8714_v23 = vpack.i.bf16 %v571_v21, %v570_v19  ;;  %v568_v24 = vld [vmem:[#allocation2 + $0x19] sm:$0xff]  ;;  %513 = vst.msk [vmem:[#allocation2 + $0x99] sm:$0xff] %vm334_vm0, %v480_v18  ;;  %v599_v21 = vld [vmem:[#allocation2 + $0xa] sm:$0xff] }
  0x6c   : > { %v569_v26 = vld [vmem:[#allocation2 + $0x21] sm:$0xff]  ;;  %516 = vst.msk [vmem:[#allocation2 + $0xc1] sm:$0xff] %vm334_vm0, %v483_v20 }
  0x6d   : > { %6485 = vrot.lane.b32.xlu1 %v8714_v23, %s8433_s11  ;;  %v8722_v28 = vpack.i.bf16 %v569_v26, %v568_v24  ;;  %v576_v29 = vld [vmem:[#allocation2 + $0x79] sm:$0xff]  ;;  %517 = vst.msk [vmem:[#allocation2 + $0xc9] sm:$0xff] %vm334_vm0, %v484_v22  ;;  %v601_v17 = vld [vmem:[#allocation2 + $0x22] sm:$0xff] }
  0x6e   : > { %v577_v31 = vld [vmem:[#allocation2 + $0x81] sm:$0xff]  ;;  %514 = vst.msk [vmem:[#allocation2 + $0xa9] sm:$0xff] %vm334_vm0, %v481_v25  ;;  %v602_v22 = vld [vmem:[#allocation2 + $0x32] sm:$0xff] }
  0x6f   : > { %6480 = vrot.lane.b32.xlu0 %v8722_v28, %s8433_s11  ;;  %v8730_v33 = vpack.i.bf16 %v577_v31, %v576_v29  ;;  %v572_v34 = vld [vmem:[#allocation2 + $0x49] sm:$0xff]  ;;  %515 = vst.msk [vmem:[#allocation2 + $0xb1] sm:$0xff] %vm334_vm0, %v482_v27  ;;  %v600_v16 = vld [vmem:[#allocation2 + $0x1a] sm:$0xff] }
  0x70   : > { %v573_v36 = vld [vmem:[#allocation2 + $0x51] sm:$0xff]  ;;  %518 = vst.msk [vmem:[#allocation2 + $0xd9] sm:$0xff] %vm334_vm0, %v485_v30  ;;  %v8803_v19 = vpack.i.bf16 %v601_v17, %v600_v16  ;;  %v598_v20 = vld [vmem:[#allocation2 + $0x2] sm:$0xff]  ;;  %v603_v24 = vld [vmem:[#allocation2 + $0x3a] sm:$0xff] }
  0x71   : > { %6500 = vrot.lane.b32.xlu2 %v8730_v33, %s8433_s11  ;;  %v8738_v38 = vpack.i.bf16 %v573_v36, %v572_v34  ;;  %v578_v39 = vld [vmem:[#allocation2 + $0x91] sm:$0xff]  ;;  %519 = vst.msk [vmem:[#allocation2 + $0xe1] sm:$0xff] %vm334_vm0, %v486_v32  ;;  %v6554_v25 = vpack.i.bf16 %v599_v21, %v598_v20  ;;  %v606_v26 = vld [vmem:[#allocation2 + $0x62] sm:$0xff]  ;;  %v8809_v29 = vpack.i.bf16 %v603_v24, %v602_v22  ;;  %v608_v34 = vld [vmem:[#allocation2 + $0x7a] sm:$0xff] }
  0x72   : > { %v579_v41 = vld [vmem:[#allocation2 + $0x99] sm:$0xff]  ;;  %522 = vst.msk [vmem:[#allocation2 + $0x109] sm:$0xff] %vm334_vm0, %v489_v35  ;;  %v607_v27 = vld [vmem:[#allocation2 + $0x6a] sm:$0xff]  ;;  %v609_v35 = vld [vmem:[#allocation2 + $0x82] sm:$0xff] }
  0x73   : > { %v8744_v43 = vpack.i.bf16 %v579_v41, %v578_v39  ;;  %v582_v44 = vld [vmem:[#allocation2 + $0xc1] sm:$0xff]  ;;  %523 = vst.msk [vmem:[#allocation2 + $0x111] sm:$0xff] %vm334_vm0, %v490_v37  ;;  %v8812_v30 = vpack.i.bf16 %v607_v27, %v606_v26  ;;  %v604_v31 = vld [vmem:[#allocation2 + $0x4a] sm:$0xff]  ;;  %v605_v32 = vld [vmem:[#allocation2 + $0x52] sm:$0xff] }
  0x74   : > { %v583_v46 = vld [vmem:[#allocation2 + $0xc9] sm:$0xff]  ;;  %520 = vst.msk [vmem:[#allocation2 + $0xf1] sm:$0xff] %vm334_vm0, %v487_v40  ;;  %v8816_v36 = vpack.i.bf16 %v605_v32, %v604_v31  ;;  %v8820_v40 = vpack.i.bf16 %v609_v35, %v608_v34  ;;  %v8870_v21 = vld [vmem:[#allocation2 + $0x38] sm:$0xff]  ;;  %v8875_v24 = vld [vmem:[#allocation2 + $0x60] sm:$0xff] }
  0x75   : > { %6490 = vrot.lane.b32.xlu1 %v8738_v38, %s8433_s11  ;;  %v8752_v48 = vpack.i.bf16 %v583_v46, %v582_v44  ;;  %521 = vst.msk [vmem:[#allocation2 + $0xf9] sm:$0xff] %vm334_vm0, %v488_v42  ;;  %v580_v50 = vld [vmem:[#allocation2 + $0xa9] sm:$0xff]  ;;  %v610_v42 = vld [vmem:[#allocation2 + $0x92] sm:$0xff]  ;;  %v611_v44 = vld [vmem:[#allocation2 + $0x9a] sm:$0xff] }
  0x76   : > { %v581_v51 = vld [vmem:[#allocation2 + $0xb1] sm:$0xff]  ;;  %524 = vst.msk [vmem:[#allocation2 + $0x121] sm:$0xff] %vm334_vm0, %v491_v45  ;;  %v614_v45 = vld [vmem:[#allocation2 + $0xc2] sm:$0xff] }
  0x77   : > { %6505 = vrot.lane.b32.xlu0 %v8744_v43, %s8433_s11  ;;  %525 = vst.msk [vmem:[#allocation2 + $0x129] sm:$0xff] %vm334_vm0, %v492_v47  ;;  %v584_v54 = vld [vmem:[#allocation2 + $0xd9] sm:$0xff]  ;;  %v8766_v57 = vpack.i.bf16 %v581_v51, %v580_v50  ;;  %v612_v37 = vld [vmem:[#allocation2 + $0xaa] sm:$0xff]  ;;  %v8828_v47 = vpack.i.bf16 %v611_v44, %v610_v42 }
  0x78   : > { %v585_v55 = vld [vmem:[#allocation2 + $0xe1] sm:$0xff]  ;;  %528 = vst.msk [vmem:[#allocation2 + $0x151] sm:$0xff] %vm334_vm0, %v495_v49  ;;  %v613_v39 = vld [vmem:[#allocation2 + $0xb2] sm:$0xff]  ;;  %v615_v46 = vld [vmem:[#allocation2 + $0xca] sm:$0xff] }
  0x79   : > { %6515 = vrot.lane.b32.xlu2 %v8752_v48, %s8433_s11  ;;  %529 = vst.msk [vmem:[#allocation2 + $0x159] sm:$0xff] %vm334_vm0, %v496_v52  ;;  %v588_v59 = vld [vmem:[#allocation2 + $0x109] sm:$0xff]  ;;  %v8772_v62 = vpack.i.bf16 %v585_v55, %v584_v54  ;;  %v8824_v41 = vpack.i.bf16 %v613_v39, %v612_v37  ;;  %v8832_v51 = vpack.i.bf16 %v615_v46, %v614_v45  ;;  %v500_v31 = vld [vmem:[%s8661_s15 + $0xf8] sm:$0xff]  ;;  %v8899_v39 = vld [vmem:[#allocation2 + $0x80] sm:$0xff] }
  0x7a   : > { %v589_v60 = vld [vmem:[#allocation2 + $0x111] sm:$0xff]  ;;  %526 = vst.msk [vmem:[#allocation2 + $0x139] sm:$0xff] %vm334_vm0, %v493_v53  ;;  %v616_v53 = vld [vmem:[#allocation2 + $0xda] sm:$0xff]  ;;  %v617_v54 = vld [vmem:[#allocation2 + $0xe2] sm:$0xff] }
  0x7b   : > { %527 = vst.msk [vmem:[#allocation2 + $0x141] sm:$0xff] %vm334_vm0, %v494_v56  ;;  %v8778_v63 = vpack.i.bf16 %v589_v60, %v588_v59  ;;  %v586_v1 = vld [vmem:[#allocation2 + $0xf1] sm:$0xff]  ;;  %v634_v34 = vld [vmem:[#allocation2 + $0x48] sm:$0xff] }
  0x7c   : > { %530 = vst.msk [vmem:[#allocation2 + $0x169] sm:$0xff] %vm334_vm0, %v497_v58  ;;  %v587_v2 = vld [vmem:[#allocation2 + $0xf9] sm:$0xff]  ;;  %v620_v55 = vld [vmem:[#allocation2 + $0x10a] sm:$0xff]  ;;  %v8840_v58 = vpack.i.bf16 %v617_v54, %v616_v53 }
  0x7d   : > { %6510 = vrot.lane.b32.xlu1 %v8766_v57, %s8433_s11  ;;  %531 = vst.msk [vmem:[#allocation2 + $0x171] sm:$0xff] %vm334_vm0, %v498_v61  ;;  %v590_v3 = vld [vmem:[#allocation2 + $0x121] sm:$0xff]  ;;  %v8785_v5 = vpack.i.bf16 %v587_v2, %v586_v1  ;;  %v618_v49 = vld [vmem:[#allocation2 + $0xf2] sm:$0xff] }
  0x7e   : > { %v591_v4 = vld [vmem:[#allocation2 + $0x129] sm:$0xff]  ;;  %v619_v50 = vld [vmem:[#allocation2 + $0xfa] sm:$0xff]  ;;  %v621_v56 = vld [vmem:[#allocation2 + $0x112] sm:$0xff]  ;;  %12839 = vst [vmem:[#allocation8_spill] sm:$0xff] %v8870_v21 }
  0x7f   : > { %6520 = vrot.lane.b32.xlu0 %v8772_v62, %s8433_s11  ;;  %v594_v6 = vld [vmem:[#allocation2 + $0x151] sm:$0xff]  ;;  %v8787_v8 = vpack.i.bf16 %v591_v4, %v590_v3  ;;  %v8836_v52 = vpack.i.bf16 %v619_v50, %v618_v49  ;;  %v8844_v61 = vpack.i.bf16 %v621_v56, %v620_v55  ;;  %v622_v2 = vld [vmem:[#allocation2 + $0x122] sm:$0xff]  ;;  %533 = vst.msk [vmem:[#allocation2 + $0x189] sm:$0xff] %vm334_vm0, %v500_v31 }
  0x80   : > { %v595_v7 = vld [vmem:[#allocation2 + $0x159] sm:$0xff]  ;;  %v623_v3 = vld [vmem:[#allocation2 + $0x12a] sm:$0xff]  ;;  %381 = vst.msk [vmem:[#allocation3] sm:$0xff] %vm380_vm3, %v12689_v0 }
  0x81   : > { %6530 = vrot.lane.b32.xlu2 %v8778_v63, %s8433_s11  ;;  %v8791_v9 = vpack.i.bf16 %v595_v7, %v594_v6  ;;  %v592_v10 = vld [vmem:[#allocation2 + $0x139] sm:$0xff]  ;;  %v8852_v7 = vpack.i.bf16 %v623_v3, %v622_v2  ;;  %v8868_v20 = vld [vmem:[#allocation2 + $0x30] sm:$0xff]  ;;  %v642_v45 = vld [vmem:[#allocation2 + $0xa8] sm:$0xff]  ;;  %382 = vst.msk [vmem:[#allocation3 + $0x8] sm:$0xff] %vm380_vm3, %v12689_v0 }
  0x82   : > { %v593_v11 = vld [vmem:[#allocation2 + $0x141] sm:$0xff]  ;;  %v626_v4 = vld [vmem:[#allocation2 + $0x152] sm:$0xff]  ;;  %12838 = vst [vmem:[#allocation7_spill] sm:$0xff] %v8868_v20  ;;  %v8882_v27 = vpack.i.bf16 %v8870_v21, %v8868_v20 }
  0x83   : > { %v596_v13 = vld [vmem:[#allocation2 + $0x169] sm:$0xff]  ;;  %v8797_v15 = vpack.i.bf16 %v593_v11, %v592_v10  ;;  %v624_v59 = vld [vmem:[#allocation2 + $0x13a] sm:$0xff]  ;;  %386 = vst.msk [vmem:[#allocation3 + $0x198] sm:$0xff] %vm380_vm3, %v12689_v0 }
  0x84   : > { %v597_v14 = vld [vmem:[#allocation2 + $0x171] sm:$0xff]  ;;  %v625_v60 = vld [vmem:[#allocation2 + $0x142] sm:$0xff]  ;;  %v627_v6 = vld [vmem:[#allocation2 + $0x15a] sm:$0xff]  ;;  %387 = vst.msk [vmem:[#allocation3 + $0x1a0] sm:$0xff] %vm380_vm3, %v12689_v0 }
  0x85   : > { %6525 = vrot.lane.b32.xlu1 %v8785_v5, %s8433_s11  ;;  %v8799_v18 = vpack.i.bf16 %v597_v14, %v596_v13  ;;  %v8848_v1 = vpack.i.bf16 %v625_v60, %v624_v59  ;;  %v8856_v10 = vld [vmem:[#allocation2 + $0x18] sm:$0xff]  ;;  %v8858_v11 = vld [vmem:[#allocation2 + $0x20] sm:$0xff]  ;;  %v8860_v13 = vpack.i.bf16 %v627_v6, %v626_v4  ;;  %v628_v16 = vld [vmem:[#allocation2 + $0x16a] sm:$0xff] }
  0x86   : > { %12836 = vst [vmem:[#allocation5_spill] sm:$0xff] %v8856_v10  ;;  %v6634_v14 = vpack.i.bf16 %v8858_v11, %v8856_v10  ;;  %v629_v17 = vld [vmem:[#allocation2 + $0x172] sm:$0xff]  ;;  %v8918_v55 = vld [vmem:[#allocation2 + $0xc0] sm:$0xff]  ;;  %v8920_v56 = vld [vmem:[#allocation2 + $0xc8] sm:$0xff] }
  0x87   : > { %6535 = vrot.lane.b32.xlu0 %v8787_v8, %s8433_s11  ;;  %12837 = vst [vmem:[#allocation6_spill] sm:$0xff] %v8858_v11  ;;  %v8872_v22 = vpack.i.bf16 %v629_v17, %v628_v16  ;;  %v499_v26 = vld [vmem:[%s8661_s15 + $0xf0] sm:$0xff]  ;;  %v8897_v37 = vld [vmem:[#allocation2 + $0x78] sm:$0xff]  ;;  %v8930_v4 = vpack.i.bf16 %v8920_v56, %v8918_v55  ;;  %v647_v16 = vld [vmem:[#allocation2 + $0xe0] sm:$0xff] }
  0x88   : > { %532 = vst.msk [vmem:[#allocation2 + $0x181] sm:$0xff] %vm334_vm0, %v499_v26  ;;  %v8893_v35 = vld [vmem:[#allocation2 + $0x50] sm:$0xff]  ;;  %v8910_v49 = vpack.i.bf16 %v8899_v39, %v8897_v37  ;;  %v641_v54 = vld [vmem:[#allocation2 + $0x98] sm:$0xff]  ;;  %v8938_v17 = vld [vmem:[#allocation2 + $0x108] sm:$0xff] }
  0x89   : > { %6545 = vrot.lane.b32.xlu2 %v8791_v9, %s8433_s11  ;;  %12840 = vst [vmem:[#allocation9_spill] sm:$0xff] %v8893_v35  ;;  %v8902_v42 = vpack.i.bf16 %v8893_v35, %v634_v34  ;;  %v643_v46 = vld [vmem:[#allocation2 + $0xb0] sm:$0xff]  ;;  %v649_v2 = vld [vmem:[#allocation2 + $0xf8] sm:$0xff]  ;;  %v658_v20 = vld [vmem:[#allocation2 + $0x168] sm:$0xff] }
  0x8a   : > { %v8914_v50 = vpack.i.bf16 %v643_v46, %v642_v45  ;;  %v640_v53 = vld [vmem:[#allocation2 + $0x90] sm:$0xff]  ;;  %12841 = vst [vmem:[#allocation10_spill] sm:$0xff] %v8938_v17  ;;  %v8946_v34 = vld [vmem:[#allocation2 + $0x138] sm:$0xff]  ;;  %v8948_v45 = vld [vmem:[#allocation2 + $0x140] sm:$0xff] }
  0x8b   : > { %v8922_v59 = vpack.i.bf16 %v641_v54, %v640_v53  ;;  %v648_v60 = vld [vmem:[#allocation2 + $0xf0] sm:$0xff]  ;;  %12843 = vst [vmem:[#allocation12_spill] sm:$0xff] %v8946_v34  ;;  %v8964_v54 = vpack.i.bf16 %v8948_v45, %v8946_v34  ;;  %v8976_v35 = vld [vmem:[#allocation2 + $0x158] sm:$0xff] }
  0x8c   : > { %v8934_v6 = vpack.i.bf16 %v649_v2, %v648_v60  ;;  %v8940_v26 = vld [vmem:[#allocation2 + $0x110] sm:$0xff]  ;;  %12844 = vst [vmem:[#allocation13_spill] sm:$0xff] %v8948_v45  ;;  %v652_v60 = vld [vmem:[#allocation2 + $0x120] sm:$0xff]  ;;  %v653_v2 = vld [vmem:[#allocation2 + $0x128] sm:$0xff] }
  0x8d   : > { %6540 = vrot.lane.b32.xlu1 %v8797_v15, %s8433_s11  ;;  %12842 = vst [vmem:[#allocation11_spill] sm:$0xff] %v8940_v26  ;;  %v8954_v53 = vpack.i.bf16 %v8940_v26, %v8938_v17  ;;  %v8978_v11 = vpack.i.bf16 %v653_v2, %v652_v60  ;;  %v659_v17 = vld [vmem:[#allocation2 + $0x170] sm:$0xff] }
  0x8e   : > { %12846 = vst [vmem:[#allocation15_spill] sm:$0xff] %v8976_v35  ;;  %v8998_v26 = vpack.i.bf16 %v659_v17, %v658_v20 }
  0x8f   : > { %6550 = vrot.lane.b32.xlu0 %v8799_v18, %s8433_s11  ;;  %v660_v34 = vld [vmem:[#allocation2 + $0x180] sm:$0xff]  ;;  %v661_v45 = vld [vmem:[#allocation2 + $0x188] sm:$0xff] }
  0x90   : > { %v8990_v21 = vpack.i.bf16 %v661_v45, %v660_v34 }
  0x91   : > { %6560 = vrot.lane.b32.xlu2 %v8803_v19, %s8434_s16 }
  0x95   : > { %6555 = vrot.lane.b32.xlu1 %v6554_v25, %s8434_s16  ;;  %v8877_v25 = vld [vmem:[#allocation2 + $0x68] sm:$0xff] }
  0x96   : > { %v8891_v32 = vpack.i.bf16 %v8877_v25, %v8875_v24 }
  0x97   : > { %6565 = vrot.lane.b32.xlu0 %v8809_v29, %s8434_s16 }
  0x99   : > { %6575 = vrot.lane.b32.xlu2 %v8812_v30, %s8434_s16 }
  0x9d   : > { %6570 = vrot.lane.b32.xlu1 %v8816_v36, %s8434_s16 }
  0x9f   : > { %6580 = vrot.lane.b32.xlu0 %v8820_v40, %s8434_s16 }
  0xa1   : > { %6590 = vrot.lane.b32.xlu2 %v8824_v41, %s8434_s16 }
  0xa5   : > { %6585 = vrot.lane.b32.xlu1 %v8828_v47, %s8434_s16 }
  0xa7   : > { %6595 = vrot.lane.b32.xlu0 %v8832_v51, %s8434_s16 }
  0xa9   : > { %6605 = vrot.lane.b32.xlu2 %v8836_v52, %s8434_s16 }
  0xad   : > { %6600 = vrot.lane.b32.xlu1 %v8840_v58, %s8434_s16 }
  0xaf   : > { %6610 = vrot.lane.b32.xlu0 %v8844_v61, %s8434_s16 }
  0xb1   : > { %6620 = vrot.lane.b32.xlu2 %v8848_v1, %s8434_s16 }
  0xb5   : > { %6615 = vrot.lane.b32.xlu1 %v8852_v7, %s8434_s16 }
  0xb7   : > { %6625 = vrot.lane.b32.xlu0 %v8860_v13, %s8434_s16 }
  0xb9   : > { %6635 = vrot.lane.b32.xlu2 %v6634_v14, %s8435_s17  ;;  %v646_v14 = vld [vmem:[#allocation2 + $0xd8] sm:$0xff] }
  0xba   : > { %v8942_v31 = vpack.i.bf16 %v647_v16, %v646_v14  ;;  %v8972_v14 = vpop.permute.xlu0 %6475  ;;  %v8974_v16 = vld [vmem:[#allocation2 + $0x150] sm:$0xff] }
  0xbb   : > { %12845 = vst [vmem:[#allocation14_spill] sm:$0xff] %v8974_v16  ;;  %v8986_v0 = vpack.i.bf16 %v8976_v35, %v8974_v16 }
  0xbd   : > { %6630 = vrot.lane.b32.xlu1 %v8872_v22, %s8434_s16 }
  0xbf   : > { %6640 = vrot.lane.b32.xlu0 %v8882_v27, %s8435_s17  ;;  %v8906_v44 = vpop.permute.xlu2 %6495 }
  0xc1   : > { %6650 = vrot.lane.b32.xlu2 %v8891_v32, %s8435_s17 }
  0xc5   : > { %6645 = vrot.lane.b32.xlu1 %v8902_v42, %s8435_s17 }
  0xc7   : > { %6655 = vrot.lane.b32.xlu0 %v8910_v49, %s8435_s17 }
  0xc9   : > { %6665 = vrot.lane.b32.xlu2 %v8914_v50, %s8435_s17 }
  0xcb   : > { %v8926_v3 = vpop.permute.xlu2 %6500 }
  0xcd   : > { %6660 = vrot.lane.b32.xlu1 %v8922_v59, %s8435_s17 }
  0xcf   : > { %6670 = vrot.lane.b32.xlu0 %v8930_v4, %s8435_s17 }
  0xd1   : > { %6680 = vrot.lane.b32.xlu2 %v8934_v6, %s8435_s17 }
  0xd3   : > { %v8950_v46 = vpop.permute.xlu2 %6515 }
  0xd5   : > { %6675 = vrot.lane.b32.xlu1 %v8942_v31, %s8435_s17 }
  0xd7   : > { %6685 = vrot.lane.b32.xlu0 %v8954_v53, %s8435_s17 }
  0xd9   : > { %6695 = vrot.lane.b32.xlu2 %v8964_v54, %s8435_s17 }
  0xdb   : > { %v8982_v10 = vpop.permute.xlu2 %6530 }
  0xdd   : > { %6690 = vrot.lane.b32.xlu1 %v8978_v11, %s8435_s17 }
  0xdf   : > { %v8992_v60 = vpop.permute.xlu1 %6485  ;;  %6700 = vrot.lane.b32.xlu0 %v8986_v0, %s8435_s17 }
  0xe1   : > { %v8996_v2 = vpop.permute.xlu0 %6480  ;;  %6710 = vrot.lane.b32.xlu2 %v8990_v21, %s8435_s17 }
  0xe3   : > { %v9002_v16 = vpop.permute.xlu2 %6545 }
  0xe5   : > { %6705 = vrot.lane.b32.xlu1 %v8998_v26, %s8435_s17 }
  0xe7   : > { %v9006_v34 = vpop.permute.xlu1 %6490  ;;  %6715 = vrot.lane.b32.xlu0 %v8722_v28, %s8436_s18 }
  0xe8   : > { %12847 = vst [vmem:[#allocation16_spill] sm:$0xff] %v9006_v34 }
  0xe9   : > { %v9010_v45 = vpop.permute.xlu0 %6505  ;;  %6725 = vrot.lane.b32.xlu2 %v8738_v38, %s8436_s18 }
  0xea   : > { %12848 = vst [vmem:[#allocation17_spill] sm:$0xff] %v9010_v45  ;;  %v769_v45 = vld [vmem:[#allocation2 + $0xa9] sm:$0xff] }
  0xeb   : > { %v9014_v20 = vpop.permute.xlu2 %6560 }
  0xed   : > { %6720 = vrot.lane.b32.xlu1 %v8714_v23, %s8436_s18 }
  0xef   : > { %v9018_v17 = vpop.permute.xlu1 %6510  ;;  %6730 = vrot.lane.b32.xlu0 %v8694_v12, %s8436_s18 }
  0xf0   : > { %12849 = vst [vmem:[#allocation18_spill] sm:$0xff] %v9018_v17 }
  0xf1   : > { %v9022_v35 = vpop.permute.xlu0 %6520  ;;  %6740 = vrot.lane.b32.xlu2 %v8744_v43, %s8436_s18 }
  0xf2   : > { %12850 = vst [vmem:[#allocation19_spill] sm:$0xff] %v9022_v35  ;;  %v764_v35 = vld [vmem:[#allocation2 + $0x69] sm:$0xff] }
  0xf3   : > { %v9026_v28 = vpop.permute.xlu2 %6575 }
  0xf5   : > { %6735 = vrot.lane.b32.xlu1 %v8730_v33, %s8436_s18 }
  0xf7   : > { %v9030_v38 = vpop.permute.xlu1 %6525  ;;  %6745 = vrot.lane.b32.xlu0 %v8766_v57, %s8436_s18 }
  0xf8   : > { %12851 = vst [vmem:[#allocation20_spill] sm:$0xff] %v9030_v38 }
  0xf9   : > { %v9034_v23 = vpop.permute.xlu0 %6535  ;;  %6755 = vrot.lane.b32.xlu2 %v8772_v62, %s8436_s18 }
  0xfa   : > { %12852 = vst [vmem:[#allocation21_spill] sm:$0xff] %v9034_v23  ;;  %v693_v23 = vld [vmem:[#allocation2 + $0x189] sm:$0xff] }
  0xfb   : > { %v9038_v12 = vpop.permute.xlu2 %6590 }
  0xfc   : > { %12853 = vst [vmem:[#allocation22_spill] sm:$0xff] %v9038_v12 }
  0xfd   : > { %6750 = vrot.lane.b32.xlu1 %v8752_v48, %s8436_s18  ;;  %v692_v48 = vld [vmem:[#allocation2 + $0x181] sm:$0xff] }
  0xff   : > { %v9042_v43 = vpop.permute.xlu1 %6540  ;;  %6760 = vrot.lane.b32.xlu0 %v8785_v5, %s8436_s18 }
 0x101   : > { %v9046_v33 = vpop.permute.xlu0 %6550  ;;  %6770 = vrot.lane.b32.xlu2 %v8787_v8, %s8436_s18  ;;  %v9064_v8 = vpack.i.bf16 %v693_v23, %v692_v48  ;;  %v725_v48 = vld [vmem:[#allocation2 + $0x18a] sm:$0xff] }
 0x103   : > { %v9050_v57 = vpop.permute.xlu2 %6605 }
 0x104   : > { %12854 = vst [vmem:[#allocation23_spill] sm:$0xff] %v9050_v57 }
 0x105   : > { %6765 = vrot.lane.b32.xlu1 %v8778_v63, %s8436_s18 }
 0x107   : > { %v9054_v62 = vpop.permute.xlu1 %6555  ;;  %6775 = vrot.lane.b32.xlu0 %v8797_v15, %s8436_s18 }
 0x109   : > { %v9058_v38 = vpop.permute.xlu0 %6565  ;;  %6785 = vrot.lane.b32.xlu2 %v8799_v18, %s8436_s18 }
 0x10b   : > { %v9062_v5 = vpop.permute.xlu2 %6620 }
 0x10d   : > { %6780 = vrot.lane.b32.xlu1 %v8791_v9, %s8436_s18 }
 0x10f   : > { %v9068_v63 = vpop.permute.xlu1 %6570  ;;  %6790 = vrot.lane.b32.xlu0 %v9064_v8, %s8436_s18 }
 0x111   : > { %v9072_v15 = vpop.permute.xlu0 %6580  ;;  %6800 = vrot.lane.b32.xlu2 %v8809_v29, %s8437_s19 }
 0x113   : > { %v9076_v57 = vpop.permute.xlu2 %6635 }
 0x115   : > { %6795 = vrot.lane.b32.xlu1 %v8803_v19, %s8437_s19 }
 0x117   : > { %v9080_v18 = vpop.permute.xlu1 %6585  ;;  %6805 = vrot.lane.b32.xlu0 %v8816_v36, %s8437_s19 }
 0x118   : > { %12855 = vst [vmem:[#allocation24_spill] sm:$0xff] %v9080_v18 }
 0x119   : > { %v9084_v9 = vpop.permute.xlu0 %6595  ;;  %6815 = vrot.lane.b32.xlu2 %v8820_v40, %s8437_s19 }
 0x11b   : > { %v9088_v23 = vpop.permute.xlu2 %6650 }
 0x11d   : > { %6810 = vrot.lane.b32.xlu1 %v8812_v30, %s8437_s19 }
 0x11f   : > { %v9092_v29 = vpop.permute.xlu1 %6600  ;;  %6820 = vrot.lane.b32.xlu0 %v8828_v47, %s8437_s19 }
 0x120   : > { %12856 = vst [vmem:[#allocation25_spill] sm:$0xff] %v9092_v29 }
 0x121   : > { %v9096_v19 = vpop.permute.xlu0 %6610  ;;  %6830 = vrot.lane.b32.xlu2 %v8832_v51, %s8437_s19 }
 0x123   : > { %v9100_v36 = vpop.permute.xlu2 %6665 }
 0x124   : > { %12857 = vst [vmem:[#allocation26_spill] sm:$0xff] %v9100_v36  ;;  %v766_v36 = vld [vmem:[#allocation2 + $0x81] sm:$0xff] }
 0x125   : > { %6825 = vrot.lane.b32.xlu1 %v8824_v41, %s8437_s19 }
 0x127   : > { %v9104_v40 = vpop.permute.xlu1 %6615  ;;  %6835 = vrot.lane.b32.xlu0 %v8840_v58, %s8437_s19 }
 0x128   : > { %12858 = vst [vmem:[#allocation27_spill] sm:$0xff] %v9104_v40 }
 0x129   : > { %v9108_v30 = vpop.permute.xlu0 %6625  ;;  %6845 = vrot.lane.b32.xlu2 %v8844_v61, %s8437_s19  ;;  %v724_v61 = vld [vmem:[#allocation2 + $0x182] sm:$0xff] }
 0x12b   : > { %v9112_v47 = vpop.permute.xlu2 %6680 }
 0x12c   : > { %12859 = vst [vmem:[#allocation28_spill] sm:$0xff] %v9112_v47 }
 0x12d   : > { %6840 = vrot.lane.b32.xlu1 %v8836_v52, %s8437_s19 }
 0x12f   : > { %v9116_v51 = vpop.permute.xlu1 %6630  ;;  %6850 = vrot.lane.b32.xlu0 %v8852_v7, %s8437_s19  ;;  %v9134_v7 = vpack.i.bf16 %v725_v48, %v724_v61  ;;  %v758_v48 = vld [vmem:[#allocation2 + $0x1a0] sm:$0xff] }
 0x130   : > { %12860 = vst [vmem:[#allocation29_spill] sm:$0xff] %v9116_v51  ;;  %v772_v51 = vld [vmem:[#allocation2 + $0xc9] sm:$0xff] }
 0x131   : > { %v9120_v41 = vpop.permute.xlu0 %6640  ;;  %6860 = vrot.lane.b32.xlu2 %v8860_v13, %s8437_s19 }
 0x133   : > { %v9124_v58 = vpop.permute.xlu2 %6695 }
 0x134   : > { %12861 = vst [vmem:[#allocation30_spill] sm:$0xff] %v9124_v58 }
 0x135   : > { %6855 = vrot.lane.b32.xlu1 %v8848_v1, %s8437_s19 }
 0x137   : > { %v9128_v40 = vpop.permute.xlu1 %6645  ;;  %6865 = vrot.lane.b32.xlu0 %v8872_v22, %s8437_s19 }
 0x139   : > { %v9132_v52 = vpop.permute.xlu0 %6655  ;;  %6875 = vrot.lane.b32.xlu2 %v8882_v27, %s8438_s20 }
 0x13b   : > { %v9138_v13 = vpop.permute.xlu2 %6710 }
 0x13c   : > { %12862 = vst [vmem:[#allocation31_spill] sm:$0xff] %v9138_v13 }
 0x13d   : > { %6870 = vrot.lane.b32.xlu1 %v9134_v7, %s8437_s19 }
 0x13f   : > { %v9142_v1 = vpop.permute.xlu1 %6660  ;;  %6880 = vrot.lane.b32.xlu0 %v8902_v42, %s8438_s20 }
 0x141   : > { %v9146_v58 = vpop.permute.xlu0 %6670  ;;  %6890 = vrot.lane.b32.xlu2 %v8910_v49, %s8438_s20 }
 0x142   : > { %12863 = vst [vmem:[#allocation32_spill] sm:$0xff] %v9146_v58 }
 0x143   : > { %v9150_v22 = vpop.permute.xlu2 %6725 }
 0x145   : > { %6885 = vrot.lane.b32.xlu1 %v8891_v32, %s8438_s20 }
 0x147   : > { %v9154_v27 = vpop.permute.xlu1 %6675  ;;  %6895 = vrot.lane.b32.xlu0 %v8922_v59, %s8438_s20 }
 0x149   : > { %v9158_v61 = vpop.permute.xlu0 %6685  ;;  %6905 = vrot.lane.b32.xlu2 %v8930_v4, %s8438_s20 }
 0x14a   : > { %12864 = vst [vmem:[#allocation33_spill] sm:$0xff] %v9158_v61 }
 0x14b   : > { %v9162_v42 = vpop.permute.xlu2 %6740 }
 0x14d   : > { %6900 = vrot.lane.b32.xlu1 %v8914_v50, %s8438_s20 }
 0x14f   : > { %v9166_v49 = vpop.permute.xlu1 %6690  ;;  %6910 = vrot.lane.b32.xlu0 %v8942_v31, %s8438_s20  ;;  %v757_v31 = vld [vmem:[#allocation2 + $0x198] sm:$0xff] }
 0x151   : > { %v9170_v32 = vpop.permute.xlu0 %6700  ;;  %6920 = vrot.lane.b32.xlu2 %v8954_v53, %s8438_s20  ;;  %v6949_v53 = vpack.i.bf16 %v758_v48, %v757_v31  ;;  %v761_v31 = vld [vmem:[#allocation2 + $0x49] sm:$0xff]  ;;  %v762_v48 = vld [vmem:[#allocation2 + $0x51] sm:$0xff] }
 0x153   : > { %v9174_v59 = vpop.permute.xlu2 %6755 }
 0x155   : > { %6915 = vrot.lane.b32.xlu1 %v8934_v6, %s8438_s20  ;;  %v759_v6 = vld [vmem:[#allocation2 + $0x31] sm:$0xff] }
 0x157   : > { %v9178_v4 = vpop.permute.xlu1 %6705  ;;  %6925 = vrot.lane.b32.xlu0 %v8978_v11, %s8438_s20  ;;  %v760_v11 = vld [vmem:[#allocation2 + $0x39] sm:$0xff] }
 0x158   : > { %12865 = vst [vmem:[#allocation34_spill] sm:$0xff] %v9178_v4  ;;  %v6954_v12 = vpack.i.bf16 %v760_v11, %v759_v6  ;;  %v770_v6 = vld [vmem:[#allocation2 + $0xb1] sm:$0xff]  ;;  %v800_v4 = vld [vmem:[#allocation2 + $0x9a] sm:$0xff] }
 0x159   : > { %v9182_v50 = vpop.permute.xlu0 %6715  ;;  %6935 = vrot.lane.b32.xlu2 %v8986_v0, %s8438_s20  ;;  %v763_v0 = vld [vmem:[#allocation2 + $0x61] sm:$0xff] }
 0x15b   : > { %v9186_v61 = vpop.permute.xlu2 %6770 }
 0x15c   : > { %12866 = vst [vmem:[#allocation35_spill] sm:$0xff] %v9186_v61 }
 0x15d   : > { %6930 = vrot.lane.b32.xlu1 %v8964_v54, %s8438_s20  ;;  %v6964_v54 = vpack.i.bf16 %v764_v35, %v763_v0  ;;  %v6979_v35 = vpack.i.bf16 %v770_v6, %v769_v45  ;;  %v767_v0 = vld [vmem:[#allocation2 + $0x91] sm:$0xff] }
 0x15f   : > { %v9190_v47 = vpop.permute.xlu1 %6720  ;;  %6940 = vrot.lane.b32.xlu0 %v8998_v26, %s8438_s20  ;;  %v765_v26 = vld [vmem:[#allocation2 + $0x79] sm:$0xff] }
 0x160   : > { %12867 = vst [vmem:[#allocation36_spill] sm:$0xff] %v9190_v47 }
 0x161   : > { %v9194_v29 = vpop.permute.xlu0 %6730  ;;  %6950 = vrot.lane.b32.xlu2 %v6949_v53, %s8438_s20  ;;  %v6959_v53 = vpack.i.bf16 %v762_v48, %v761_v31  ;;  %v776_v48 = vld [vmem:[#allocation2 + $0xf9] sm:$0xff] }
 0x162   : > { %12868 = vst [vmem:[#allocation37_spill] sm:$0xff] %v9194_v29  ;;  %v768_v29 = vld [vmem:[#allocation2 + $0x99] sm:$0xff] }
 0x163   : > { %v9197_v58 = vpop.permute.xlu2 %6785  ;;  %v6974_v31 = vpack.i.bf16 %v768_v29, %v767_v0  ;;  %v782_v0 = vld [vmem:[#allocation2 + $0x141] sm:$0xff] }
 0x164   : > { %12869 = vst [vmem:[#allocation38_spill] sm:$0xff] %v9197_v58 }
 0x165   : > { %6945 = vrot.lane.b32.xlu1 %v8990_v21, %s8438_s20  ;;  %v6969_v21 = vpack.i.bf16 %v766_v36, %v765_v26  ;;  %v773_v26 = vld [vmem:[#allocation2 + $0xd9] sm:$0xff] }
 0x167   : > { %v9201_v17 = vpop.permute.xlu1 %6735  ;;  %6955 = vrot.lane.b32.xlu0 %v6954_v12, %s8439_s21  ;;  %v771_v12 = vld [vmem:[#allocation2 + $0xc1] sm:$0xff] }
 0x168   : > { %v6984_v36 = vpack.i.bf16 %v772_v51, %v771_v12 }
 0x169   : > { %v9204_v18 = vpop.permute.xlu0 %6745  ;;  %6965 = vrot.lane.b32.xlu2 %v6964_v54, %s8439_s21  ;;  %v775_v54 = vld [vmem:[#allocation2 + $0xf1] sm:$0xff] }
 0x16a   : > { %12870 = vst [vmem:[#allocation39_spill] sm:$0xff] %v9204_v18  ;;  %v6994_v45 = vpack.i.bf16 %v776_v48, %v775_v54  ;;  %v780_v54 = vld [vmem:[#allocation2 + $0x129] sm:$0xff] }
 0x16b   : > { %v9207_v11 = vpop.permute.xlu2 %6800 }
 0x16c   : > { %12871 = vst [vmem:[#allocation40_spill] sm:$0xff] %v9207_v11  ;;  %v806_v11 = vld [vmem:[#allocation2 + $0xe2] sm:$0xff] }
 0x16d   : > { %6960 = vrot.lane.b32.xlu1 %v6959_v53, %s8439_s21  ;;  %v774_v53 = vld [vmem:[#allocation2 + $0xe1] sm:$0xff] }
 0x16e   : > { %v6989_v29 = vpack.i.bf16 %v774_v53, %v773_v26 }
 0x16f   : > { %v9210_v13 = vpop.permute.xlu1 %6750  ;;  %6970 = vrot.lane.b32.xlu0 %v6969_v21, %s8439_s21  ;;  %v777_v21 = vld [vmem:[#allocation2 + $0x109] sm:$0xff] }
 0x170   : > { %12872 = vst [vmem:[#allocation41_spill] sm:$0xff] %v9210_v13  ;;  %v778_v13 = vld [vmem:[#allocation2 + $0x111] sm:$0xff] }
 0x171   : > { %v9213_v18 = vpop.permute.xlu0 %6760  ;;  %6980 = vrot.lane.b32.xlu2 %v6979_v35, %s8439_s21  ;;  %v781_v35 = vld [vmem:[#allocation2 + $0x139] sm:$0xff]  ;;  %v6999_v51 = vpack.i.bf16 %v778_v13, %v777_v21  ;;  %v785_v13 = vld [vmem:[#allocation2 + $0x169] sm:$0xff]  ;;  %v786_v21 = vld [vmem:[#allocation2 + $0x171] sm:$0xff] }
 0x172   : > { %12873 = vst [vmem:[#allocation42_spill] sm:$0xff] %v9213_v18  ;;  %v7009_v12 = vpack.i.bf16 %v782_v0, %v781_v35  ;;  %v789_v35 = vld [vmem:[#allocation2 + $0x199] sm:$0xff]  ;;  %v790_v0 = vld [vmem:[#allocation2 + $0x1a1] sm:$0xff] }
 0x173   : > { %v9216_v58 = vpop.permute.xlu2 %6815 }
 0x175   : > { %6975 = vrot.lane.b32.xlu1 %v6974_v31, %s8439_s21  ;;  %v779_v31 = vld [vmem:[#allocation2 + $0x121] sm:$0xff] }
 0x176   : > { %v7004_v26 = vpack.i.bf16 %v780_v54, %v779_v31  ;;  %v794_v31 = vld [vmem:[#allocation2 + $0x52] sm:$0xff] }
 0x177   : > { %v9219_v6 = vpop.permute.xlu1 %6765  ;;  %6985 = vrot.lane.b32.xlu0 %v6984_v36, %s8439_s21  ;;  %v783_v36 = vld [vmem:[#allocation2 + $0x151] sm:$0xff] }
 0x178   : > { %12874 = vst [vmem:[#allocation43_spill] sm:$0xff] %v9219_v6  ;;  %v784_v6 = vld [vmem:[#allocation2 + $0x159] sm:$0xff] }
 0x179   : > { %v9222_v18 = vpop.permute.xlu0 %6775  ;;  %6995 = vrot.lane.b32.xlu2 %v6994_v45, %s8439_s21  ;;  %v7014_v53 = vpack.i.bf16 %v784_v6, %v783_v36  ;;  %v7029_v6 = vpack.i.bf16 %v790_v0, %v789_v35 }
 0x17a   : > { %12875 = vst [vmem:[#allocation44_spill] sm:$0xff] %v9222_v18 }
 0x17b   : > { %v9225_v61 = vpop.permute.xlu2 %6830 }
 0x17c   : > { %12876 = vst [vmem:[#allocation45_spill] sm:$0xff] %v9225_v61  ;;  %v7019_v61 = vpack.i.bf16 %v786_v21, %v785_v13 }
 0x17d   : > { %6990 = vrot.lane.b32.xlu1 %v6989_v29, %s8439_s21 }
 0x17f   : > { %v9228_v48 = vpop.permute.xlu1 %6780  ;;  %7000 = vrot.lane.b32.xlu0 %v6999_v51, %s8439_s21 }
 0x181   : > { %v9231_v18 = vpop.permute.xlu0 %6790  ;;  %7010 = vrot.lane.b32.xlu2 %v7009_v12, %s8439_s21  ;;  %v793_v12 = vld [vmem:[#allocation2 + $0x4a] sm:$0xff] }
 0x182   : > { %12877 = vst [vmem:[#allocation46_spill] sm:$0xff] %v9231_v18  ;;  %v7039_v36 = vpack.i.bf16 %v794_v31, %v793_v12  ;;  %v797_v12 = vld [vmem:[#allocation2 + $0x7a] sm:$0xff]  ;;  %v798_v31 = vld [vmem:[#allocation2 + $0x82] sm:$0xff] }
 0x183   : > { %v9234_v45 = vpop.permute.xlu2 %6845 }
 0x184   : > { %12878 = vst [vmem:[#allocation47_spill] sm:$0xff] %v9234_v45  ;;  %v792_v45 = vld [vmem:[#allocation2 + $0x3a] sm:$0xff] }
 0x185   : > { %7005 = vrot.lane.b32.xlu1 %v7004_v26, %s8439_s21  ;;  %v791_v26 = vld [vmem:[#allocation2 + $0x32] sm:$0xff] }
 0x186   : > { %v7034_v21 = vpack.i.bf16 %v792_v45, %v791_v26  ;;  %v7049_v26 = vpack.i.bf16 %v798_v31, %v797_v12  ;;  %v812_v31 = vld [vmem:[#allocation2 + $0x12a] sm:$0xff] }
 0x187   : > { %v9237_v29 = vpop.permute.xlu1 %6795  ;;  %7015 = vrot.lane.b32.xlu0 %v7014_v53, %s8439_s21  ;;  %v795_v53 = vld [vmem:[#allocation2 + $0x62] sm:$0xff] }
 0x189   : > { %v9240_v51 = vpop.permute.xlu0 %6805  ;;  %7025 = vrot.lane.b32.xlu2 %v9064_v8, %s8439_s21  ;;  %v799_v8 = vld [vmem:[#allocation2 + $0x92] sm:$0xff] }
 0x18a   : > { %12879 = vst [vmem:[#allocation48_spill] sm:$0xff] %v9240_v51  ;;  %v796_v51 = vld [vmem:[#allocation2 + $0x6a] sm:$0xff]  ;;  %v7054_v0 = vpack.i.bf16 %v800_v4, %v799_v8 }
 0x18b   : > { %v9244_v54 = vpop.permute.xlu2 %6860 }
 0x18c   : > { %12880 = vst [vmem:[#allocation49_spill] sm:$0xff] %v9244_v54 }
 0x18d   : > { %7020 = vrot.lane.b32.xlu1 %v7019_v61, %s8439_s21  ;;  %v7044_v61 = vpack.i.bf16 %v796_v51, %v795_v53  ;;  %v803_v53 = vld [vmem:[#allocation2 + $0xc2] sm:$0xff] }
 0x18f   : > { %v9247_v18 = vpop.permute.xlu1 %6810  ;;  %7030 = vrot.lane.b32.xlu0 %v7029_v6, %s8439_s21  ;;  %v801_v6 = vld [vmem:[#allocation2 + $0xaa] sm:$0xff] }
 0x190   : > { %12881 = vst [vmem:[#allocation50_spill] sm:$0xff] %v9247_v18 }
 0x191   : > { %v9250_v13 = vpop.permute.xlu0 %6820  ;;  %7040 = vrot.lane.b32.xlu2 %v7039_v36, %s8440_s22  ;;  %v805_v36 = vld [vmem:[#allocation2 + $0xda] sm:$0xff] }
 0x192   : > { %12882 = vst [vmem:[#allocation51_spill] sm:$0xff] %v9250_v13  ;;  %v802_v13 = vld [vmem:[#allocation2 + $0xb2] sm:$0xff]  ;;  %v7069_v4 = vpack.i.bf16 %v806_v11, %v805_v36 }
 0x193   : > { %v9253_v35 = vpop.permute.xlu2 %6875  ;;  %v7059_v51 = vpack.i.bf16 %v802_v13, %v801_v6  ;;  %v809_v6 = vld [vmem:[#allocation2 + $0x10a] sm:$0xff] }
 0x195   : > { %7035 = vrot.lane.b32.xlu1 %v7034_v21, %s8440_s22  ;;  %v804_v21 = vld [vmem:[#allocation2 + $0xca] sm:$0xff] }
 0x196   : > { %v7064_v12 = vpack.i.bf16 %v804_v21, %v803_v53  ;;  %v818_v21 = vld [vmem:[#allocation2 + $0x172] sm:$0xff] }
 0x197   : > { %v9256_v18 = vpop.permute.xlu1 %6825  ;;  %7045 = vrot.lane.b32.xlu0 %v7044_v61, %s8440_s22  ;;  %v807_v61 = vld [vmem:[#allocation2 + $0xf2] sm:$0xff] }
 0x198   : > { %12883 = vst [vmem:[#allocation52_spill] sm:$0xff] %v9256_v18  ;;  %v808_v18 = vld [vmem:[#allocation2 + $0xfa] sm:$0xff] }
 0x199   : > { %v9259_v45 = vpop.permute.xlu0 %6835  ;;  %7055 = vrot.lane.b32.xlu2 %v7054_v0, %s8440_s22  ;;  %v811_v0 = vld [vmem:[#allocation2 + $0x122] sm:$0xff]  ;;  %v7074_v13 = vpack.i.bf16 %v808_v18, %v807_v61 }
 0x19a   : > { %12884 = vst [vmem:[#allocation53_spill] sm:$0xff] %v9259_v45  ;;  %v7084_v11 = vpack.i.bf16 %v812_v31, %v811_v0  ;;  %v816_v0 = vld [vmem:[#allocation2 + $0x15a] sm:$0xff] }
 0x19b   : > { %v9262_v54 = vpop.permute.xlu2 %6890 }
 0x19c   : > { %12885 = vst [vmem:[#allocation54_spill] sm:$0xff] %v9262_v54 }
 0x19d   : > { %7050 = vrot.lane.b32.xlu1 %v7049_v26, %s8440_s22  ;;  %v810_v26 = vld [vmem:[#allocation2 + $0x112] sm:$0xff] }
 0x19e   : > { %v7079_v53 = vpack.i.bf16 %v810_v26, %v809_v6  ;;  %v821_v6 = vld [vmem:[#allocation2 + $0x19a] sm:$0xff] }
 0x19f   : > { %v9265_v8 = vpop.permute.xlu1 %6840  ;;  %7060 = vrot.lane.b32.xlu0 %v7059_v51, %s8440_s22  ;;  %v813_v51 = vld [vmem:[#allocation2 + $0x13a] sm:$0xff] }
 0x1a0   : > { %12886 = vst [vmem:[#allocation55_spill] sm:$0xff] %v9265_v8  ;;  %v814_v8 = vld [vmem:[#allocation2 + $0x142] sm:$0xff] }
 0x1a1   : > { %v9268_v45 = vpop.permute.xlu0 %6850  ;;  %7070 = vrot.lane.b32.xlu2 %v7069_v4, %s8440_s22  ;;  %v817_v4 = vld [vmem:[#allocation2 + $0x16a] sm:$0xff]  ;;  %v7089_v18 = vpack.i.bf16 %v814_v8, %v813_v51  ;;  %v822_v8 = vld [vmem:[#allocation2 + $0x1a2] sm:$0xff] }
 0x1a2   : > { %12887 = vst [vmem:[#allocation56_spill] sm:$0xff] %v9268_v45  ;;  %v7099_v61 = vpack.i.bf16 %v818_v21, %v817_v4 }
 0x1a3   : > { %v9271_v54 = vpop.permute.xlu2 %6905 }
 0x1a4   : > { %12888 = vst [vmem:[#allocation57_spill] sm:$0xff] %v9271_v54 }
 0x1a5   : > { %7065 = vrot.lane.b32.xlu1 %v7064_v12, %s8440_s22  ;;  %v815_v12 = vld [vmem:[#allocation2 + $0x152] sm:$0xff] }
 0x1a7   : > { %v9274_v36 = vpop.permute.xlu1 %6855  ;;  %7075 = vrot.lane.b32.xlu0 %v7074_v13, %s8440_s22 }
 0x1a8   : > { %12889 = vst [vmem:[#allocation58_spill] sm:$0xff] %v9274_v36  ;;  %v7094_v36 = vpack.i.bf16 %v816_v0, %v815_v12 }
 0x1a9   : > { %v9277_v45 = vpop.permute.xlu0 %6865  ;;  %7085 = vrot.lane.b32.xlu2 %v7084_v11, %s8440_s22 }
 0x1aa   : > { %12890 = vst [vmem:[#allocation59_spill] sm:$0xff] %v9277_v45  ;;  %v6477_v45 = vunpack.i.l.bf16 %v8972_v14 }
 0x1ab   : > { %v9280_v54 = vpop.permute.xlu2 %6920 }
 0x1ac   : > { %12891 = vst [vmem:[#allocation60_spill] sm:$0xff] %v9280_v54 }
 0x1ad   : > { %7080 = vrot.lane.b32.xlu1 %v7079_v53, %s8440_s22  ;;  %v7109_v53 = vpack.i.bf16 %v822_v8, %v821_v6 }
 0x1af   : > { %v9283_v31 = vpop.permute.xlu1 %6870  ;;  %7090 = vrot.lane.b32.xlu0 %v7089_v18, %s8440_s22 }
 0x1b0   : > { %12892 = vst [vmem:[#allocation61_spill] sm:$0xff] %v9283_v31 }
 0x1b1   : > { %v9286_v13 = vpop.permute.xlu0 %6880  ;;  %7100 = vrot.lane.b32.xlu2 %v7099_v61, %s8440_s22 }
 0x1b2   : > { %12893 = vst [vmem:[#allocation62_spill] sm:$0xff] %v9286_v13  ;;  %v6517_v13 = vunpack.i.l.bf16 %v8950_v46 }
 0x1b3   : > { %v9289_v11 = vpop.permute.xlu2 %6935 }
 0x1b4   : > { %12894 = vst [vmem:[#allocation63_spill] sm:$0xff] %v9289_v11 }
 0x1b5   : > { %7095 = vrot.lane.b32.xlu1 %v7094_v36, %s8440_s22 }
 0x1b7   : > { %v9292_v26 = vpop.permute.xlu1 %6885  ;;  %7105 = vrot.lane.b32.xlu0 %v9134_v7, %s8440_s22 }
 0x1b8   : > { %12895 = vst [vmem:[#allocation64_spill] sm:$0xff] %v9292_v26  ;;  %v6498_v26 = vunpack.i.h.bf16 %v8906_v44 }
 0x1b9   : > { %v9296_v51 = vpop.permute.xlu0 %6895 }
 0x1bb   : > { %v9298_v4 = vpop.permute.xlu2 %6950 }
 0x1bc   : > { %12896 = vst [vmem:[#allocation65_spill] sm:$0xff] %v9298_v4 }
 0x1bd   : > { %7110 = vrot.lane.b32.xlu1 %v7109_v53, %s8440_s22  ;;  %v6478_v53 = vunpack.i.h.bf16 %v8972_v14  ;;  %v6532_v14 = vunpack.i.l.bf16 %v8982_v10 }
 0x1bf   : > { %v9301_v21 = vpop.permute.xlu1 %6900 }
 0x1c0   : > { %12897 = vst [vmem:[#allocation66_spill] sm:$0xff] %v9301_v21 }
 0x1c1   : > { %v9303_v18 = vpop.permute.xlu0 %6910 }
 0x1c2   : > { %12898 = vst [vmem:[#allocation67_spill] sm:$0xff] %v9303_v18  ;;  %v535_v18 = vld [vmem:[#allocation2 + $0x8] sm:$0xff] }
 0x1c3   : > { %v9305_v61 = vpop.permute.xlu2 %6965  ;;  %v9330_v31 = vsel %vm334_vm0, %v535_v18, %v6478_v53 }
 0x1c4   : > { %12899 = vst [vmem:[#allocation68_spill] sm:$0xff] %v9305_v61 }
 0x1c7   : > { %v9307_v36 = vpop.permute.xlu1 %6915 }
 0x1c8   : > { %12900 = vst [vmem:[#allocation69_spill] sm:$0xff] %v9307_v36  ;;  %v534_v36 = vld [vmem:[#allocation2] sm:$0xff] }
 0x1c9   : > { %v9309_v12 = vpop.permute.xlu0 %6925  ;;  %v1847_v21 = vsel %vm334_vm0, %v534_v36, %v6477_v45  ;;  %v6548_v45 = vunpack.i.h.bf16 %v9002_v16 }
 0x1ca   : > { %12901 = vst [vmem:[#allocation70_spill] sm:$0xff] %v9309_v12  ;;  %v2129_v12 = vld [vmem:[%s12675_s1 + $0x10] sm:$0x3] }
 0x1cb   : > { %v9311_v0 = vpop.permute.xlu2 %6980  ;;  %v2143_v61 = vunpack.c.l.b16 %v2129_v12  ;;  %v6488_v12 = vunpack.i.h.bf16 %v8992_v60 }
 0x1cc   : > { %12902 = vst [vmem:[#allocation71_spill] sm:$0xff] %v9311_v0  ;;  %v6533_v0 = vunpack.i.h.bf16 %v8982_v10  ;;  %v1856_v10 = vsel %vm334_vm0, %v8877_v25, %v6498_v26  ;;  %v9373_v25 = vsel %vm334_vm0, %v8918_v55, %v6517_v13  ;;  %v12916_v55 = vld [vmem:[#allocation5_spill] sm:$0xff] }
 0x1cd   : > { %v2146_v53 = vpack.c.b16 %v2143_v61, %v2143_v61 }
 0x1cf   : > { %v9313_v7 = vpop.permute.xlu1 %6930 }
 0x1d0   : > { %12903 = vst [vmem:[#allocation72_spill] sm:$0xff] %v9313_v7  ;;  %v6503_v7 = vunpack.i.h.bf16 %v8926_v3 }
 0x1d1   : > { %v9315_v11 = vpop.permute.xlu0 %6940 }
 0x1d2   : > { %12904 = vst [vmem:[#allocation73_spill] sm:$0xff] %v9315_v11  ;;  %v6482_v11 = vunpack.i.l.bf16 %v8996_v2 }
 0x1d3   : > { %v9317_v6 = vpop.permute.xlu2 %6995 }
 0x1d4   : > { %12905 = vst [vmem:[#allocation74_spill] sm:$0xff] %v9317_v6  ;;  %v6502_v6 = vunpack.i.l.bf16 %v8926_v3  ;;  %v6483_v3 = vunpack.i.h.bf16 %v8996_v2  ;;  %v6433_v2 = vld [vmem:[%s12675_s1 + $0x8] sm:$0xff]  ;;  %v1849_v13 = vsel %vm334_vm0, %v12916_v55, %v6482_v11  ;;  %v12919_v11 = vld [vmem:[#allocation14_spill] sm:$0xff]  ;;  %v6542_v55 = vunpack.i.l.bf16 %v9042_v43 }
 0x1d6   : > { %v9365_v36 = vsel %vm334_vm0, %v8897_v37, %v6502_v6  ;;  %v12914_v6 = vld [vmem:[#allocation7_spill] sm:$0xff] }
 0x1d7   : > { %v9319_v8 = vpop.permute.xlu1 %6945 }
 0x1d8   : > { %12906 = vst [vmem:[#allocation75_spill] sm:$0xff] %v9319_v8  ;;  %v6497_v8 = vunpack.i.l.bf16 %v8906_v44  ;;  %v6487_v44 = vunpack.i.l.bf16 %v8992_v60  ;;  %v9357_v60 = vsel %vm334_vm0, %v8899_v39, %v6503_v7  ;;  %v6547_v39 = vunpack.i.l.bf16 %v9002_v16  ;;  %v12912_v7 = vld [vmem:[#allocation11_spill] sm:$0xff]  ;;  %v12917_v16 = vld [vmem:[#allocation6_spill] sm:$0xff] }
 0x1d9   : > { %v9322_v54 = vpop.permute.xlu0 %6955 }
 0x1da   : > { %12907 = vst [vmem:[#allocation76_spill] sm:$0xff] %v9322_v54  ;;  %v1855_v61 = vsel %vm334_vm0, %v8875_v24, %v6497_v8  ;;  %v9380_v8 = vsel %vm334_vm0, %v12912_v7, %v6533_v0  ;;  %v6562_v0 = vunpack.i.l.bf16 %v9014_v20  ;;  %v12918_v7 = vld [vmem:[#allocation15_spill] sm:$0xff] }
 0x1db   : > { %v9324_v4 = vpop.permute.xlu2 %7010 }
 0x1dc   : > { %12908 = vst [vmem:[#allocation77_spill] sm:$0xff] %v9324_v4  ;;  %v6518_v4 = vunpack.i.h.bf16 %v8950_v46  ;;  %v2200_v46 = vsel %vm2198_vm4, %v2146_v53, 0  ;;  %v12913_v53 = vld [vmem:[#allocation10_spill] sm:$0xff] }
 0x1dd   : > { %2207 = vmatpush.bf16.msra.mxu0 %v2200_v46  ;;  %6441 = vmatpush.bf16.msra.mxu3 %v2200_v46  ;;  %v9384_v37 = vsel %vm334_vm0, %v12913_v53, %v6532_v14  ;;  %v9398_v14 = vsel %vm334_vm0, %v12918_v7, %v6548_v45  ;;  %v6563_v53 = vunpack.i.h.bf16 %v9014_v20  ;;  %v6558_v20 = vunpack.i.h.bf16 %v9054_v62  ;;  %v12920_v7 = vld [vmem:[#allocation9_spill] sm:$0xff] }
 0x1de   : > { %v9369_v24 = vsel %vm334_vm0, %v8920_v56, %v6518_v4  ;;  %v1851_v56 = vsel %vm334_vm0, %v12914_v6, %v6487_v44  ;;  %v12915_v4 = vld [vmem:[#allocation8_spill] sm:$0xff]  ;;  %v6578_v44 = vunpack.i.h.bf16 %v9026_v28  ;;  %v9405_v6 = vsel %vm334_vm0, %v12919_v11, %v6547_v39  ;;  %v6432_v39 = vld [vmem:[%s12675_s1] sm:$0xff] }
 0x1df   : > { %v9340_v18 = vpop.permute.xlu1 %6960  ;;  %v1852_v46 = vsel %vm334_vm0, %v12915_v4, %v6488_v12  ;;  %v6577_v12 = vunpack.i.l.bf16 %v9026_v28  ;;  %v6543_v4 = vunpack.i.h.bf16 %v9042_v43  ;;  %v6568_v28 = vunpack.i.h.bf16 %v9058_v38 }
 0x1e0   : > { %12909 = vst [vmem:[#allocation78_spill] sm:$0xff] %v9340_v18  ;;  %v9424_v43 = vsel %vm380_vm3, %v1849_v13, %v6562_v0  ;;  %v12924_v0 = vld [vmem:[#allocation12_spill] sm:$0xff] }
 0x1e1   : > { %v9348_v54 = vpop.permute.xlu0 %6970  ;;  %2208 = vmatpush.bf16.msra.mxu0 %v6433_v2  ;;  %6442 = vmatpush.bf16.msra.mxu3 %v6433_v2  ;;  %v6567_v2 = vunpack.i.l.bf16 %v9058_v38  ;;  %v1888_v38 = vsel %vm380_vm3, %v1856_v10, %v6578_v44  ;;  %v1887_v47 = vsel %vm380_vm3, %v1855_v61, %v6577_v12  ;;  %v9447_v10 = vsel %vm380_vm3, %v1852_v46, %v6568_v28 }
 0x1e2   : > { %12910 = vst [vmem:[#allocation79_spill] sm:$0xff] %v9348_v54  ;;  %v1850_v54 = vsel %vm334_vm0, %v12917_v16, %v6483_v3  ;;  %v6557_v16 = vunpack.i.l.bf16 %v9054_v62  ;;  %v6623_v3 = vunpack.i.h.bf16 %v9062_v5  ;;  %v6738_v46 = vunpack.i.h.bf16 %v9201_v17 }
 0x1e3   : > { %v9376_v26 = vpop.permute.xlu2 %7025  ;;  %v9431_v18 = vsel %vm380_vm3, %v1850_v54, %v6563_v53  ;;  %v1880_v54 = vsel %vm380_vm3, %v9330_v31, %v6558_v20  ;;  %v9450_v53 = vsel %vm380_vm3, %v1851_v56, %v6567_v2  ;;  %v6737_v20 = vunpack.i.l.bf16 %v9201_v17 }
 0x1e4   : > { %12911 = vst [vmem:[#allocation80_spill] sm:$0xff] %v9376_v26  ;;  %v6493_v26 = vunpack.i.h.bf16 %v9006_v34  ;;  %v6622_v34 = vunpack.i.l.bf16 %v9062_v5  ;;  %v6553_v5 = vunpack.i.h.bf16 %v9046_v33  ;;  %v1879_v61 = vsel %vm380_vm3, %v1847_v21, %v6557_v16 }
 0x1e5   : > { %2209 = vmatpush.bf16.msra.mxu0 %v6432_v39  ;;  %6443 = vmatpush.bf16.msra.mxu3 %v6432_v39  ;;  %v6583_v21 = vunpack.i.h.bf16 %v9072_v15  ;;  %v6582_v56 = vunpack.i.l.bf16 %v9072_v15  ;;  %v6818_v16 = vunpack.i.h.bf16 %v9216_v58  ;;  %v6898_v2 = vunpack.i.h.bf16 %v9296_v51 }
 0x1e6   : > { %v9421_v11 = vsel %vm334_vm0, %v12920_v7, %v6493_v26  ;;  %v12923_v26 = vld [vmem:[#allocation13_spill] sm:$0xff]  ;;  %v1873_v7 = vsel %vm334_vm0, %v12924_v0, %v6542_v55  ;;  %v6657_v55 = vunpack.i.l.bf16 %v9132_v52  ;;  %v6897_v39 = vunpack.i.l.bf16 %v9296_v51 }
 0x1e7   : > { %v9410_v45 = vpop.permute.xlu1 %6975  ;;  %12921 = vst [vmem:[#allocation11_spill] sm:$0xff] %v9421_v11  ;;  %v1874_v13 = vsel %vm334_vm0, %v12923_v26, %v6543_v4  ;;  %v9456_v12 = vsel %vm380_vm3, %v1873_v7, %v6622_v34  ;;  %v6658_v4 = vunpack.i.h.bf16 %v9132_v52  ;;  %v6817_v34 = vunpack.i.l.bf16 %v9216_v58 }
 0x1e8   : > { %v9453_v44 = vsel %vm380_vm3, %v1874_v13, %v6623_v3  ;;  %v6638_v3 = vunpack.i.h.bf16 %v9076_v57  ;;  %v6637_v52 = vunpack.i.l.bf16 %v9076_v57  ;;  %v1920_v17 = vsel %vm1911_vm5, %v1887_v47, %v6657_v55 }
 0x1e9   : > { %v9428_v62 = vpop.permute.xlu0 %6985  ;;  %v1921_v26 = vsel %vm1911_vm5, %v1888_v38, %v6658_v4  ;;  %v6978_v15 = vunpack.i.h.bf16 %v9410_v45  ;;  %v6977_v13 = vunpack.i.l.bf16 %v9410_v45  ;;  %v6598_v58 = vunpack.i.h.bf16 %v9084_v9 }
 0x1ea   : > { %12922 = vst [vmem:[#allocation10_spill] sm:$0xff] %v9428_v62  ;;  %v1953_v7 = vsel %vm1944_vm6, %v1920_v17, %v6737_v20  ;;  %v1954_v57 = vsel %vm1944_vm6, %v1921_v26, %v6738_v46  ;;  %v6597_v62 = vunpack.i.l.bf16 %v9084_v9  ;;  %v6613_v9 = vunpack.i.h.bf16 %v9096_v19 }
 0x1eb   : > { %v9441_v11 = vpop.permute.xlu2 %7040  ;;  %v1986_v31 = vsel %vm1977_vm7, %v1953_v7, %v6817_v34  ;;  %v1987_v51 = vsel %vm1977_vm7, %v1954_v57, %v6818_v16  ;;  %v6572_v34 = vunpack.i.l.bf16 %v9068_v63  ;;  %v1890_v16 = vsel %vm380_vm3, %v9357_v60, %v6583_v21 }
 0x1ec   : > { %v2019_v47 = vsel %vm2010_vm8, %v1986_v31, %v6897_v39  ;;  %v2020_v45 = vsel %vm2010_vm8, %v1987_v51, %v6898_v2  ;;  %v1889_v2 = vsel %vm380_vm3, %v9365_v36, %v6582_v56  ;;  %v6612_v39 = vunpack.i.l.bf16 %v9096_v19 }
 0x1ed   : > { %v2052_v20 = vsel %vm2043_vm9, %v2019_v47, %v6977_v13  ;;  %v2053_v46 = vsel %vm2043_vm9, %v2020_v45, %v6978_v15  ;;  %v1913_v60 = vsel %vm1911_vm5, %v1880_v54, %v6638_v3  ;;  %v1912_v21 = vsel %vm1911_vm5, %v1879_v61, %v6637_v52 }
 0x1ee   : > { %v6628_v13 = vunpack.i.h.bf16 %v9108_v30  ;;  %v6627_v7 = vunpack.i.l.bf16 %v9108_v30  ;;  %v1896_v36 = vsel %vm380_vm3, %v9369_v24, %v6598_v58  ;;  %v1895_v56 = vsel %vm380_vm3, %v9373_v25, %v6597_v62 }
 0x1ef   : > { %v9468_v28 = vpop.permute.xlu1 %6990  ;;  %v6653_v19 = vunpack.i.h.bf16 %v9088_v23  ;;  %v6642_v57 = vunpack.i.l.bf16 %v9120_v41  ;;  %v6643_v54 = vunpack.i.h.bf16 %v9120_v41  ;;  %v6648_v61 = vunpack.i.h.bf16 %v9128_v40 }
 0x1f0   : > { %v6647_v3 = vunpack.i.l.bf16 %v9128_v40  ;;  %v6662_v30 = vunpack.i.l.bf16 %v9142_v1  ;;  %v9524_v24 = vsel %vm380_vm3, %v9380_v8, %v6613_v9  ;;  %v9528_v25 = vsel %vm380_vm3, %v9384_v37, %v6612_v39 }
 0x1f1   : > { %v9477_v0 = vpop.permute.xlu0 %7000  ;;  %v6663_v62 = vunpack.i.h.bf16 %v9142_v1  ;;  %v6727_v52 = vunpack.i.l.bf16 %v9150_v22  ;;  %v9536_v41 = vsel %vm380_vm3, %v9398_v14, %v6628_v13  ;;  %v9540_v40 = vsel %vm380_vm3, %v9405_v6, %v6627_v7 }
 0x1f2   : > { %v6677_v8 = vunpack.i.l.bf16 %v9154_v27  ;;  %v9546_v37 = vsel %vm1911_vm5, %v9424_v43, %v6642_v57  ;;  %v6678_v1 = vunpack.i.h.bf16 %v9154_v27  ;;  %v6743_v47 = vunpack.i.h.bf16 %v9162_v42 }
 0x1f3   : > { %v7056_v38 = vpop.permute.xlu2 %7055  ;;  %v6742_v45 = vunpack.i.l.bf16 %v9162_v42  ;;  %v9553_v14 = vsel %vm1911_vm5, %v9431_v18, %v6643_v54  ;;  %v1916_v6 = vsel %vm1911_vm5, %v9450_v53, %v6647_v3  ;;  %v1923_v43 = vsel %vm1911_vm5, %v1890_v16, %v6663_v62 }
 0x1f4   : > { %v7058_v4 = vunpack.i.h.bf16 %v7056_v38  ;;  %v7057_v55 = vunpack.i.l.bf16 %v7056_v38  ;;  %v6728_v38 = vunpack.i.h.bf16 %v9150_v22  ;;  %v1917_v22 = vsel %vm1911_vm5, %v9447_v10, %v6648_v61 }
 0x1f5   : > { %v9562_v27 = vsel %vm1944_vm6, %v1916_v6, %v6727_v52  ;;  %v6702_v42 = vunpack.i.l.bf16 %v9170_v32  ;;  %v9569_v18 = vsel %vm1911_vm5, %v1895_v56, %v6677_v8  ;;  %v6718_v10 = vunpack.i.h.bf16 %v9182_v50  ;;  %v12925_v8 = vld [vmem:[#allocation36_spill] sm:$0xff] }
 0x1f6   : > { %v9493_v26 = vsel %vm2076_vm10, %v2052_v20, %v7057_v55  ;;  %v9496_v31 = vsel %vm2076_vm10, %v2053_v46, %v7058_v4  ;;  %v1922_v4 = vsel %vm1911_vm5, %v1889_v2, %v6662_v30  ;;  %v6703_v55 = vunpack.i.h.bf16 %v9170_v32 }
 0x1f7   : > { %v9502_v17 = vpop.permute.xlu1 %7005  ;;  %v9572_v53 = vsel %vm1944_vm6, %v1917_v22, %v6728_v38  ;;  %v6717_v46 = vunpack.i.l.bf16 %v9182_v50  ;;  %v9577_v16 = vsel %vm1911_vm5, %v1896_v36, %v6678_v1  ;;  %v6693_v2 = vunpack.i.h.bf16 %v9166_v49  ;;  %v12926_v1 = vld [vmem:[#allocation76_spill] sm:$0xff] }
 0x1f8   : > { %v9581_v9 = vsel %vm1944_vm6, %v1922_v4, %v6742_v45  ;;  %v9584_v32 = vsel %vm1944_vm6, %v1923_v43, %v6743_v47  ;;  %v6692_v13 = vunpack.i.l.bf16 %v9166_v49  ;;  %v6782_v7 = vunpack.i.l.bf16 %v9228_v48  ;;  %v12927_v4 = vld [vmem:[#allocation49_spill] sm:$0xff] }
 0x1f9   : > { %v9516_v51 = vpop.permute.xlu0 %7015  ;;  %v6798_v56 = vunpack.i.h.bf16 %v9237_v29  ;;  %v6797_v50 = vunpack.i.l.bf16 %v9237_v29  ;;  %v1939_v36 = vsel %vm1911_vm5, %v9453_v44, %v6703_v55  ;;  %v1938_v57 = vsel %vm1911_vm5, %v9456_v12, %v6702_v42 }
 0x1fa   : > { %v6878_v54 = vunpack.i.h.bf16 %v9253_v35  ;;  %v6877_v61 = vunpack.i.l.bf16 %v9253_v35  ;;  %v6758_v30 = vunpack.i.h.bf16 %v9174_v59  ;;  %v6757_v62 = vunpack.i.l.bf16 %v9174_v59 }
 0x1fb   : > { %v9532_v58 = vpop.permute.xlu2 %7070  ;;  %v1946_v52 = vsel %vm1944_vm6, %v1913_v60, %v6718_v10  ;;  %v1945_v29 = vsel %vm1944_vm6, %v1912_v21, %v6717_v46  ;;  %v6723_v38 = vunpack.i.h.bf16 %v12925_v8  ;;  %v6722_v44 = vunpack.i.l.bf16 %v12925_v8  ;;  %v12928_v10 = vld [vmem:[#allocation73_spill] sm:$0xff] }
 0x1fc   : > { %v6958_v12 = vunpack.i.h.bf16 %v12926_v1  ;;  %v6957_v47 = vunpack.i.l.bf16 %v12926_v1  ;;  %v6783_v35 = vunpack.i.h.bf16 %v9228_v48  ;;  %v1971_v45 = vsel %vm1944_vm6, %v1938_v57, %v6782_v7 }
 0x1fd   : > { %v1978_v6 = vsel %vm1977_vm7, %v1945_v29, %v6797_v50  ;;  %v1979_v22 = vsel %vm1977_vm7, %v1946_v52, %v6798_v56  ;;  %v6863_v60 = vunpack.i.h.bf16 %v12927_v4  ;;  %v6862_v21 = vunpack.i.l.bf16 %v12927_v4 }
 0x1fe   : > { %v2011_v43 = vsel %vm2010_vm8, %v1978_v6, %v6877_v61  ;;  %v2012_v55 = vsel %vm2010_vm8, %v1979_v22, %v6878_v54  ;;  %v6943_v46 = vunpack.i.h.bf16 %v12928_v10  ;;  %v6942_v8 = vunpack.i.l.bf16 %v12928_v10  ;;  %v12929_v6 = vld [vmem:[#allocation40_spill] sm:$0xff] }
 0x1ff   : > { %v9566_v20 = vpop.permute.xlu1 %7020  ;;  %v2044_v57 = vsel %vm2043_vm9, %v2011_v43, %v6957_v47  ;;  %v2045_v52 = vsel %vm2043_vm9, %v2012_v55, %v6958_v12  ;;  %v1972_v61 = vsel %vm1944_vm6, %v1939_v36, %v6783_v35  ;;  %v6802_v22 = vunpack.i.l.bf16 %v12929_v6  ;;  %v12930_v36 = vld [vmem:[#allocation51_spill] sm:$0xff] }
 0x200   : > { %v7023_v7 = vunpack.i.h.bf16 %v9566_v20  ;;  %v7022_v50 = vunpack.i.l.bf16 %v9566_v20  ;;  %v2004_v4 = vsel %vm1977_vm7, %v1971_v45, %v6862_v21  ;;  %v6823_v35 = vunpack.i.h.bf16 %v12930_v36  ;;  %v12931_v21 = vld [vmem:[#allocation66_spill] sm:$0xff] }
 0x201   : > { %v9586_v39 = vpop.permute.xlu0 %7030  ;;  %v2037_v15 = vsel %vm2010_vm8, %v2004_v4, %v6942_v8  ;;  %v6822_v55 = vunpack.i.l.bf16 %v12930_v36  ;;  %v6803_v4 = vunpack.i.h.bf16 %v12929_v6  ;;  %v12934_v6 = vld [vmem:[#allocation78_spill] sm:$0xff]  ;;  %v7043_v36 = vunpack.i.h.bf16 %v9441_v11 }
 0x203   : > { %v9598_v3 = vpop.permute.xlu2 %7085 }
 0x207   : > { %v7036_v42 = vpop.permute.xlu1 %7035 }
 0x208   : > { %v7038_v48 = vunpack.i.h.bf16 %v7036_v42  ;;  %v7037_v1 = vunpack.i.l.bf16 %v7036_v42  ;;  %v2005_v42 = vsel %vm1977_vm7, %v1972_v61, %v6863_v60  ;;  %v6903_v60 = vunpack.i.h.bf16 %v12931_v21 }
 0x209   : > { %v9620_v56 = vpop.permute.xlu0 %7045  ;;  %v2038_v47 = vsel %vm2010_vm8, %v2005_v42, %v6943_v46 }
 0x20a   : > { %v2077_v54 = vsel %vm2076_vm10, %v2044_v57, %v7037_v1  ;;  %v2078_v29 = vsel %vm2076_vm10, %v2045_v52, %v7038_v48  ;;  %v2070_v48 = vsel %vm2043_vm9, %v2037_v15, %v7022_v50  ;;  %v2071_v45 = vsel %vm2043_vm9, %v2038_v47, %v7023_v7  ;;  %v12932_v52 = vld [vmem:[#allocation71_spill] sm:$0xff] }
 0x20b   : > { %v2109_v20 = vpack.c.bf16 %v2078_v29, %v2077_v54  ;;  %v7101_v10 = vpop.permute.xlu2 %7100  ;;  %v6902_v1 = vunpack.i.l.bf16 %v12931_v21  ;;  %v1947_v57 = vsel %vm1944_vm6, %v9546_v37, %v6722_v44  ;;  %v6983_v61 = vunpack.i.h.bf16 %v12932_v52  ;;  %v12935_v21 = vld [vmem:[#allocation53_spill] sm:$0xff] }
 0x20c   : > { %v7103_v12 = vunpack.i.h.bf16 %v7101_v10  ;;  %v7102_v43 = vunpack.i.l.bf16 %v7101_v10  ;;  %v6982_v54 = vunpack.i.l.bf16 %v12932_v52  ;;  %v1961_v7 = vsel %vm1944_vm6, %v9569_v18, %v6757_v62 }
 0x20d   : > { %6350 = vmatmul.msk.bf16.vlgmr.msra.gmra.mxu0 %vm2149_vm11, %v2109_v20  ;;  %v1948_v50 = vsel %vm1944_vm6, %v9553_v14, %v6723_v38  ;;  %v1980_v42 = vsel %vm1977_vm7, %v1947_v57, %v6802_v22  ;;  %v1988_v37 = vsel %vm1977_vm7, %v9581_v9, %v6822_v55  ;;  %v1989_v44 = vsel %vm1977_vm7, %v9584_v32, %v6823_v35  ;;  %v12933_v20 = vld [vmem:[#allocation62_spill] sm:$0xff] }
 0x20e   : > { %v2103_v8 = vsel %vm2076_vm10, %v2070_v48, %v7102_v43  ;;  %v2104_v46 = vsel %vm2076_vm10, %v2071_v45, %v7103_v12  ;;  %v6883_v10 = vunpack.i.h.bf16 %v12933_v20  ;;  %v6882_v47 = vunpack.i.l.bf16 %v12933_v20  ;;  %v12938_v20 = vld [vmem:[#allocation34_spill] sm:$0xff] }
 0x20f   : > { %v9645_v29 = vpop.permute.xlu1 %7050  ;;  %v2122_v15 = vpack.c.bf16 %v2104_v46, %v2103_v8  ;;  %v2021_v18 = vsel %vm2010_vm8, %v1988_v37, %v6902_v1  ;;  %v2022_v14 = vsel %vm2010_vm8, %v1989_v44, %v6903_v60  ;;  %v6963_v22 = vunpack.i.h.bf16 %v12934_v6 }
 0x210   : > { %v6962_v9 = vunpack.i.l.bf16 %v12934_v6  ;;  %v2054_v43 = vsel %vm2043_vm9, %v2021_v18, %v6982_v54  ;;  %v2055_v32 = vsel %vm2043_vm9, %v2022_v14, %v6983_v61  ;;  %v7042_v35 = vunpack.i.l.bf16 %v9441_v11  ;;  %v12936_v11 = vld [vmem:[#allocation69_spill] sm:$0xff]  ;;  %v12937_v54 = vld [vmem:[#allocation74_spill] sm:$0xff]  ;;  %v12939_v14 = vld [vmem:[#allocation35_spill] sm:$0xff] }
 0x211   : > { %v7061_v12 = vpop.permute.xlu0 %7060  ;;  %6363 = vmatmul.msk.bf16.vlgmr.msra.gmra.mxu3 %vm2149_vm11, %v2122_v15  ;;  %v1981_v45 = vsel %vm1977_vm7, %v1948_v50, %v6803_v4  ;;  %v6838_v60 = vunpack.i.h.bf16 %v12935_v21  ;;  %v6837_v1 = vunpack.i.l.bf16 %v12935_v21  ;;  %v2013_v46 = vsel %vm2010_vm8, %v1980_v42, %v6882_v47 }
 0x212   : > { %v7063_v62 = vunpack.i.h.bf16 %v7061_v12  ;;  %v7062_v38 = vunpack.i.l.bf16 %v7061_v12  ;;  %v2014_v57 = vsel %vm2010_vm8, %v1981_v45, %v6883_v10  ;;  %v6918_v52 = vunpack.i.h.bf16 %v12936_v11  ;;  %v12940_v45 = vld [vmem:[#allocation48_spill] sm:$0xff] }
 0x213   : > { %v6917_v61 = vunpack.i.l.bf16 %v12936_v11  ;;  %v6998_v15 = vunpack.i.h.bf16 %v12937_v54  ;;  %v6997_v37 = vunpack.i.l.bf16 %v12937_v54  ;;  %v2046_v4 = vsel %vm2043_vm9, %v2013_v46, %v6962_v9  ;;  %v12942_v54 = vld [vmem:[#allocation72_spill] sm:$0xff] }
 0x214   : > { %v9669_v55 = vsel %vm2076_vm10, %v2054_v43, %v7062_v38  ;;  %v9672_v48 = vsel %vm2076_vm10, %v2055_v32, %v7063_v62  ;;  %v2047_v44 = vsel %vm2043_vm9, %v2014_v57, %v6963_v22  ;;  %v6708_v12 = vunpack.i.h.bf16 %v12938_v20  ;;  %v12941_v57 = vld [vmem:[#allocation56_spill] sm:$0xff] }
 0x215   : > { %v2114_v8 = vpack.c.bf16 %v9672_v48, %v9669_v55  ;;  %v1962_v42 = vsel %vm1944_vm6, %v9577_v16, %v6758_v30  ;;  %v2079_v10 = vsel %vm2076_vm10, %v2046_v4, %v7042_v35  ;;  %v2080_v47 = vsel %vm2076_vm10, %v2047_v44, %v7043_v36  ;;  %v12969_v48 = vld [vmem:[#allocation52_spill] sm:$0xff] }
 0x216   : > { %v6707_v18 = vunpack.i.l.bf16 %v12938_v20  ;;  %v6773_v62 = vunpack.i.h.bf16 %v12939_v14  ;;  %v1994_v38 = vsel %vm1977_vm7, %v1961_v7, %v6837_v1  ;;  %v1995_v6 = vsel %vm1977_vm7, %v1962_v42, %v6838_v60  ;;  %v12944_v42 = vld [vmem:[#allocation38_spill] sm:$0xff] }
 0x217   : > { %v9685_v50 = vpop.permute.xlu1 %7065  ;;  %v2027_v9 = vsel %vm2010_vm8, %v1994_v38, %v6917_v61  ;;  %v2028_v59 = vsel %vm2010_vm8, %v1995_v6, %v6918_v52  ;;  %v6772_v16 = vunpack.i.l.bf16 %v12939_v14  ;;  %v2110_v30 = vpack.c.bf16 %v2080_v47, %v2079_v10  ;;  %v12945_v14 = vld [vmem:[#allocation64_spill] sm:$0xff] }
 0x218   : > { %v2060_v36 = vsel %vm2043_vm9, %v2027_v9, %v6997_v37  ;;  %v2061_v35 = vsel %vm2043_vm9, %v2028_v59, %v6998_v15  ;;  %v1934_v7 = vsel %vm1911_vm5, %v9528_v25, %v6692_v13  ;;  %v6807_v21 = vunpack.i.l.bf16 %v12940_v45  ;;  %v12943_v37 = vld [vmem:[#allocation77_spill] sm:$0xff] }
 0x219   : > { %v7076_v22 = vpop.permute.xlu0 %7075  ;;  %v1935_v46 = vsel %vm1911_vm5, %v9524_v24, %v6693_v2  ;;  %v6853_v11 = vunpack.i.h.bf16 %v12941_v57  ;;  %v6852_v52 = vunpack.i.l.bf16 %v12941_v57  ;;  %v1940_v13 = vsel %vm1911_vm5, %v9540_v40, %v6707_v18  ;;  %v12947_v57 = vld [vmem:[#allocation59_spill] sm:$0xff] }
 0x21a   : > { %v7078_v43 = vunpack.i.h.bf16 %v7076_v22  ;;  %v7077_v32 = vunpack.i.l.bf16 %v7076_v22  ;;  %v1941_v61 = vsel %vm1911_vm5, %v9536_v41, %v6708_v12  ;;  %v6933_v49 = vunpack.i.h.bf16 %v12942_v54 }
 0x21b   : > { %v6932_v15 = vunpack.i.l.bf16 %v12942_v54  ;;  %v1967_v24 = vsel %vm1944_vm6, %v1934_v7, %v6772_v16  ;;  %v1968_v2 = vsel %vm1944_vm6, %v1935_v46, %v6773_v62  ;;  %v7013_v4 = vunpack.i.h.bf16 %v12943_v37 }
 0x21c   : > { %v9711_v60 = vsel %vm2076_vm10, %v2060_v36, %v7077_v32  ;;  %v9714_v1 = vsel %vm2076_vm10, %v2061_v35, %v7078_v43  ;;  %v7012_v44 = vunpack.i.l.bf16 %v12943_v37  ;;  %v6788_v10 = vunpack.i.h.bf16 %v12944_v42  ;;  %v12946_v32 = vld [vmem:[#allocation68_spill] sm:$0xff] }
 0x21d   : > { %6351 = vmatmul.msk.bf16.gmra.mxu0 %vm2149_vm11, %v2110_v30  ;;  %v2117_v25 = vpack.c.bf16 %v9714_v1, %v9711_v60  ;;  %v6787_v40 = vunpack.i.l.bf16 %v12944_v42  ;;  %v6808_v41 = vunpack.i.h.bf16 %v12940_v45  ;;  %v1982_v12 = vsel %vm1977_vm7, %v9562_v27, %v6807_v21  ;;  %v12949_v37 = vld [vmem:[#allocation80_spill] sm:$0xff]  ;;  %v12982_v1 = vld [vmem:[#allocation42_spill] sm:$0xff] }
 0x21e   : > { %v2000_v47 = vsel %vm1977_vm7, %v1967_v24, %v6852_v52  ;;  %v2001_v18 = vsel %vm1977_vm7, %v1968_v2, %v6853_v11  ;;  %v6888_v62 = vunpack.i.h.bf16 %v12945_v14  ;;  %v6887_v38 = vunpack.i.l.bf16 %v12945_v14 }
 0x21f   : > { %v9735_v20 = vpop.permute.xlu1 %7080  ;;  %v2033_v22 = vsel %vm2010_vm8, %v2000_v47, %v6932_v15  ;;  %v2034_v9 = vsel %vm2010_vm8, %v2001_v18, %v6933_v49  ;;  %v6968_v16 = vunpack.i.h.bf16 %v12946_v32  ;;  %v6967_v30 = vunpack.i.l.bf16 %v12946_v32  ;;  %v12948_v15 = vld [vmem:[#allocation75_spill] sm:$0xff] }
 0x220   : > { %v2066_v27 = vsel %vm2043_vm9, %v2033_v22, %v7012_v44  ;;  %v2067_v36 = vsel %vm2043_vm9, %v2034_v9, %v7013_v4  ;;  %v7048_v35 = vunpack.i.h.bf16 %v9620_v56  ;;  %v7047_v7 = vunpack.i.l.bf16 %v9620_v56 }
 0x221   : > { %v7091_v6 = vpop.permute.xlu0 %7090  ;;  %v1983_v46 = vsel %vm1977_vm7, %v9572_v53, %v6808_v41  ;;  %v6868_v11 = vunpack.i.h.bf16 %v12947_v57  ;;  %v6867_v52 = vunpack.i.l.bf16 %v12947_v57  ;;  %v2015_v49 = vsel %vm2010_vm8, %v1982_v12, %v6887_v38  ;;  %v8403_v57 = vld [vmem:[#allocation2 + $0x48] sm:$0xff] }
 0x222   : > { %v7093_v59 = vunpack.i.h.bf16 %v7091_v6  ;;  %v7092_v43 = vunpack.i.l.bf16 %v7091_v6  ;;  %v2016_v56 = vsel %vm2010_vm8, %v1983_v46, %v6888_v62  ;;  %v6948_v24 = vunpack.i.h.bf16 %v12948_v15  ;;  %v12950_v62 = vld [vmem:[#allocation29_spill] sm:$0xff] }
 0x223   : > { %v6947_v2 = vunpack.i.l.bf16 %v12948_v15  ;;  %v7028_v4 = vunpack.i.h.bf16 %v12949_v37  ;;  %v7027_v44 = vunpack.i.l.bf16 %v12949_v37  ;;  %v2048_v53 = vsel %vm2043_vm9, %v2015_v49, %v6967_v30  ;;  %v8404_v37 = vld [vmem:[#allocation2 + $0x170] sm:$0xff] }
 0x224   : > { %v9755_v45 = vsel %vm2076_vm10, %v2066_v27, %v7092_v43  ;;  %v9758_v21 = vsel %vm2076_vm10, %v2067_v36, %v7093_v59  ;;  %v2049_v42 = vsel %vm2043_vm9, %v2016_v56, %v6968_v16  ;;  %v1973_v41 = vsel %vm1944_vm6, %v1940_v13, %v6787_v40  ;;  %v12951_v27 = vld [vmem:[#allocation31_spill] sm:$0xff]  ;;  %v12954_v56 = vld [vmem:[#allocation37_spill] sm:$0xff] }
 0x225   : > { %v2120_v54 = vpack.c.bf16 %v9758_v21, %v9755_v45  ;;  %v1974_v47 = vsel %vm1944_vm6, %v1941_v61, %v6788_v10  ;;  %v2081_v12 = vsel %vm2076_vm10, %v2048_v53, %v7047_v7  ;;  %v2082_v18 = vsel %vm2076_vm10, %v2049_v42, %v7048_v35 }
 0x226   : > { %v6652_v14 = vunpack.i.l.bf16 %v9088_v23  ;;  %v6633_v38 = vunpack.i.h.bf16 %v12950_v62  ;;  %v2006_v6 = vsel %vm1977_vm7, %v1973_v41, %v6867_v52  ;;  %v2007_v22 = vsel %vm1977_vm7, %v1974_v47, %v6868_v11  ;;  %v12952_v11 = vld [vmem:[#allocation16_spill] sm:$0xff]  ;;  %v12956_v41 = vld [vmem:[#allocation46_spill] sm:$0xff] }
 0x227   : > { %v9782_v9 = vpop.permute.xlu1 %7095  ;;  %v2039_v43 = vsel %vm2010_vm8, %v2006_v6, %v6947_v2  ;;  %v2040_v13 = vsel %vm2010_vm8, %v2007_v22, %v6948_v24  ;;  %v6632_v40 = vunpack.i.l.bf16 %v12950_v62  ;;  %v2111_v32 = vpack.c.bf16 %v2082_v18, %v2081_v12  ;;  %v12958_v6 = vld [vmem:[#allocation11_spill] sm:$0xff] }
 0x228   : > { %v2072_v16 = vsel %vm2043_vm9, %v2039_v43, %v7027_v44  ;;  %v2073_v30 = vsel %vm2043_vm9, %v2040_v13, %v7028_v4  ;;  %v6713_v36 = vunpack.i.h.bf16 %v12951_v27  ;;  %v6712_v35 = vunpack.i.l.bf16 %v12951_v27  ;;  %v8405_v44 = vld [vmem:[#allocation2 + $0x168] sm:$0xff] }
 0x229   : > { %v7106_v59 = vpop.permute.xlu0 %7105  ;;  %v12953_v52 = vunpack.i.l.bf16 %v12952_v11  ;;  %v6733_v15 = vunpack.i.h.bf16 %v12954_v56  ;;  %v6732_v24 = vunpack.i.l.bf16 %v12954_v56  ;;  %v1878_v4 = vsel %vm334_vm0, %v8404_v37, %v6553_v5  ;;  %v12963_v11 = vld [vmem:[#allocation65_spill] sm:$0xff] }
 0x22a   : > { %v7108_v61 = vunpack.i.h.bf16 %v7106_v59  ;;  %v7107_v10 = vunpack.i.l.bf16 %v7106_v59  ;;  %v12955_v53 = vunpack.i.l.bf16 %v9046_v33  ;;  %v6793_v47 = vunpack.i.h.bf16 %v12956_v41 }
 0x22b   : > { %v1853_v49 = vsel %vm334_vm0, %v8403_v57, %v12953_v52  ;;  %v6792_v12 = vunpack.i.l.bf16 %v12956_v41  ;;  %v12957_v62 = vunpack.i.h.bf16 %v9068_v63  ;;  %v1910_v59 = vsel %vm380_vm3, %v1878_v4, %v6633_v38 }
 0x22c   : > { %v2105_v7 = vsel %vm2076_vm10, %v2072_v16, %v7107_v10  ;;  %v2106_v46 = vsel %vm2076_vm10, %v2073_v30, %v7108_v61  ;;  %v1877_v42 = vsel %vm334_vm0, %v8405_v44, %v12955_v53  ;;  %v1885_v18 = vsel %vm380_vm3, %v1853_v49, %v6572_v34  ;;  %v12959_v10 = vld [vmem:[#allocation50_spill] sm:$0xff]  ;;  %v12961_v30 = vld [vmem:[#allocation61_spill] sm:$0xff] }
 0x22d   : > { %6352 = vmatmul.msk.bf16.gmra.mxu0 %vm2149_vm11, %v2111_v32  ;;  %v2123_v2 = vpack.c.bf16 %v2106_v46, %v2105_v7  ;;  %v1886_v22 = vsel %vm380_vm3, %v12958_v6, %v12957_v62  ;;  %v1909_v5 = vsel %vm380_vm3, %v1877_v42, %v6632_v40  ;;  %v1918_v43 = vsel %vm1911_vm5, %v1885_v18, %v6652_v14  ;;  %v12960_v16 = vld [vmem:[#allocation54_spill] sm:$0xff] }
 0x22e   : > { %v1919_v33 = vsel %vm1911_vm5, %v1886_v22, %v6653_v19  ;;  %v1942_v13 = vsel %vm1911_vm5, %v1909_v5, %v6712_v35  ;;  %v1943_v34 = vsel %vm1911_vm5, %v1910_v59, %v6713_v36  ;;  %v1951_v61 = vsel %vm1944_vm6, %v1918_v43, %v6732_v24  ;;  %v12962_v35 = vld [vmem:[#allocation79_spill] sm:$0xff] }
 0x22f   : > { %6364 = vmatmul.msk.bf16.gmra.mxu3 %vm2149_vm11, %v2123_v2  ;;  %v1952_v63 = vsel %vm1944_vm6, %v1919_v33, %v6733_v15  ;;  %v6813_v40 = vunpack.i.h.bf16 %v12959_v10  ;;  %v6812_v38 = vunpack.i.l.bf16 %v12959_v10  ;;  %v1975_v32 = vsel %vm1944_vm6, %v1942_v13, %v6792_v12  ;;  %v7111_v57 = vpop.permute.xlu1 %7110 }
 0x230   : > { %v1976_v23 = vsel %vm1944_vm6, %v1943_v34, %v6793_v47  ;;  %v6893_v19 = vunpack.i.h.bf16 %v12960_v16  ;;  %v6892_v14 = vunpack.i.l.bf16 %v12960_v16  ;;  %v6873_v27 = vunpack.i.h.bf16 %v12961_v30  ;;  %v12967_v16 = vld [vmem:[#allocation26_spill] sm:$0xff] }
 0x231   : > { %v6872_v36 = vunpack.i.l.bf16 %v12961_v30  ;;  %v6973_v7 = vunpack.i.h.bf16 %v12962_v35  ;;  %v6972_v46 = vunpack.i.l.bf16 %v12962_v35  ;;  %v6953_v52 = vunpack.i.h.bf16 %v12963_v11  ;;  %v8407_v35 = vld [vmem:[#allocation2 + $0x90] sm:$0xff] }
 0x232   : > { %v6952_v49 = vunpack.i.l.bf16 %v12963_v11  ;;  %v7053_v56 = vunpack.i.h.bf16 %v9645_v29  ;;  %v7052_v15 = vunpack.i.l.bf16 %v9645_v29  ;;  %v1984_v24 = vsel %vm1977_vm7, %v1951_v61, %v6812_v38  ;;  %v12965_v61 = vld [vmem:[#allocation17_spill] sm:$0xff]  ;;  %v12966_v38 = vld [vmem:[#allocation24_spill] sm:$0xff] }
 0x233   : > { %v1985_v2 = vsel %vm1977_vm7, %v1952_v63, %v6813_v40  ;;  %v7033_v37 = vunpack.i.h.bf16 %v9586_v39  ;;  %v7032_v4 = vunpack.i.l.bf16 %v9586_v39  ;;  %v2017_v44 = vsel %vm2010_vm8, %v1984_v24, %v6892_v14  ;;  %v12970_v11 = vld [vmem:[#allocation57_spill] sm:$0xff]  ;;  %v12971_v24 = vld [vmem:[#allocation10_spill] sm:$0xff] }
 0x234   : > { %v2018_v53 = vsel %vm2010_vm8, %v1985_v2, %v6893_v19  ;;  %v7113_v42 = vunpack.i.h.bf16 %v7111_v57  ;;  %v7112_v41 = vunpack.i.l.bf16 %v7111_v57  ;;  %v2008_v47 = vsel %vm1977_vm7, %v1975_v32, %v6872_v36 }
 0x235   : > { %v2009_v12 = vsel %vm1977_vm7, %v1976_v23, %v6873_v27  ;;  %v2050_v29 = vsel %vm2043_vm9, %v2017_v44, %v6972_v46  ;;  %v2051_v18 = vsel %vm2043_vm9, %v2018_v53, %v6973_v7  ;;  %v2041_v62 = vsel %vm2010_vm8, %v2008_v47, %v6952_v49  ;;  %v8406_v27 = vld [vmem:[#allocation2 + $0x98] sm:$0xff] }
 0x236   : > { %v2042_v6 = vsel %vm2010_vm8, %v2009_v12, %v6953_v52  ;;  %v2083_v39 = vsel %vm2076_vm10, %v2050_v29, %v7052_v15  ;;  %v2084_v22 = vsel %vm2076_vm10, %v2051_v18, %v7053_v56  ;;  %v2074_v5 = vsel %vm2043_vm9, %v2041_v62, %v7032_v4 }
 0x237   : > { %v2075_v59 = vsel %vm2043_vm9, %v2042_v6, %v7033_v37  ;;  %v2107_v33 = vsel %vm2076_vm10, %v2074_v5, %v7112_v41  ;;  %v2112_v13 = vpack.c.bf16 %v2084_v22, %v2083_v39  ;;  %v12964_v63 = vpack.c.bf16 %v9496_v31, %v9493_v26  ;;  %v12968_v26 = vld [vmem:[#allocation39_spill] sm:$0xff]  ;;  %v12972_v5 = vld [vmem:[#allocation18_spill] sm:$0xff] }
 0x238   : > { %v2108_v43 = vsel %vm2076_vm10, %v2075_v59, %v7113_v42  ;;  %v6508_v10 = vunpack.i.h.bf16 %v12965_v61  ;;  %v6507_v40 = vunpack.i.l.bf16 %v12965_v61  ;;  %v6588_v32 = vunpack.i.h.bf16 %v12966_v38 }
 0x239   : > { %v2124_v34 = vpack.c.bf16 %v2108_v43, %v2107_v33  ;;  %v6587_v23 = vunpack.i.l.bf16 %v12966_v38  ;;  %v6668_v19 = vunpack.i.h.bf16 %v12967_v16  ;;  %v6667_v14 = vunpack.i.l.bf16 %v12967_v16  ;;  %v12973_v33 = vld [vmem:[#allocation22_spill] sm:$0xff] }
 0x23a   : > { %v6748_v31 = vunpack.i.h.bf16 %v12968_v26  ;;  %v6747_v30 = vunpack.i.l.bf16 %v12968_v26  ;;  %v1860_v36 = vsel %vm334_vm0, %v8406_v27, %v6508_v10  ;;  %v1859_v55 = vsel %vm334_vm0, %v8407_v35, %v6507_v40  ;;  %v12975_v10 = vld [vmem:[#allocation41_spill] sm:$0xff]  ;;  %v12978_v35 = vld [vmem:[#allocation67_spill] sm:$0xff] }
 0x23b   : > { %v6827_v7 = vunpack.i.l.bf16 %v12969_v48  ;;  %v1891_v46 = vsel %vm380_vm3, %v1859_v55, %v6587_v23  ;;  %v1892_v57 = vsel %vm380_vm3, %v1860_v36, %v6588_v32  ;;  %v6908_v52 = vunpack.i.h.bf16 %v12970_v11  ;;  %v8408_v23 = vld [vmem:[#allocation2 + $0xb0] sm:$0xff] }
 0x23c   : > { %v6907_v49 = vunpack.i.l.bf16 %v12970_v11  ;;  %v1924_v56 = vsel %vm1911_vm5, %v1891_v46, %v6667_v14  ;;  %v1925_v15 = vsel %vm1911_vm5, %v1892_v57, %v6668_v19  ;;  %v6988_v2 = vunpack.i.h.bf16 %v12971_v24  ;;  %v8409_v19 = vld [vmem:[#allocation2 + $0xa8] sm:$0xff]  ;;  %v12977_v26 = vld [vmem:[#allocation45_spill] sm:$0xff] }
 0x23d   : > { %6353 = vmatmul.msk.bf16.gmra.mxu0 %vm2149_vm11, %v2112_v13  ;;  %v6987_v37 = vunpack.i.l.bf16 %v12971_v24  ;;  %v1957_v4 = vsel %vm1944_vm6, %v1924_v56, %v6747_v30  ;;  %v1958_v44 = vsel %vm1944_vm6, %v1925_v15, %v6748_v31  ;;  %v7068_v53 = vunpack.i.h.bf16 %v9685_v50 }
 0x23e   : > { %v7067_v42 = vunpack.i.l.bf16 %v9685_v50  ;;  %v1990_v41 = vsel %vm1977_vm7, %v1957_v4, %v6827_v7  ;;  %v6513_v59 = vunpack.i.h.bf16 %v12972_v5  ;;  %v6512_v50 = vunpack.i.l.bf16 %v12972_v5  ;;  %v12981_v5 = vld [vmem:[#allocation28_spill] sm:$0xff] }
 0x23f   : > { %6365 = vmatmul.msk.bf16.gmra.mxu3 %vm2149_vm11, %v2124_v34  ;;  %v2023_v12 = vsel %vm2010_vm8, %v1990_v41, %v6907_v49  ;;  %v6593_v43 = vunpack.i.h.bf16 %v12973_v33  ;;  %v6592_v13 = vunpack.i.l.bf16 %v12973_v33  ;;  %v12974_v34 = vld [vmem:[#allocation32_spill] sm:$0xff]  ;;  %v6753_v40 = vunpack.i.h.bf16 %v12975_v10  ;;  %v8410_v33 = vld [vmem:[#allocation2 + $0xd8] sm:$0xff] }
 0x240   : > { %v2056_v18 = vsel %vm2043_vm9, %v2023_v12, %v6987_v37  ;;  %v6672_v61 = vunpack.i.l.bf16 %v12974_v34  ;;  %v6752_v38 = vunpack.i.l.bf16 %v12975_v10  ;;  %v12976_v32 = vmov 0.0   ;;  %v12979_v12 = vld [vmem:[#allocation19_spill] sm:$0xff] }
 0x241   : > { %v2089_v6 = vsel %vm2076_vm10, %v2056_v18, %v7067_v42  ;;  %390 = vst.msk [vmem:[#allocation3] sm:$0x1] %vm389_vm12, %v12976_v32  ;;  %v1862_v16 = vsel %vm334_vm0, %v8408_v23, %v6513_v59  ;;  %v1861_v14 = vsel %vm334_vm0, %v8409_v19, %v6512_v50  ;;  %v6833_v31 = vunpack.i.h.bf16 %v12977_v26  ;;  %v9982_v42 = vld [vmem:[%s12676_s2] ss:$0 sm:$0xff] }
 0x242   : > { %v6832_v30 = vunpack.i.l.bf16 %v12977_v26  ;;  %391 = vst.msk [vmem:[#allocation3 + $0x18] sm:$0x1] %vm389_vm12, %v12976_v32  ;;  %v1894_v27 = vsel %vm380_vm3, %v1862_v16, %v6593_v43  ;;  %v1893_v36 = vsel %vm380_vm3, %v1861_v14, %v6592_v13  ;;  %v6913_v55 = vunpack.i.h.bf16 %v12978_v35  ;;  %v8411_v13 = vld [vmem:[#allocation2 + $0xe0] sm:$0xff]  ;;  %v12984_v16 = vld [vmem:[#allocation60_spill] sm:$0xff] }
 0x243   : > { %392 = vst.msk [vmem:[#allocation3 + $0x30] sm:$0x1] %vm389_vm12, %v12976_v32  ;;  %v1926_v7 = vsel %vm1911_vm5, %v1893_v36, %v6672_v61  ;;  %v6993_v46 = vunpack.i.h.bf16 %v9468_v28  ;;  %v6992_v57 = vunpack.i.l.bf16 %v9468_v28  ;;  %v7073_v49 = vunpack.i.h.bf16 %v9532_v58  ;;  %v12983_v61 = vld [vmem:[#allocation55_spill] sm:$0xff] }
 0x244   : > { %393 = vst.msk [vmem:[#allocation3 + $0x48] sm:$0x1] %vm389_vm12, %v12976_v32  ;;  %v1959_v11 = vsel %vm1944_vm6, %v1926_v7, %v6752_v38  ;;  %v7072_v56 = vunpack.i.l.bf16 %v9532_v58  ;;  %v6523_v18 = vunpack.i.h.bf16 %v12979_v12  ;;  %v6682_v59 = vunpack.i.l.bf16 %v12981_v5 }
 0x245   : > { %394 = vst.msk [vmem:[#allocation3 + $0x60] sm:$0x1] %vm389_vm12, %v12976_v32  ;;  %v1992_v15 = vsel %vm1977_vm7, %v1959_v11, %v6832_v30  ;;  %v6683_v50 = vunpack.i.h.bf16 %v12981_v5  ;;  %v6762_v43 = vunpack.i.l.bf16 %v12982_v1  ;;  %v6843_v10 = vunpack.i.h.bf16 %v12983_v61 }
 0x246   : > { %395 = vst.msk [vmem:[#allocation3 + $0x78] sm:$0x1] %vm389_vm12, %v12976_v32  ;;  %v6923_v19 = vunpack.i.h.bf16 %v12984_v16  ;;  %v6922_v14 = vunpack.i.l.bf16 %v12984_v16  ;;  %v7003_v30 = vunpack.i.h.bf16 %v9477_v0 }
 0x247   : > { %396 = vst.msk [vmem:[#allocation3 + $0x90] sm:$0x1] %vm389_vm12, %v12976_v32 }
 0x248   : > { %397 = vst.msk [vmem:[#allocation3 + $0xa8] sm:$0x1] %vm389_vm12, %v12976_v32 }
 0x249   : > { %398 = vst.msk [vmem:[#allocation3 + $0xc0] sm:$0x1] %vm389_vm12, %v12976_v32 }
 0x24a   : > { %399 = vst.msk [vmem:[#allocation3 + $0xd8] sm:$0x1] %vm389_vm12, %v12976_v32 }
 0x24b   : > { %400 = vst.msk [vmem:[#allocation3 + $0xf0] sm:$0x1] %vm389_vm12, %v12976_v32 }
 0x24c   : > { %401 = vst.msk [vmem:[#allocation3 + $0x108] sm:$0x1] %vm389_vm12, %v12976_v32 }
 0x24d   : > { %6354 = vmatmul.msk.bf16.gmra.mxu0 %vm2149_vm11, %v12964_v63  ;;  %v6673_v63 = vunpack.i.h.bf16 %v12974_v34  ;;  %402 = vst.msk [vmem:[#allocation3 + $0x120] sm:$0x1] %vm389_vm12, %v12976_v32  ;;  %v1866_v34 = vsel %vm334_vm0, %v8411_v13, %v6523_v18  ;;  %v12988_v13 = vld [vmem:[#allocation43_spill] sm:$0xff] }
 0x24e   : > { %403 = vst.msk [vmem:[#allocation3 + $0x138] sm:$0x1] %vm389_vm12, %v12976_v32 }
 0x24f   : > { %404 = vst.msk [vmem:[#allocation3 + $0x150] sm:$0x1] %vm389_vm12, %v12976_v32 }
 0x250   : > { %405 = vst.msk [vmem:[#allocation3 + $0x168] sm:$0x1] %vm389_vm12, %v12976_v32 }
 0x251   : > { %406 = vst.msk [vmem:[#allocation3 + $0x180] sm:$0x1] %vm389_vm12, %v12976_v32 }
 0x252   : > { %407 = vst.msk [vmem:[#allocation3 + $0x198] sm:$0x1] %vm389_vm12, %v12976_v32 }
 0x253   : > { %409 = vst.msk [vmem:[#allocation3 + $0x29] sm:$0x1] %vm389_vm12, %v12976_v32 }
 0x254   : > { %410 = vst.msk [vmem:[#allocation3 + $0x41] sm:$0x1] %vm389_vm12, %v12976_v32 }
 0x255   : > { %411 = vst.msk [vmem:[#allocation3 + $0x59] sm:$0x1] %vm389_vm12, %v12976_v32 }
 0x256   : > { %412 = vst.msk [vmem:[#allocation3 + $0x71] sm:$0x1] %vm389_vm12, %v12976_v32 }
 0x257   : > { %413 = vst.msk [vmem:[#allocation3 + $0x89] sm:$0x1] %vm389_vm12, %v12976_v32 }
 0x258   : > { %414 = vst.msk [vmem:[#allocation3 + $0xa1] sm:$0x1] %vm389_vm12, %v12976_v32 }
 0x259   : > { %415 = vst.msk [vmem:[#allocation3 + $0xb9] sm:$0x1] %vm389_vm12, %v12976_v32 }
 0x25a   : > { %416 = vst.msk [vmem:[#allocation3 + $0xd1] sm:$0x1] %vm389_vm12, %v12976_v32 }
 0x25b   : > { %417 = vst.msk [vmem:[#allocation3 + $0xe9] sm:$0x1] %vm389_vm12, %v12976_v32 }
 0x25c   : > { %418 = vst.msk [vmem:[#allocation3 + $0x101] sm:$0x1] %vm389_vm12, %v12976_v32 }
 0x25d   : > { %6355 = vmatmul.msk.bf16.gmra.mxu0 %vm2149_vm11, %v2114_v8  ;;  %v6828_v8 = vunpack.i.h.bf16 %v12969_v48  ;;  %v6912_v48 = vunpack.i.l.bf16 %v12978_v35  ;;  %419 = vst.msk [vmem:[#allocation3 + $0x119] sm:$0x1] %vm389_vm12, %v12976_v32 }
 0x25e   : > { %420 = vst.msk [vmem:[#allocation3 + $0x131] sm:$0x1] %vm389_vm12, %v12976_v32 }
 0x25f   : > { %v1991_v47 = vsel %vm1977_vm7, %v1958_v44, %v6828_v8  ;;  %v1927_v8 = vsel %vm1911_vm5, %v1894_v27, %v6673_v63  ;;  %v2025_v28 = vsel %vm2010_vm8, %v1992_v15, %v6912_v48  ;;  %421 = vst.msk [vmem:[#allocation3 + $0x149] sm:$0x1] %vm389_vm12, %v12976_v32  ;;  %v7002_v27 = vunpack.i.l.bf16 %v9477_v0 }
 0x260   : > { %v2024_v29 = vsel %vm2010_vm8, %v1991_v47, %v6908_v52  ;;  %v1960_v52 = vsel %vm1944_vm6, %v1927_v8, %v6753_v40  ;;  %v2058_v37 = vsel %vm2043_vm9, %v2025_v28, %v6992_v57  ;;  %384 = vst.msk [vmem:[#allocation3 + $0x10] sm:$0x3] %vm383_vm13, %v12976_v32  ;;  %v6842_v40 = vunpack.i.l.bf16 %v12983_v61  ;;  %v8413_v61 = vld [vmem:[#allocation2 + $0xf0] sm:$0xff] }
 0x261   : > { %v2057_v62 = vsel %vm2043_vm9, %v2024_v29, %v6988_v2  ;;  %v1993_v24 = vsel %vm1977_vm7, %v1960_v52, %v6833_v31  ;;  %v2091_v4 = vsel %vm2076_vm10, %v2058_v37, %v7072_v56  ;;  %v6522_v29 = vunpack.i.l.bf16 %v12979_v12  ;;  %388 = vst.msk [vmem:[#allocation3 + $0x1a8] sm:$0x3] %vm383_vm13, %v12976_v32 }
 0x262   : > { %v2090_v39 = vsel %vm2076_vm10, %v2057_v62, %v7068_v53  ;;  %v2026_v2 = vsel %vm2010_vm8, %v1993_v24, %v6913_v55  ;;  %v12980_v62 = vld [vmem:[#allocation25_spill] sm:$0xff]  ;;  %408 = vst.msk [vmem:[#allocation3 + $0x11] sm:$0x1] %vm389_vm12, %v12976_v32  ;;  %v7083_v48 = vunpack.i.h.bf16 %v9735_v20  ;;  %v7082_v8 = vunpack.i.l.bf16 %v9735_v20 }
 0x263   : > { %v2115_v22 = vpack.c.bf16 %v2090_v39, %v2089_v6  ;;  %v2059_v58 = vsel %vm2043_vm9, %v2026_v2, %v6993_v46  ;;  %v6602_v6 = vunpack.i.l.bf16 %v12980_v62  ;;  %v1865_v60 = vsel %vm334_vm0, %v8410_v33, %v6522_v29  ;;  %422 = vst.msk [vmem:[#allocation3 + $0x161] sm:$0x1] %vm389_vm12, %v12976_v32  ;;  %v2388_v24 = vld [vmem:[#allocation3 + $0x1] sm:$0xff]  ;;  %v12986_v29 = vld [vmem:[#allocation23_spill] sm:$0xff] }
 0x264   : > { %v2092_v44 = vsel %vm2076_vm10, %v2059_v58, %v7073_v49  ;;  %423 = vst.msk [vmem:[#allocation3 + $0x179] sm:$0x1] %vm389_vm12, %v12976_v32  ;;  %v6608_v18 = vunpack.i.h.bf16 %v12986_v29  ;;  %vm3985_vm13 = vcmask 588800  }
 0x265   : > { %v2116_v53 = vpack.c.bf16 %v2092_v44, %v2091_v4  ;;  %v1897_v63 = vsel %vm380_vm3, %v1865_v60, %v6602_v6  ;;  %424 = vst.msk [vmem:[#allocation3 + $0x191] sm:$0x1] %vm389_vm12, %v12976_v32 }
 0x266   : > { %v1930_v23 = vsel %vm1911_vm5, %v1897_v63, %v6682_v59  ;;  %425 = vst.msk [vmem:[#allocation3 + $0x1a9] sm:$0x1] %vm389_vm12, %v12976_v32  ;;  %v6767_v63 = vunpack.i.l.bf16 %v12988_v13  ;;  %vm3896_vm12 = vcmask 523264  }
 0x267   : > { %v1963_v35 = vsel %vm1944_vm6, %v1930_v23, %v6762_v43  ;;  %v2389_v28 = vld [vmem:[#allocation3 + $0x9] sm:$0xff] }
 0x268   : > { %v1996_v46 = vsel %vm1977_vm7, %v1963_v35, %v6842_v40  ;;  %v7114_v58 = vpack.i.bf16 %v2389_v28, %v2388_v24  ;;  %v7008_v35 = vunpack.i.h.bf16 %v9502_v17 }
 0x269   : > { %v2029_v52 = vsel %vm2010_vm8, %v1996_v46, %v6922_v14  ;;  %v7088_v46 = vunpack.i.h.bf16 %v9598_v3 }
 0x26a   : > { %v2062_v56 = vsel %vm2043_vm9, %v2029_v52, %v7002_v27  ;;  %7115 = vrot.lane.b32.xlu2 %v7114_v58, %s8434_s16 }
 0x26b   : > { %v2095_v2 = vsel %vm2076_vm10, %v2062_v56, %v7082_v8 }
 0x26d   : > { %6356 = vmatmul.msk.bf16.gmra.mxu0 %vm2149_vm11, %v2115_v22  ;;  %v6603_v22 = vunpack.i.h.bf16 %v12980_v62 }
 0x26f   : > { %v1898_v38 = vsel %vm380_vm3, %v1866_v34, %v6603_v22  ;;  %v12987_v22 = vld [vmem:[#allocation33_spill] sm:$0xff]  ;;  %v6768_v34 = vunpack.i.h.bf16 %v12988_v13  ;;  %v12993_v13 = vld [vmem:[#allocation30_spill] sm:$0xff] }
 0x270   : > { %v1931_v31 = vsel %vm1911_vm5, %v1898_v38, %v6683_v50  ;;  %v6688_v5 = vunpack.i.h.bf16 %v12987_v22  ;;  %v6687_v33 = vunpack.i.l.bf16 %v12987_v22  ;;  %v12989_v38 = vld [vmem:[#allocation47_spill] sm:$0xff]  ;;  %v12991_v22 = vld [vmem:[#allocation21_spill] sm:$0xff] }
 0x271   : > { %v6848_v23 = vunpack.i.h.bf16 %v12989_v38  ;;  %v6847_v16 = vunpack.i.l.bf16 %v12989_v38  ;;  %v8414_v38 = vld [vmem:[#allocation2 + $0x128] sm:$0xff] }
 0x27d   : > { %6357 = vmatmul.msk.bf16.gmra.mxu0 %vm2149_vm11, %v2116_v53  ;;  %v12985_v53 = vld [vmem:[#allocation20_spill] sm:$0xff] }
 0x27e   : > { %v6527_v12 = vunpack.i.l.bf16 %v12985_v53 }
 0x28a   : > { %v2211_v41 = vpop.f32.mrf.mxu0 }
 0x28b   : > { %v2212_v47 = vadd.f32 %v9982_v42, %v2211_v41  ;;  %v6528_v41 = vunpack.i.h.bf16 %v12985_v53 }
 0x28d   : > { %v2291_v39 = vmax.f32 %v2212_v47, 0.0  ;;  %6358 = vmatmul.msk.bf16.gmra.mxu0 %vm2149_vm11, %v2117_v25  ;;  %v6763_v25 = vunpack.i.h.bf16 %v12982_v1 }
 0x28f   : > { %2324 = vst.msk [vmem:[#allocation3 + $0x19] sm:$0xff] %vm380_vm3, %v2291_v39  ;;  %v1964_v55 = vsel %vm1944_vm6, %v1931_v31, %v6763_v25  ;;  %v6607_v39 = vunpack.i.l.bf16 %v12986_v29  ;;  %v8412_v25 = vld [vmem:[#allocation2 + $0xf8] sm:$0xff] }
 0x290   : > { %v1997_v0 = vsel %vm1977_vm7, %v1964_v55, %v6843_v10  ;;  %v1868_v43 = vsel %vm334_vm0, %v8412_v25, %v6528_v41  ;;  %v1867_v10 = vsel %vm334_vm0, %v8413_v61, %v6527_v12  ;;  %v7007_v55 = vunpack.i.l.bf16 %v9502_v17 }
 0x291   : > { %v2030_v49 = vsel %vm2010_vm8, %v1997_v0, %v6923_v19  ;;  %v1900_v40 = vsel %vm380_vm3, %v1868_v43, %v6608_v18  ;;  %v1899_v19 = vsel %vm380_vm3, %v1867_v10, %v6607_v39  ;;  %v7087_v0 = vunpack.i.l.bf16 %v9598_v3 }
 0x292   : > { %v2213_v26 = vpop.f32.mrf.mxu0  ;;  %v2063_v15 = vsel %vm2043_vm9, %v2030_v49, %v7003_v30  ;;  %v1933_v14 = vsel %vm1911_vm5, %v1900_v40, %v6688_v5  ;;  %v6538_v5 = vunpack.i.h.bf16 %v12991_v22 }
 0x293   : > { %v2214_v36 = vadd.f32 %v9982_v42, %v2213_v26  ;;  %v2096_v37 = vsel %vm2076_vm10, %v2063_v15, %v7083_v48  ;;  %v12990_v26 = vld [vmem:[#allocation70_spill] sm:$0xff] }
 0x294   : > { %v2276_v7 = vpop.f32.mrf.mxu3  ;;  %v2118_v44 = vpack.c.bf16 %v2096_v37, %v2095_v2  ;;  %v6928_v31 = vunpack.i.h.bf16 %v12990_v26  ;;  %v6927_v30 = vunpack.i.l.bf16 %v12990_v26 }
 0x295   : > { %v2292_v57 = vmax.f32 %v2214_v36, 0.0  ;;  %v2277_v11 = vadd.f32 %v9982_v42, %v2276_v7  ;;  %v1932_v36 = vsel %vm1911_vm5, %v1899_v19, %v6687_v33  ;;  %v1966_v7 = vsel %vm1944_vm6, %v1933_v14, %v6768_v34  ;;  %v12994_v14 = vld [vmem:[#allocation44_spill] sm:$0xff] }
 0x296   : > { %v2390_v59 = vld [vmem:[#allocation3 + $0x19] sm:$0xff]  ;;  %v1965_v8 = vsel %vm1944_vm6, %v1932_v36, %v6767_v63  ;;  %v6698_v34 = vunpack.i.h.bf16 %v12993_v13  ;;  %v6697_v63 = vunpack.i.l.bf16 %v12993_v13  ;;  %v6778_v45 = vunpack.i.h.bf16 %v12994_v14 }
 0x297   : > { %2325 = vst.msk [vmem:[#allocation3 + $0x21] sm:$0xff] %vm380_vm3, %v2292_v57  ;;  %v2317_v20 = vmax.f32 %v2277_v11, 0.0  ;;  %v1998_v57 = vsel %vm1977_vm7, %v1965_v8, %v6847_v16  ;;  %v1999_v11 = vsel %vm1977_vm7, %v1966_v7, %v6848_v23  ;;  %v1872_v23 = vsel %vm334_vm0, %v8414_v38, %v6538_v5  ;;  %v8415_v16 = vld [vmem:[#allocation2 + $0x120] sm:$0xff] }
 0x298   : > { %v2031_v49 = vsel %vm2010_vm8, %v1998_v57, %v6927_v30  ;;  %v6777_v21 = vunpack.i.l.bf16 %v12994_v14  ;;  %v7017_v57 = vunpack.i.l.bf16 %v9516_v51 }
 0x299   : > { %2350 = vst.msk [vmem:[#allocation3 + $0x151] sm:$0xff] %vm380_vm3, %v2317_v20  ;;  %v2032_v20 = vsel %vm2010_vm8, %v1999_v11, %v6928_v31  ;;  %v2064_v17 = vsel %vm2043_vm9, %v2031_v49, %v7007_v55  ;;  %v12995_v31 = vld [vmem:[#allocation58_spill] sm:$0xff]  ;;  %v12996_v55 = vld [vmem:[#allocation63_spill] sm:$0xff] }
 0x29a   : > { %v2216_v4 = vpop.f32.mrf.mxu0  ;;  %v2065_v56 = vsel %vm2043_vm9, %v2032_v20, %v7008_v35  ;;  %v2097_v15 = vsel %vm2076_vm10, %v2064_v17, %v7087_v0  ;;  %v6858_v30 = vunpack.i.h.bf16 %v12995_v31  ;;  %v6937_v8 = vunpack.i.l.bf16 %v12996_v55 }
 0x29b   : > { %v2217_v32 = vadd.f32 %v9982_v42, %v2216_v4  ;;  %v2098_v24 = vsel %vm2076_vm10, %v2065_v56, %v7088_v46  ;;  %v7018_v0 = vunpack.i.h.bf16 %v9516_v51  ;;  %v7098_v17 = vunpack.i.h.bf16 %v9782_v9 }
 0x29c   : > { %v2278_v47 = vpop.f32.mrf.mxu3  ;;  %v2119_v2 = vpack.c.bf16 %v2098_v24, %v2097_v15  ;;  %v7097_v56 = vunpack.i.l.bf16 %v9782_v9 }
 0x29d   : > { %v2293_v62 = vmax.f32 %v2217_v32, 0.0  ;;  %6359 = vmatmul.msk.bf16.gmra.mxu0 %vm2149_vm11, %v2118_v44  ;;  %v2279_v6 = vadd.f32 %v9982_v42, %v2278_v47 }
 0x29e   : > { %v2391_v50 = vld [vmem:[#allocation3 + $0x21] sm:$0xff] }
 0x29f   : > { %2326 = vst.msk [vmem:[#allocation3 + $0x31] sm:$0xff] %vm380_vm3, %v2293_v62  ;;  %v2318_v60 = vmax.f32 %v2279_v6, 0.0  ;;  %v10065_v1 = vpack.i.bf16 %v2391_v50, %v2390_v59  ;;  %v6537_v59 = vunpack.i.l.bf16 %v12991_v22  ;;  %v12992_v50 = vld [vmem:[#allocation27_spill] sm:$0xff] }
 0x2a0   : > { %v6618_v33 = vunpack.i.h.bf16 %v12992_v50 }
 0x2a1   : > { %2351 = vst.msk [vmem:[#allocation3 + $0x159] sm:$0xff] %vm380_vm3, %v2318_v60  ;;  %7120 = vrot.lane.b32.xlu0 %v10065_v1, %s8434_s16  ;;  %v6617_v60 = vunpack.i.l.bf16 %v12992_v50  ;;  %v1871_v19 = vsel %vm334_vm0, %v8415_v16, %v6537_v59 }
 0x2a2   : > { %v2218_v27 = vpop.f32.mrf.mxu0  ;;  %v1904_v26 = vsel %vm380_vm3, %v1872_v23, %v6618_v33  ;;  %v2420_v33 = vld [vmem:[#allocation3 + $0x2] sm:$0xff] }
 0x2a3   : > { %v2219_v48 = vadd.f32 %v9982_v42, %v2218_v27  ;;  %v6857_v27 = vunpack.i.l.bf16 %v12995_v31  ;;  %v1937_v35 = vsel %vm1911_vm5, %v1904_v26, %v6698_v34  ;;  %v2416_v31 = vld [vmem:[#allocation3 + $0x151] sm:$0xff] }
 0x2a4   : > { %v1970_v20 = vsel %vm1944_vm6, %v1937_v35, %v6778_v45  ;;  %v2422_v35 = vld [vmem:[#allocation3 + $0x1a] sm:$0xff] }
 0x2a5   : > { %v2294_v52 = vmax.f32 %v2219_v48, 0.0  ;;  %v6938_v48 = vunpack.i.h.bf16 %v12996_v55  ;;  %v2003_v24 = vsel %vm1977_vm7, %v1970_v20, %v6858_v30  ;;  %v2423_v55 = vld [vmem:[#allocation3 + $0x22] sm:$0xff] }
 0x2a6   : > { %v2392_v58 = vld [vmem:[#allocation3 + $0x31] sm:$0xff] }
 0x2a7   : > { %2327 = vst.msk [vmem:[#allocation3 + $0x39] sm:$0xff] %vm380_vm3, %v2294_v52 }
 0x2aa   : > { %v2221_v3 = vpop.f32.mrf.mxu0 }
 0x2ab   : > { %v2222_v28 = vadd.f32 %v9982_v42, %v2221_v3 }
 0x2ad   : > { %v2295_v37 = vmax.f32 %v2222_v28, 0.0  ;;  %6360 = vmatmul.msk.bf16.gmra.mxu0 %vm2149_vm11, %v2119_v2  ;;  %v2036_v2 = vsel %vm2010_vm8, %v2003_v24, %v6938_v48 }
 0x2ae   : > { %v2393_v4 = vld [vmem:[#allocation3 + $0x39] sm:$0xff] }
 0x2af   : > { %2328 = vst.msk [vmem:[#allocation3 + $0x49] sm:$0xff] %vm380_vm3, %v2295_v37  ;;  %v10101_v32 = vpack.i.bf16 %v2393_v4, %v2392_v58  ;;  %v2069_v58 = vsel %vm2043_vm9, %v2036_v2, %v7018_v0  ;;  %v10193_v0 = vpack.i.bf16 %v2423_v55, %v2422_v35  ;;  %v10256_v55 = vld [vmem:[#allocation3 + $0x30] sm:$0xff] }
 0x2b1   : > { %7125 = vrot.lane.b32.xlu1 %v10101_v32, %s8434_s16 }
 0x2b2   : > { %v2223_v44 = vpop.f32.mrf.mxu0  ;;  %v2281_v53 = vpop.f32.mrf.mxu3 }
 0x2b3   : > { %v2224_v41 = vadd.f32 %v9982_v42, %v2223_v44  ;;  %v2282_v47 = vadd.f32 %v9982_v42, %v2281_v53  ;;  %v2102_v53 = vsel %vm2076_vm10, %v2069_v58, %v7098_v17 }
 0x2b5   : > { %v2296_v12 = vmax.f32 %v2224_v41, 0.0  ;;  %v2319_v29 = vmax.f32 %v2282_v47, 0.0 }
 0x2b6   : > { %v2394_v61 = vld [vmem:[#allocation3 + $0x49] sm:$0xff] }
 0x2b7   : > { %2329 = vst.msk [vmem:[#allocation3 + $0x51] sm:$0xff] %vm380_vm3, %v2296_v12  ;;  %v10254_v35 = vld [vmem:[#allocation3 + $0x48] sm:$0xff] }
 0x2b8   : > { %2352 = vst.msk [vmem:[#allocation3 + $0x169] sm:$0xff] %vm380_vm3, %v2319_v29 }
 0x2ba   : > { %v2226_v18 = vpop.f32.mrf.mxu0  ;;  %v2283_v62 = vpop.f32.mrf.mxu3 }
 0x2bb   : > { %v2227_v6 = vadd.f32 %v9982_v42, %v2226_v18  ;;  %v2284_v39 = vadd.f32 %v9982_v42, %v2283_v62 }
 0x2bd   : > { %v2297_v25 = vmax.f32 %v2227_v6, 0.0  ;;  %v2320_v43 = vmax.f32 %v2284_v39, 0.0  ;;  %6361 = vmatmul.msk.bf16.gmra.mxu0 %vm2149_vm11, %v2120_v54  ;;  %v1903_v54 = vsel %vm380_vm3, %v1871_v19, %v6617_v60  ;;  %v2421_v60 = vld [vmem:[#allocation3 + $0xa] sm:$0xff] }
 0x2be   : > { %v2395_v10 = vld [vmem:[#allocation3 + $0x51] sm:$0xff]  ;;  %v1936_v36 = vsel %vm1911_vm5, %v1903_v54, %v6697_v63  ;;  %v7154_v13 = vpack.i.bf16 %v2421_v60, %v2420_v33  ;;  %v2417_v54 = vld [vmem:[#allocation3 + $0x159] sm:$0xff] }
 0x2bf   : > { %2330 = vst.msk [vmem:[#allocation3 + $0x61] sm:$0xff] %vm380_vm3, %v2297_v25  ;;  %v10122_v40 = vpack.i.bf16 %v2395_v10, %v2394_v61  ;;  %v1969_v49 = vsel %vm1944_vm6, %v1936_v36, %v6777_v21  ;;  %v2418_v4 = vld [vmem:[#allocation3 + $0x169] sm:$0xff]  ;;  %v2427_v10 = vld [vmem:[#allocation3 + $0x52] sm:$0xff]  ;;  %v10185_v30 = vpack.i.bf16 %v2417_v54, %v2416_v31 }
 0x2c0   : > { %2353 = vst.msk [vmem:[#allocation3 + $0x171] sm:$0xff] %vm380_vm3, %v2320_v43  ;;  %v2002_v15 = vsel %vm1977_vm7, %v1969_v49, %v6857_v27  ;;  %v2426_v61 = vld [vmem:[#allocation3 + $0x4a] sm:$0xff]  ;;  %v2425_v49 = vld [vmem:[#allocation3 + $0x3a] sm:$0xff] }
 0x2c1   : > { %7130 = vrot.lane.b32.xlu2 %v10122_v40, %s8434_s16  ;;  %v2035_v51 = vsel %vm2010_vm8, %v2002_v15, %v6937_v8  ;;  %v10175_v19 = vpack.i.bf16 %v2427_v10, %v2426_v61  ;;  %v10250_v31 = vld [vmem:[#allocation3 + $0x38] sm:$0xff] }
 0x2c2   : > { %v2228_v7 = vpop.f32.mrf.mxu0  ;;  %v2286_v46 = vpop.f32.mrf.mxu3  ;;  %v2068_v37 = vsel %vm2043_vm9, %v2035_v51, %v7017_v57  ;;  %12997 = vst [vmem:[#allocation7_spill] sm:$0xff] %v10250_v31 }
 0x2c3   : > { %v2229_v11 = vadd.f32 %v9982_v42, %v2228_v7  ;;  %v2287_v52 = vadd.f32 %v9982_v42, %v2286_v46  ;;  %v2101_v9 = vsel %vm2076_vm10, %v2068_v37, %v7097_v56 }
 0x2c4   : > { %v2121_v62 = vpack.c.bf16 %v2102_v53, %v2101_v9 }
 0x2c5   : > { %v2298_v3 = vmax.f32 %v2229_v11, 0.0  ;;  %v2321_v28 = vmax.f32 %v2287_v52, 0.0  ;;  %v2424_v52 = vld [vmem:[#allocation3 + $0x32] sm:$0xff] }
 0x2c6   : > { %v2396_v22 = vld [vmem:[#allocation3 + $0x61] sm:$0xff]  ;;  %v10201_v15 = vpack.i.bf16 %v2425_v49, %v2424_v52 }
 0x2c7   : > { %2331 = vst.msk [vmem:[#allocation3 + $0x69] sm:$0xff] %vm380_vm3, %v2298_v3  ;;  %v2419_v44 = vld [vmem:[#allocation3 + $0x171] sm:$0xff] }
 0x2c8   : > { %2354 = vst.msk [vmem:[#allocation3 + $0x181] sm:$0xff] %vm380_vm3, %v2321_v28  ;;  %v10157_v41 = vpack.i.bf16 %v2419_v44, %v2418_v4 }
 0x2ca   : > { %7150 = vrot.lane.b32.xlu2 %v10157_v41, %s8434_s16  ;;  %v2231_v47 = vpop.f32.mrf.mxu0  ;;  %v2288_v12 = vpop.f32.mrf.mxu3 }
 0x2cb   : > { %v2232_v29 = vadd.f32 %v9982_v42, %v2231_v47  ;;  %v2289_v18 = vadd.f32 %v9982_v42, %v2288_v12 }
 0x2cd   : > { %v2299_v6 = vmax.f32 %v2232_v29, 0.0  ;;  %v2322_v39 = vmax.f32 %v2289_v18, 0.0  ;;  %6362 = vmatmul.msk.bf16.gmra.mxu0 %vm2149_vm11, %v2121_v62  ;;  %v2448_v62 = vld [vmem:[#allocation3 + $0x152] sm:$0xff] }
 0x2ce   : > { %v2397_v5 = vld [vmem:[#allocation3 + $0x69] sm:$0xff] }
 0x2cf   : > { %2332 = vst.msk [vmem:[#allocation3 + $0x79] sm:$0xff] %vm380_vm3, %v2299_v6  ;;  %v10165_v59 = vpack.i.bf16 %v2397_v5, %v2396_v22  ;;  %v2428_v20 = vld [vmem:[#allocation3 + $0x62] sm:$0xff]  ;;  %v2429_v17 = vld [vmem:[#allocation3 + $0x6a] sm:$0xff]  ;;  %v2449_v22 = vld [vmem:[#allocation3 + $0x15a] sm:$0xff] }
 0x2d0   : > { %2355 = vst.msk [vmem:[#allocation3 + $0x189] sm:$0xff] %vm380_vm3, %v2322_v39  ;;  %v10203_v24 = vpack.i.bf16 %v2429_v17, %v2428_v20  ;;  %v10227_v33 = vpack.i.bf16 %v2449_v22, %v2448_v62  ;;  %v10277_v17 = vld [vmem:[#allocation3 + $0x68] sm:$0xff] }
 0x2d1   : > { %7135 = vrot.lane.b32.xlu0 %v10165_v59, %s8434_s16  ;;  %12998 = vst [vmem:[#allocation8_spill] sm:$0xff] %v10277_v17 }
 0x2d2   : > { %v2233_v50 = vpop.f32.mrf.mxu0 }
 0x2d3   : > { %v2234_v25 = vadd.f32 %v9982_v42, %v2233_v50 }
 0x2d5   : > { %v2300_v43 = vmax.f32 %v2234_v25, 0.0 }
 0x2d6   : > { %v2398_v23 = vld [vmem:[#allocation3 + $0x79] sm:$0xff] }
 0x2d7   : > { %2333 = vst.msk [vmem:[#allocation3 + $0x81] sm:$0xff] %vm380_vm3, %v2300_v43  ;;  %v2450_v43 = vld [vmem:[#allocation3 + $0x16a] sm:$0xff] }
 0x2d9   : > { %7155 = vrot.lane.b32.xlu0 %v7154_v13, %s8436_s18  ;;  %v2451_v13 = vld [vmem:[#allocation3 + $0x172] sm:$0xff] }
 0x2da   : > { %v2236_v34 = vpop.f32.mrf.mxu0 }
 0x2db   : > { %v2237_v63 = vadd.f32 %v9982_v42, %v2236_v34 }
 0x2dd   : > { %v2301_v38 = vmax.f32 %v2237_v63, 0.0 }
 0x2de   : > { %v2399_v16 = vld [vmem:[#allocation3 + $0x81] sm:$0xff] }
 0x2df   : > { %2334 = vst.msk [vmem:[#allocation3 + $0x91] sm:$0xff] %vm380_vm3, %v2301_v38  ;;  %v10177_v14 = vpack.i.bf16 %v2399_v16, %v2398_v23  ;;  %v2430_v51 = vld [vmem:[#allocation3 + $0x7a] sm:$0xff]  ;;  %v2431_v2 = vld [vmem:[#allocation3 + $0x82] sm:$0xff]  ;;  %v10235_v23 = vpack.i.bf16 %v2451_v13, %v2450_v43 }
 0x2e0   : > { %v10213_v47 = vpack.i.bf16 %v2431_v2, %v2430_v51 }
 0x2e1   : > { %7175 = vrot.lane.b32.xlu0 %v10175_v19, %s8436_s18  ;;  %7140 = vrot.lane.b32.xlu1 %v10177_v14, %s8434_s16 }
 0x2e2   : > { %v2238_v45 = vpop.f32.mrf.mxu0 }
 0x2e3   : > { %v2239_v21 = vadd.f32 %v9982_v42, %v2238_v45 }
 0x2e5   : > { %v2302_v26 = vmax.f32 %v2239_v21, 0.0 }
 0x2e6   : > { %v2400_v8 = vld [vmem:[#allocation3 + $0x91] sm:$0xff] }
 0x2e7   : > { %2335 = vst.msk [vmem:[#allocation3 + $0x99] sm:$0xff] %vm380_vm3, %v2302_v26  ;;  %v10248_v26 = vld [vmem:[#allocation3 + $0x50] sm:$0xff] }
 0x2e9   : > { %7145 = vrot.lane.b32.xlu1 %v10185_v30, %s8434_s16 }
 0x2ea   : > { %v2241_v27 = vpop.f32.mrf.mxu0 }
 0x2eb   : > { %v2242_v36 = vadd.f32 %v9982_v42, %v2241_v27 }
 0x2ed   : > { %v2303_v48 = vmax.f32 %v2242_v36, 0.0  ;;  %v10252_v36 = vld [vmem:[#allocation3 + $0x20] sm:$0xff] }
 0x2ee   : > { %v2401_v7 = vld [vmem:[#allocation3 + $0x99] sm:$0xff] }
 0x2ef   : > { %2336 = vst.msk [vmem:[#allocation3 + $0xa9] sm:$0xff] %vm380_vm3, %v2303_v48  ;;  %v10191_v46 = vpack.i.bf16 %v2401_v7, %v2400_v8  ;;  %v2432_v6 = vld [vmem:[#allocation3 + $0x92] sm:$0xff]  ;;  %v2433_v39 = vld [vmem:[#allocation3 + $0x9a] sm:$0xff]  ;;  %v10263_v8 = vpack.i.bf16 %v10248_v26, %v10254_v35  ;;  %v10267_v7 = vpack.i.bf16 %v10250_v31, %v10256_v55 }
 0x2f0   : > { %v10225_v50 = vpack.i.bf16 %v2433_v39, %v2432_v6  ;;  %v10259_v48 = vld [vmem:[#allocation3 + $0x18] sm:$0xff]  ;;  %v2462_v6 = vld [vmem:[#allocation3 + $0x90] sm:$0xff] }
 0x2f1   : > { %7165 = vrot.lane.b32.xlu2 %v10191_v46, %s8434_s16  ;;  %7160 = vrot.lane.b32.xlu1 %v10193_v0, %s8436_s18  ;;  %v10301_v39 = vld [vmem:[#allocation3 + $0x78] sm:$0xff] }
 0x2f2   : > { %v2243_v57 = vpop.f32.mrf.mxu0  ;;  %13002 = vst [vmem:[#allocation14_spill] sm:$0xff] %v10301_v39 }
 0x2f3   : > { %v2244_v11 = vadd.f32 %v9982_v42, %v2243_v57  ;;  %v7219_v57 = vpack.i.bf16 %v10252_v36, %v10259_v48 }
 0x2f5   : > { %v2304_v56 = vmax.f32 %v2244_v11, 0.0 }
 0x2f6   : > { %v2402_v58 = vld [vmem:[#allocation3 + $0xa9] sm:$0xff] }
 0x2f7   : > { %2337 = vst.msk [vmem:[#allocation3 + $0xb1] sm:$0xff] %vm380_vm3, %v2304_v56 }
 0x2f9   : > { %7170 = vrot.lane.b32.xlu2 %v10201_v15, %s8436_s18  ;;  %7180 = vrot.lane.b32.xlu1 %v10203_v24, %s8436_s18 }
 0x2fa   : > { %v2246_v3 = vpop.f32.mrf.mxu0 }
 0x2fb   : > { %v2247_v28 = vadd.f32 %v9982_v42, %v2246_v3 }
 0x2fd   : > { %v2305_v37 = vmax.f32 %v2247_v28, 0.0 }
 0x2fe   : > { %v2403_v4 = vld [vmem:[#allocation3 + $0xb1] sm:$0xff] }
 0x2ff   : > { %v2434_v44 = vld [vmem:[#allocation3 + $0xaa] sm:$0xff]  ;;  %v2435_v9 = vld [vmem:[#allocation3 + $0xb2] sm:$0xff]  ;;  %2338 = vst.msk [vmem:[#allocation3 + $0xc1] sm:$0xff] %vm380_vm3, %v2305_v37  ;;  %v10211_v53 = vpack.i.bf16 %v2403_v4, %v2402_v58  ;;  %v10284_v37 = vld [vmem:[#allocation3 + $0x60] sm:$0xff] }
 0x300   : > { %v10215_v12 = vpack.i.bf16 %v2435_v9, %v2434_v44  ;;  %12999 = vst [vmem:[#allocation5_spill] sm:$0xff] %v10284_v37  ;;  %v10288_v58 = vpack.i.bf16 %v10277_v17, %v10284_v37  ;;  %v2463_v9 = vld [vmem:[#allocation3 + $0x98] sm:$0xff]  ;;  %v10299_v62 = vld [vmem:[#allocation3 + $0xb0] sm:$0xff] }
 0x301   : > { %7190 = vrot.lane.b32.xlu0 %v10211_v53, %s8434_s16  ;;  %7185 = vrot.lane.b32.xlu2 %v10213_v47, %s8436_s18  ;;  %13001 = vst [vmem:[#allocation15_spill] sm:$0xff] %v10299_v62  ;;  %v10304_v22 = vpack.i.bf16 %v2463_v9, %v2462_v6 }
 0x302   : > { %7200 = vrot.lane.b32.xlu1 %v10215_v12, %s8436_s18  ;;  %v2248_v29 = vpop.f32.mrf.mxu0 }
 0x303   : > { %v2249_v18 = vadd.f32 %v9982_v42, %v2248_v29  ;;  %v10297_v29 = vld [vmem:[#allocation3 + $0x80] sm:$0xff] }
 0x304   : > { %13000 = vst [vmem:[#allocation6_spill] sm:$0xff] %v10297_v29 }
 0x305   : > { %v2306_v5 = vmax.f32 %v2249_v18, 0.0 }
 0x306   : > { %v2404_v63 = vld [vmem:[#allocation3 + $0xc1] sm:$0xff] }
 0x307   : > { %2339 = vst.msk [vmem:[#allocation3 + $0xc9] sm:$0xff] %vm380_vm3, %v2306_v5  ;;  %v10308_v5 = vpack.i.bf16 %v10297_v29, %v10301_v39 }
 0x309   : > { %7195 = vrot.lane.b32.xlu0 %v10225_v50, %s8436_s18  ;;  %7205 = vrot.lane.b32.xlu2 %v10227_v33, %s8436_s18 }
 0x30a   : > { %v2251_v60 = vpop.f32.mrf.mxu0 }
 0x30b   : > { %v2252_v25 = vadd.f32 %v9982_v42, %v2251_v60  ;;  %v10310_v60 = vld [vmem:[#allocation3 + $0xa8] sm:$0xff] }
 0x30c   : > { %13003 = vst [vmem:[#allocation9_spill] sm:$0xff] %v10310_v60 }
 0x30d   : > { %v2307_v34 = vmax.f32 %v2252_v25, 0.0  ;;  %v10314_v25 = vpack.i.bf16 %v10299_v62, %v10310_v60 }
 0x30e   : > { %v2436_v61 = vld [vmem:[#allocation3 + $0xc2] sm:$0xff]  ;;  %v2437_v10 = vld [vmem:[#allocation3 + $0xca] sm:$0xff] }
 0x30f   : > { %v2405_v38 = vld [vmem:[#allocation3 + $0xc9] sm:$0xff]  ;;  %2340 = vst.msk [vmem:[#allocation3 + $0xd9] sm:$0xff] %vm380_vm3, %v2307_v34  ;;  %v10237_v16 = vpack.i.bf16 %v2437_v10, %v2436_v61  ;;  %v10325_v10 = vld [vmem:[#allocation3 + $0xc0] sm:$0xff] }
 0x310   : > { %v10239_v45 = vpack.i.bf16 %v2405_v38, %v2404_v63  ;;  %v10323_v34 = vld [vmem:[#allocation3 + $0xc8] sm:$0xff]  ;;  %13005 = vst [vmem:[#allocation12_spill] sm:$0xff] %v10325_v10 }
 0x311   : > { %7210 = vrot.lane.b32.xlu0 %v10235_v23, %s8436_s18  ;;  %7225 = vrot.lane.b32.xlu2 %v10237_v16, %s8436_s18  ;;  %13004 = vst [vmem:[#allocation13_spill] sm:$0xff] %v10323_v34 }
 0x312   : > { %7215 = vrot.lane.b32.xlu1 %v10239_v45, %s8434_s16  ;;  %v2253_v21 = vpop.f32.mrf.mxu0 }
 0x313   : > { %v2254_v54 = vadd.f32 %v9982_v42, %v2253_v21 }
 0x315   : > { %v2308_v27 = vmax.f32 %v2254_v54, 0.0 }
 0x316   : > { %v2406_v20 = vld [vmem:[#allocation3 + $0xd9] sm:$0xff] }
 0x317   : > { %2341 = vst.msk [vmem:[#allocation3 + $0xe1] sm:$0xff] %vm380_vm3, %v2308_v27  ;;  %v10327_v27 = vpop.permute.xlu2 %7115 }
 0x319   : > { %7235 = vrot.lane.b32.xlu0 %v10263_v8, %s8438_s20  ;;  %7230 = vrot.lane.b32.xlu2 %v10267_v7, %s8438_s20 }
 0x31a   : > { %7220 = vrot.lane.b32.xlu1 %v7219_v57, %s8438_s20  ;;  %v2256_v11 = vpop.f32.mrf.mxu0 }
 0x31b   : > { %v2257_v52 = vadd.f32 %v9982_v42, %v2256_v11  ;;  %v10334_v11 = vpack.i.bf16 %v10323_v34, %v10325_v10  ;;  %v2478_v34 = vld [vmem:[#allocation3 + $0x150] sm:$0xff] }
 0x31d   : > { %v2309_v49 = vmax.f32 %v2257_v52, 0.0 }
 0x31e   : > { %v2438_v56 = vld [vmem:[#allocation3 + $0xda] sm:$0xff]  ;;  %v2439_v3 = vld [vmem:[#allocation3 + $0xe2] sm:$0xff] }
 0x31f   : > { %v2407_v28 = vld [vmem:[#allocation3 + $0xe1] sm:$0xff]  ;;  %2342 = vst.msk [vmem:[#allocation3 + $0xf1] sm:$0xff] %vm380_vm3, %v2309_v49  ;;  %v10280_v51 = vpack.i.bf16 %v2439_v3, %v2438_v56  ;;  %v10362_v6 = vpop.permute.xlu2 %7130 }
 0x320   : > { %v10282_v2 = vpack.i.bf16 %v2407_v28, %v2406_v20  ;;  %v10345_v56 = vld [vmem:[#allocation3 + $0xe0] sm:$0xff] }
 0x321   : > { %7255 = vrot.lane.b32.xlu0 %v10280_v51, %s8436_s18  ;;  %13006 = vst [vmem:[#allocation36_spill] sm:$0xff] %v10345_v56 }
 0x322   : > { %7245 = vrot.lane.b32.xlu2 %v10282_v2, %s8434_s16  ;;  %7240 = vrot.lane.b32.xlu1 %v10288_v58, %s8438_s20  ;;  %v2258_v4 = vpop.f32.mrf.mxu0 }
 0x323   : > { %v2259_v44 = vadd.f32 %v9982_v42, %v2258_v4  ;;  %v10349_v4 = vld [vmem:[#allocation3 + $0xd8] sm:$0xff] }
 0x324   : > { %13008 = vst [vmem:[#allocation49_spill] sm:$0xff] %v10349_v4 }
 0x325   : > { %v2310_v18 = vmax.f32 %v2259_v44, 0.0  ;;  %v10354_v44 = vpack.i.bf16 %v10345_v56, %v10349_v4 }
 0x326   : > { %v2408_v61 = vld [vmem:[#allocation3 + $0xf1] sm:$0xff] }
 0x327   : > { %2343 = vst.msk [vmem:[#allocation3 + $0xf9] sm:$0xff] %vm380_vm3, %v2310_v18  ;;  %v10356_v9 = vld [vmem:[#allocation3 + $0xf0] sm:$0xff] }
 0x328   : > { %13009 = vst [vmem:[#allocation73_spill] sm:$0xff] %v10356_v9 }
 0x329   : > { %7260 = vrot.lane.b32.xlu0 %v10304_v22, %s8438_s20 }
 0x32a   : > { %7250 = vrot.lane.b32.xlu2 %v10308_v5, %s8438_s20  ;;  %7265 = vrot.lane.b32.xlu1 %v10314_v25, %s8438_s20  ;;  %v2261_v43 = vpop.f32.mrf.mxu0 }
 0x32b   : > { %v2262_v13 = vadd.f32 %v9982_v42, %v2261_v43 }
 0x32d   : > { %v2311_v63 = vmax.f32 %v2262_v13, 0.0 }
 0x32e   : > { %v2409_v38 = vld [vmem:[#allocation3 + $0xf9] sm:$0xff] }
 0x32f   : > { %v2440_v21 = vld [vmem:[#allocation3 + $0xf2] sm:$0xff]  ;;  %v2441_v54 = vld [vmem:[#allocation3 + $0xfa] sm:$0xff]  ;;  %2344 = vst.msk [vmem:[#allocation3 + $0x109] sm:$0xff] %vm380_vm3, %v2311_v63  ;;  %v10330_v57 = vpack.i.bf16 %v2409_v38, %v2408_v61  ;;  %v2386_v61 = vld [vmem:[#allocation3 + $0x168] sm:$0xff] }
 0x330   : > { %v10336_v52 = vpack.i.bf16 %v2441_v54, %v2440_v21  ;;  %v10347_v28 = vld [vmem:[#allocation3 + $0xf8] sm:$0xff]  ;;  %v2387_v63 = vld [vmem:[#allocation3 + $0x170] sm:$0xff] }
 0x331   : > { %7275 = vrot.lane.b32.xlu0 %v10330_v57, %s8434_s16  ;;  %13007 = vst [vmem:[#allocation76_spill] sm:$0xff] %v10347_v28  ;;  %v10360_v18 = vpack.i.bf16 %v10347_v28, %v10356_v9 }
 0x332   : > { %7270 = vrot.lane.b32.xlu2 %v10334_v11, %s8438_s20  ;;  %7285 = vrot.lane.b32.xlu1 %v10336_v52, %s8436_s18  ;;  %v2263_v49 = vpop.f32.mrf.mxu0 }
 0x333   : > { %v2264_v20 = vadd.f32 %v9982_v42, %v2263_v49 }
 0x335   : > { %v2312_v3 = vmax.f32 %v2264_v20, 0.0 }
 0x336   : > { %v2410_v21 = vld [vmem:[#allocation3 + $0x109] sm:$0xff] }
 0x337   : > { %2345 = vst.msk [vmem:[#allocation3 + $0x111] sm:$0xff] %vm380_vm3, %v2312_v3  ;;  %v7314_v3 = vpack.i.bf16 %v2387_v63, %v2386_v61  ;;  %v2483_v61 = vld [vmem:[#allocation3 + $0x188] sm:$0xff] }
 0x339   : > { %7280 = vrot.lane.b32.xlu0 %v10354_v44, %s8438_s20 }
 0x33a   : > { %7290 = vrot.lane.b32.xlu1 %v10360_v18, %s8438_s20  ;;  %v2266_v43 = vpop.f32.mrf.mxu0 }
 0x33b   : > { %v2267_v13 = vadd.f32 %v9982_v42, %v2266_v43 }
 0x33d   : > { %v2313_v38 = vmax.f32 %v2267_v13, 0.0  ;;  %v10379_v13 = vpop.permute.xlu2 %7150 }
 0x33e   : > { %v2442_v54 = vld [vmem:[#allocation3 + $0x10a] sm:$0xff]  ;;  %v2443_v49 = vld [vmem:[#allocation3 + $0x112] sm:$0xff]  ;;  %13010 = vst [vmem:[#allocation40_spill] sm:$0xff] %v10379_v13 }
 0x33f   : > { %v2411_v20 = vld [vmem:[#allocation3 + $0x111] sm:$0xff]  ;;  %2346 = vst.msk [vmem:[#allocation3 + $0x121] sm:$0xff] %vm380_vm3, %v2313_v38  ;;  %v10370_v9 = vpack.i.bf16 %v2443_v49, %v2442_v54  ;;  %v10384_v38 = vld [vmem:[#allocation3 + $0x108] sm:$0xff]  ;;  %v2482_v54 = vld [vmem:[#allocation3 + $0x180] sm:$0xff] }
 0x340   : > { %v10372_v28 = vpack.i.bf16 %v2411_v20, %v2410_v21  ;;  %v10382_v56 = vld [vmem:[#allocation3 + $0x110] sm:$0xff]  ;;  %13012 = vst [vmem:[#allocation66_spill] sm:$0xff] %v10384_v38  ;;  %v10391_v49 = vpack.i.bf16 %v2483_v61, %v2482_v54  ;;  %v10402_v61 = vpop.permute.xlu0 %7120 }
 0x341   : > { %7315 = vrot.lane.b32.xlu0 %v7314_v3, %s8438_s20  ;;  %7300 = vrot.lane.b32.xlu2 %v10370_v9, %s8436_s18  ;;  %13011 = vst [vmem:[#allocation51_spill] sm:$0xff] %v10382_v56  ;;  %v10389_v21 = vpack.i.bf16 %v10382_v56, %v10384_v38 }
 0x342   : > { %7295 = vrot.lane.b32.xlu1 %v10372_v28, %s8434_s16  ;;  %v2268_v43 = vpop.f32.mrf.mxu0 }
 0x343   : > { %v2269_v4 = vadd.f32 %v9982_v42, %v2268_v43  ;;  %v10400_v43 = vpop.permute.xlu1 %7125 }
 0x345   : > { %v2314_v63 = vmax.f32 %v2269_v4, 0.0 }
 0x347   : > { %2347 = vst.msk [vmem:[#allocation3 + $0x129] sm:$0xff] %vm380_vm3, %v2314_v63  ;;  %v2479_v63 = vld [vmem:[#allocation3 + $0x158] sm:$0xff] }
 0x348   : > { %v10407_v60 = vpack.i.bf16 %v2479_v63, %v2478_v34  ;;  %v2412_v63 = vld [vmem:[#allocation3 + $0x121] sm:$0xff]  ;;  %v10424_v39 = vpop.permute.xlu0 %7135 }
 0x349   : > { %7305 = vrot.lane.b32.xlu2 %v10389_v21, %s8438_s20 }
 0x34a   : > { %7320 = vrot.lane.b32.xlu1 %v10391_v49, %s8438_s20  ;;  %v2271_v20 = vpop.f32.mrf.mxu0 }
 0x34b   : > { %v2272_v4 = vadd.f32 %v9982_v42, %v2271_v20  ;;  %v10398_v3 = vpop.permute.xlu2 %7165 }
 0x34c   : > { %13013 = vst [vmem:[#allocation71_spill] sm:$0xff] %v10398_v3 }
 0x34d   : > { %v2315_v10 = vmax.f32 %v2272_v4, 0.0 }
 0x34e   : > { %v2444_v38 = vld [vmem:[#allocation3 + $0x122] sm:$0xff]  ;;  %v2445_v56 = vld [vmem:[#allocation3 + $0x12a] sm:$0xff] }
 0x34f   : > { %2348 = vst.msk [vmem:[#allocation3 + $0x139] sm:$0xff] %vm380_vm3, %v2315_v10  ;;  %v10405_v54 = vpack.i.bf16 %v2445_v56, %v2444_v38  ;;  %v10420_v10 = vld [vmem:[#allocation3 + $0x128] sm:$0xff]  ;;  %v10422_v38 = vld [vmem:[#allocation3 + $0x120] sm:$0xff] }
 0x350   : > { %13014 = vst [vmem:[#allocation62_spill] sm:$0xff] %v10420_v10  ;;  %v2413_v34 = vld [vmem:[#allocation3 + $0x129] sm:$0xff]  ;;  %v10440_v31 = vpop.permute.xlu0 %7155 }
 0x351   : > { %7335 = vrot.lane.b32.xlu0 %v10405_v54, %s8436_s18  ;;  %7310 = vrot.lane.b32.xlu2 %v10407_v60, %s8438_s20  ;;  %13015 = vst [vmem:[#allocation78_spill] sm:$0xff] %v10422_v38 }
 0x352   : > { %7350 = vrot.lane.b32.xlu1 %v10122_v40, %s8440_s22  ;;  %v2273_v20 = vpop.f32.mrf.mxu0  ;;  %v10429_v40 = vpack.i.bf16 %v10420_v10, %v10422_v38 }
 0x353   : > { %v2274_v4 = vadd.f32 %v9982_v42, %v2273_v20  ;;  %v10416_v3 = vpop.permute.xlu2 %7170  ;;  %v10418_v62 = vpop.permute.xlu1 %7140  ;;  %v7324_v42 = vpack.i.bf16 %v2413_v34, %v2412_v63 }
 0x355   : > { %v2316_v56 = vmax.f32 %v2274_v4, 0.0 }
 0x356   : > { %v2414_v38 = vld [vmem:[#allocation3 + $0x139] sm:$0xff] }
 0x357   : > { %2349 = vst.msk [vmem:[#allocation3 + $0x141] sm:$0xff] %vm380_vm3, %v2316_v56 }
 0x359   : > { %7340 = vrot.lane.b32.xlu0 %v10429_v40, %s8438_s20  ;;  %7325 = vrot.lane.b32.xlu2 %v7324_v42, %s8434_s16 }
 0x35b   : > { %v10434_v20 = vpop.permute.xlu2 %7185  ;;  %v10436_v4 = vpop.permute.xlu1 %7145 }
 0x35c   : > { %13016 = vst [vmem:[#allocation53_spill] sm:$0xff] %v10436_v4  ;;  %v2476_v4 = vld [vmem:[#allocation3 + $0x138] sm:$0xff] }
 0x35e   : > { %v2446_v29 = vld [vmem:[#allocation3 + $0x13a] sm:$0xff]  ;;  %v2447_v17 = vld [vmem:[#allocation3 + $0x142] sm:$0xff] }
 0x35f   : > { %v10438_v37 = vpack.i.bf16 %v2447_v17, %v2446_v29  ;;  %v2415_v56 = vld [vmem:[#allocation3 + $0x141] sm:$0xff] }
 0x360   : > { %v2477_v63 = vld [vmem:[#allocation3 + $0x140] sm:$0xff]  ;;  %v7359_v10 = vpack.i.bf16 %v2415_v56, %v2414_v38 }
 0x361   : > { %7345 = vrot.lane.b32.xlu0 %v10101_v32, %s8440_s22  ;;  %7330 = vrot.lane.b32.xlu2 %v10065_v1, %s8440_s22  ;;  %v10452_v29 = vpack.i.bf16 %v2477_v63, %v2476_v4  ;;  %v10459_v1 = vpop.permute.xlu0 %7175  ;;  %v2514_v63 = vld [vmem:[#allocation3 + $0x181] sm:$0xff] }
 0x362   : > { %7370 = vrot.lane.b32.xlu1 %v10438_v37, %s8436_s18 }
 0x363   : > { %v10448_v34 = vpop.permute.xlu2 %7205  ;;  %v10450_v17 = vpop.permute.xlu1 %7160 }
 0x369   : > { %7360 = vrot.lane.b32.xlu0 %v7359_v10, %s8434_s16  ;;  %7355 = vrot.lane.b32.xlu2 %v10165_v59, %s8440_s22 }
 0x36a   : > { %7375 = vrot.lane.b32.xlu1 %v10452_v29, %s8438_s20 }
 0x36b   : > { %v10461_v32 = vpop.permute.xlu2 %7225  ;;  %v10467_v38 = vpop.permute.xlu1 %7180 }
 0x371   : > { %7365 = vrot.lane.b32.xlu0 %v10177_v14, %s8440_s22  ;;  %7385 = vrot.lane.b32.xlu2 %v10211_v53, %s8440_s22 }
 0x372   : > { %7380 = vrot.lane.b32.xlu1 %v10191_v46, %s8440_s22 }
 0x373   : > { %v10471_v4 = vpop.permute.xlu0 %7190  ;;  %v10473_v59 = vpop.permute.xlu2 %7230 }
 0x374   : > { %v10483_v53 = vpop.permute.xlu1 %7200 }
 0x379   : > { %7390 = vrot.lane.b32.xlu0 %v10239_v45, %s8440_s22  ;;  %7400 = vrot.lane.b32.xlu2 %v10330_v57, %s8440_s22  ;;  %v2515_v57 = vld [vmem:[#allocation3 + $0x189] sm:$0xff] }
 0x37a   : > { %7395 = vrot.lane.b32.xlu1 %v10282_v2, %s8440_s22  ;;  %v10495_v2 = vpack.i.bf16 %v2515_v57, %v2514_v63 }
 0x37b   : > { %v10481_v14 = vpop.permute.xlu0 %7195 }
 0x37c   : > { %13017 = vst [vmem:[#allocation69_spill] sm:$0xff] %v10481_v14  ;;  %v10485_v56 = vpop.permute.xlu2 %7245 }
 0x381   : > { %7405 = vrot.lane.b32.xlu0 %v10372_v28, %s8440_s22  ;;  %7415 = vrot.lane.b32.xlu2 %v7359_v10, %s8440_s22 }
 0x382   : > { %7410 = vrot.lane.b32.xlu1 %v7324_v42, %s8440_s22 }
 0x383   : > { %v10491_v46 = vpop.permute.xlu0 %7210 }
 0x384   : > { %13018 = vst [vmem:[#allocation74_spill] sm:$0xff] %v10491_v46  ;;  %v10493_v45 = vpop.permute.xlu1 %7215  ;;  %v10497_v14 = vpop.permute.xlu2 %7250  ;;  %v2582_v46 = vld [vmem:[#allocation3 + $0x39] sm:$0xff] }
 0x389   : > { %7420 = vrot.lane.b32.xlu0 %v10185_v30, %s8440_s22  ;;  %7430 = vrot.lane.b32.xlu2 %v10495_v2, %s8440_s22 }
 0x38a   : > { %7425 = vrot.lane.b32.xlu1 %v10157_v41, %s8440_s22 }
 0x38b   : > { %v10505_v28 = vpop.permute.xlu0 %7235 }
 0x38c   : > { %v10507_v10 = vpop.permute.xlu1 %7220  ;;  %v10515_v30 = vpop.permute.xlu2 %7270 }
 0x391   : > { %7435 = vrot.lane.b32.xlu0 %v10193_v0, %s8441_s13  ;;  %7445 = vrot.lane.b32.xlu2 %v10175_v19, %s8441_s13 }
 0x392   : > { %7440 = vrot.lane.b32.xlu1 %v10201_v15, %s8441_s13 }
 0x393   : > { %v10517_v42 = vpop.permute.xlu0 %7255 }
 0x394   : > { %v10519_v57 = vpop.permute.xlu1 %7240 }
 0x399   : > { %7450 = vrot.lane.b32.xlu0 %v10203_v24, %s8441_s13  ;;  %7460 = vrot.lane.b32.xlu2 %v10225_v50, %s8441_s13 }
 0x39a   : > { %7455 = vrot.lane.b32.xlu1 %v10213_v47, %s8441_s13 }
 0x39b   : > { %v10527_v41 = vpop.permute.xlu2 %7300  ;;  %v10531_v0 = vpop.permute.xlu0 %7260 }
 0x39c   : > { %v10529_v19 = vpop.permute.xlu1 %7265  ;;  %13020 = vst [vmem:[#allocation35_spill] sm:$0xff] %v10531_v0  ;;  %v2588_v0 = vld [vmem:[#allocation3 + $0x81] sm:$0xff] }
 0x39d   : > { %13019 = vst [vmem:[#allocation34_spill] sm:$0xff] %v10529_v19 }
 0x3a1   : > { %7465 = vrot.lane.b32.xlu0 %v10215_v12, %s8441_s13  ;;  %7475 = vrot.lane.b32.xlu2 %v10280_v51, %s8441_s13 }
 0x3a2   : > { %7470 = vrot.lane.b32.xlu1 %v10237_v16, %s8441_s13 }
 0x3a3   : > { %v10539_v15 = vpop.permute.xlu2 %7305  ;;  %v10543_v47 = vpop.permute.xlu0 %7275 }
 0x3a4   : > { %v10541_v24 = vpop.permute.xlu1 %7285 }
 0x3a9   : > { %7480 = vrot.lane.b32.xlu0 %v10336_v52, %s8441_s13  ;;  %7490 = vrot.lane.b32.xlu2 %v10405_v54, %s8441_s13  ;;  %v2546_v52 = vld [vmem:[#allocation3 + $0x182] sm:$0xff]  ;;  %v2547_v54 = vld [vmem:[#allocation3 + $0x18a] sm:$0xff] }
 0x3aa   : > { %7485 = vrot.lane.b32.xlu1 %v10370_v9, %s8441_s13  ;;  %v10565_v9 = vpack.i.bf16 %v2547_v54, %v2546_v52  ;;  %v2575_v54 = vld [vmem:[#allocation3 + $0x168] sm:$0xff] }
 0x3ab   : > { %v10551_v12 = vpop.permute.xlu2 %7310  ;;  %v10555_v16 = vpop.permute.xlu0 %7280 }
 0x3ac   : > { %13021 = vst [vmem:[#allocation48_spill] sm:$0xff] %v10551_v12  ;;  %v10553_v50 = vpop.permute.xlu1 %7290 }
 0x3b1   : > { %7495 = vrot.lane.b32.xlu0 %v10438_v37, %s8441_s13  ;;  %7505 = vrot.lane.b32.xlu2 %v10235_v23, %s8441_s13 }
 0x3b2   : > { %7500 = vrot.lane.b32.xlu1 %v10227_v33, %s8441_s13 }
 0x3b3   : > { %v10563_v51 = vpop.permute.xlu2 %7325  ;;  %v10575_v23 = vpop.permute.xlu0 %7315 }
 0x3b4   : > { %v10567_v63 = vpop.permute.xlu1 %7295  ;;  %13022 = vst [vmem:[#allocation56_spill] sm:$0xff] %v10575_v23  ;;  %v2581_v23 = vld [vmem:[#allocation3 + $0x31] sm:$0xff] }
 0x3b9   : > { %7510 = vrot.lane.b32.xlu0 %v10565_v9, %s8441_s13  ;;  %7520 = vrot.lane.b32.xlu2 %v10263_v8, %s8442_s14 }
 0x3ba   : > { %7515 = vrot.lane.b32.xlu1 %v10267_v7, %s8442_s14 }
 0x3bb   : > { %v10577_v33 = vpop.permute.xlu2 %7330 }
 0x3bc   : > { %v10583_v37 = vpop.permute.xlu1 %7320 }
 0x3bd   : > { %13023 = vst [vmem:[#allocation72_spill] sm:$0xff] %v10583_v37  ;;  %v2580_v37 = vld [vmem:[#allocation3 + $0x1a0] sm:$0xff] }
 0x3c1   : > { %7525 = vrot.lane.b32.xlu0 %v10288_v58, %s8442_s14  ;;  %7535 = vrot.lane.b32.xlu2 %v10304_v22, %s8442_s14 }
 0x3c2   : > { %7530 = vrot.lane.b32.xlu1 %v10308_v5, %s8442_s14 }
 0x3c3   : > { %v10587_v52 = vpop.permute.xlu0 %7335  ;;  %v10589_v8 = vpop.permute.xlu2 %7355 }
 0x3c4   : > { %13024 = vst [vmem:[#allocation77_spill] sm:$0xff] %v10589_v8  ;;  %v10601_v22 = vpop.permute.xlu1 %7350  ;;  %v2606_v8 = vld [vmem:[#allocation3 + $0x159] sm:$0xff] }
 0x3c9   : > { %7540 = vrot.lane.b32.xlu0 %v10314_v25, %s8442_s14  ;;  %7550 = vrot.lane.b32.xlu2 %v10354_v44, %s8442_s14  ;;  %v2576_v44 = vld [vmem:[#allocation3 + $0x170] sm:$0xff] }
 0x3ca   : > { %7545 = vrot.lane.b32.xlu1 %v10334_v11, %s8442_s14 }
 0x3cb   : > { %v10597_v7 = vpop.permute.xlu0 %7340  ;;  %v10599_v58 = vpop.permute.xlu2 %7385 }
 0x3cc   : > { %13025 = vst [vmem:[#allocation38_spill] sm:$0xff] %v10599_v58  ;;  %v7579_v58 = vpack.i.bf16 %v2576_v44, %v2575_v54  ;;  %v7594_v44 = vpack.i.bf16 %v2582_v46, %v2581_v23  ;;  %v2584_v54 = vld [vmem:[#allocation3 + $0x51] sm:$0xff] }
 0x3d1   : > { %7555 = vrot.lane.b32.xlu0 %v10360_v18, %s8442_s14  ;;  %7565 = vrot.lane.b32.xlu2 %v10429_v40, %s8442_s14  ;;  %v2579_v40 = vld [vmem:[#allocation3 + $0x198] sm:$0xff] }
 0x3d2   : > { %7560 = vrot.lane.b32.xlu1 %v10389_v21, %s8442_s14  ;;  %v7589_v12 = vpack.i.bf16 %v2580_v37, %v2579_v40  ;;  %v2587_v37 = vld [vmem:[#allocation3 + $0x79] sm:$0xff]  ;;  %v2585_v40 = vld [vmem:[#allocation3 + $0x61] sm:$0xff] }
 0x3d3   : > { %v10609_v5 = vpop.permute.xlu0 %7345  ;;  %v10611_v25 = vpop.permute.xlu2 %7400  ;;  %v7609_v23 = vpack.i.bf16 %v2588_v0, %v2587_v37  ;;  %v2591_v0 = vld [vmem:[#allocation3 + $0xa9] sm:$0xff] }
 0x3d4   : > { %13026 = vst [vmem:[#allocation64_spill] sm:$0xff] %v10609_v5  ;;  %v10613_v11 = vpop.permute.xlu1 %7370  ;;  %v2597_v5 = vld [vmem:[#allocation3 + $0xf1] sm:$0xff] }
 0x3d5   : > { %13027 = vst [vmem:[#allocation68_spill] sm:$0xff] %v10611_v25  ;;  %v2618_v25 = vld [vmem:[#allocation3 + $0x6a] sm:$0xff] }
 0x3d6   : > { %13028 = vst [vmem:[#allocation59_spill] sm:$0xff] %v10613_v11  ;;  %v2586_v11 = vld [vmem:[#allocation3 + $0x69] sm:$0xff] }
 0x3d9   : > { %7570 = vrot.lane.b32.xlu0 %v10452_v29, %s8442_s14  ;;  %7580 = vrot.lane.b32.xlu2 %v7579_v58, %s8442_s14 }
 0x3da   : > { %7575 = vrot.lane.b32.xlu1 %v10407_v60, %s8442_s14 }
 0x3db   : > { %v10620_v18 = vpop.permute.xlu0 %7360  ;;  %v10622_v21 = vpop.permute.xlu2 %7415 }
 0x3dc   : > { %13029 = vst [vmem:[#allocation75_spill] sm:$0xff] %v10620_v18  ;;  %v10624_v19 = vpop.permute.xlu1 %7375  ;;  %v2613_v18 = vld [vmem:[#allocation3 + $0x32] sm:$0xff] }
 0x3dd   : > { %13030 = vst [vmem:[#allocation80_spill] sm:$0xff] %v10622_v21  ;;  %v2583_v21 = vld [vmem:[#allocation3 + $0x49] sm:$0xff] }
 0x3de   : > { %13031 = vst [vmem:[#allocation29_spill] sm:$0xff] %v10624_v19  ;;  %v7599_v46 = vpack.i.bf16 %v2584_v54, %v2583_v21  ;;  %v2614_v19 = vld [vmem:[#allocation3 + $0x3a] sm:$0xff]  ;;  %v2589_v21 = vld [vmem:[#allocation3 + $0x91] sm:$0xff] }
 0x3df   : > { %v7619_v37 = vpack.i.bf16 %v2614_v19, %v2613_v18 }
 0x3e1   : > { %7585 = vrot.lane.b32.xlu0 %v10391_v49, %s8442_s14  ;;  %7595 = vrot.lane.b32.xlu2 %v7594_v44, %s8443_s23  ;;  %v7604_v49 = vpack.i.bf16 %v2586_v11, %v2585_v40 }
 0x3e2   : > { %7590 = vrot.lane.b32.xlu1 %v7589_v12, %s8442_s14 }
 0x3e3   : > { %v10630_v60 = vpop.permute.xlu0 %7365  ;;  %v10632_v29 = vpop.permute.xlu2 %7430 }
 0x3e4   : > { %13032 = vst [vmem:[#allocation31_spill] sm:$0xff] %v10630_v60  ;;  %v10634_v58 = vpop.permute.xlu1 %7380  ;;  %v2592_v60 = vld [vmem:[#allocation3 + $0xb1] sm:$0xff] }
 0x3e5   : > { %13033 = vst [vmem:[#allocation16_spill] sm:$0xff] %v10632_v29  ;;  %v7624_v11 = vpack.i.bf16 %v2592_v60, %v2591_v0  ;;  %v2595_v60 = vld [vmem:[#allocation3 + $0xd9] sm:$0xff] }
 0x3e6   : > { %13034 = vst [vmem:[#allocation37_spill] sm:$0xff] %v10634_v58  ;;  %v2590_v58 = vld [vmem:[#allocation3 + $0x99] sm:$0xff] }
 0x3e7   : > { %v7614_v54 = vpack.i.bf16 %v2590_v58, %v2589_v21  ;;  %v2593_v58 = vld [vmem:[#allocation3 + $0xc1] sm:$0xff] }
 0x3e9   : > { %7600 = vrot.lane.b32.xlu0 %v7599_v46, %s8443_s23  ;;  %7610 = vrot.lane.b32.xlu2 %v7609_v23, %s8443_s23 }
 0x3ea   : > { %7605 = vrot.lane.b32.xlu1 %v7604_v49, %s8443_s23  ;;  %v2594_v49 = vld [vmem:[#allocation3 + $0xc9] sm:$0xff] }
 0x3eb   : > { %v10639_v12 = vpop.permute.xlu0 %7390  ;;  %v10641_v44 = vpop.permute.xlu2 %7445  ;;  %v7629_v19 = vpack.i.bf16 %v2594_v49, %v2593_v58  ;;  %v2599_v49 = vld [vmem:[#allocation3 + $0x109] sm:$0xff] }
 0x3ec   : > { %13035 = vst [vmem:[#allocation46_spill] sm:$0xff] %v10639_v12  ;;  %v10643_v29 = vpop.permute.xlu1 %7395  ;;  %v2596_v12 = vld [vmem:[#allocation3 + $0xe1] sm:$0xff] }
 0x3ed   : > { %13036 = vst [vmem:[#allocation11_spill] sm:$0xff] %v10641_v44  ;;  %v2615_v44 = vld [vmem:[#allocation3 + $0x4a] sm:$0xff]  ;;  %v7639_v18 = vpack.i.bf16 %v2596_v12, %v2595_v60 }
 0x3ee   : > { %13037 = vst [vmem:[#allocation50_spill] sm:$0xff] %v10643_v29  ;;  %v2616_v29 = vld [vmem:[#allocation3 + $0x52] sm:$0xff] }
 0x3ef   : > { %v7634_v21 = vpack.i.bf16 %v2616_v29, %v2615_v44 }
 0x3f1   : > { %7615 = vrot.lane.b32.xlu0 %v7614_v54, %s8443_s23  ;;  %7625 = vrot.lane.b32.xlu2 %v7624_v11, %s8443_s23 }
 0x3f2   : > { %7620 = vrot.lane.b32.xlu1 %v7619_v37, %s8444_s24  ;;  %v2598_v37 = vld [vmem:[#allocation3 + $0xf9] sm:$0xff] }
 0x3f3   : > { %v10648_v46 = vpop.permute.xlu0 %7405  ;;  %v10650_v23 = vpop.permute.xlu2 %7460  ;;  %v7644_v12 = vpack.i.bf16 %v2598_v37, %v2597_v5 }
 0x3f4   : > { %13038 = vst [vmem:[#allocation54_spill] sm:$0xff] %v10648_v46  ;;  %v10652_v40 = vpop.permute.xlu1 %7410  ;;  %v2617_v46 = vld [vmem:[#allocation3 + $0x62] sm:$0xff] }
 0x3f5   : > { %13039 = vst [vmem:[#allocation61_spill] sm:$0xff] %v10650_v23  ;;  %v2600_v23 = vld [vmem:[#allocation3 + $0x111] sm:$0xff]  ;;  %v7649_v44 = vpack.i.bf16 %v2618_v25, %v2617_v46  ;;  %v2601_v25 = vld [vmem:[#allocation3 + $0x121] sm:$0xff] }
 0x3f6   : > { %v7654_v29 = vpack.i.bf16 %v2600_v23, %v2599_v49 }
 0x3f9   : > { %7630 = vrot.lane.b32.xlu0 %v7629_v19, %s8443_s23  ;;  %7640 = vrot.lane.b32.xlu2 %v7639_v18, %s8443_s23  ;;  %v2619_v18 = vld [vmem:[#allocation3 + $0x7a] sm:$0xff] }
 0x3fa   : > { %7635 = vrot.lane.b32.xlu1 %v7634_v21, %s8444_s24  ;;  %v2620_v21 = vld [vmem:[#allocation3 + $0x82] sm:$0xff] }
 0x3fb   : > { %v10657_v0 = vpop.permute.xlu0 %7420  ;;  %v10659_v54 = vpop.permute.xlu2 %7475  ;;  %v7659_v5 = vpack.i.bf16 %v2620_v21, %v2619_v18  ;;  %v2607_v18 = vld [vmem:[#allocation3 + $0x169] sm:$0xff] }
 0x3fc   : > { %13040 = vst [vmem:[#allocation79_spill] sm:$0xff] %v10657_v0  ;;  %v10661_v11 = vpop.permute.xlu1 %7425  ;;  %v2602_v0 = vld [vmem:[#allocation3 + $0x129] sm:$0xff] }
 0x3fd   : > { %13041 = vst [vmem:[#allocation65_spill] sm:$0xff] %v10659_v54  ;;  %v2603_v54 = vld [vmem:[#allocation3 + $0x139] sm:$0xff]  ;;  %v7664_v46 = vpack.i.bf16 %v2602_v0, %v2601_v25  ;;  %v2605_v0 = vld [vmem:[#allocation3 + $0x151] sm:$0xff] }
 0x3fe   : > { %13042 = vst [vmem:[#allocation17_spill] sm:$0xff] %v10661_v11  ;;  %v2604_v11 = vld [vmem:[#allocation3 + $0x141] sm:$0xff]  ;;  %v7679_v21 = vpack.i.bf16 %v2606_v8, %v2605_v0  ;;  %v2623_v25 = vld [vmem:[#allocation3 + $0xaa] sm:$0xff]  ;;  %v2611_v8 = vld [vmem:[#allocation3 + $0x199] sm:$0xff] }
 0x3ff   : > { %v7669_v23 = vpack.i.bf16 %v2604_v11, %v2603_v54  ;;  %v2629_v0 = vld [vmem:[#allocation3 + $0xf2] sm:$0xff] }
 0x401   : > { %7645 = vrot.lane.b32.xlu0 %v7644_v12, %s8443_s23  ;;  %7655 = vrot.lane.b32.xlu2 %v7654_v29, %s8443_s23  ;;  %v2621_v29 = vld [vmem:[#allocation3 + $0x92] sm:$0xff] }
 0x402   : > { %7650 = vrot.lane.b32.xlu1 %v7649_v44, %s8444_s24  ;;  %v2622_v44 = vld [vmem:[#allocation3 + $0x9a] sm:$0xff] }
 0x403   : > { %v10666_v58 = vpop.permute.xlu0 %7435  ;;  %v10668_v60 = vpop.permute.xlu2 %7490  ;;  %v7674_v54 = vpack.i.bf16 %v2622_v44, %v2621_v29  ;;  %v2612_v44 = vld [vmem:[#allocation3 + $0x1a1] sm:$0xff] }
 0x404   : > { %v10670_v19 = vpop.permute.xlu1 %7440 }
 0x405   : > { %13043 = vst [vmem:[#allocation24_spill] sm:$0xff] %v10670_v19  ;;  %v2608_v19 = vld [vmem:[#allocation3 + $0x171] sm:$0xff] }
 0x406   : > { %v7684_v11 = vpack.i.bf16 %v2608_v19, %v2607_v18 }
 0x409   : > { %7660 = vrot.lane.b32.xlu0 %v7659_v5, %s8444_s24  ;;  %7670 = vrot.lane.b32.xlu2 %v7669_v23, %s8443_s23 }
 0x40a   : > { %7665 = vrot.lane.b32.xlu1 %v7664_v46, %s8443_s23 }
 0x40b   : > { %v10675_v37 = vpop.permute.xlu0 %7450  ;;  %v10677_v49 = vpop.permute.xlu2 %7505 }
 0x40c   : > { %13044 = vst [vmem:[#allocation26_spill] sm:$0xff] %v10675_v37  ;;  %v10679_v12 = vpop.permute.xlu1 %7455  ;;  %v2626_v37 = vld [vmem:[#allocation3 + $0xca] sm:$0xff] }
 0x40d   : > { %13045 = vst [vmem:[#allocation39_spill] sm:$0xff] %v10677_v49  ;;  %v2624_v49 = vld [vmem:[#allocation3 + $0xb2] sm:$0xff] }
 0x40e   : > { %13046 = vst [vmem:[#allocation52_spill] sm:$0xff] %v10679_v12  ;;  %v2625_v12 = vld [vmem:[#allocation3 + $0xc2] sm:$0xff]  ;;  %v7689_v29 = vpack.i.bf16 %v2624_v49, %v2623_v25  ;;  %v2627_v49 = vld [vmem:[#allocation3 + $0xda] sm:$0xff] }
 0x40f   : > { %v7699_v19 = vpack.i.bf16 %v2626_v37, %v2625_v12  ;;  %v2628_v37 = vld [vmem:[#allocation3 + $0xe2] sm:$0xff] }
 0x410   : > { %v7709_v25 = vpack.i.bf16 %v2628_v37, %v2627_v49 }
 0x411   : > { %7675 = vrot.lane.b32.xlu0 %v7674_v54, %s8444_s24  ;;  %7685 = vrot.lane.b32.xlu2 %v7684_v11, %s8443_s23 }
 0x412   : > { %7680 = vrot.lane.b32.xlu1 %v7679_v21, %s8443_s23  ;;  %v2630_v21 = vld [vmem:[#allocation3 + $0xfa] sm:$0xff] }
 0x413   : > { %v10684_v5 = vpop.permute.xlu0 %7465  ;;  %v10686_v23 = vpop.permute.xlu2 %7520  ;;  %v7714_v12 = vpack.i.bf16 %v2630_v21, %v2629_v0 }
 0x414   : > { %13047 = vst [vmem:[#allocation57_spill] sm:$0xff] %v10684_v5  ;;  %v10688_v46 = vpop.permute.xlu1 %7470  ;;  %v7704_v5 = vpack.i.bf16 %v2612_v44, %v2611_v8  ;;  %v2636_v8 = vld [vmem:[#allocation3 + $0x142] sm:$0xff] }
 0x415   : > { %13048 = vst [vmem:[#allocation10_spill] sm:$0xff] %v10686_v23  ;;  %v2633_v44 = vld [vmem:[#allocation3 + $0x122] sm:$0xff] }
 0x416   : > { %13049 = vst [vmem:[#allocation18_spill] sm:$0xff] %v10688_v46  ;;  %v2635_v46 = vld [vmem:[#allocation3 + $0x13a] sm:$0xff] }
 0x417   : > { %v7729_v21 = vpack.i.bf16 %v2636_v8, %v2635_v46  ;;  %v2643_v46 = vld [vmem:[#allocation3 + $0x19a] sm:$0xff] }
 0x419   : > { %7690 = vrot.lane.b32.xlu0 %v7689_v29, %s8444_s24  ;;  %7700 = vrot.lane.b32.xlu2 %v7699_v19, %s8444_s24  ;;  %v2631_v19 = vld [vmem:[#allocation3 + $0x10a] sm:$0xff] }
 0x41a   : > { %7695 = vrot.lane.b32.xlu1 %v10495_v2, %s8443_s23 }
 0x41b   : > { %v10694_v18 = vpop.permute.xlu0 %7480  ;;  %v10696_v54 = vpop.permute.xlu2 %7535 }
 0x41c   : > { %13050 = vst [vmem:[#allocation22_spill] sm:$0xff] %v10694_v18  ;;  %v10698_v11 = vpop.permute.xlu1 %7485  ;;  %v2632_v18 = vld [vmem:[#allocation3 + $0x112] sm:$0xff] }
 0x41d   : > { %13051 = vst [vmem:[#allocation32_spill] sm:$0xff] %v10696_v54  ;;  %v7719_v0 = vpack.i.bf16 %v2632_v18, %v2631_v19 }
 0x41e   : > { %13052 = vst [vmem:[#allocation41_spill] sm:$0xff] %v10698_v11  ;;  %v2634_v11 = vld [vmem:[#allocation3 + $0x12a] sm:$0xff] }
 0x41f   : > { %v7724_v49 = vpack.i.bf16 %v2634_v11, %v2633_v44  ;;  %v2644_v11 = vld [vmem:[#allocation3 + $0x1a2] sm:$0xff]  ;;  %v3953_v44 = vld [vmem:[%s12677_s3 + $0x20] sm:$0xf] }
 0x421   : > { %7705 = vrot.lane.b32.xlu0 %v7704_v5, %s8443_s23  ;;  %7715 = vrot.lane.b32.xlu2 %v7714_v12, %s8444_s24 }
 0x422   : > { %7710 = vrot.lane.b32.xlu1 %v7709_v25, %s8444_s24  ;;  %v2637_v25 = vld [vmem:[#allocation3 + $0x152] sm:$0xff] }
 0x423   : > { %v10703_v2 = vpop.permute.xlu0 %7495  ;;  %v10705_v29 = vpop.permute.xlu2 %7550 }
 0x424   : > { %13053 = vst [vmem:[#allocation45_spill] sm:$0xff] %v10703_v2  ;;  %v10707_v54 = vpop.permute.xlu1 %7500  ;;  %v2640_v2 = vld [vmem:[#allocation3 + $0x172] sm:$0xff] }
 0x425   : > { %13054 = vst [vmem:[#allocation67_spill] sm:$0xff] %v10705_v29  ;;  %v2639_v29 = vld [vmem:[#allocation3 + $0x16a] sm:$0xff] }
 0x426   : > { %13055 = vst [vmem:[#allocation19_spill] sm:$0xff] %v10707_v54  ;;  %v2638_v54 = vld [vmem:[#allocation3 + $0x15a] sm:$0xff]  ;;  %v7739_v18 = vpack.i.bf16 %v2640_v2, %v2639_v29  ;;  %v3975_v2 = vunpack.c.l.b16 %v3953_v44  ;;  %v6437_v29 = vld [vmem:[%s12677_s3 + $0x18] sm:$0xff] }
 0x427   : > { %v7734_v23 = vpack.i.bf16 %v2638_v54, %v2637_v25  ;;  %v7749_v54 = vpack.i.bf16 %v2644_v11, %v2643_v46  ;;  %v7117_v46 = vunpack.i.l.bf16 %v10327_v27  ;;  %v7122_v11 = vunpack.i.l.bf16 %v10402_v61  ;;  %v6436_v44 = vld [vmem:[%s12677_s3 + $0x10] sm:$0xff] }
 0x429   : > { %7720 = vrot.lane.b32.xlu0 %v7719_v0, %s8444_s24  ;;  %7730 = vrot.lane.b32.xlu2 %v7729_v21, %s8444_s24 }
 0x42a   : > { %7725 = vrot.lane.b32.xlu1 %v7724_v49, %s8444_s24 }
 0x42b   : > { %v10712_v5 = vpop.permute.xlu0 %7510  ;;  %v10714_v37 = vpop.permute.xlu2 %7565 }
 0x42c   : > { %13056 = vst [vmem:[#allocation25_spill] sm:$0xff] %v10712_v5  ;;  %v10716_v12 = vpop.permute.xlu1 %7515 }
 0x431   : > { %7735 = vrot.lane.b32.xlu0 %v7734_v23, %s8444_s24  ;;  %7745 = vrot.lane.b32.xlu2 %v10565_v9, %s8444_s24  ;;  %v3980_v23 = vpack.c.b16 %v3975_v2, %v3975_v2  ;;  %v2357_v2 = vld [vmem:[#allocation3 + $0x8] sm:$0xff] }
 0x432   : > { %7740 = vrot.lane.b32.xlu1 %v7739_v18, %s8444_s24  ;;  %v7118_v18 = vunpack.i.h.bf16 %v10327_v27 }
 0x433   : > { %v10722_v19 = vpop.permute.xlu0 %7525  ;;  %v10724_v8 = vpop.permute.xlu2 %7580  ;;  %v4036_v9 = vsel %vm4034_vm14, %v3980_v23, 0  ;;  %v7123_v23 = vunpack.i.h.bf16 %v10402_v61 }
 0x434   : > { %13057 = vst [vmem:[#allocation28_spill] sm:$0xff] %v10722_v19  ;;  %v10729_v0 = vpop.permute.xlu1 %7530  ;;  %4041 = vmatpush.bf16.msra.mxu1 %v4036_v9  ;;  %6444 = vmatpush.bf16.msrb.mxu3 %v4036_v9  ;;  %v7132_v9 = vunpack.i.l.bf16 %v10362_v6  ;;  %v3670_v5 = vsel %vm380_vm3, %v2357_v2, %v7118_v18  ;;  %v7137_v18 = vunpack.i.l.bf16 %v10424_v39  ;;  %v7157_v2 = vunpack.i.l.bf16 %v10440_v31 }
 0x435   : > { %13058 = vst [vmem:[#allocation42_spill] sm:$0xff] %v10724_v8  ;;  %v7127_v8 = vunpack.i.l.bf16 %v10400_v43  ;;  %v3672_v61 = vsel %vm380_vm3, %v10252_v36, %v7123_v23  ;;  %v7177_v36 = vunpack.i.l.bf16 %v10459_v1  ;;  %v7178_v19 = vunpack.i.h.bf16 %v10459_v1  ;;  %v13066_v1 = vld [vmem:[#allocation5_spill] sm:$0xff] }
 0x436   : > { %13059 = vst [vmem:[#allocation55_spill] sm:$0xff] %v10729_v0  ;;  %v6435_v0 = vld [vmem:[%s12677_s3 + $0x8] sm:$0xff]  ;;  %v3677_v13 = vsel %vm380_vm3, %v13066_v1, %v7137_v18 }
 0x438   : > { %4042 = vmatpush.bf16.msra.mxu1 %v6437_v29  ;;  %6445 = vmatpush.bf16.msrb.mxu3 %v6437_v29  ;;  %v7128_v29 = vunpack.i.h.bf16 %v10400_v43 }
 0x439   : > { %7750 = vrot.lane.b32.xlu0 %v7749_v54, %s8444_s24  ;;  %v2356_v54 = vld [vmem:[#allocation3] sm:$0xff] }
 0x43a   : > { %v3669_v27 = vsel %vm380_vm3, %v2356_v54, %v7117_v46 }
 0x43b   : > { %v10735_v21 = vpop.permute.xlu0 %7540  ;;  %v10737_v49 = vpop.permute.xlu2 %7595 }
 0x43c   : > { %13060 = vst [vmem:[#allocation60_spill] sm:$0xff] %v10735_v21  ;;  %v10739_v25 = vpop.permute.xlu1 %7545  ;;  %v3671_v21 = vsel %vm380_vm3, %v10259_v48, %v7122_v11  ;;  %4043 = vmatpush.bf16.msra.mxu1 %v6436_v44  ;;  %6446 = vmatpush.bf16.msrb.mxu3 %v6436_v44  ;;  %v3675_v48 = vsel %vm380_vm3, %v10254_v35, %v7132_v9  ;;  %v7158_v11 = vunpack.i.h.bf16 %v10440_v31  ;;  %v7172_v44 = vunpack.i.l.bf16 %v10416_v3 }
 0x43d   : > { %13061 = vst [vmem:[#allocation20_spill] sm:$0xff] %v10739_v25  ;;  %v7133_v25 = vunpack.i.h.bf16 %v10362_v6  ;;  %v7138_v6 = vunpack.i.h.bf16 %v10424_v39  ;;  %v3673_v35 = vsel %vm380_vm3, %v10256_v55, %v7127_v8  ;;  %v7173_v9 = vunpack.i.h.bf16 %v10416_v3 }
 0x43e   : > { %v7143_v31 = vunpack.i.h.bf16 %v10418_v62  ;;  %v7187_v3 = vunpack.i.l.bf16 %v10434_v20  ;;  %v10795_v8 = vsel %vm1944_vm6, %v3670_v5, %v7158_v11  ;;  %v10808_v18 = vsel %vm1944_vm6, %v3673_v35, %v7172_v44  ;;  %v13068_v11 = vld [vmem:[#allocation6_spill] sm:$0xff] }
 0x43f   : > { %v3676_v43 = vsel %vm380_vm3, %v10248_v26, %v7133_v25  ;;  %v6434_v26 = vld [vmem:[%s12677_s3] sm:$0xff] }
 0x440   : > { %4044 = vmatpush.bf16.msra.mxu1 %v6435_v0  ;;  %v13065_v25 = vld [vmem:[#allocation7_spill] sm:$0xff]  ;;  %6447 = vmatpush.bf16.msrb.mxu3 %v6435_v0  ;;  %v7162_v0 = vunpack.i.l.bf16 %v10450_v17 }
 0x441   : > { %v3674_v39 = vsel %vm380_vm3, %v13065_v25, %v7128_v29  ;;  %v7188_v29 = vunpack.i.h.bf16 %v10434_v20  ;;  %v10805_v25 = vsel %vm1944_vm6, %v3676_v43, %v7178_v19  ;;  %v7193_v43 = vunpack.i.h.bf16 %v10471_v4 }
 0x442   : > { %v3706_v5 = vsel %vm1944_vm6, %v3674_v39, %v7173_v9  ;;  %v13072_v9 = vld [vmem:[#allocation15_spill] sm:$0xff] }
 0x443   : > { %v10763_v46 = vpop.permute.xlu0 %7555  ;;  %v10765_v54 = vpop.permute.xlu2 %7610 }
 0x444   : > { %13062 = vst [vmem:[#allocation23_spill] sm:$0xff] %v10763_v46  ;;  %v10772_v23 = vpop.permute.xlu1 %7560  ;;  %v10801_v46 = vsel %vm1944_vm6, %v3675_v48, %v7177_v36  ;;  %v13070_v36 = vld [vmem:[#allocation53_spill] sm:$0xff]  ;;  %4045 = vmatpush.bf16.msra.mxu1 %v6434_v26  ;;  %6448 = vmatpush.bf16.msrb.mxu3 %v6434_v26  ;;  %v7233_v26 = vunpack.i.h.bf16 %v10473_v59 }
 0x445   : > { %13063 = vst [vmem:[#allocation33_spill] sm:$0xff] %v10765_v54  ;;  %v7142_v54 = vunpack.i.l.bf16 %v10418_v62  ;;  %v10798_v62 = vsel %vm1944_vm6, %v3669_v27, %v7157_v2  ;;  %v3680_v27 = vsel %vm380_vm3, %v13068_v11, %v7143_v31  ;;  %v13069_v2 = vld [vmem:[#allocation14_spill] sm:$0xff]  ;;  %v7183_v31 = vunpack.i.h.bf16 %v10467_v38 }
 0x446   : > { %13064 = vst [vmem:[#allocation43_spill] sm:$0xff] %v10772_v23  ;;  %v13067_v23 = vld [vmem:[#allocation8_spill] sm:$0xff]  ;;  %v10829_v35 = vsel %vm1944_vm6, %v3680_v27, %v7188_v29  ;;  %v7182_v11 = vunpack.i.l.bf16 %v10467_v38  ;;  %v7203_v29 = vunpack.i.h.bf16 %v10483_v53  ;;  %v7202_v27 = vunpack.i.l.bf16 %v10483_v53 }
 0x447   : > { %v3678_v55 = vsel %vm380_vm3, %v13067_v23, %v7138_v6  ;;  %v7163_v6 = vunpack.i.h.bf16 %v10450_v17  ;;  %v3679_v48 = vsel %vm380_vm3, %v13069_v2, %v7142_v54  ;;  %v7192_v17 = vunpack.i.l.bf16 %v10471_v4 }
 0x448   : > { %v10819_v19 = vsel %vm1944_vm6, %v3679_v48, %v7187_v3  ;;  %v3703_v4 = vsel %vm1944_vm6, %v3671_v21, %v7162_v0  ;;  %v7232_v2 = vunpack.i.l.bf16 %v10473_v59  ;;  %v7218_v48 = vunpack.i.h.bf16 %v10493_v45 }
 0x449   : > { %v3704_v3 = vsel %vm1944_vm6, %v3672_v61, %v7163_v6  ;;  %v7228_v54 = vunpack.i.h.bf16 %v10461_v32  ;;  %v3684_v23 = vsel %vm380_vm3, %v13072_v9, %v7193_v43  ;;  %v13073_v61 = vld [vmem:[#allocation9_spill] sm:$0xff]  ;;  %v7217_v38 = vunpack.i.l.bf16 %v10493_v45 }
 0x44a   : > { %v3683_v21 = vsel %vm380_vm3, %v13073_v61, %v7192_v17  ;;  %v7227_v6 = vunpack.i.l.bf16 %v10461_v32  ;;  %v3710_v59 = vsel %vm1944_vm6, %v3678_v55, %v7183_v31  ;;  %v7248_v0 = vunpack.i.h.bf16 %v10485_v56  ;;  %v13074_v55 = vld [vmem:[#allocation13_spill] sm:$0xff]  ;;  %v13075_v31 = vld [vmem:[#allocation12_spill] sm:$0xff] }
 0x44b   : > { %v10824_v44 = vpop.permute.xlu0 %7570  ;;  %v10826_v39 = vpop.permute.xlu2 %7625  ;;  %v7247_v53 = vunpack.i.l.bf16 %v10485_v56  ;;  %v3709_v20 = vsel %vm1944_vm6, %v3677_v13, %v7182_v11  ;;  %v7253_v43 = vunpack.i.h.bf16 %v10497_v14  ;;  %v7252_v9 = vunpack.i.l.bf16 %v10497_v14 }
 0x44c   : > { %13071 = vst [vmem:[#allocation47_spill] sm:$0xff] %v10826_v39  ;;  %v10834_v1 = vpop.permute.xlu1 %7575  ;;  %v10856_v39 = vsel %vm2010_vm8, %v3703_v4, %v7232_v2  ;;  %v10861_v17 = vsel %vm2010_vm8, %v3704_v3, %v7233_v26  ;;  %v10864_v32 = vsel %vm1944_vm6, %v3684_v23, %v7203_v29  ;;  %v3715_v45 = vsel %vm1944_vm6, %v3683_v21, %v7202_v27  ;;  %v13076_v23 = vld [vmem:[#allocation36_spill] sm:$0xff]  ;;  %v13077_v29 = vld [vmem:[#allocation49_spill] sm:$0xff] }
 0x44d   : > { %v3686_v56 = vsel %vm380_vm3, %v13074_v55, %v7218_v48  ;;  %v3685_v13 = vsel %vm380_vm3, %v13075_v31, %v7217_v38  ;;  %v7238_v4 = vunpack.i.h.bf16 %v10505_v28  ;;  %v7237_v11 = vunpack.i.l.bf16 %v10505_v28 }
 0x44e   : > { %v7272_v14 = vunpack.i.l.bf16 %v10515_v30  ;;  %v10880_v26 = vsel %vm380_vm3, %v13076_v23, %v7248_v0  ;;  %v10884_v27 = vsel %vm380_vm3, %v13077_v29, %v7247_v53  ;;  %v7223_v48 = vunpack.i.h.bf16 %v10507_v10 }
 0x44f   : > { %v7222_v61 = vunpack.i.l.bf16 %v10507_v10  ;;  %v10891_v28 = vsel %vm2010_vm8, %v3709_v20, %v7252_v9  ;;  %v10894_v38 = vsel %vm2010_vm8, %v3710_v59, %v7253_v43  ;;  %v7278_v55 = vunpack.i.h.bf16 %v10543_v47 }
 0x450   : > { %v7277_v0 = vunpack.i.l.bf16 %v10543_v47  ;;  %v10899_v31 = vsel %vm1944_vm6, %v3685_v13, %v7227_v6  ;;  %v10902_v53 = vsel %vm1944_vm6, %v3686_v56, %v7228_v54  ;;  %v7298_v10 = vunpack.i.h.bf16 %v10567_v63  ;;  %v13079_v56 = vld [vmem:[#allocation76_spill] sm:$0xff] }
 0x451   : > { %v7297_v23 = vunpack.i.l.bf16 %v10567_v63  ;;  %v10908_v20 = vsel %vm2010_vm8, %v10808_v18, %v7237_v11  ;;  %v10911_v59 = vsel %vm2010_vm8, %v3706_v5, %v7238_v4  ;;  %v10915_v47 = vsel %vm2010_vm8, %v3715_v45, %v7272_v14  ;;  %v13080_v4 = vld [vmem:[#allocation73_spill] sm:$0xff]  ;;  %v13081_v11 = vld [vmem:[#allocation51_spill] sm:$0xff]  ;;  %v13082_v14 = vld [vmem:[#allocation66_spill] sm:$0xff] }
 0x452   : > { %v3734_v54 = vsel %vm2010_vm8, %v10795_v8, %v7223_v48  ;;  %v3733_v6 = vsel %vm2010_vm8, %v10798_v62, %v7222_v61  ;;  %v7288_v63 = vunpack.i.h.bf16 %v10541_v24  ;;  %v7287_v9 = vunpack.i.l.bf16 %v10541_v24 }
 0x453   : > { %v10874_v2 = vpop.permute.xlu0 %7585  ;;  %v10876_v3 = vpop.permute.xlu2 %7640  ;;  %v3690_v13 = vsel %vm380_vm3, %v13079_v56, %v7278_v55  ;;  %v3689_v45 = vsel %vm380_vm3, %v13080_v4, %v7277_v0  ;;  %v3692_v8 = vsel %vm380_vm3, %v13081_v11, %v7298_v10  ;;  %v3691_v62 = vsel %vm380_vm3, %v13082_v14, %v7297_v23 }
 0x454   : > { %v10888_v21 = vpop.permute.xlu1 %7590  ;;  %v7333_v29 = vunpack.i.h.bf16 %v10577_v33  ;;  %v7332_v24 = vunpack.i.l.bf16 %v10577_v33  ;;  %v7303_v48 = vunpack.i.h.bf16 %v10527_v41  ;;  %v7302_v61 = vunpack.i.l.bf16 %v10527_v41 }
 0x455   : > { %13078 = vst [vmem:[#allocation70_spill] sm:$0xff] %v10888_v21  ;;  %v7342_v55 = vunpack.i.l.bf16 %v10597_v7  ;;  %v10944_v10 = vsel %vm1944_vm6, %v3690_v13, %v7288_v63  ;;  %v3721_v23 = vsel %vm1944_vm6, %v3689_v45, %v7287_v9  ;;  %v7343_v4 = vunpack.i.h.bf16 %v10597_v7 }
 0x456   : > { %v7412_v33 = vunpack.i.l.bf16 %v10652_v40  ;;  %v7283_v41 = vunpack.i.h.bf16 %v10555_v16  ;;  %v3723_v14 = vsel %vm1944_vm6, %v3691_v62, %v7302_v61  ;;  %v3724_v5 = vsel %vm1944_vm6, %v3692_v8, %v7303_v48 }
 0x457   : > { %v7413_v43 = vunpack.i.h.bf16 %v10652_v40  ;;  %v3765_v18 = vsel %vm2076_vm10, %v3733_v6, %v7332_v24  ;;  %v3766_v63 = vsel %vm2076_vm10, %v3734_v54, %v7333_v29  ;;  %v7438_v9 = vunpack.i.h.bf16 %v10666_v58 }
 0x458   : > { %v7437_v7 = vunpack.i.l.bf16 %v10666_v58  ;;  %v3755_v13 = vsel %vm2010_vm8, %v3723_v14, %v7342_v55  ;;  %v7493_v45 = vunpack.i.h.bf16 %v10668_v60  ;;  %v7492_v21 = vunpack.i.l.bf16 %v10668_v60 }
 0x459   : > { %v7517_v62 = vunpack.i.l.bf16 %v10716_v12  ;;  %v3756_v8 = vsel %vm2010_vm8, %v3724_v5, %v7343_v4  ;;  %v3787_v40 = vsel %vm2076_vm10, %v3755_v13, %v7412_v33  ;;  %v7518_v6 = vunpack.i.h.bf16 %v10716_v12 }
 0x45a   : > { %v3788_v54 = vsel %vm2076_vm10, %v3756_v8, %v7413_v43  ;;  %v7573_v58 = vunpack.i.h.bf16 %v10824_v44  ;;  %v7572_v29 = vunpack.i.l.bf16 %v10824_v44  ;;  %v3798_v24 = vsel %vm3797_vm15, %v3765_v18, %v7437_v7 }
 0x45b   : > { %v10939_v56 = vpop.permute.xlu0 %7600  ;;  %v10941_v0 = vpop.permute.xlu2 %7655  ;;  %v3799_v60 = vsel %vm3797_vm15, %v3766_v63, %v7438_v9  ;;  %v7598_v48 = vunpack.i.h.bf16 %v10737_v49  ;;  %v7597_v5 = vunpack.i.l.bf16 %v10737_v49  ;;  %v3820_v61 = vsel %vm3797_vm15, %v3787_v40, %v7492_v21 }
 0x45c   : > { %v10949_v11 = vpop.permute.xlu1 %7605  ;;  %v3821_v55 = vsel %vm3797_vm15, %v3788_v54, %v7493_v45  ;;  %v3831_v12 = vsel %vm3830_vm1, %v3798_v24, %v7517_v62  ;;  %v3832_v44 = vsel %vm3830_vm1, %v3799_v60, %v7518_v6  ;;  %v3853_v63 = vsel %vm3830_vm1, %v3820_v61, %v7572_v29 }
 0x45d   : > { %v3854_v49 = vsel %vm3830_vm1, %v3821_v55, %v7573_v58  ;;  %v3864_v45 = vsel %vm3863_vm2, %v3831_v12, %v7597_v5  ;;  %v3865_v62 = vsel %vm3863_vm2, %v3832_v44, %v7598_v48  ;;  %v7282_v8 = vunpack.i.l.bf16 %v10555_v16 }
 0x45e   : > { %v7307_v54 = vunpack.i.l.bf16 %v10539_v15  ;;  %v7328_v58 = vunpack.i.h.bf16 %v10563_v51  ;;  %v7327_v29 = vunpack.i.l.bf16 %v10563_v51  ;;  %v7338_v48 = vunpack.i.h.bf16 %v10587_v52 }
 0x45f   : > { %v7337_v16 = vunpack.i.l.bf16 %v10587_v52  ;;  %v7353_v61 = vunpack.i.h.bf16 %v10601_v22  ;;  %v7352_v55 = vunpack.i.l.bf16 %v10601_v22  ;;  %v3749_v44 = vsel %vm2010_vm8, %v10899_v31, %v7282_v8  ;;  %v13088_v31 = vld [vmem:[#allocation64_spill] sm:$0xff] }
 0x460   : > { %v11002_v12 = vsel %vm2010_vm8, %v3721_v23, %v7307_v54  ;;  %v3750_v52 = vsel %vm2010_vm8, %v10902_v53, %v7283_v41  ;;  %v7348_v8 = vunpack.i.h.bf16 %v13088_v31  ;;  %v13089_v54 = vld [vmem:[#allocation24_spill] sm:$0xff] }
 0x463   : > { %v10976_v43 = vpop.permute.xlu0 %7615  ;;  %v7671_v4 = vpop.permute.xlu2 %7670 }
 0x464   : > { %v7673_v33 = vunpack.i.h.bf16 %v7671_v4  ;;  %v7672_v18 = vunpack.i.l.bf16 %v7671_v4  ;;  %v7621_v14 = vpop.permute.xlu1 %7620  ;;  %v13083_v4 = vunpack.i.h.bf16 %v10539_v15  ;;  %v13085_v15 = vld [vmem:[#allocation62_spill] sm:$0xff] }
 0x465   : > { %v7623_v9 = vunpack.i.h.bf16 %v7621_v14  ;;  %v7622_v21 = vunpack.i.l.bf16 %v7621_v14  ;;  %v13086_v14 = vld [vmem:[#allocation78_spill] sm:$0xff] }
 0x466   : > { %v10982_v7 = vsel %vm3863_vm2, %v3853_v63, %v7672_v18  ;;  %v10985_v13 = vsel %vm3863_vm2, %v3854_v49, %v7673_v33  ;;  %v11008_v51 = vsel %vm2010_vm8, %v10944_v10, %v13083_v4  ;;  %v3694_v10 = vsel %vm380_vm3, %v13085_v15, %v7328_v58  ;;  %v13087_v49 = vld [vmem:[#allocation77_spill] sm:$0xff]  ;;  %v13092_v15 = vld [vmem:[#allocation10_spill] sm:$0xff] }
 0x467   : > { %v3897_v40 = vsel %vm3896_vm12, %v3864_v45, %v7622_v21  ;;  %v3898_v6 = vsel %vm3896_vm12, %v3865_v62, %v7623_v9  ;;  %v3693_v63 = vsel %vm380_vm3, %v13086_v14, %v7327_v29  ;;  %v7347_v21 = vunpack.i.l.bf16 %v13088_v31  ;;  %v13091_v4 = vld [vmem:[#allocation29_spill] sm:$0xff]  ;;  %v13093_v31 = vld [vmem:[#allocation75_spill] sm:$0xff]  ;;  %v13094_v62 = vld [vmem:[#allocation80_spill] sm:$0xff] }
 0x468   : > { %v3929_v24 = vpack.c.bf16 %v3898_v6, %v3897_v40  ;;  %v3725_v53 = vsel %vm1944_vm6, %v3693_v63, %v7337_v16  ;;  %v3726_v41 = vsel %vm1944_vm6, %v3694_v10, %v7338_v48  ;;  %v11033_v40 = vsel %vm2076_vm10, %v10908_v20, %v7352_v55 }
 0x469   : > { %v11037_v6 = vsel %vm2076_vm10, %v10911_v59, %v7353_v61  ;;  %v7443_v58 = vunpack.i.h.bf16 %v13089_v54  ;;  %v7442_v29 = vunpack.i.l.bf16 %v13089_v54  ;;  %v7378_v48 = vunpack.i.h.bf16 %v13091_v4 }
 0x46a   : > { %6382 = vmatmul.msk.bf16.vlgmr.msra.gmra.mxu1 %vm3985_vm13, %v3929_v24  ;;  %v13090_v24 = vld [vmem:[#allocation68_spill] sm:$0xff]  ;;  %v7523_v10 = vunpack.i.h.bf16 %v13092_v15  ;;  %v7522_v14 = vunpack.i.l.bf16 %v13092_v15  ;;  %v3767_v20 = vsel %vm2076_vm10, %v10856_v39, %v7347_v21  ;;  %v7377_v55 = vunpack.i.l.bf16 %v13091_v4  ;;  %v13095_v4 = vld [vmem:[#allocation50_spill] sm:$0xff] }
 0x46b   : > { %v11017_v23 = vpop.permute.xlu0 %7630  ;;  %v11019_v18 = vpop.permute.xlu2 %7685  ;;  %v7603_v59 = vunpack.i.h.bf16 %v10939_v56  ;;  %v7602_v61 = vunpack.i.l.bf16 %v10939_v56  ;;  %v3768_v63 = vsel %vm2076_vm10, %v10861_v17, %v7348_v8  ;;  %v3800_v33 = vsel %vm3797_vm15, %v3767_v20, %v7442_v29  ;;  %v13097_v29 = vld [vmem:[#allocation54_spill] sm:$0xff] }
 0x46c   : > { %13084 = vst [vmem:[#allocation21_spill] sm:$0xff] %v11017_v23  ;;  %v7636_v45 = vpop.permute.xlu1 %7635  ;;  %v3801_v39 = vsel %vm3797_vm15, %v3768_v63, %v7443_v58  ;;  %v11058_v21 = vsel %vm2010_vm8, %v3726_v41, %v7378_v48  ;;  %v7397_v56 = vunpack.i.l.bf16 %v13095_v4  ;;  %v3833_v5 = vsel %vm3830_vm1, %v3800_v33, %v7522_v14  ;;  %v13098_v14 = vld [vmem:[#allocation11_spill] sm:$0xff] }
 0x46d   : > { %v7638_v16 = vunpack.i.h.bf16 %v7636_v45  ;;  %v7637_v9 = vunpack.i.l.bf16 %v7636_v45  ;;  %v3834_v17 = vsel %vm3830_vm1, %v3801_v39, %v7523_v10  ;;  %v3757_v45 = vsel %vm2010_vm8, %v3725_v53, %v7377_v55  ;;  %v13099_v39 = vld [vmem:[#allocation65_spill] sm:$0xff] }
 0x46e   : > { %v7398_v22 = vunpack.i.h.bf16 %v13095_v4  ;;  %v3866_v58 = vsel %vm3863_vm2, %v3833_v5, %v7602_v61  ;;  %v3867_v41 = vsel %vm3863_vm2, %v3834_v17, %v7603_v59  ;;  %v7408_v48 = vunpack.i.h.bf16 %v13097_v29  ;;  %v13100_v4 = vld [vmem:[#allocation41_spill] sm:$0xff] }
 0x46f   : > { %v7407_v20 = vunpack.i.l.bf16 %v13097_v29  ;;  %v3899_v33 = vsel %vm3896_vm12, %v3866_v58, %v7637_v9  ;;  %v3900_v10 = vsel %vm3896_vm12, %v3867_v41, %v7638_v16  ;;  %v7448_v63 = vunpack.i.h.bf16 %v13098_v14  ;;  %v13101_v58 = vld [vmem:[#allocation23_spill] sm:$0xff] }
 0x470   : > { %v7478_v53 = vunpack.i.h.bf16 %v13099_v39  ;;  %v7477_v55 = vunpack.i.l.bf16 %v13099_v39  ;;  %v7487_v54 = vunpack.i.l.bf16 %v13100_v4  ;;  %v7447_v5 = vunpack.i.l.bf16 %v13098_v14 }
 0x471   : > { %v3781_v59 = vsel %vm2076_vm10, %v3749_v44, %v7397_v56  ;;  %v7488_v61 = vunpack.i.h.bf16 %v13100_v4  ;;  %v7567_v17 = vunpack.i.l.bf16 %v10714_v37  ;;  %v3782_v9 = vsel %vm2076_vm10, %v3750_v52, %v7398_v22 }
 0x472   : > { %v7558_v16 = vunpack.i.h.bf16 %v13101_v58  ;;  %v7557_v41 = vunpack.i.l.bf16 %v13101_v58  ;;  %v3930_v29 = vpack.c.bf16 %v3900_v10, %v3899_v33  ;;  %v3785_v39 = vsel %vm2076_vm10, %v11002_v12, %v7407_v20  ;;  %v13102_v33 = vld [vmem:[#allocation45_spill] sm:$0xff] }
 0x473   : > { %v7646_v8 = vpop.permute.xlu0 %7645  ;;  %v11063_v60 = vpop.permute.xlu2 %7700  ;;  %v3814_v44 = vsel %vm3797_vm15, %v3781_v59, %v7477_v55  ;;  %v3815_v56 = vsel %vm3797_vm15, %v3782_v9, %v7478_v53  ;;  %v3818_v4 = vsel %vm3797_vm15, %v3785_v39, %v7487_v54  ;;  %v7568_v52 = vunpack.i.h.bf16 %v10714_v37 }
 0x474   : > { %13096 = vst [vmem:[#allocation27_spill] sm:$0xff] %v11063_v60  ;;  %v11067_v15 = vpop.permute.xlu1 %7650  ;;  %v3786_v60 = vsel %vm2076_vm10, %v11008_v51, %v7408_v48  ;;  %v7648_v14 = vunpack.i.h.bf16 %v7646_v8  ;;  %v7647_v23 = vunpack.i.l.bf16 %v7646_v8  ;;  %v7498_v10 = vunpack.i.h.bf16 %v13102_v33 }
 0x475   : > { %v3819_v22 = vsel %vm3797_vm15, %v3786_v60, %v7488_v61  ;;  %v7497_v12 = vunpack.i.l.bf16 %v13102_v33  ;;  %v3851_v51 = vsel %vm3830_vm1, %v3818_v4, %v7567_v17  ;;  %v3847_v20 = vsel %vm3830_vm1, %v3814_v44, %v7557_v41 }
 0x476   : > { %v3848_v53 = vsel %vm3830_vm1, %v3815_v56, %v7558_v16  ;;  %v3880_v60 = vsel %vm3863_vm2, %v3847_v20, %v7647_v23  ;;  %v3852_v58 = vsel %vm3830_vm1, %v3819_v22, %v7568_v52  ;;  %v13104_v4 = vunpack.i.h.bf16 %v13093_v31 }
 0x477   : > { %v3881_v61 = vsel %vm3863_vm2, %v3848_v53, %v7648_v14  ;;  %v8416_v14 = vld [vmem:[#allocation3 + $0x140] sm:$0xff]  ;;  %v7362_v22 = vunpack.i.l.bf16 %v13093_v31  ;;  %v7608_v33 = vunpack.i.h.bf16 %v10949_v11  ;;  %v13106_v53 = vunpack.i.h.bf16 %v13094_v62 }
 0x478   : > { %v3696_v52 = vsel %vm380_vm3, %v8416_v14, %v13104_v4  ;;  %v3802_v31 = vsel %vm3797_vm15, %v11033_v40, %v7447_v5 }
 0x47a   : > { %6383 = vmatmul.msk.bf16.gmra.mxu1 %vm3985_vm13, %v3930_v29  ;;  %v13103_v29 = vld [vmem:[#allocation28_spill] sm:$0xff] }
 0x47b   : > { %v11099_v48 = vpop.permute.xlu0 %7660  ;;  %v7716_v8 = vpop.permute.xlu2 %7715  ;;  %v7528_v17 = vunpack.i.h.bf16 %v13103_v29  ;;  %v7527_v16 = vunpack.i.l.bf16 %v13103_v29 }
 0x47c   : > { %v7718_v54 = vunpack.i.h.bf16 %v7716_v8  ;;  %v7717_v55 = vunpack.i.l.bf16 %v7716_v8  ;;  %v7666_v37 = vpop.permute.xlu1 %7665  ;;  %v7607_v8 = vunpack.i.l.bf16 %v10949_v11  ;;  %v7578_v11 = vunpack.i.h.bf16 %v10834_v1 }
 0x47d   : > { %v7668_v59 = vunpack.i.h.bf16 %v7666_v37  ;;  %v7667_v9 = vunpack.i.l.bf16 %v7666_v37  ;;  %v7652_v37 = vunpack.i.l.bf16 %v11067_v15 }
 0x47e   : > { %v11108_v39 = vsel %vm3896_vm12, %v3880_v60, %v7717_v55  ;;  %v11111_v41 = vsel %vm3896_vm12, %v3881_v61, %v7718_v54  ;;  %v3790_v54 = vsel %vm2076_vm10, %v11058_v21, %v13106_v53  ;;  %v7653_v55 = vunpack.i.h.bf16 %v11067_v15 }
 0x47f   : > { %v11115_v44 = vsel %vm3863_vm2, %v3851_v51, %v7667_v9  ;;  %v11118_v56 = vsel %vm3863_vm2, %v3852_v58, %v7668_v59  ;;  %v3937_v23 = vpack.c.bf16 %v11111_v41, %v11108_v39  ;;  %v13105_v51 = vunpack.i.l.bf16 %v13094_v62 }
 0x480   : > { %v3803_v59 = vsel %vm3797_vm15, %v11037_v6, %v7448_v63  ;;  %v7577_v9 = vunpack.i.l.bf16 %v10834_v1  ;;  %v3823_v62 = vsel %vm3797_vm15, %v3790_v54, %v7498_v10  ;;  %v3835_v21 = vsel %vm3830_vm1, %v3802_v31, %v7527_v16 }
 0x481   : > { %v3789_v20 = vsel %vm2076_vm10, %v3757_v45, %v13105_v51  ;;  %v3836_v60 = vsel %vm3830_vm1, %v3803_v59, %v7528_v17  ;;  %v3868_v6 = vsel %vm3863_vm2, %v3835_v21, %v7607_v8  ;;  %v3856_v17 = vsel %vm3830_vm1, %v3823_v62, %v7578_v11  ;;  %v8417_v8 = vld [vmem:[#allocation3 + $0x138] sm:$0xff] }
 0x482   : > { %v3822_v45 = vsel %vm3797_vm15, %v3789_v20, %v7497_v12  ;;  %v3869_v63 = vsel %vm3863_vm2, %v3836_v60, %v7608_v33  ;;  %v3901_v12 = vsel %vm3896_vm12, %v3868_v6, %v7652_v37  ;;  %v3695_v33 = vsel %vm380_vm3, %v8417_v8, %v7362_v22  ;;  %v13113_v60 = vld [vmem:[#allocation35_spill] sm:$0xff] }
 0x483   : > { %v11147_v61 = vpop.permute.xlu0 %7675  ;;  %v7731_v15 = vpop.permute.xlu2 %7730  ;;  %v3902_v10 = vsel %vm3896_vm12, %v3869_v63, %v7653_v55  ;;  %v3855_v16 = vsel %vm3830_vm1, %v3822_v45, %v7577_v9  ;;  %v7402_v54 = vunpack.i.l.bf16 %v13090_v24  ;;  %v13108_v31 = vunpack.i.h.bf16 %v10515_v30 }
 0x484   : > { %v7733_v58 = vunpack.i.h.bf16 %v7731_v15  ;;  %v7732_v40 = vunpack.i.l.bf16 %v7731_v15  ;;  %v7681_v5 = vpop.permute.xlu1 %7680  ;;  %v13109_v59 = vunpack.i.l.bf16 %v10517_v42  ;;  %v13110_v9 = vunpack.i.h.bf16 %v10517_v42  ;;  %v13114_v42 = vld [vmem:[#allocation48_spill] sm:$0xff] }
 0x485   : > { %v7683_v29 = vunpack.i.h.bf16 %v7681_v5  ;;  %v7682_v1 = vunpack.i.l.bf16 %v7681_v5  ;;  %v3748_v22 = vsel %vm2010_vm8, %v10864_v32, %v13108_v31  ;;  %v13111_v62 = vunpack.i.h.bf16 %v10519_v57 }
 0x486   : > { %v11157_v14 = vsel %vm3896_vm12, %v10982_v7, %v7732_v40  ;;  %v11161_v4 = vsel %vm3896_vm12, %v10985_v13, %v7733_v58  ;;  %v13107_v7 = vld [vmem:[#allocation59_spill] sm:$0xff]  ;;  %v3931_v13 = vpack.c.bf16 %v3902_v10, %v3901_v12  ;;  %v3719_v11 = vsel %vm1944_vm6, %v10884_v27, %v13109_v59  ;;  %v13123_v59 = vld [vmem:[#allocation18_spill] sm:$0xff] }
 0x487   : > { %v11165_v51 = vsel %vm3863_vm2, %v3855_v16, %v7682_v1  ;;  %v11168_v20 = vsel %vm3863_vm2, %v3856_v17, %v7683_v29  ;;  %v3940_v53 = vpack.c.bf16 %v11161_v4, %v11157_v14  ;;  %v7373_v55 = vunpack.i.h.bf16 %v13107_v7  ;;  %v13120_v17 = vld [vmem:[#allocation46_spill] sm:$0xff] }
 0x488   : > { %v7372_v37 = vunpack.i.l.bf16 %v13107_v7  ;;  %v3720_v45 = vsel %vm1944_vm6, %v10880_v26, %v13110_v9  ;;  %v3740_v21 = vsel %vm2010_vm8, %v10805_v25, %v13111_v62  ;;  %v13112_v30 = vunpack.i.l.bf16 %v10519_v57 }
 0x489   : > { %v7263_v15 = vunpack.i.h.bf16 %v13113_v60  ;;  %v3728_v27 = vsel %vm1944_vm6, %v3696_v52, %v7373_v55  ;;  %v7313_v26 = vunpack.i.h.bf16 %v13114_v42  ;;  %v7312_v40 = vunpack.i.l.bf16 %v13114_v42  ;;  %v13121_v55 = vld [vmem:[#allocation31_spill] sm:$0xff] }
 0x48a   : > { %v3739_v32 = vsel %vm2010_vm8, %v10801_v46, %v13112_v30  ;;  %v3727_v58 = vsel %vm1944_vm6, %v3695_v33, %v7372_v37  ;;  %6384 = vmatmul.msk.bf16.gmra.mxu1 %vm3985_vm13, %v3931_v13  ;;  %v13115_v5 = vunpack.i.h.bf16 %v10553_v50  ;;  %v13116_v57 = vunpack.i.l.bf16 %v10553_v50  ;;  %v13122_v13 = vld [vmem:[#allocation26_spill] sm:$0xff]  ;;  %v13125_v30 = vld [vmem:[#allocation67_spill] sm:$0xff] }
 0x48b   : > { %v11207_v6 = vpop.permute.xlu0 %7690  ;;  %v13117_v63 = vunpack.i.l.bf16 %v13087_v49  ;;  %v13118_v29 = vunpack.i.h.bf16 %v13087_v49  ;;  %v13119_v10 = vunpack.i.h.bf16 %v13090_v24  ;;  %v7393_v8 = vunpack.i.h.bf16 %v13120_v17 }
 0x48c   : > { %v3752_v25 = vsel %vm2010_vm8, %v3720_v45, %v13115_v5  ;;  %v3751_v46 = vsel %vm2010_vm8, %v3719_v11, %v13116_v57  ;;  %v11223_v50 = vpop.permute.xlu1 %7695  ;;  %v7392_v33 = vunpack.i.l.bf16 %v13120_v17  ;;  %v3759_v7 = vsel %vm2010_vm8, %v3727_v58, %v7312_v40  ;;  %v13124_v45 = vld [vmem:[#allocation55_spill] sm:$0xff] }
 0x48d   : > { %v3771_v52 = vsel %vm2076_vm10, %v3739_v32, %v13117_v63  ;;  %v3772_v1 = vsel %vm2076_vm10, %v3740_v21, %v13118_v29  ;;  %v11216_v12 = vsel %vm2076_vm10, %v3751_v46, %v7402_v54  ;;  %v11221_v16 = vsel %vm2076_vm10, %v3752_v25, %v13119_v10 }
 0x48e   : > { %v11229_v49 = vsel %vm2010_vm8, %v3728_v27, %v7313_v26  ;;  %v7368_v37 = vunpack.i.h.bf16 %v13121_v55  ;;  %v7367_v54 = vunpack.i.l.bf16 %v13121_v55  ;;  %v7453_v24 = vunpack.i.h.bf16 %v13122_v13  ;;  %v13126_v27 = vld [vmem:[#allocation33_spill] sm:$0xff] }
 0x48f   : > { %v7452_v31 = vunpack.i.l.bf16 %v13122_v13  ;;  %v7473_v11 = vunpack.i.h.bf16 %v13123_v59  ;;  %v7472_v9 = vunpack.i.l.bf16 %v13123_v59  ;;  %v7533_v62 = vunpack.i.h.bf16 %v13124_v45 }
 0x490   : > { %v7532_v21 = vunpack.i.l.bf16 %v13124_v45  ;;  %v7553_v32 = vunpack.i.h.bf16 %v13125_v30  ;;  %v7552_v58 = vunpack.i.l.bf16 %v13125_v30  ;;  %v7613_v42 = vunpack.i.h.bf16 %v13126_v27  ;;  %v13128_v30 = vld [vmem:[#allocation22_spill] sm:$0xff] }
 0x491   : > { %v7612_v26 = vunpack.i.l.bf16 %v13126_v27  ;;  %v3779_v40 = vsel %vm2076_vm10, %v10915_v47, %v7392_v33  ;;  %v3780_v5 = vsel %vm2076_vm10, %v3748_v22, %v7393_v8  ;;  %v7663_v25 = vunpack.i.h.bf16 %v11099_v48 }
 0x492   : > { %v7662_v57 = vunpack.i.l.bf16 %v11099_v48  ;;  %v3804_v46 = vsel %vm3797_vm15, %v3771_v52, %v7452_v31  ;;  %v3805_v63 = vsel %vm3797_vm15, %v3772_v1, %v7453_v24  ;;  %v7643_v29 = vunpack.i.h.bf16 %v10876_v3 }
 0x493   : > { %v7642_v10 = vunpack.i.l.bf16 %v10876_v3  ;;  %v3812_v17 = vsel %vm3797_vm15, %v3779_v40, %v7472_v9  ;;  %v3813_v55 = vsel %vm3797_vm15, %v3780_v5, %v7473_v11  ;;  %v3837_v47 = vsel %vm3830_vm1, %v3804_v46, %v7532_v21  ;;  %v11256_v8 = vpop.permute.xlu0 %7705  ;;  %v13127_v9 = vld [vmem:[#allocation79_spill] sm:$0xff] }
 0x494   : > { %v3838_v22 = vsel %vm3830_vm1, %v3805_v63, %v7533_v62  ;;  %v3845_v48 = vsel %vm3830_vm1, %v3812_v17, %v7552_v58  ;;  %v3846_v52 = vsel %vm3830_vm1, %v3813_v55, %v7553_v32  ;;  %v7711_v33 = vpop.permute.xlu1 %7710  ;;  %v3870_v1 = vsel %vm3863_vm2, %v3837_v47, %v7612_v26  ;;  %v13129_v26 = vld [vmem:[#allocation43_spill] sm:$0xff]  ;;  %v13131_v47 = vld [vmem:[#allocation32_spill] sm:$0xff] }
 0x495   : > { %v3871_v13 = vsel %vm3863_vm2, %v3838_v22, %v7613_v42  ;;  %v7713_v3 = vunpack.i.h.bf16 %v7711_v33  ;;  %v7712_v24 = vunpack.i.l.bf16 %v7711_v33  ;;  %v3903_v31 = vsel %vm3896_vm12, %v3870_v1, %v7662_v57 }
 0x496   : > { %v3904_v59 = vsel %vm3896_vm12, %v3871_v13, %v7663_v25  ;;  %v3773_v11 = vsel %vm2076_vm10, %v10891_v28, %v7367_v54  ;;  %v7422_v45 = vunpack.i.l.bf16 %v13127_v9  ;;  %v3878_v62 = vsel %vm3863_vm2, %v3845_v48, %v7642_v10  ;;  %v13130_v10 = vld [vmem:[#allocation52_spill] sm:$0xff] }
 0x497   : > { %v3879_v21 = vsel %vm3863_vm2, %v3846_v52, %v7643_v29  ;;  %v7483_v32 = vunpack.i.h.bf16 %v13128_v30  ;;  %v7482_v58 = vunpack.i.l.bf16 %v13128_v30  ;;  %v11272_v27 = vsel %vm3896_vm12, %v3878_v62, %v7712_v24  ;;  %v13132_v52 = vld [vmem:[#allocation19_spill] sm:$0xff] }
 0x498   : > { %v11275_v42 = vsel %vm3896_vm12, %v3879_v21, %v7713_v3  ;;  %v7563_v40 = vunpack.i.h.bf16 %v13129_v26  ;;  %v7562_v28 = vunpack.i.l.bf16 %v13129_v26  ;;  %v3932_v54 = vpack.c.bf16 %v3904_v59, %v3903_v31 }
 0x499   : > { %v3936_v5 = vpack.c.bf16 %v11275_v42, %v11272_v27  ;;  %v3774_v25 = vsel %vm2076_vm10, %v10894_v38, %v7368_v37  ;;  %v7423_v57 = vunpack.i.h.bf16 %v13127_v9  ;;  %v7658_v46 = vunpack.i.h.bf16 %v10941_v0 }
 0x49a   : > { %v7657_v63 = vunpack.i.l.bf16 %v10941_v0  ;;  %v3791_v29 = vsel %vm2076_vm10, %v3759_v7, %v7422_v45  ;;  %v7458_v17 = vunpack.i.h.bf16 %v13130_v10  ;;  %v7457_v55 = vunpack.i.l.bf16 %v13130_v10  ;;  %6385 = vmatmul.msk.bf16.gmra.mxu1 %vm3985_vm13, %v3932_v54  ;;  %v13133_v45 = vld [vmem:[#allocation42_spill] sm:$0xff] }
 0x49b   : > { %v7538_v22 = vunpack.i.h.bf16 %v13131_v47  ;;  %v3816_v48 = vsel %vm3797_vm15, %v11216_v12, %v7482_v58  ;;  %v3817_v38 = vsel %vm3797_vm15, %v11221_v16, %v7483_v32  ;;  %v7537_v37 = vunpack.i.l.bf16 %v13131_v47  ;;  %v7721_v33 = vpop.permute.xlu0 %7720 }
 0x49c   : > { %v7503_v0 = vunpack.i.h.bf16 %v13132_v52  ;;  %v3849_v7 = vsel %vm3830_vm1, %v3816_v48, %v7562_v28  ;;  %v3850_v1 = vsel %vm3830_vm1, %v3817_v38, %v7563_v40  ;;  %v7723_v13 = vunpack.i.h.bf16 %v7721_v33  ;;  %v7726_v24 = vpop.permute.xlu1 %7725 }
 0x49d   : > { %v7722_v3 = vunpack.i.l.bf16 %v7721_v33  ;;  %v7728_v31 = vunpack.i.h.bf16 %v7726_v24  ;;  %v7727_v59 = vunpack.i.l.bf16 %v7726_v24  ;;  %v3882_v9 = vsel %vm3863_vm2, %v3849_v7, %v7657_v63 }
 0x49e   : > { %v3883_v12 = vsel %vm3863_vm2, %v3850_v1, %v7658_v46  ;;  %v7502_v16 = vunpack.i.l.bf16 %v13132_v52  ;;  %v7583_v62 = vunpack.i.h.bf16 %v13133_v45  ;;  %v7582_v32 = vunpack.i.l.bf16 %v13133_v45 }
 0x49f   : > { %v11304_v21 = vsel %vm3896_vm12, %v3882_v9, %v7722_v3  ;;  %v11307_v30 = vsel %vm3896_vm12, %v3883_v12, %v7723_v13  ;;  %v11314_v26 = vsel %vm3896_vm12, %v11115_v44, %v7727_v59  ;;  %v11318_v40 = vsel %vm3896_vm12, %v11118_v56, %v7728_v31 }
 0x4a0   : > { %v3938_v58 = vpack.c.bf16 %v11307_v30, %v11304_v21  ;;  %v3792_v28 = vsel %vm2076_vm10, %v11229_v49, %v7423_v57  ;;  %v7618_v54 = vunpack.i.h.bf16 %v10976_v43  ;;  %v7617_v46 = vunpack.i.l.bf16 %v10976_v43 }
 0x4a1   : > { %v3939_v63 = vpack.c.bf16 %v11318_v40, %v11314_v26  ;;  %v3806_v10 = vsel %vm3797_vm15, %v3773_v11, %v7457_v55  ;;  %v3807_v47 = vsel %vm3797_vm15, %v3774_v25, %v7458_v17  ;;  %v7678_v44 = vunpack.i.h.bf16 %v11147_v61 }
 0x4a2   : > { %v7677_v48 = vunpack.i.l.bf16 %v11147_v61  ;;  %v3824_v56 = vsel %vm3797_vm15, %v3791_v29, %v7502_v16  ;;  %v3825_v38 = vsel %vm3797_vm15, %v3792_v28, %v7503_v0  ;;  %v7688_v49 = vunpack.i.h.bf16 %v11019_v18  ;;  %v13134_v16 = vld [vmem:[#allocation56_spill] sm:$0xff] }
 0x4a3   : > { %v7687_v57 = vunpack.i.l.bf16 %v11019_v18  ;;  %v3839_v43 = vsel %vm3830_vm1, %v3806_v10, %v7537_v37  ;;  %v3840_v52 = vsel %vm3830_vm1, %v3807_v47, %v7538_v22  ;;  %v3857_v11 = vsel %vm3830_vm1, %v3824_v56, %v7582_v32  ;;  %v7736_v17 = vpop.permute.xlu0 %7735  ;;  %v8418_v28 = vld [vmem:[#allocation3 + $0x158] sm:$0xff] }
 0x4a4   : > { %v3858_v25 = vsel %vm3830_vm1, %v3825_v38, %v7583_v62  ;;  %v7738_v55 = vunpack.i.h.bf16 %v7736_v17  ;;  %v7737_v33 = vunpack.i.l.bf16 %v7736_v17  ;;  %v7741_v61 = vpop.permute.xlu1 %7740  ;;  %v3872_v29 = vsel %vm3863_vm2, %v3839_v43, %v7617_v46  ;;  %v8419_v46 = vld [vmem:[#allocation3 + $0x150] sm:$0xff] }
 0x4a5   : > { %v3873_v0 = vsel %vm3863_vm2, %v3840_v52, %v7618_v54  ;;  %v7743_v7 = vunpack.i.h.bf16 %v7741_v61  ;;  %v7742_v1 = vunpack.i.l.bf16 %v7741_v61  ;;  %v3905_v18 = vsel %vm3896_vm12, %v3872_v29, %v7677_v48  ;;  %v13140_v52 = vld [vmem:[#allocation17_spill] sm:$0xff] }
 0x4a6   : > { %v3906_v37 = vsel %vm3896_vm12, %v3873_v0, %v7678_v44  ;;  %v3890_v22 = vsel %vm3863_vm2, %v3857_v11, %v7687_v57  ;;  %v3891_v13 = vsel %vm3863_vm2, %v3858_v25, %v7688_v49  ;;  %v11346_v3 = vsel %vm3896_vm12, %v11165_v51, %v7737_v33  ;;  %v13137_v44 = vld [vmem:[#allocation37_spill] sm:$0xff] }
 0x4a7   : > { %v11350_v24 = vsel %vm3896_vm12, %v11168_v20, %v7738_v55  ;;  %v7262_v31 = vunpack.i.l.bf16 %v13113_v60  ;;  %v3923_v9 = vsel %vm3896_vm12, %v3890_v22, %v7742_v1  ;;  %v3924_v12 = vsel %vm3896_vm12, %v3891_v13, %v7743_v7  ;;  %v13141_v55 = vld [vmem:[#allocation39_spill] sm:$0xff]  ;;  %v13142_v60 = vld [vmem:[#allocation61_spill] sm:$0xff]  ;;  %v7746_v22 = vpop.permute.xlu2 %7745 }
 0x4a8   : > { %v3941_v59 = vpack.c.bf16 %v11350_v24, %v11346_v3  ;;  %v7318_v45 = vunpack.i.h.bf16 %v13134_v16  ;;  %v7317_v62 = vunpack.i.l.bf16 %v13134_v16  ;;  %v3942_v32 = vpack.c.bf16 %v3924_v12, %v3923_v9  ;;  %v13143_v12 = vld [vmem:[#allocation60_spill] sm:$0xff] }
 0x4a9   : > { %v3933_v51 = vpack.c.bf16 %v3906_v37, %v3905_v18  ;;  %v13135_v54 = vunpack.i.h.bf16 %v13070_v36  ;;  %v13136_v10 = vunpack.i.l.bf16 %v13070_v36  ;;  %v7383_v48 = vunpack.i.h.bf16 %v13137_v44 }
 0x4aa   : > { %v7382_v56 = vunpack.i.l.bf16 %v13137_v44  ;;  %v13138_v38 = vunpack.i.l.bf16 %v10448_v34  ;;  %v13139_v57 = vunpack.i.h.bf16 %v10448_v34  ;;  %v7428_v11 = vunpack.i.h.bf16 %v13140_v52  ;;  %6395 = vmatmul.msk.bf16.vlgmr.msrb.gmra.mxu3 %vm3985_vm13, %v3942_v32 }
 0x4ab   : > { %v3698_v20 = vsel %vm380_vm3, %v8418_v28, %v13135_v54  ;;  %v3697_v47 = vsel %vm380_vm3, %v8419_v46, %v13136_v10  ;;  %v7427_v25 = vunpack.i.l.bf16 %v13140_v52  ;;  %6386 = vmatmul.msk.bf16.gmra.mxu1 %vm3985_vm13, %v3933_v51  ;;  %v3743_v36 = vsel %vm2010_vm8, %v10819_v19, %v7262_v31 }
 0x4ac   : > { %v3729_v49 = vsel %vm1944_vm6, %v3697_v47, %v13138_v38  ;;  %v3730_v43 = vsel %vm1944_vm6, %v3698_v20, %v13139_v57  ;;  %v3744_v17 = vsel %vm2010_vm8, %v10829_v35, %v7263_v15  ;;  %v7508_v34 = vunpack.i.h.bf16 %v13141_v55  ;;  %v8420_v57 = vld [vmem:[#allocation3 + $0x170] sm:$0xff] }
 0x4ad   : > { %v7507_v33 = vunpack.i.l.bf16 %v13141_v55  ;;  %v3761_v61 = vsel %vm2010_vm8, %v3729_v49, %v7317_v62  ;;  %v3762_v29 = vsel %vm2010_vm8, %v3730_v43, %v7318_v45  ;;  %v7588_v0 = vunpack.i.h.bf16 %v10874_v2  ;;  %v13144_v62 = vld [vmem:[#allocation47_spill] sm:$0xff]  ;;  %v13145_v43 = vld [vmem:[#allocation40_spill] sm:$0xff] }
 0x4ae   : > { %v7587_v7 = vunpack.i.l.bf16 %v10874_v2  ;;  %v3775_v1 = vsel %vm2076_vm10, %v3743_v36, %v7382_v56  ;;  %v3776_v19 = vsel %vm2076_vm10, %v3744_v17, %v7383_v48  ;;  %v7463_v18 = vunpack.i.h.bf16 %v13142_v60 }
 0x4af   : > { %v7462_v35 = vunpack.i.l.bf16 %v13142_v60  ;;  %v3793_v15 = vsel %vm2076_vm10, %v3761_v61, %v7427_v25  ;;  %v3794_v37 = vsel %vm2076_vm10, %v3762_v29, %v7428_v11  ;;  %v7698_v13 = vunpack.i.h.bf16 %v11223_v50  ;;  %v13147_v61 = vld [vmem:[#allocation71_spill] sm:$0xff]  ;;  %v13149_v60 = vld [vmem:[#allocation74_spill] sm:$0xff] }
 0x4b0   : > { %v7697_v31 = vunpack.i.l.bf16 %v11223_v50  ;;  %v3826_v9 = vsel %vm3797_vm15, %v3793_v15, %v7507_v33  ;;  %v3827_v2 = vsel %vm3797_vm15, %v3794_v37, %v7508_v34  ;;  %v7543_v16 = vunpack.i.h.bf16 %v13143_v12  ;;  %v13150_v15 = vld [vmem:[#allocation34_spill] sm:$0xff] }
 0x4b1   : > { %v7542_v45 = vunpack.i.l.bf16 %v13143_v12  ;;  %v7628_v32 = vunpack.i.h.bf16 %v13144_v62  ;;  %v7627_v51 = vunpack.i.l.bf16 %v13144_v62  ;;  %v3859_v28 = vsel %vm3830_vm1, %v3826_v9, %v7587_v7  ;;  %v13148_v7 = vld [vmem:[#allocation69_spill] sm:$0xff] }
 0x4b2   : > { %v3860_v54 = vsel %vm3830_vm1, %v3827_v2, %v7588_v0  ;;  %v7693_v20 = vunpack.i.h.bf16 %v11207_v6  ;;  %v7692_v50 = vunpack.i.l.bf16 %v11207_v6  ;;  %v7748_v46 = vunpack.i.h.bf16 %v7746_v22 }
 0x4b3   : > { %v7747_v10 = vunpack.i.l.bf16 %v7746_v22  ;;  %v3808_v47 = vsel %vm3797_vm15, %v3775_v1, %v7462_v35  ;;  %v3809_v44 = vsel %vm3797_vm15, %v3776_v19, %v7463_v18  ;;  %v3892_v48 = vsel %vm3863_vm2, %v3859_v28, %v7697_v31 }
 0x4b4   : > { %v3893_v56 = vsel %vm3863_vm2, %v3860_v54, %v7698_v13  ;;  %v3841_v38 = vsel %vm3830_vm1, %v3808_v47, %v7542_v45  ;;  %v3842_v49 = vsel %vm3830_vm1, %v3809_v44, %v7543_v16  ;;  %v13146_v52 = vunpack.i.h.bf16 %v13145_v43  ;;  %v13151_v13 = vld [vmem:[#allocation72_spill] sm:$0xff]  ;;  %v13152_v16 = vld [vmem:[#allocation38_spill] sm:$0xff] }
 0x4b5   : > { %v7152_v6 = vunpack.i.l.bf16 %v13145_v43  ;;  %v3874_v25 = vsel %vm3863_vm2, %v3841_v38, %v7627_v51  ;;  %v3875_v36 = vsel %vm3863_vm2, %v3842_v49, %v7628_v32  ;;  %v3925_v34 = vsel %vm3896_vm12, %v3892_v48, %v7747_v10  ;;  %v13153_v32 = vld [vmem:[#allocation16_spill] sm:$0xff]  ;;  %v8421_v54 = vld [vmem:[#allocation3 + $0x168] sm:$0xff]  ;;  %v8423_v10 = vld [vmem:[#allocation3 + $0x90] sm:$0xff] }
 0x4b6   : > { %v3700_v11 = vsel %vm380_vm3, %v8420_v57, %v13146_v52  ;;  %v3907_v17 = vsel %vm3896_vm12, %v3874_v25, %v7692_v50  ;;  %v3908_v55 = vsel %vm3896_vm12, %v3875_v36, %v7693_v20  ;;  %v3926_v33 = vsel %vm3896_vm12, %v3893_v56, %v7748_v46  ;;  %v8422_v50 = vld [vmem:[#allocation3 + $0x98] sm:$0xff] }
 0x4b7   : > { %v7168_v29 = vunpack.i.h.bf16 %v13147_v61  ;;  %v7167_v0 = vunpack.i.l.bf16 %v13147_v61  ;;  %v7198_v1 = vunpack.i.h.bf16 %v13148_v7  ;;  %v7197_v19 = vunpack.i.l.bf16 %v13148_v7  ;;  %v13156_v7 = vld [vmem:[#allocation20_spill] sm:$0xff] }
 0x4b8   : > { %v7213_v18 = vunpack.i.h.bf16 %v13149_v60  ;;  %v7212_v35 = vunpack.i.l.bf16 %v13149_v60  ;;  %v7268_v37 = vunpack.i.h.bf16 %v13150_v15  ;;  %v7267_v22 = vunpack.i.l.bf16 %v13150_v15  ;;  %v13157_v60 = vld [vmem:[#allocation70_spill] sm:$0xff]  ;;  %v13158_v15 = vld [vmem:[#allocation21_spill] sm:$0xff] }
 0x4b9   : > { %v7323_v31 = vunpack.i.h.bf16 %v13151_v13  ;;  %v7322_v9 = vunpack.i.l.bf16 %v13151_v13  ;;  %v3934_v2 = vpack.c.bf16 %v3908_v55, %v3907_v17  ;;  %v3943_v12 = vpack.c.bf16 %v3926_v33, %v3925_v34  ;;  %v13154_v55 = vld [vmem:[#allocation57_spill] sm:$0xff] }
 0x4ba   : > { %v7388_v45 = vunpack.i.h.bf16 %v13152_v16  ;;  %v7387_v62 = vunpack.i.l.bf16 %v13152_v16  ;;  %v7433_v51 = vunpack.i.h.bf16 %v13153_v32  ;;  %v7432_v28 = vunpack.i.l.bf16 %v13153_v32  ;;  %v13155_v33 = vld [vmem:[#allocation25_spill] sm:$0xff] }
 0x4bb   : > { %v3699_v20 = vsel %vm380_vm3, %v8421_v54, %v7152_v6  ;;  %v3682_v46 = vsel %vm380_vm3, %v8422_v50, %v7168_v29  ;;  %v3681_v47 = vsel %vm380_vm3, %v8423_v10, %v7167_v0  ;;  %6387 = vmatmul.msk.bf16.gmra.mxu1 %vm3985_vm13, %v3934_v2  ;;  %6396 = vmatmul.msk.bf16.gmra.mxu3 %vm3985_vm13, %v3943_v12  ;;  %v7468_v34 = vunpack.i.h.bf16 %v13154_v55  ;;  %v7751_v0 = vpop.permute.xlu0 %7750 }
 0x4bc   : > { %v3713_v44 = vsel %vm1944_vm6, %v3681_v47, %v7197_v19  ;;  %v3714_v48 = vsel %vm1944_vm6, %v3682_v46, %v7198_v1  ;;  %v3731_v56 = vsel %vm1944_vm6, %v3699_v20, %v7212_v35  ;;  %v3732_v38 = vsel %vm1944_vm6, %v3700_v11, %v7213_v18 }
 0x4bd   : > { %v3746_v49 = vsel %vm2010_vm8, %v3714_v48, %v7268_v37  ;;  %v3745_v57 = vsel %vm2010_vm8, %v3713_v44, %v7267_v22  ;;  %v3764_v43 = vsel %vm2010_vm8, %v3732_v38, %v7323_v31  ;;  %v3763_v52 = vsel %vm2010_vm8, %v3731_v56, %v7322_v9  ;;  %v13159_v9 = vld [vmem:[#allocation27_spill] sm:$0xff] }
 0x4be   : > { %v3777_v6 = vsel %vm2076_vm10, %v3745_v57, %v7387_v62  ;;  %v3778_v25 = vsel %vm2076_vm10, %v3746_v49, %v7388_v45  ;;  %v3795_v36 = vsel %vm2076_vm10, %v3763_v52, %v7432_v28  ;;  %v3796_v17 = vsel %vm2076_vm10, %v3764_v43, %v7433_v51  ;;  %v11493_v52 = vld [vmem:[%s12678_s4] ss:$0 sm:$0xff] }
 0x4bf   : > { %v7467_v11 = vunpack.i.l.bf16 %v13154_v55  ;;  %v7513_v61 = vunpack.i.h.bf16 %v13155_v33  ;;  %v7512_v29 = vunpack.i.l.bf16 %v13155_v33  ;;  %v7548_v1 = vunpack.i.h.bf16 %v13156_v7  ;;  %v4225_v55 = vld [vmem:[#allocation4 + $0x9] sm:$0xff] }
 0x4c0   : > { %v7547_v19 = vunpack.i.l.bf16 %v13156_v7  ;;  %v7593_v18 = vunpack.i.h.bf16 %v13157_v60  ;;  %v7592_v35 = vunpack.i.l.bf16 %v13157_v60  ;;  %v7633_v37 = vunpack.i.h.bf16 %v13158_v15 }
 0x4c1   : > { %v7632_v22 = vunpack.i.l.bf16 %v13158_v15  ;;  %v7708_v13 = vunpack.i.h.bf16 %v11256_v8  ;;  %v7707_v31 = vunpack.i.l.bf16 %v11256_v8  ;;  %v7703_v2 = vunpack.i.h.bf16 %v13159_v9 }
 0x4c2   : > { %v7702_v12 = vunpack.i.l.bf16 %v13159_v9  ;;  %v7753_v16 = vunpack.i.h.bf16 %v7751_v0  ;;  %v7752_v45 = vunpack.i.l.bf16 %v7751_v0  ;;  %v3810_v62 = vsel %vm3797_vm15, %v3777_v6, %v7467_v11 }
 0x4c3   : > { %v3811_v32 = vsel %vm3797_vm15, %v3778_v25, %v7468_v34  ;;  %v3828_v51 = vsel %vm3797_vm15, %v3795_v36, %v7512_v29  ;;  %v3829_v28 = vsel %vm3797_vm15, %v3796_v17, %v7513_v61  ;;  %v3843_v54 = vsel %vm3830_vm1, %v3810_v62, %v7547_v19 }
 0x4c4   : > { %v3844_v20 = vsel %vm3830_vm1, %v3811_v32, %v7548_v1  ;;  %v3861_v8 = vsel %vm3830_vm1, %v3828_v51, %v7592_v35  ;;  %v3862_v50 = vsel %vm3830_vm1, %v3829_v28, %v7593_v18  ;;  %v3876_v47 = vsel %vm3863_vm2, %v3843_v54, %v7632_v22 }
 0x4c5   : > { %v3894_v46 = vsel %vm3863_vm2, %v3861_v8, %v7707_v31  ;;  %v3895_v10 = vsel %vm3863_vm2, %v3862_v50, %v7708_v13  ;;  %v3877_v44 = vsel %vm3863_vm2, %v3844_v20, %v7633_v37  ;;  %v3909_v48 = vsel %vm3896_vm12, %v3876_v47, %v7702_v12 }
 0x4c6   : > { %v3910_v56 = vsel %vm3896_vm12, %v3877_v44, %v7703_v2  ;;  %v3927_v38 = vsel %vm3896_vm12, %v3894_v46, %v7752_v45  ;;  %v3928_v49 = vsel %vm3896_vm12, %v3895_v10, %v7753_v16 }
 0x4c7   : > { %v3935_v57 = vpack.c.bf16 %v3910_v56, %v3909_v48  ;;  %v3944_v43 = vpack.c.bf16 %v3928_v49, %v3927_v38  ;;  %v4256_v49 = vld [vmem:[#allocation4 + $0x2] sm:$0xff] }
 0x4cb   : > { %6388 = vmatmul.msk.bf16.gmra.mxu1 %vm3985_vm13, %v3935_v57  ;;  %6397 = vmatmul.msk.bf16.gmra.mxu3 %vm3985_vm13, %v3944_v43  ;;  %v4257_v57 = vld [vmem:[#allocation4 + $0xa] sm:$0xff] }
 0x4db   : > { %6389 = vmatmul.msk.bf16.gmra.mxu1 %vm3985_vm13, %v3936_v5  ;;  %v4224_v5 = vld [vmem:[#allocation4 + $0x1] sm:$0xff] }
 0x4dc   : > { %v7754_v34 = vpack.i.bf16 %v4225_v55, %v4224_v5 }
 0x4de   : > { %7755 = vrot.lane.b32.xlu1 %v7754_v34, %s8433_s11 }
 0x4e7   : > { %v4047_v6 = vpop.f32.mrf.mxu1 }
 0x4e8   : > { %v4048_v25 = vadd.f32 %v11493_v52, %v4047_v6 }
 0x4ea   : > { %v4127_v36 = vmax.f32 %v4048_v25, 0.0 }
 0x4eb   : > { %6390 = vmatmul.msk.bf16.gmra.mxu1 %vm3985_vm13, %v3937_v23 }
 0x4ec   : > { %4160 = vst.msk [vmem:[#allocation4 + $0x19] sm:$0xff] %vm334_vm0, %v4127_v36  ;;  %v7794_v36 = vpack.i.bf16 %v4257_v57, %v4256_v49 }
 0x4ef   : > { %v4049_v17 = vpop.f32.mrf.mxu1 }
 0x4f0   : > { %v4050_v27 = vadd.f32 %v11493_v52, %v4049_v17 }
 0x4f2   : > { %v4128_v42 = vmax.f32 %v4050_v27, 0.0 }
 0x4f3   : > { %v4226_v39 = vld [vmem:[#allocation4 + $0x19] sm:$0xff] }
 0x4f4   : > { %4161 = vst.msk [vmem:[#allocation4 + $0x21] sm:$0xff] %vm334_vm0, %v4128_v42 }
 0x4f7   : > { %v4052_v11 = vpop.f32.mrf.mxu1 }
 0x4f8   : > { %v4053_v33 = vadd.f32 %v11493_v52, %v4052_v11 }
 0x4fa   : > { %v4129_v61 = vmax.f32 %v4053_v33, 0.0 }
 0x4fb   : > { %6391 = vmatmul.msk.bf16.gmra.mxu1 %vm3985_vm13, %v3938_v58  ;;  %v4227_v41 = vld [vmem:[#allocation4 + $0x21] sm:$0xff] }
 0x4fc   : > { %4162 = vst.msk [vmem:[#allocation4 + $0x31] sm:$0xff] %vm334_vm0, %v4129_v61  ;;  %v11510_v23 = vpack.i.bf16 %v4227_v41, %v4226_v39  ;;  %v4352_v34 = vld [vmem:[#allocation4 + $0x1a] sm:$0xff]  ;;  %v4353_v11 = vld [vmem:[#allocation4 + $0x22] sm:$0xff] }
 0x4fd   : > { %v7809_v41 = vpack.i.bf16 %v4353_v11, %v4352_v34 }
 0x4fe   : > { %7760 = vrot.lane.b32.xlu2 %v11510_v23, %s8433_s11 }
 0x4ff   : > { %v4054_v29 = vpop.f32.mrf.mxu1 }
 0x500   : > { %v4055_v0 = vadd.f32 %v11493_v52, %v4054_v29 }
 0x502   : > { %v4130_v7 = vmax.f32 %v4055_v0, 0.0 }
 0x503   : > { %v4228_v58 = vld [vmem:[#allocation4 + $0x31] sm:$0xff] }
 0x504   : > { %4163 = vst.msk [vmem:[#allocation4 + $0x39] sm:$0xff] %vm334_vm0, %v4130_v7 }
 0x507   : > { %v4057_v1 = vpop.f32.mrf.mxu1 }
 0x508   : > { %v4058_v21 = vadd.f32 %v11493_v52, %v4057_v1 }
 0x50a   : > { %v4131_v30 = vmax.f32 %v4058_v21, 0.0 }
 0x50b   : > { %6392 = vmatmul.msk.bf16.gmra.mxu1 %vm3985_vm13, %v3939_v63  ;;  %v4229_v19 = vld [vmem:[#allocation4 + $0x39] sm:$0xff] }
 0x50c   : > { %4164 = vst.msk [vmem:[#allocation4 + $0x49] sm:$0xff] %vm334_vm0, %v4131_v30  ;;  %v11522_v60 = vpack.i.bf16 %v4229_v19, %v4228_v58  ;;  %v4449_v58 = vld [vmem:[#allocation4 + $0x32] sm:$0xff]  ;;  %v4450_v19 = vld [vmem:[#allocation4 + $0x3a] sm:$0xff] }
 0x50e   : > { %7765 = vrot.lane.b32.xlu0 %v11522_v60, %s8433_s11 }
 0x50f   : > { %v4059_v18 = vpop.f32.mrf.mxu1 }
 0x510   : > { %v4060_v35 = vadd.f32 %v11493_v52, %v4059_v18  ;;  %v11578_v18 = vld [vmem:[#allocation4 + $0x20] sm:$0xff] }
 0x512   : > { %v4132_v15 = vmax.f32 %v4060_v35, 0.0 }
 0x513   : > { %v4230_v63 = vld [vmem:[#allocation4 + $0x49] sm:$0xff] }
 0x514   : > { %4165 = vst.msk [vmem:[#allocation4 + $0x51] sm:$0xff] %vm334_vm0, %v4132_v15  ;;  %v11581_v15 = vld [vmem:[#allocation4 + $0x18] sm:$0xff] }
 0x517   : > { %v4062_v37 = vpop.f32.mrf.mxu1 }
 0x518   : > { %v4063_v26 = vadd.f32 %v11493_v52, %v4062_v37  ;;  %v11584_v37 = vpack.i.bf16 %v4450_v19, %v4449_v58 }
 0x51a   : > { %v4133_v40 = vmax.f32 %v4063_v26, 0.0  ;;  %v7799_v26 = vpack.i.bf16 %v11578_v18, %v11581_v15 }
 0x51b   : > { %6393 = vmatmul.msk.bf16.gmra.mxu1 %vm3985_vm13, %v3940_v53  ;;  %v4231_v22 = vld [vmem:[#allocation4 + $0x51] sm:$0xff] }
 0x51c   : > { %4166 = vst.msk [vmem:[#allocation4 + $0x61] sm:$0xff] %vm334_vm0, %v4133_v40  ;;  %v11534_v13 = vpack.i.bf16 %v4231_v22, %v4230_v63 }
 0x51e   : > { %7770 = vrot.lane.b32.xlu1 %v11534_v13, %s8433_s11 }
 0x51f   : > { %v4064_v31 = vpop.f32.mrf.mxu1 }
 0x520   : > { %v4065_v9 = vadd.f32 %v11493_v52, %v4064_v31 }
 0x522   : > { %v4134_v2 = vmax.f32 %v4065_v9, 0.0 }
 0x523   : > { %v4232_v53 = vld [vmem:[#allocation4 + $0x61] sm:$0xff] }
 0x524   : > { %4167 = vst.msk [vmem:[#allocation4 + $0x69] sm:$0xff] %vm334_vm0, %v4134_v2 }
 0x528   : > { %v4067_v12 = vpop.f32.mrf.mxu1 }
 0x529   : > { %v4068_v14 = vadd.f32 %v11493_v52, %v4067_v12  ;;  %v11594_v12 = vld [vmem:[#allocation4 + $0x38] sm:$0xff] }
 0x52b   : > { %v4135_v4 = vmax.f32 %v4068_v14, 0.0  ;;  %6394 = vmatmul.msk.bf16.gmra.mxu1 %vm3985_vm13, %v3941_v59  ;;  %v4233_v16 = vld [vmem:[#allocation4 + $0x69] sm:$0xff] }
 0x52c   : > { %v11546_v45 = vpack.i.bf16 %v4233_v16, %v4232_v53  ;;  %v11599_v16 = vld [vmem:[#allocation4 + $0x30] sm:$0xff] }
 0x52d   : > { %4168 = vst.msk [vmem:[#allocation4 + $0x79] sm:$0xff] %vm334_vm0, %v4135_v4  ;;  %v4112_v62 = vpop.f32.mrf.mxu3 }
 0x52e   : > { %v4113_v32 = vadd.f32 %v11493_v52, %v4112_v62  ;;  %7775 = vrot.lane.b32.xlu2 %v11546_v45, %s8433_s11  ;;  %v7814_v62 = vpack.i.bf16 %v11594_v12, %v11599_v16 }
 0x530   : > { %v4069_v51 = vpop.f32.mrf.mxu1  ;;  %v4153_v28 = vmax.f32 %v4113_v32, 0.0 }
 0x531   : > { %v4070_v54 = vadd.f32 %v11493_v52, %v4069_v51 }
 0x532   : > { %4186 = vst.msk [vmem:[#allocation4 + $0x151] sm:$0xff] %vm334_vm0, %v4153_v28 }
 0x533   : > { %v4136_v3 = vmax.f32 %v4070_v54, 0.0 }
 0x534   : > { %v4234_v10 = vld [vmem:[#allocation4 + $0x79] sm:$0xff] }
 0x535   : > { %4169 = vst.msk [vmem:[#allocation4 + $0x81] sm:$0xff] %vm334_vm0, %v4136_v3  ;;  %v4114_v24 = vpop.f32.mrf.mxu3 }
 0x536   : > { %v4115_v59 = vadd.f32 %v11493_v52, %v4114_v24  ;;  %v11616_v24 = vld [vmem:[#allocation4 + $0x50] sm:$0xff] }
 0x538   : > { %v4072_v20 = vpop.f32.mrf.mxu1  ;;  %v4154_v8 = vmax.f32 %v4115_v59, 0.0 }
 0x539   : > { %v4073_v50 = vadd.f32 %v11493_v52, %v4072_v20  ;;  %v11618_v20 = vld [vmem:[#allocation4 + $0x48] sm:$0xff] }
 0x53a   : > { %4187 = vst.msk [vmem:[#allocation4 + $0x159] sm:$0xff] %vm334_vm0, %v4154_v8  ;;  %v7869_v8 = vpack.i.bf16 %v11616_v24, %v11618_v20 }
 0x53b   : > { %v4137_v46 = vmax.f32 %v4073_v50, 0.0 }
 0x53c   : > { %v4235_v47 = vld [vmem:[#allocation4 + $0x81] sm:$0xff] }
 0x53d   : > { %4170 = vst.msk [vmem:[#allocation4 + $0x91] sm:$0xff] %vm334_vm0, %v4137_v46  ;;  %v11558_v44 = vpack.i.bf16 %v4235_v47, %v4234_v10  ;;  %v11629_v46 = vld [vmem:[#allocation4 + $0x68] sm:$0xff] }
 0x53e   : > { %v4117_v48 = vpop.f32.mrf.mxu3  ;;  %v4451_v47 = vld [vmem:[#allocation4 + $0x4a] sm:$0xff]  ;;  %v4456_v34 = vld [vmem:[#allocation4 + $0x82] sm:$0xff] }
 0x53f   : > { %v4118_v56 = vadd.f32 %v11493_v52, %v4117_v48  ;;  %7780 = vrot.lane.b32.xlu0 %v11558_v44, %s8433_s11  ;;  %v4452_v48 = vld [vmem:[#allocation4 + $0x52] sm:$0xff] }
 0x540   : > { %v4074_v38 = vpop.f32.mrf.mxu1 }
 0x541   : > { %v4155_v43 = vmax.f32 %v4118_v56, 0.0  ;;  %v4075_v6 = vadd.f32 %v11493_v52, %v4074_v38  ;;  %v11631_v56 = vld [vmem:[#allocation4 + $0x60] sm:$0xff]  ;;  %v7859_v38 = vpack.i.bf16 %v4452_v48, %v4451_v47  ;;  %v6439_v48 = vld [vmem:[%s12679_s5 + $0x8] sm:$0xff] }
 0x543   : > { %4188 = vst.msk [vmem:[#allocation4 + $0x169] sm:$0xff] %vm334_vm0, %v4155_v43  ;;  %v4138_v25 = vmax.f32 %v4075_v6, 0.0 }
 0x544   : > { %v4236_v61 = vld [vmem:[#allocation4 + $0x91] sm:$0xff] }
 0x545   : > { %4171 = vst.msk [vmem:[#allocation4 + $0x99] sm:$0xff] %vm334_vm0, %v4138_v25 }
 0x546   : > { %v4119_v17 = vpop.f32.mrf.mxu3 }
 0x547   : > { %v4120_v27 = vadd.f32 %v11493_v52, %v4119_v17  ;;  %7795 = vrot.lane.b32.xlu0 %v7794_v36, %s8434_s16  ;;  %v4358_v36 = vld [vmem:[#allocation4 + $0x62] sm:$0xff]  ;;  %v4359_v17 = vld [vmem:[#allocation4 + $0x6a] sm:$0xff] }
 0x548   : > { %v4077_v42 = vpop.f32.mrf.mxu1 }
 0x549   : > { %v4156_v5 = vmax.f32 %v4120_v27, 0.0  ;;  %v4078_v55 = vadd.f32 %v11493_v52, %v4077_v42  ;;  %v7914_v42 = vpack.i.bf16 %v4359_v17, %v4358_v36 }
 0x54b   : > { %4189 = vst.msk [vmem:[#allocation4 + $0x171] sm:$0xff] %vm334_vm0, %v4156_v5  ;;  %v4139_v33 = vmax.f32 %v4078_v55, 0.0  ;;  %v4455_v55 = vld [vmem:[#allocation4 + $0x7a] sm:$0xff] }
 0x54c   : > { %v4237_v39 = vld [vmem:[#allocation4 + $0x99] sm:$0xff] }
 0x54d   : > { %4172 = vst.msk [vmem:[#allocation4 + $0xa9] sm:$0xff] %vm334_vm0, %v4139_v33  ;;  %v11571_v29 = vpack.i.bf16 %v4237_v39, %v4236_v61  ;;  %v11654_v33 = vpack.i.bf16 %v4456_v34, %v4455_v55  ;;  %v4192_v34 = vld [vmem:[#allocation4] sm:$0xff] }
 0x54e   : > { %v4122_v0 = vpop.f32.mrf.mxu3 }
 0x54f   : > { %v4123_v7 = vadd.f32 %v11493_v52, %v4122_v0  ;;  %7810 = vrot.lane.b32.xlu0 %v7809_v41, %s8437_s19  ;;  %7785 = vrot.lane.b32.xlu1 %v11571_v29, %s8433_s11  ;;  %v11661_v0 = vld [vmem:[#allocation4 + $0x80] sm:$0xff] }
 0x550   : > { %v4079_v1 = vpop.f32.mrf.mxu1 }
 0x551   : > { %v4157_v21 = vmax.f32 %v4123_v7, 0.0  ;;  %v4080_v30 = vadd.f32 %v11493_v52, %v4079_v1  ;;  %v11664_v7 = vld [vmem:[#allocation4 + $0x78] sm:$0xff] }
 0x552   : > { %v7919_v1 = vpack.i.bf16 %v11661_v0, %v11664_v7 }
 0x553   : > { %4190 = vst.msk [vmem:[#allocation4 + $0x181] sm:$0xff] %vm334_vm0, %v4157_v21  ;;  %v4140_v35 = vmax.f32 %v4080_v30, 0.0 }
 0x554   : > { %v4238_v14 = vld [vmem:[#allocation4 + $0xa9] sm:$0xff] }
 0x555   : > { %4173 = vst.msk [vmem:[#allocation4 + $0xb1] sm:$0xff] %vm334_vm0, %v4140_v35 }
 0x556   : > { %v4124_v40 = vpop.f32.mrf.mxu3 }
 0x557   : > { %v4125_v63 = vadd.f32 %v11493_v52, %v4124_v40  ;;  %7825 = vrot.lane.b32.xlu0 %v11584_v37, %s8440_s22  ;;  %7800 = vrot.lane.b32.xlu1 %v7799_v26, %s8435_s17  ;;  %v11682_v40 = vld [vmem:[#allocation4 + $0x90] sm:$0xff] }
 0x558   : > { %v4082_v22 = vpop.f32.mrf.mxu1 }
 0x559   : > { %v4158_v31 = vmax.f32 %v4125_v63, 0.0  ;;  %v4083_v9 = vadd.f32 %v11493_v52, %v4082_v22  ;;  %v11692_v22 = vpop.permute.xlu2 %7760 }
 0x55b   : > { %4191 = vst.msk [vmem:[#allocation4 + $0x189] sm:$0xff] %vm334_vm0, %v4158_v31  ;;  %v4141_v2 = vmax.f32 %v4083_v9, 0.0 }
 0x55c   : > { %v4239_v4 = vld [vmem:[#allocation4 + $0xb1] sm:$0xff] }
 0x55d   : > { %4174 = vst.msk [vmem:[#allocation4 + $0xc1] sm:$0xff] %vm334_vm0, %v4141_v2  ;;  %v11597_v53 = vpack.i.bf16 %v4239_v4, %v4238_v14  ;;  %v11697_v2 = vld [vmem:[#allocation4 + $0xb0] sm:$0xff] }
 0x55e   : > { %v5781_v14 = vld [vmem:[%s12679_s5 + $0x10] sm:$0x3] }
 0x55f   : > { %7840 = vrot.lane.b32.xlu0 %v11522_v60, %s8436_s18  ;;  %7790 = vrot.lane.b32.xlu2 %v11597_v53, %s8433_s11 }
 0x560   : > { %7815 = vrot.lane.b32.xlu1 %v7814_v62, %s8438_s20  ;;  %v4084_v32 = vpop.f32.mrf.mxu1 }
 0x561   : > { %v4085_v51 = vadd.f32 %v11493_v52, %v4084_v32  ;;  %v5795_v32 = vunpack.c.l.b16 %v5781_v14 }
 0x563   : > { %v4142_v28 = vmax.f32 %v4085_v51, 0.0  ;;  %v11702_v51 = vld [vmem:[#allocation4 + $0xa8] sm:$0xff] }
 0x565   : > { %4175 = vst.msk [vmem:[#allocation4 + $0xc9] sm:$0xff] %vm334_vm0, %v4142_v28  ;;  %v7989_v28 = vpack.i.bf16 %v11697_v2, %v11702_v51 }
 0x567   : > { %7805 = vrot.lane.b32.xlu2 %v11510_v23, %s8436_s18  ;;  %7855 = vrot.lane.b32.xlu0 %v11534_v13, %s8439_s21 }
 0x568   : > { %7830 = vrot.lane.b32.xlu1 %v7809_v41, %s8434_s16  ;;  %v4087_v54 = vpop.f32.mrf.mxu1 }
 0x569   : > { %v4088_v3 = vadd.f32 %v11493_v52, %v4087_v54  ;;  %v5798_v54 = vpack.c.b16 %v5795_v32, %v5795_v32 }
 0x56b   : > { %v4143_v59 = vmax.f32 %v4088_v3, 0.0 }
 0x56d   : > { %4176 = vst.msk [vmem:[#allocation4 + $0xd9] sm:$0xff] %vm334_vm0, %v4143_v59  ;;  %v5850_v59 = vsel %vm2198_vm4, %v5798_v54, 0 }
 0x56e   : > { %5857 = vmatpush.bf16.msra.mxu2 %v5850_v59  ;;  %6449 = vmatpush.bf16.msra.mxu3 %v5850_v59 }
 0x56f   : > { %7820 = vrot.lane.b32.xlu2 %v11522_v60, %s8439_s21  ;;  %7870 = vrot.lane.b32.xlu0 %v7869_v8, %s8435_s17  ;;  %v7884_v60 = vpack.i.bf16 %v11629_v46, %v11631_v56 }
 0x570   : > { %7845 = vrot.lane.b32.xlu1 %v11584_v37, %s8437_s19  ;;  %v4089_v23 = vpop.f32.mrf.mxu1 }
 0x571   : > { %v4090_v50 = vadd.f32 %v11493_v52, %v4089_v23 }
 0x572   : > { %5858 = vmatpush.bf16.msra.mxu2 %v6439_v48  ;;  %6450 = vmatpush.bf16.msra.mxu3 %v6439_v48 }
 0x573   : > { %v4144_v10 = vmax.f32 %v4090_v50, 0.0 }
 0x575   : > { %4177 = vst.msk [vmem:[#allocation4 + $0xe1] sm:$0xff] %vm334_vm0, %v4144_v10 }
 0x577   : > { %7835 = vrot.lane.b32.xlu2 %v7814_v62, %s8435_s17  ;;  %7885 = vrot.lane.b32.xlu0 %v7884_v60, %s8438_s20  ;;  %v4458_v62 = vld [vmem:[#allocation4 + $0x9a] sm:$0xff] }
 0x578   : > { %7860 = vrot.lane.b32.xlu1 %v7859_v38, %s8440_s22  ;;  %v4092_v49 = vpop.f32.mrf.mxu1 }
 0x579   : > { %v4093_v57 = vadd.f32 %v11493_v52, %v4092_v49 }
 0x57b   : > { %v4145_v43 = vmax.f32 %v4093_v57, 0.0 }
 0x57d   : > { %4178 = vst.msk [vmem:[#allocation4 + $0xf1] sm:$0xff] %vm334_vm0, %v4145_v43  ;;  %v4364_v43 = vld [vmem:[#allocation4 + $0xaa] sm:$0xff] }
 0x57f   : > { %7850 = vrot.lane.b32.xlu2 %v7869_v8, %s8438_s20  ;;  %7900 = vrot.lane.b32.xlu0 %v7859_v38, %s8434_s16  ;;  %v7756_v8 = vpop.permute.xlu1 %7755 }
 0x580   : > { %7875 = vrot.lane.b32.xlu1 %v11534_v13, %s8436_s18  ;;  %v4094_v6 = vpop.f32.mrf.mxu1  ;;  %v11694_v31 = vpop.permute.xlu0 %7765  ;;  %v7757_v55 = vunpack.i.l.bf16 %v7756_v8 }
 0x581   : > { %v4095_v25 = vadd.f32 %v11493_v52, %v4094_v6  ;;  %v4365_v6 = vld [vmem:[#allocation4 + $0xb2] sm:$0xff] }
 0x583   : > { %v4146_v27 = vmax.f32 %v4095_v25, 0.0  ;;  %v11731_v25 = vpack.i.bf16 %v4365_v6, %v4364_v43 }
 0x585   : > { %4179 = vst.msk [vmem:[#allocation4 + $0xf9] sm:$0xff] %vm334_vm0, %v4146_v27  ;;  %v4461_v27 = vld [vmem:[#allocation4 + $0xc2] sm:$0xff] }
 0x587   : > { %7865 = vrot.lane.b32.xlu2 %v11584_v37, %s8434_s16  ;;  %7915 = vrot.lane.b32.xlu0 %v7914_v42, %s8437_s19  ;;  %v11680_v37 = vld [vmem:[#allocation4 + $0x98] sm:$0xff] }
 0x588   : > { %7890 = vrot.lane.b32.xlu1 %v11546_v45, %s8439_s21  ;;  %v4097_v5 = vpop.f32.mrf.mxu1  ;;  %v7974_v63 = vpack.i.bf16 %v11680_v37, %v11682_v40  ;;  %v11711_v50 = vpop.permute.xlu2 %7775 }
 0x589   : > { %v4098_v13 = vadd.f32 %v11493_v52, %v4097_v5 }
 0x58b   : > { %v4147_v11 = vmax.f32 %v4098_v13, 0.0  ;;  %v7758_v13 = vunpack.i.h.bf16 %v7756_v8 }
 0x58d   : > { %4180 = vst.msk [vmem:[#allocation4 + $0x109] sm:$0xff] %vm334_vm0, %v4147_v11  ;;  %v4193_v11 = vld [vmem:[#allocation4 + $0x8] sm:$0xff] }
 0x58f   : > { %7880 = vrot.lane.b32.xlu2 %v7859_v38, %s8437_s19  ;;  %7930 = vrot.lane.b32.xlu0 %v11654_v33, %s8440_s22  ;;  %v6438_v38 = vld [vmem:[%s12679_s5] sm:$0xff] }
 0x590   : > { %7905 = vrot.lane.b32.xlu1 %v7884_v60, %s8435_s17  ;;  %v4099_v61 = vpop.f32.mrf.mxu1  ;;  %5859 = vmatpush.bf16.msra.mxu2 %v6438_v38  ;;  %v11729_v57 = vpop.permute.xlu1 %7770 }
 0x591   : > { %v4100_v39 = vadd.f32 %v11493_v52, %v4099_v61  ;;  %6451 = vmatpush.bf16.msra.mxu3 %v6438_v38 }
 0x593   : > { %v4148_v41 = vmax.f32 %v4100_v39, 0.0 }
 0x595   : > { %4181 = vst.msk [vmem:[#allocation4 + $0x111] sm:$0xff] %vm334_vm0, %v4148_v41 }
 0x597   : > { %7895 = vrot.lane.b32.xlu2 %v7914_v42, %s8440_s22  ;;  %7945 = vrot.lane.b32.xlu0 %v11558_v44, %s8436_s18 }
 0x598   : > { %7920 = vrot.lane.b32.xlu1 %v7919_v1, %s8438_s20  ;;  %v4102_v21 = vpop.f32.mrf.mxu1 }
 0x599   : > { %v4103_v30 = vadd.f32 %v11493_v52, %v4102_v21  ;;  %v4335_v21 = vld [vmem:[#allocation4 + $0xc9] sm:$0xff] }
 0x59b   : > { %v4149_v58 = vmax.f32 %v4103_v30, 0.0 }
 0x59d   : > { %4182 = vst.msk [vmem:[#allocation4 + $0x121] sm:$0xff] %vm334_vm0, %v4149_v58 }
 0x59f   : > { %7910 = vrot.lane.b32.xlu2 %v11546_v45, %s8436_s18  ;;  %7960 = vrot.lane.b32.xlu0 %v11571_v29, %s8439_s21 }
 0x5a0   : > { %7935 = vrot.lane.b32.xlu1 %v7914_v42, %s8434_s16  ;;  %v4104_v19 = vpop.f32.mrf.mxu1  ;;  %v4462_v42 = vld [vmem:[#allocation4 + $0xca] sm:$0xff] }
 0x5a1   : > { %v4105_v35 = vadd.f32 %v11493_v52, %v4104_v19  ;;  %v11741_v5 = vpack.i.bf16 %v4462_v42, %v4461_v27  ;;  %v11747_v19 = vld [vmem:[#allocation4 + $0xc8] sm:$0xff] }
 0x5a3   : > { %v4150_v26 = vmax.f32 %v4105_v35, 0.0  ;;  %v5506_v35 = vsel %vm334_vm0, %v4193_v11, %v7758_v13 }
 0x5a5   : > { %4183 = vst.msk [vmem:[#allocation4 + $0x129] sm:$0xff] %vm334_vm0, %v4150_v26  ;;  %v5505_v26 = vsel %vm334_vm0, %v4192_v34, %v7757_v55 }
 0x5a7   : > { %7925 = vrot.lane.b32.xlu2 %v11558_v44, %s8439_s21  ;;  %7975 = vrot.lane.b32.xlu0 %v7974_v63, %s8435_s17  ;;  %v4457_v44 = vld [vmem:[#allocation4 + $0x92] sm:$0xff] }
 0x5a8   : > { %7950 = vrot.lane.b32.xlu1 %v11654_v33, %s8437_s19  ;;  %v4107_v45 = vpop.f32.mrf.mxu1  ;;  %v7964_v3 = vpack.i.bf16 %v4458_v62, %v4457_v44 }
 0x5a9   : > { %v4108_v9 = vadd.f32 %v11493_v52, %v4107_v45 }
 0x5ab   : > { %v4151_v4 = vmax.f32 %v4108_v9, 0.0 }
 0x5ad   : > { %4184 = vst.msk [vmem:[#allocation4 + $0x139] sm:$0xff] %vm334_vm0, %v4151_v4  ;;  %v11755_v4 = vld [vmem:[#allocation4 + $0xc0] sm:$0xff] }
 0x5ae   : > { %v11761_v32 = vpack.i.bf16 %v11747_v19, %v11755_v4 }
 0x5af   : > { %7940 = vrot.lane.b32.xlu2 %v7919_v1, %s8435_s17  ;;  %7990 = vrot.lane.b32.xlu0 %v7989_v28, %s8438_s20 }
 0x5b0   : > { %7965 = vrot.lane.b32.xlu1 %v7964_v3, %s8440_s22  ;;  %v4109_v23 = vpop.f32.mrf.mxu1 }
 0x5b1   : > { %v4110_v10 = vadd.f32 %v11493_v52, %v4109_v23  ;;  %v11714_v47 = vpop.permute.xlu0 %7780 }
 0x5b3   : > { %v4152_v60 = vmax.f32 %v4110_v10, 0.0 }
 0x5b5   : > { %4185 = vst.msk [vmem:[#allocation4 + $0x141] sm:$0xff] %vm334_vm0, %v4152_v60 }
 0x5b7   : > { %7955 = vrot.lane.b32.xlu2 %v7974_v63, %s8438_s20  ;;  %8005 = vrot.lane.b32.xlu0 %v7964_v3, %s8434_s16  ;;  %v4334_v63 = vld [vmem:[#allocation4 + $0xc1] sm:$0xff] }
 0x5b8   : > { %7980 = vrot.lane.b32.xlu1 %v11571_v29, %s8436_s18  ;;  %v11753_v14 = vpack.i.bf16 %v4335_v21, %v4334_v63 }
 0x5b9   : > { %v7796_v52 = vpop.permute.xlu0 %7795  ;;  %v11727_v49 = vpop.permute.xlu2 %7790 }
 0x5ba   : > { %v7797_v61 = vunpack.i.l.bf16 %v7796_v52 }
 0x5bc   : > { %v5537_v9 = vsel %vm380_vm3, %v5505_v26, %v7797_v61  ;;  %v7762_v26 = vunpack.i.l.bf16 %v11692_v22 }
 0x5bf   : > { %7970 = vrot.lane.b32.xlu2 %v11654_v33, %s8434_s16  ;;  %8020 = vrot.lane.b32.xlu0 %v11731_v25, %s8437_s19  ;;  %v7798_v33 = vunpack.i.h.bf16 %v7796_v52  ;;  %v4431_v52 = vld [vmem:[#allocation4 + $0xd9] sm:$0xff] }
 0x5c0   : > { %7995 = vrot.lane.b32.xlu1 %v11597_v53, %s8439_s21 }
 0x5c1   : > { %v7811_v29 = vpop.permute.xlu0 %7810  ;;  %v7806_v36 = vpop.permute.xlu2 %7805  ;;  %v5538_v45 = vsel %vm380_vm3, %v5506_v35, %v7798_v33  ;;  %v7763_v35 = vunpack.i.h.bf16 %v11692_v22 }
 0x5c2   : > { %v11739_v17 = vpop.permute.xlu1 %7785  ;;  %v7807_v54 = vunpack.i.l.bf16 %v7806_v36  ;;  %v7813_v48 = vunpack.i.h.bf16 %v7811_v29  ;;  %v7812_v60 = vunpack.i.l.bf16 %v7811_v29 }
 0x5c7   : > { %7985 = vrot.lane.b32.xlu2 %v7964_v3, %s8437_s19  ;;  %8035 = vrot.lane.b32.xlu0 %v11741_v5, %s8440_s22  ;;  %v4432_v3 = vld [vmem:[#allocation4 + $0xe1] sm:$0xff] }
 0x5c8   : > { %8010 = vrot.lane.b32.xlu1 %v7989_v28, %s8435_s17  ;;  %v7808_v28 = vunpack.i.h.bf16 %v7806_v36  ;;  %v11771_v36 = vpack.i.bf16 %v4432_v3, %v4431_v52 }
 0x5c9   : > { %v7826_v39 = vpop.permute.xlu0 %7825  ;;  %v7821_v41 = vpop.permute.xlu2 %7820 }
 0x5ca   : > { %v7801_v1 = vpop.permute.xlu1 %7800  ;;  %v7823_v27 = vunpack.i.h.bf16 %v7821_v41  ;;  %v7822_v42 = vunpack.i.l.bf16 %v7821_v41  ;;  %v7828_v34 = vunpack.i.h.bf16 %v7826_v39  ;;  %v7827_v11 = vunpack.i.l.bf16 %v7826_v39 }
 0x5cb   : > { %v7803_v30 = vunpack.i.h.bf16 %v7801_v1  ;;  %v7802_v58 = vunpack.i.l.bf16 %v7801_v1 }
 0x5cd   : > { %v5570_v44 = vsel %vm1911_vm5, %v5538_v45, %v7803_v30  ;;  %v5569_v62 = vsel %vm1911_vm5, %v5537_v9, %v7802_v58  ;;  %v5507_v9 = vsel %vm334_vm0, %v11581_v15, %v7762_v26  ;;  %v7768_v26 = vunpack.i.h.bf16 %v11694_v31 }
 0x5ce   : > { %v5602_v59 = vsel %vm1944_vm6, %v5570_v44, %v7808_v28  ;;  %v5601_v8 = vsel %vm1944_vm6, %v5569_v62, %v7807_v54  ;;  %v5508_v44 = vsel %vm334_vm0, %v11578_v18, %v7763_v35  ;;  %v11824_v35 = vld [vmem:[#allocation4 + $0xd8] sm:$0xff] }
 0x5cf   : > { %8000 = vrot.lane.b32.xlu2 %v11731_v25, %s8440_s22  ;;  %8050 = vrot.lane.b32.xlu0 %v11753_v14, %s8436_s18  ;;  %v5633_v13 = vsel %vm1977_vm7, %v5601_v8, %v7812_v60  ;;  %v5634_v55 = vsel %vm1977_vm7, %v5602_v59, %v7813_v48  ;;  %v4368_v8 = vld [vmem:[#allocation4 + $0xda] sm:$0xff]  ;;  %v4369_v48 = vld [vmem:[#allocation4 + $0xe2] sm:$0xff] }
 0x5d0   : > { %8025 = vrot.lane.b32.xlu1 %v11761_v32, %s8438_s20 }
 0x5d1   : > { %v7841_v23 = vpop.permute.xlu0 %7840  ;;  %v7836_v10 = vpop.permute.xlu2 %7835 }
 0x5d2   : > { %v7816_v38 = vpop.permute.xlu1 %7815  ;;  %v7838_v22 = vunpack.i.h.bf16 %v7836_v10  ;;  %v7837_v28 = vunpack.i.l.bf16 %v7836_v10  ;;  %v7843_v60 = vunpack.i.h.bf16 %v7841_v23 }
 0x5d3   : > { %v7818_v43 = vunpack.i.h.bf16 %v7816_v38  ;;  %v7817_v6 = vunpack.i.l.bf16 %v7816_v38  ;;  %v7842_v38 = vunpack.i.l.bf16 %v7841_v23 }
 0x5d5   : > { %v5665_v33 = vsel %vm2010_vm8, %v5633_v13, %v7817_v6  ;;  %v5666_v61 = vsel %vm2010_vm8, %v5634_v55, %v7818_v43 }
 0x5d6   : > { %v5697_v29 = vsel %vm2043_vm9, %v5665_v33, %v7822_v42  ;;  %v5698_v1 = vsel %vm2043_vm9, %v5666_v61, %v7823_v27  ;;  %v11808_v27 = vpack.i.bf16 %v4369_v48, %v4368_v8  ;;  %v11822_v61 = vld [vmem:[#allocation4 + $0xe0] sm:$0xff] }
 0x5d7   : > { %8015 = vrot.lane.b32.xlu2 %v11597_v53, %s8436_s18  ;;  %8065 = vrot.lane.b32.xlu0 %v11771_v36, %s8439_s21  ;;  %v5729_v41 = vsel %vm2076_vm10, %v5697_v29, %v7827_v11  ;;  %v5730_v21 = vsel %vm2076_vm10, %v5698_v1, %v7828_v34 }
 0x5d8   : > { %8040 = vrot.lane.b32.xlu1 %v11731_v25, %s8434_s16  ;;  %v5761_v39 = vpack.c.bf16 %v5730_v21, %v5729_v41  ;;  %v4465_v21 = vld [vmem:[#allocation4 + $0xf2] sm:$0xff] }
 0x5d9   : > { %v7856_v30 = vpop.permute.xlu0 %7855  ;;  %v7851_v58 = vpop.permute.xlu2 %7850 }
 0x5da   : > { %v7831_v63 = vpop.permute.xlu1 %7830  ;;  %6406 = vmatmul.msk.bf16.vlgmr.msra.gmra.mxu2 %vm2149_vm11, %v5761_v39  ;;  %v7853_v13 = vunpack.i.h.bf16 %v7851_v58  ;;  %v7852_v55 = vunpack.i.l.bf16 %v7851_v58  ;;  %v7858_v29 = vunpack.i.h.bf16 %v7856_v30  ;;  %v7857_v1 = vunpack.i.l.bf16 %v7856_v30 }
 0x5db   : > { %v7833_v53 = vunpack.i.h.bf16 %v7831_v63  ;;  %v7832_v45 = vunpack.i.l.bf16 %v7831_v63  ;;  %v8059_v63 = vpack.i.bf16 %v11822_v61, %v11824_v35 }
 0x5dd   : > { %v5540_v25 = vsel %vm380_vm3, %v5508_v44, %v7833_v53  ;;  %v5539_v62 = vsel %vm380_vm3, %v5507_v9, %v7832_v45  ;;  %v7767_v9 = vunpack.i.l.bf16 %v11694_v31 }
 0x5de   : > { %v5572_v18 = vsel %vm1911_vm5, %v5540_v25, %v7838_v22  ;;  %v5571_v3 = vsel %vm1911_vm5, %v5539_v62, %v7837_v28 }
 0x5df   : > { %8030 = vrot.lane.b32.xlu2 %v11753_v14, %s8439_s21  ;;  %8080 = vrot.lane.b32.xlu0 %v11741_v5, %s8434_s16  ;;  %v5603_v6 = vsel %vm1944_vm6, %v5571_v3, %v7842_v38  ;;  %v5604_v10 = vsel %vm1944_vm6, %v5572_v18, %v7843_v60  ;;  %v5509_v31 = vsel %vm334_vm0, %v11599_v16, %v7767_v9 }
 0x5e0   : > { %8055 = vrot.lane.b32.xlu1 %v11741_v5, %s8437_s19  ;;  %v5510_v18 = vsel %vm334_vm0, %v11594_v12, %v7768_v26 }
 0x5e1   : > { %v7866_v54 = vpop.permute.xlu2 %7865  ;;  %v11802_v15 = vpop.permute.xlu0 %7870 }
 0x5e2   : > { %v7846_v59 = vpop.permute.xlu1 %7845  ;;  %v7868_v62 = vunpack.i.h.bf16 %v7866_v54  ;;  %v7867_v22 = vunpack.i.l.bf16 %v7866_v54  ;;  %v7873_v3 = vunpack.i.h.bf16 %v11802_v15  ;;  %v7872_v54 = vunpack.i.l.bf16 %v11802_v15 }
 0x5e3   : > { %v7848_v52 = vunpack.i.h.bf16 %v7846_v59  ;;  %v7847_v43 = vunpack.i.l.bf16 %v7846_v59 }
 0x5e4   : > { %v5542_v48 = vsel %vm380_vm3, %v5510_v18, %v7868_v62  ;;  %v5541_v60 = vsel %vm380_vm3, %v5509_v31, %v7867_v22  ;;  %v7772_v31 = vunpack.i.l.bf16 %v11729_v57 }
 0x5e5   : > { %v5635_v5 = vsel %vm1977_vm7, %v5603_v6, %v7847_v43  ;;  %v5636_v42 = vsel %vm1977_vm7, %v5604_v10, %v7848_v52  ;;  %v11849_v52 = vld [vmem:[#allocation4 + $0xf8] sm:$0xff]  ;;  %v11851_v10 = vld [vmem:[#allocation4 + $0xf0] sm:$0xff]  ;;  %v5574_v16 = vsel %vm1911_vm5, %v5542_v48, %v7873_v3  ;;  %v5573_v12 = vsel %vm1911_vm5, %v5541_v60, %v7872_v54 }
 0x5e6   : > { %v5667_v23 = vsel %vm2010_vm8, %v5635_v5, %v7852_v55  ;;  %v5668_v34 = vsel %vm2010_vm8, %v5636_v42, %v7853_v13  ;;  %v8124_v15 = vpack.i.bf16 %v11849_v52, %v11851_v10  ;;  %v4434_v60 = vld [vmem:[#allocation4 + $0xf9] sm:$0xff] }
 0x5e7   : > { %8045 = vrot.lane.b32.xlu2 %v11761_v32, %s8435_s17  ;;  %8095 = vrot.lane.b32.xlu0 %v11808_v27, %s8437_s19  ;;  %v4466_v32 = vld [vmem:[#allocation4 + $0xfa] sm:$0xff]  ;;  %v5699_v53 = vsel %vm2043_vm9, %v5667_v23, %v7857_v1  ;;  %v5700_v45 = vsel %vm2043_vm9, %v5668_v34, %v7858_v29 }
 0x5e8   : > { %8070 = vrot.lane.b32.xlu1 %v11808_v27, %s8440_s22  ;;  %v11832_v44 = vpack.i.bf16 %v4466_v32, %v4465_v21 }
 0x5e9   : > { %v7881_v11 = vpop.permute.xlu2 %7880  ;;  %v11820_v33 = vpop.permute.xlu0 %7885 }
 0x5ea   : > { %v7861_v41 = vpop.permute.xlu1 %7860  ;;  %v7883_v13 = vunpack.i.h.bf16 %v7881_v11  ;;  %v7882_v55 = vunpack.i.l.bf16 %v7881_v11  ;;  %v7887_v21 = vunpack.i.l.bf16 %v11820_v33 }
 0x5eb   : > { %v7863_v39 = vunpack.i.h.bf16 %v7861_v41  ;;  %v7862_v58 = vunpack.i.l.bf16 %v7861_v41  ;;  %v7888_v41 = vunpack.i.h.bf16 %v11820_v33 }
 0x5ed   : > { %v5731_v30 = vsel %vm2076_vm10, %v5699_v53, %v7862_v58  ;;  %v5732_v25 = vsel %vm2076_vm10, %v5700_v45, %v7863_v39  ;;  %v4404_v39 = vld [vmem:[#allocation4 + $0x110] sm:$0xff]  ;;  %v4403_v45 = vld [vmem:[#allocation4 + $0x108] sm:$0xff] }
 0x5ee   : > { %v5762_v28 = vpack.c.bf16 %v5732_v25, %v5731_v30  ;;  %v11871_v25 = vpack.i.bf16 %v4404_v39, %v4403_v45  ;;  %v4340_v39 = vld [vmem:[#allocation4 + $0x109] sm:$0xff] }
 0x5ef   : > { %8060 = vrot.lane.b32.xlu2 %v8059_v63, %s8438_s20  ;;  %8110 = vrot.lane.b32.xlu0 %v11832_v44, %s8440_s22 }
 0x5f0   : > { %8085 = vrot.lane.b32.xlu1 %v8059_v63, %s8435_s17  ;;  %6407 = vmatmul.msk.bf16.gmra.mxu2 %vm2149_vm11, %v5762_v28  ;;  %v7773_v28 = vunpack.i.h.bf16 %v11729_v57  ;;  %v4433_v57 = vld [vmem:[#allocation4 + $0xf1] sm:$0xff] }
 0x5f1   : > { %v7896_v59 = vpop.permute.xlu2 %7895  ;;  %v7901_v8 = vpop.permute.xlu0 %7900 }
 0x5f2   : > { %v7876_v38 = vpop.permute.xlu1 %7875  ;;  %v7898_v26 = vunpack.i.h.bf16 %v7896_v59  ;;  %v7903_v18 = vunpack.i.h.bf16 %v7901_v8  ;;  %v7902_v3 = vunpack.i.l.bf16 %v7901_v8  ;;  %v8104_v8 = vpack.i.bf16 %v4434_v60, %v4433_v57 }
 0x5f3   : > { %v7878_v43 = vunpack.i.h.bf16 %v7876_v38  ;;  %v7877_v6 = vunpack.i.l.bf16 %v7876_v38 }
 0x5f5   : > { %v5606_v5 = vsel %vm1944_vm6, %v5574_v16, %v7878_v43  ;;  %v5605_v42 = vsel %vm1944_vm6, %v5573_v12, %v7877_v6  ;;  %v5511_v6 = vsel %vm334_vm0, %v11618_v20, %v7772_v31  ;;  %v5512_v16 = vsel %vm334_vm0, %v11616_v24, %v7773_v28  ;;  %v4341_v20 = vld [vmem:[#allocation4 + $0x111] sm:$0xff] }
 0x5f6   : > { %v5638_v23 = vsel %vm1977_vm7, %v5606_v5, %v7883_v13  ;;  %v5637_v34 = vsel %vm1977_vm7, %v5605_v42, %v7882_v55  ;;  %v5543_v12 = vsel %vm380_vm3, %v5511_v6, %v7902_v3 }
 0x5f7   : > { %8075 = vrot.lane.b32.xlu2 %v11753_v14, %s8433_s11  ;;  %8125 = vrot.lane.b32.xlu0 %v8124_v15, %s8435_s17  ;;  %v7897_v14 = vunpack.i.l.bf16 %v7896_v59  ;;  %v5669_v63 = vsel %vm2010_vm8, %v5637_v34, %v7887_v21  ;;  %v5670_v53 = vsel %vm2010_vm8, %v5638_v23, %v7888_v41 }
 0x5f8   : > { %8100 = vrot.lane.b32.xlu1 %v8124_v15, %s8438_s20 }
 0x5f9   : > { %v7911_v29 = vpop.permute.xlu2 %7910  ;;  %v7916_v1 = vpop.permute.xlu0 %7915 }
 0x5fa   : > { %v7891_v32 = vpop.permute.xlu1 %7890  ;;  %v7913_v42 = vunpack.i.h.bf16 %v7911_v29  ;;  %v7912_v13 = vunpack.i.l.bf16 %v7911_v29  ;;  %v7918_v41 = vunpack.i.h.bf16 %v7916_v1  ;;  %v7917_v21 = vunpack.i.l.bf16 %v7916_v1 }
 0x5fb   : > { %v7893_v11 = vunpack.i.h.bf16 %v7891_v32  ;;  %v7892_v58 = vunpack.i.l.bf16 %v7891_v32  ;;  %v11897_v29 = vpack.i.bf16 %v4341_v20, %v4340_v39  ;;  %v4468_v20 = vld [vmem:[#allocation4 + $0x112] sm:$0xff] }
 0x5fd   : > { %v5701_v9 = vsel %vm2043_vm9, %v5669_v63, %v7892_v58  ;;  %v5702_v30 = vsel %vm2043_vm9, %v5670_v53, %v7893_v11 }
 0x5fe   : > { %v5733_v62 = vsel %vm2076_vm10, %v5701_v9, %v7897_v14  ;;  %v5734_v33 = vsel %vm2076_vm10, %v5702_v30, %v7898_v26 }
 0x5ff   : > { %8090 = vrot.lane.b32.xlu2 %v11771_v36, %s8436_s18  ;;  %8140 = vrot.lane.b32.xlu0 %v11871_v25, %s8438_s20  ;;  %v5763_v22 = vpack.c.bf16 %v5734_v33, %v5733_v62 }
 0x600   : > { %8115 = vrot.lane.b32.xlu1 %v11771_v36, %s8433_s11  ;;  %v5544_v36 = vsel %vm380_vm3, %v5512_v16, %v7903_v18 }
 0x601   : > { %6408 = vmatmul.msk.bf16.gmra.mxu2 %vm2149_vm11, %v5763_v22  ;;  %v7926_v54 = vpop.permute.xlu2 %7925  ;;  %v7931_v59 = vpop.permute.xlu0 %7930 }
 0x602   : > { %v7906_v48 = vpop.permute.xlu1 %7905  ;;  %v7928_v26 = vunpack.i.h.bf16 %v7926_v54  ;;  %v7927_v14 = vunpack.i.l.bf16 %v7926_v54  ;;  %v7933_v45 = vunpack.i.h.bf16 %v7931_v59  ;;  %v7932_v9 = vunpack.i.l.bf16 %v7931_v59 }
 0x603   : > { %v7908_v38 = vunpack.i.h.bf16 %v7906_v48  ;;  %v7907_v43 = vunpack.i.l.bf16 %v7906_v48  ;;  %v7778_v54 = vunpack.i.h.bf16 %v11711_v50  ;;  %v7777_v59 = vunpack.i.l.bf16 %v11711_v50 }
 0x605   : > { %v5575_v15 = vsel %vm1911_vm5, %v5543_v12, %v7907_v43  ;;  %v5576_v5 = vsel %vm1911_vm5, %v5544_v36, %v7908_v38  ;;  %v4437_v43 = vld [vmem:[#allocation4 + $0x121] sm:$0xff]  ;;  %v5513_v16 = vsel %vm334_vm0, %v11631_v56, %v7777_v59  ;;  %v5514_v57 = vsel %vm334_vm0, %v11629_v46, %v7778_v54 }
 0x606   : > { %v5607_v24 = vsel %vm1944_vm6, %v5575_v15, %v7912_v13  ;;  %v5608_v55 = vsel %vm1944_vm6, %v5576_v5, %v7913_v42  ;;  %v4467_v5 = vld [vmem:[#allocation4 + $0x10a] sm:$0xff] }
 0x607   : > { %8105 = vrot.lane.b32.xlu2 %v8104_v8, %s8439_s21  ;;  %8155 = vrot.lane.b32.xlu0 %v8104_v8, %s8433_s11  ;;  %v5639_v63 = vsel %vm1977_vm7, %v5607_v24, %v7917_v21  ;;  %v5640_v53 = vsel %vm1977_vm7, %v5608_v55, %v7918_v41  ;;  %v4282_v24 = vld [vmem:[#allocation4 + $0x13a] sm:$0xff]  ;;  %v4283_v55 = vld [vmem:[#allocation4 + $0x142] sm:$0xff] }
 0x608   : > { %8130 = vrot.lane.b32.xlu1 %v8104_v8, %s8436_s18 }
 0x609   : > { %v7941_v23 = vpop.permute.xlu2 %7940  ;;  %v7946_v34 = vpop.permute.xlu0 %7945 }
 0x60a   : > { %v7921_v32 = vpop.permute.xlu1 %7920  ;;  %v7943_v50 = vunpack.i.h.bf16 %v7941_v23  ;;  %v7942_v8 = vunpack.i.l.bf16 %v7941_v23  ;;  %v7948_v41 = vunpack.i.h.bf16 %v7946_v34  ;;  %v7947_v21 = vunpack.i.l.bf16 %v7946_v34 }
 0x60b   : > { %v7923_v11 = vunpack.i.h.bf16 %v7921_v32  ;;  %v7922_v58 = vunpack.i.l.bf16 %v7921_v32 }
 0x60d   : > { %v5671_v30 = vsel %vm2010_vm8, %v5639_v63, %v7922_v58  ;;  %v5672_v62 = vsel %vm2010_vm8, %v5640_v53, %v7923_v11  ;;  %v11936_v11 = vpack.i.bf16 %v4468_v20, %v4467_v5  ;;  %v11938_v58 = vpack.i.bf16 %v4283_v55, %v4282_v24  ;;  %v4405_v24 = vld [vmem:[#allocation4 + $0x120] sm:$0xff] }
 0x60e   : > { %v5703_v1 = vsel %vm2043_vm9, %v5671_v30, %v7927_v14  ;;  %v5704_v33 = vsel %vm2043_vm9, %v5672_v62, %v7928_v26 }
 0x60f   : > { %8120 = vrot.lane.b32.xlu2 %v11808_v27, %s8434_s16  ;;  %8170 = vrot.lane.b32.xlu0 %v11897_v29, %s8436_s18  ;;  %v5735_v22 = vsel %vm2076_vm10, %v5703_v1, %v7932_v9  ;;  %v5736_v28 = vsel %vm2076_vm10, %v5704_v33, %v7933_v45  ;;  %v4438_v27 = vld [vmem:[#allocation4 + $0x129] sm:$0xff] }
 0x610   : > { %8145 = vrot.lane.b32.xlu1 %v11897_v29, %s8439_s21  ;;  %v5764_v31 = vpack.c.bf16 %v5736_v28, %v5735_v22  ;;  %v11916_v6 = vpack.i.bf16 %v4438_v27, %v4437_v43  ;;  %v7782_v27 = vunpack.i.l.bf16 %v11714_v47 }
 0x611   : > { %v7956_v18 = vpop.permute.xlu2 %7955  ;;  %v7961_v3 = vpop.permute.xlu0 %7960 }
 0x612   : > { %v7936_v48 = vpop.permute.xlu1 %7935  ;;  %6409 = vmatmul.msk.bf16.gmra.mxu2 %vm2149_vm11, %v5764_v31  ;;  %v7958_v63 = vunpack.i.h.bf16 %v7956_v18  ;;  %v7957_v53 = vunpack.i.l.bf16 %v7956_v18  ;;  %v7963_v62 = vunpack.i.h.bf16 %v7961_v3  ;;  %v7962_v1 = vunpack.i.l.bf16 %v7961_v3  ;;  %v4469_v31 = vld [vmem:[#allocation4 + $0x122] sm:$0xff]  ;;  %v4470_v18 = vld [vmem:[#allocation4 + $0x12a] sm:$0xff] }
 0x613   : > { %v7938_v60 = vunpack.i.h.bf16 %v7936_v48  ;;  %v7937_v38 = vunpack.i.l.bf16 %v7936_v48  ;;  %v7783_v48 = vunpack.i.h.bf16 %v11714_v47  ;;  %v11958_v3 = vpack.i.bf16 %v4470_v18, %v4469_v31  ;;  %v4378_v31 = vld [vmem:[#allocation4 + $0x152] sm:$0xff]  ;;  %v4379_v18 = vld [vmem:[#allocation4 + $0x15a] sm:$0xff] }
 0x614   : > { %v5515_v47 = vsel %vm334_vm0, %v11664_v7, %v7782_v27  ;;  %v11977_v7 = vld [vmem:[#allocation4 + $0x158] sm:$0xff] }
 0x615   : > { %v5546_v12 = vsel %vm380_vm3, %v5514_v57, %v7938_v60  ;;  %v5545_v36 = vsel %vm380_vm3, %v5513_v16, %v7937_v38 }
 0x616   : > { %v5578_v46 = vsel %vm1911_vm5, %v5546_v12, %v7943_v50  ;;  %v5577_v42 = vsel %vm1911_vm5, %v5545_v36, %v7942_v8  ;;  %v5516_v12 = vsel %vm334_vm0, %v11661_v0, %v7783_v48  ;;  %v4411_v0 = vld [vmem:[#allocation4 + $0x168] sm:$0xff] }
 0x617   : > { %8135 = vrot.lane.b32.xlu2 %v11832_v44, %s8437_s19  ;;  %8185 = vrot.lane.b32.xlu0 %v11916_v6, %s8439_s21  ;;  %v5609_v23 = vsel %vm1944_vm6, %v5577_v42, %v7947_v21  ;;  %v4412_v42 = vld [vmem:[#allocation4 + $0x170] sm:$0xff] }
 0x618   : > { %8160 = vrot.lane.b32.xlu1 %v11832_v44, %s8434_s16  ;;  %v5610_v44 = vsel %vm1944_vm6, %v5578_v46, %v7948_v41  ;;  %v4406_v46 = vld [vmem:[#allocation4 + $0x128] sm:$0xff]  ;;  %v11983_v21 = vpack.i.bf16 %v4412_v42, %v4411_v0  ;;  %v4347_v42 = vld [vmem:[#allocation4 + $0x159] sm:$0xff] }
 0x619   : > { %v7971_v15 = vpop.permute.xlu2 %7970  ;;  %v11930_v56 = vpop.permute.xlu0 %7975  ;;  %v11981_v41 = vpack.i.bf16 %v4406_v46, %v4405_v24 }
 0x61a   : > { %v7951_v13 = vpop.permute.xlu1 %7950  ;;  %v7973_v43 = vunpack.i.h.bf16 %v7971_v15  ;;  %v7972_v16 = vunpack.i.l.bf16 %v7971_v15  ;;  %v7978_v36 = vunpack.i.h.bf16 %v11930_v56  ;;  %v7977_v50 = vunpack.i.l.bf16 %v11930_v56 }
 0x61b   : > { %v7953_v32 = vunpack.i.h.bf16 %v7951_v13  ;;  %v7952_v39 = vunpack.i.l.bf16 %v7951_v13 }
 0x61c   : > { %v5547_v15 = vsel %vm380_vm3, %v5515_v47, %v7972_v16 }
 0x61d   : > { %v5641_v26 = vsel %vm1977_vm7, %v5609_v23, %v7952_v39  ;;  %v5642_v14 = vsel %vm1977_vm7, %v5610_v44, %v7953_v32  ;;  %v5579_v56 = vsel %vm1911_vm5, %v5547_v15, %v7977_v50  ;;  %v11985_v32 = vld [vmem:[#allocation4 + $0x150] sm:$0xff]  ;;  %v7787_v50 = vunpack.i.l.bf16 %v11739_v17 }
 0x61e   : > { %v5673_v34 = vsel %vm2010_vm8, %v5641_v26, %v7957_v53  ;;  %v5674_v45 = vsel %vm2010_vm8, %v5642_v14, %v7958_v63  ;;  %v11991_v44 = vpack.i.bf16 %v11977_v7, %v11985_v32 }
 0x61f   : > { %8150 = vrot.lane.b32.xlu2 %v11936_v11, %s8440_s22  ;;  %8200 = vrot.lane.b32.xlu0 %v11938_v58, %s8434_s16  ;;  %v5705_v54 = vsel %vm2043_vm9, %v5673_v34, %v7962_v1  ;;  %v5706_v59 = vsel %vm2043_vm9, %v5674_v45, %v7963_v62  ;;  %v5517_v0 = vsel %vm334_vm0, %v11682_v40, %v7787_v50 }
 0x620   : > { %8175 = vrot.lane.b32.xlu1 %v11936_v11, %s8437_s19 }
 0x621   : > { %v7986_v9 = vpop.permute.xlu2 %7985  ;;  %v11950_v30 = vpop.permute.xlu0 %7990 }
 0x622   : > { %v7966_v33 = vpop.permute.xlu1 %7965  ;;  %v7988_v26 = vunpack.i.h.bf16 %v7986_v9  ;;  %v7987_v14 = vunpack.i.l.bf16 %v7986_v9  ;;  %v7993_v62 = vunpack.i.h.bf16 %v11950_v30  ;;  %v7992_v9 = vunpack.i.l.bf16 %v11950_v30 }
 0x623   : > { %v7968_v22 = vunpack.i.h.bf16 %v7966_v33  ;;  %v7967_v28 = vunpack.i.l.bf16 %v7966_v33  ;;  %v4251_v33 = vld [vmem:[#allocation4 + $0x141] sm:$0xff]  ;;  %v12011_v30 = vpack.i.bf16 %v4379_v18, %v4378_v31  ;;  %v4475_v18 = vld [vmem:[#allocation4 + $0x16a] sm:$0xff] }
 0x625   : > { %v5737_v60 = vsel %vm2076_vm10, %v5705_v54, %v7967_v28  ;;  %v5738_v38 = vsel %vm2076_vm10, %v5706_v59, %v7968_v22 }
 0x626   : > { %v5765_v57 = vpack.c.bf16 %v5738_v38, %v5737_v60  ;;  %v4250_v60 = vld [vmem:[#allocation4 + $0x139] sm:$0xff] }
 0x627   : > { %8165 = vrot.lane.b32.xlu2 %v11871_v25, %s8435_s17  ;;  %8215 = vrot.lane.b32.xlu0 %v11897_v29, %s8433_s11  ;;  %v5548_v29 = vsel %vm380_vm3, %v5516_v12, %v7973_v43  ;;  %v12009_v16 = vpack.i.bf16 %v4251_v33, %v4250_v60 }
 0x628   : > { %8190 = vrot.lane.b32.xlu1 %v11958_v3, %s8440_s22  ;;  %6410 = vmatmul.msk.bf16.gmra.mxu2 %vm2149_vm11, %v5765_v57  ;;  %v5580_v55 = vsel %vm1911_vm5, %v5548_v29, %v7978_v36  ;;  %v7788_v36 = vunpack.i.h.bf16 %v11739_v17 }
 0x629   : > { %v8001_v8 = vpop.permute.xlu2 %8000  ;;  %v11973_v25 = vpop.permute.xlu0 %8005 }
 0x62a   : > { %v7981_v5 = vpop.permute.xlu1 %7980  ;;  %v8003_v54 = vunpack.i.h.bf16 %v8001_v8  ;;  %v8002_v59 = vunpack.i.l.bf16 %v8001_v8  ;;  %v8008_v8 = vunpack.i.h.bf16 %v11973_v25  ;;  %v8007_v29 = vunpack.i.l.bf16 %v11973_v25 }
 0x62b   : > { %v7983_v13 = vunpack.i.h.bf16 %v7981_v5  ;;  %v7982_v20 = vunpack.i.l.bf16 %v7981_v5  ;;  %v5518_v17 = vsel %vm334_vm0, %v11680_v37, %v7788_v36 }
 0x62c   : > { %v5549_v25 = vsel %vm380_vm3, %v5517_v0, %v8007_v29 }
 0x62d   : > { %v5612_v39 = vsel %vm1944_vm6, %v5580_v55, %v7983_v13  ;;  %v5611_v23 = vsel %vm1944_vm6, %v5579_v56, %v7982_v20  ;;  %v12026_v13 = vld [vmem:[#allocation4 + $0x140] sm:$0xff]  ;;  %v4346_v55 = vld [vmem:[#allocation4 + $0x151] sm:$0xff] }
 0x62e   : > { %v5644_v63 = vsel %vm1977_vm7, %v5612_v39, %v7988_v26  ;;  %v5643_v53 = vsel %vm1977_vm7, %v5611_v23, %v7987_v14  ;;  %v12032_v56 = vld [vmem:[#allocation4 + $0x138] sm:$0xff]  ;;  %v5550_v39 = vsel %vm380_vm3, %v5518_v17, %v8008_v8  ;;  %v12036_v23 = vpack.i.bf16 %v4347_v42, %v4346_v55  ;;  %v4443_v17 = vld [vmem:[#allocation4 + $0x169] sm:$0xff] }
 0x62f   : > { %8180 = vrot.lane.b32.xlu2 %v11981_v41, %s8438_s20  ;;  %8230 = vrot.lane.b32.xlu0 %v11983_v21, %s8438_s20  ;;  %v5675_v48 = vsel %vm2010_vm8, %v5643_v53, %v7992_v9  ;;  %v5676_v27 = vsel %vm2010_vm8, %v5644_v63, %v7993_v62  ;;  %v12040_v26 = vpack.i.bf16 %v12026_v13, %v12032_v56 }
 0x630   : > { %8205 = vrot.lane.b32.xlu1 %v11991_v44, %s8435_s17 }
 0x631   : > { %v8016_v34 = vpop.permute.xlu2 %8015  ;;  %v12001_v45 = vpop.permute.xlu0 %8020 }
 0x632   : > { %v7996_v1 = vpop.permute.xlu1 %7995  ;;  %v8018_v63 = vunpack.i.h.bf16 %v8016_v34  ;;  %v8017_v53 = vunpack.i.l.bf16 %v8016_v34  ;;  %v8023_v33 = vunpack.i.h.bf16 %v12001_v45 }
 0x633   : > { %v7998_v22 = vunpack.i.h.bf16 %v7996_v1  ;;  %v7997_v28 = vunpack.i.l.bf16 %v7996_v1 }
 0x635   : > { %v5707_v38 = vsel %vm2043_vm9, %v5675_v48, %v7997_v28  ;;  %v5708_v43 = vsel %vm2043_vm9, %v5676_v27, %v7998_v22  ;;  %v8022_v22 = vunpack.i.l.bf16 %v12001_v45 }
 0x636   : > { %v5739_v57 = vsel %vm2076_vm10, %v5707_v38, %v8002_v59  ;;  %v5740_v47 = vsel %vm2076_vm10, %v5708_v43, %v8003_v54  ;;  %v4476_v54 = vld [vmem:[#allocation4 + $0x172] sm:$0xff] }
 0x637   : > { %8195 = vrot.lane.b32.xlu2 %v12009_v16, %s8433_s11  ;;  %8245 = vrot.lane.b32.xlu0 %v11916_v6, %s8436_s18  ;;  %v5766_v12 = vpack.c.bf16 %v5740_v47, %v5739_v57  ;;  %v12058_v47 = vpack.i.bf16 %v4476_v54, %v4475_v18 }
 0x638   : > { %8220 = vrot.lane.b32.xlu1 %v12011_v30, %s8437_s19 }
 0x639   : > { %6411 = vmatmul.msk.bf16.gmra.mxu2 %vm2149_vm11, %v5766_v12  ;;  %v8031_v15 = vpop.permute.xlu2 %8030  ;;  %v8036_v5 = vpop.permute.xlu0 %8035 }
 0x63a   : > { %v8011_v46 = vpop.permute.xlu1 %8010  ;;  %v8033_v59 = vunpack.i.h.bf16 %v8031_v15  ;;  %v8032_v48 = vunpack.i.l.bf16 %v8031_v15  ;;  %v8038_v60 = vunpack.i.h.bf16 %v8036_v5  ;;  %v8037_v38 = vunpack.i.l.bf16 %v8036_v5 }
 0x63b   : > { %v8013_v20 = vunpack.i.h.bf16 %v8011_v46  ;;  %v8012_v24 = vunpack.i.l.bf16 %v8011_v46  ;;  %v7793_v5 = vunpack.i.h.bf16 %v11727_v49  ;;  %v7792_v46 = vunpack.i.l.bf16 %v11727_v49 }
 0x63d   : > { %v5581_v14 = vsel %vm1911_vm5, %v5549_v25, %v8012_v24  ;;  %v5582_v37 = vsel %vm1911_vm5, %v5550_v39, %v8013_v20  ;;  %v5520_v55 = vsel %vm334_vm0, %v11697_v2, %v7793_v5  ;;  %v5519_v25 = vsel %vm334_vm0, %v11702_v51, %v7792_v46 }
 0x63e   : > { %v5613_v40 = vsel %vm1944_vm6, %v5581_v14, %v8017_v53  ;;  %v5614_v62 = vsel %vm1944_vm6, %v5582_v37, %v8018_v63 }
 0x63f   : > { %8210 = vrot.lane.b32.xlu2 %v12036_v23, %s8436_s18  ;;  %8260 = vrot.lane.b32.xlu0 %v12040_v26, %s8438_s20  ;;  %v5645_v27 = vsel %vm1977_vm7, %v5613_v40, %v8022_v22 }
 0x640   : > { %8235 = vrot.lane.b32.xlu1 %v11981_v41, %s8435_s17  ;;  %v5646_v41 = vsel %vm1977_vm7, %v5614_v62, %v8023_v33 }
 0x641   : > { %v8046_v9 = vpop.permute.xlu2 %8045  ;;  %v8051_v1 = vpop.permute.xlu0 %8050 }
 0x642   : > { %v8026_v34 = vpop.permute.xlu1 %8025  ;;  %v8048_v49 = vunpack.i.h.bf16 %v8046_v9  ;;  %v8047_v37 = vunpack.i.l.bf16 %v8046_v9  ;;  %v8053_v62 = vunpack.i.h.bf16 %v8051_v1  ;;  %v8052_v33 = vunpack.i.l.bf16 %v8051_v1 }
 0x643   : > { %v8028_v28 = vunpack.i.h.bf16 %v8026_v34  ;;  %v8027_v31 = vunpack.i.l.bf16 %v8026_v34 }
 0x645   : > { %v5677_v43 = vsel %vm2010_vm8, %v5645_v27, %v8027_v31  ;;  %v5678_v57 = vsel %vm2010_vm8, %v5646_v41, %v8028_v28 }
 0x646   : > { %v5709_v45 = vsel %vm2043_vm9, %v5677_v43, %v8032_v48  ;;  %v5710_v12 = vsel %vm2043_vm9, %v5678_v57, %v8033_v59  ;;  %v4446_v57 = vld [vmem:[#allocation4 + $0x189] sm:$0xff] }
 0x647   : > { %8225 = vrot.lane.b32.xlu2 %v11936_v11, %s8434_s16  ;;  %8275 = vrot.lane.b32.xlu0 %v12036_v23, %s8433_s11  ;;  %v5741_v36 = vsel %vm2076_vm10, %v5709_v45, %v8037_v38  ;;  %v5742_v50 = vsel %vm2076_vm10, %v5710_v12, %v8038_v60  ;;  %v4444_v11 = vld [vmem:[#allocation4 + $0x171] sm:$0xff] }
 0x648   : > { %8250 = vrot.lane.b32.xlu1 %v12058_v47, %s8440_s22  ;;  %v5767_v8 = vpack.c.bf16 %v5742_v50, %v5741_v36  ;;  %v12073_v0 = vpack.i.bf16 %v4444_v11, %v4443_v17  ;;  %v4445_v36 = vld [vmem:[#allocation4 + $0x181] sm:$0xff] }
 0x649   : > { %v8061_v29 = vpop.permute.xlu2 %8060  ;;  %v8066_v15 = vpop.permute.xlu0 %8065 }
 0x64a   : > { %v8041_v42 = vpop.permute.xlu1 %8040  ;;  %6412 = vmatmul.msk.bf16.gmra.mxu2 %vm2149_vm11, %v5767_v8  ;;  %v8063_v54 = vunpack.i.h.bf16 %v8061_v29  ;;  %v8062_v59 = vunpack.i.l.bf16 %v8061_v29  ;;  %v8068_v60 = vunpack.i.h.bf16 %v8066_v15  ;;  %v8067_v38 = vunpack.i.l.bf16 %v8066_v15 }
 0x64b   : > { %v8043_v20 = vunpack.i.h.bf16 %v8041_v42  ;;  %v8042_v24 = vunpack.i.l.bf16 %v8041_v42  ;;  %v12103_v8 = vpack.i.bf16 %v4446_v57, %v4445_v36 }
 0x64d   : > { %v5552_v39 = vsel %vm380_vm3, %v5520_v55, %v8043_v20  ;;  %v5551_v14 = vsel %vm380_vm3, %v5519_v25, %v8042_v24 }
 0x64e   : > { %v5584_v53 = vsel %vm1911_vm5, %v5552_v39, %v8048_v49  ;;  %v5583_v51 = vsel %vm1911_vm5, %v5551_v14, %v8047_v37  ;;  %v4414_v37 = vld [vmem:[#allocation4 + $0x188] sm:$0xff] }
 0x64f   : > { %8240 = vrot.lane.b32.xlu2 %v12073_v0, %s8439_s21  ;;  %8290 = vrot.lane.b32.xlu0 %v12073_v0, %s8436_s18  ;;  %v5615_v28 = vsel %vm1944_vm6, %v5583_v51, %v8052_v33  ;;  %v5616_v31 = vsel %vm1944_vm6, %v5584_v53, %v8053_v62  ;;  %v4413_v53 = vld [vmem:[#allocation4 + $0x180] sm:$0xff] }
 0x650   : > { %8265 = vrot.lane.b32.xlu1 %v12009_v16, %s8439_s21 }
 0x651   : > { %v8076_v63 = vpop.permute.xlu2 %8075  ;;  %v8081_v2 = vpop.permute.xlu0 %8080 }
 0x652   : > { %v8056_v40 = vpop.permute.xlu1 %8055  ;;  %v8078_v46 = vunpack.i.h.bf16 %v8076_v63  ;;  %v8077_v42 = vunpack.i.l.bf16 %v8076_v63  ;;  %v8083_v15 = vunpack.i.h.bf16 %v8081_v2  ;;  %v8082_v20 = vunpack.i.l.bf16 %v8081_v2 }
 0x653   : > { %v8058_v22 = vunpack.i.h.bf16 %v8056_v40  ;;  %v8057_v34 = vunpack.i.l.bf16 %v8056_v40  ;;  %v8309_v40 = vpack.i.bf16 %v4414_v37, %v4413_v53 }
 0x654   : > { %v5522_v55 = vsel %vm334_vm0, %v11747_v19, %v8078_v46  ;;  %v5521_v25 = vsel %vm334_vm0, %v11755_v4, %v8077_v42  ;;  %v4416_v42 = vld [vmem:[#allocation4 + $0x1a0] sm:$0xff] }
 0x655   : > { %v5647_v9 = vsel %vm1977_vm7, %v5615_v28, %v8057_v34  ;;  %v5648_v18 = vsel %vm1977_vm7, %v5616_v31, %v8058_v22  ;;  %v5554_v63 = vsel %vm380_vm3, %v5522_v55, %v8083_v15 }
 0x656   : > { %v5679_v1 = vsel %vm2010_vm8, %v5647_v9, %v8062_v59  ;;  %v5680_v48 = vsel %vm2010_vm8, %v5648_v18, %v8063_v54 }
 0x657   : > { %8255 = vrot.lane.b32.xlu2 %v11958_v3, %s8437_s19  ;;  %8305 = vrot.lane.b32.xlu0 %v11958_v3, %s8434_s16  ;;  %v5711_v50 = vsel %vm2043_vm9, %v5679_v1, %v8067_v38  ;;  %v5712_v3 = vsel %vm2043_vm9, %v5680_v48, %v8068_v60 }
 0x658   : > { %8280 = vrot.lane.b32.xlu1 %v12011_v30, %s8434_s16 }
 0x659   : > { %v8091_v27 = vpop.permute.xlu2 %8090  ;;  %v8096_v41 = vpop.permute.xlu0 %8095 }
 0x65a   : > { %v8071_v43 = vpop.permute.xlu1 %8070  ;;  %v8093_v62 = vunpack.i.h.bf16 %v8091_v27  ;;  %v8092_v33 = vunpack.i.l.bf16 %v8091_v27  ;;  %v8098_v28 = vunpack.i.h.bf16 %v8096_v41  ;;  %v8097_v31 = vunpack.i.l.bf16 %v8096_v41 }
 0x65b   : > { %v8073_v45 = vunpack.i.h.bf16 %v8071_v43  ;;  %v8072_v12 = vunpack.i.l.bf16 %v8071_v43 }
 0x65d   : > { %v5743_v29 = vsel %vm2076_vm10, %v5711_v50, %v8072_v12  ;;  %v5744_v5 = vsel %vm2076_vm10, %v5712_v3, %v8073_v45 }
 0x65e   : > { %v5768_v11 = vpack.c.bf16 %v5744_v5, %v5743_v29 }
 0x65f   : > { %8270 = vrot.lane.b32.xlu2 %v11938_v58, %s8440_s22  ;;  %8320 = vrot.lane.b32.xlu0 %v12103_v8, %s8439_s21 }
 0x660   : > { %8295 = vrot.lane.b32.xlu1 %v11916_v6, %s8433_s11  ;;  %6413 = vmatmul.msk.bf16.gmra.mxu2 %vm2149_vm11, %v5768_v11  ;;  %v5553_v6 = vsel %vm380_vm3, %v5521_v25, %v8082_v20  ;;  %v4478_v25 = vld [vmem:[#allocation4 + $0x18a] sm:$0xff] }
 0x661   : > { %v8106_v24 = vpop.permute.xlu2 %8105  ;;  %v8111_v17 = vpop.permute.xlu0 %8110 }
 0x662   : > { %v8086_v39 = vpop.permute.xlu1 %8085  ;;  %v8108_v59 = vunpack.i.h.bf16 %v8106_v24  ;;  %v8107_v1 = vunpack.i.l.bf16 %v8106_v24  ;;  %v8112_v27 = vunpack.i.l.bf16 %v8111_v17 }
 0x663   : > { %v8088_v14 = vunpack.i.h.bf16 %v8086_v39  ;;  %v8087_v49 = vunpack.i.l.bf16 %v8086_v39 }
 0x665   : > { %v5586_v51 = vsel %vm1911_vm5, %v5554_v63, %v8088_v14  ;;  %v5585_v2 = vsel %vm1911_vm5, %v5553_v6, %v8087_v49 }
 0x666   : > { %v5618_v19 = vsel %vm1944_vm6, %v5586_v51, %v8093_v62  ;;  %v5617_v4 = vsel %vm1944_vm6, %v5585_v2, %v8092_v33 }
 0x667   : > { %8285 = vrot.lane.b32.xlu2 %v11983_v21, %s8435_s17  ;;  %8335 = vrot.lane.b32.xlu0 %v11938_v58, %s8437_s19  ;;  %v5649_v21 = vsel %vm1977_vm7, %v5617_v4, %v8097_v31  ;;  %v5650_v48 = vsel %vm1977_vm7, %v5618_v19, %v8098_v28  ;;  %v8113_v58 = vunpack.i.h.bf16 %v8111_v17 }
 0x668   : > { %8310 = vrot.lane.b32.xlu1 %v8309_v40, %s8438_s20 }
 0x669   : > { %v8121_v22 = vpop.permute.xlu2 %8120  ;;  %v8126_v34 = vpop.permute.xlu0 %8125 }
 0x66a   : > { %v8101_v9 = vpop.permute.xlu1 %8100  ;;  %v8123_v11 = vunpack.i.h.bf16 %v8121_v22  ;;  %v8122_v15 = vunpack.i.l.bf16 %v8121_v22  ;;  %v8127_v14 = vunpack.i.l.bf16 %v8126_v34 }
 0x66b   : > { %v8103_v18 = vunpack.i.h.bf16 %v8101_v9  ;;  %v8102_v54 = vunpack.i.l.bf16 %v8101_v9 }
 0x66d   : > { %v5681_v60 = vsel %vm2010_vm8, %v5649_v21, %v8102_v54  ;;  %v5682_v38 = vsel %vm2010_vm8, %v5650_v48, %v8103_v18 }
 0x66e   : > { %v5713_v43 = vsel %vm2043_vm9, %v5681_v60, %v8107_v1  ;;  %v5714_v57 = vsel %vm2043_vm9, %v5682_v38, %v8108_v59 }
 0x66f   : > { %8300 = vrot.lane.b32.xlu2 %v12058_v47, %s8437_s19  ;;  %8350 = vrot.lane.b32.xlu0 %v12011_v30, %s8440_s22  ;;  %v5745_v41 = vsel %vm2076_vm10, %v5713_v43, %v8112_v27  ;;  %v5746_v45 = vsel %vm2076_vm10, %v5714_v57, %v8113_v58  ;;  %v4447_v43 = vld [vmem:[#allocation4 + $0x199] sm:$0xff]  ;;  %v4448_v57 = vld [vmem:[#allocation4 + $0x1a1] sm:$0xff] }
 0x670   : > { %8325 = vrot.lane.b32.xlu1 %v12009_v16, %s8436_s18  ;;  %v5769_v12 = vpack.c.bf16 %v5746_v45, %v5745_v41  ;;  %v4415_v16 = vld [vmem:[#allocation4 + $0x198] sm:$0xff] }
 0x671   : > { %v8136_v36 = vpop.permute.xlu2 %8135  ;;  %v8141_v50 = vpop.permute.xlu0 %8140  ;;  %v8379_v39 = vpack.i.bf16 %v4416_v42, %v4415_v16 }
 0x672   : > { %v8116_v3 = vpop.permute.xlu1 %8115  ;;  %6414 = vmatmul.msk.bf16.gmra.mxu2 %vm2149_vm11, %v5769_v12  ;;  %v8138_v2 = vunpack.i.h.bf16 %v8136_v36  ;;  %v8143_v22 = vunpack.i.h.bf16 %v8141_v50 }
 0x673   : > { %v8118_v29 = vunpack.i.h.bf16 %v8116_v3  ;;  %v8117_v5 = vunpack.i.l.bf16 %v8116_v3  ;;  %v8384_v3 = vpack.i.bf16 %v4448_v57, %v4447_v43 }
 0x675   : > { %v5524_v46 = vsel %vm334_vm0, %v11822_v61, %v8118_v29  ;;  %v5523_v30 = vsel %vm334_vm0, %v11824_v35, %v8117_v5  ;;  %v4477_v35 = vld [vmem:[#allocation4 + $0x182] sm:$0xff] }
 0x676   : > { %v5556_v17 = vsel %vm380_vm3, %v5524_v46, %v8123_v11  ;;  %v5555_v61 = vsel %vm380_vm3, %v5523_v30, %v8122_v15  ;;  %v8329_v53 = vpack.i.bf16 %v4478_v25, %v4477_v35 }
 0x677   : > { %8315 = vrot.lane.b32.xlu2 %v12040_v26, %s8435_s17  ;;  %8365 = vrot.lane.b32.xlu0 %v8309_v40, %s8435_s17  ;;  %v8128_v26 = vunpack.i.h.bf16 %v8126_v34  ;;  %v5587_v63 = vsel %vm1911_vm5, %v5555_v61, %v8127_v14  ;;  %v8137_v40 = vunpack.i.l.bf16 %v8136_v36  ;;  %v8142_v34 = vunpack.i.l.bf16 %v8141_v50  ;;  %v12187_v61 = vpop.f32.mrf.mxu2  ;;  %v4479_v14 = vld [vmem:[#allocation4 + $0x19a] sm:$0xff] }
 0x678   : > { %8340 = vrot.lane.b32.xlu1 %v11991_v44, %s8438_s20 }
 0x679   : > { %v8151_v20 = vpop.permute.xlu2 %8150  ;;  %v8156_v24 = vpop.permute.xlu0 %8155  ;;  %v5588_v6 = vsel %vm1911_vm5, %v5556_v17, %v8128_v26 }
 0x67a   : > { %v8131_v55 = vpop.permute.xlu1 %8130  ;;  %v8153_v18 = vunpack.i.h.bf16 %v8151_v20  ;;  %v8152_v54 = vunpack.i.l.bf16 %v8151_v20  ;;  %v8158_v41 = vunpack.i.h.bf16 %v8156_v24  ;;  %v8157_v45 = vunpack.i.l.bf16 %v8156_v24 }
 0x67b   : > { %v8133_v49 = vunpack.i.h.bf16 %v8131_v55  ;;  %v8132_v37 = vunpack.i.l.bf16 %v8131_v55 }
 0x67c   : > { %v5526_v29 = vsel %vm334_vm0, %v11849_v52, %v8158_v41 }
 0x67d   : > { %v5619_v44 = vsel %vm1944_vm6, %v5587_v63, %v8132_v37  ;;  %v5620_v51 = vsel %vm1944_vm6, %v5588_v6, %v8133_v49  ;;  %v4480_v49 = vld [vmem:[#allocation4 + $0x1a2] sm:$0xff] }
 0x67e   : > { %v5651_v62 = vsel %vm1977_vm7, %v5619_v44, %v8137_v40  ;;  %v5652_v33 = vsel %vm1977_vm7, %v5620_v51, %v8138_v2 }
 0x67f   : > { %8330 = vrot.lane.b32.xlu2 %v8329_v53, %s8440_s22  ;;  %8380 = vrot.lane.b32.xlu0 %v8379_v39, %s8438_s20  ;;  %v5683_v59 = vsel %vm2010_vm8, %v5651_v62, %v8142_v34  ;;  %v5684_v1 = vsel %vm2010_vm8, %v5652_v33, %v8143_v22 }
 0x680   : > { %8355 = vrot.lane.b32.xlu1 %v12073_v0, %s8433_s11 }
 0x681   : > { %v8166_v19 = vpop.permute.xlu2 %8165  ;;  %v8171_v4 = vpop.permute.xlu0 %8170 }
 0x682   : > { %v8146_v28 = vpop.permute.xlu1 %8145  ;;  %v8168_v46 = vunpack.i.h.bf16 %v8166_v19  ;;  %v8167_v30 = vunpack.i.l.bf16 %v8166_v19  ;;  %v8173_v20 = vunpack.i.h.bf16 %v8171_v4  ;;  %v8389_v19 = vpack.i.bf16 %v4480_v49, %v4479_v14 }
 0x683   : > { %v8148_v31 = vunpack.i.h.bf16 %v8146_v28  ;;  %v8147_v9 = vunpack.i.l.bf16 %v8146_v28  ;;  %v12200_v28 = vpop.f32.mrf.mxu2 }
 0x685   : > { %v5715_v21 = vsel %vm2043_vm9, %v5683_v59, %v8147_v9  ;;  %v5716_v0 = vsel %vm2043_vm9, %v5684_v1, %v8148_v31 }
 0x686   : > { %v5747_v48 = vsel %vm2076_vm10, %v5715_v21, %v8152_v54  ;;  %v5748_v58 = vsel %vm2076_vm10, %v5716_v0, %v8153_v18 }
 0x687   : > { %8345 = vrot.lane.b32.xlu2 %v12036_v23, %s8439_s21  ;;  %v5770_v27 = vpack.c.bf16 %v5748_v58, %v5747_v48  ;;  %v5525_v23 = vsel %vm334_vm0, %v11851_v10, %v8157_v45  ;;  %v8172_v10 = vunpack.i.l.bf16 %v8171_v4 }
 0x688   : > { %8370 = vrot.lane.b32.xlu1 %v12103_v8, %s8436_s18 }
 0x689   : > { %6415 = vmatmul.msk.bf16.gmra.mxu2 %vm2149_vm11, %v5770_v27  ;;  %v8181_v60 = vpop.permute.xlu2 %8180  ;;  %v8186_v38 = vpop.permute.xlu0 %8185 }
 0x68a   : > { %v8161_v12 = vpop.permute.xlu1 %8160  ;;  %v8183_v39 = vunpack.i.h.bf16 %v8181_v60  ;;  %v8182_v26 = vunpack.i.l.bf16 %v8181_v60  ;;  %v8188_v51 = vunpack.i.h.bf16 %v8186_v38  ;;  %v8187_v2 = vunpack.i.l.bf16 %v8186_v38 }
 0x68b   : > { %v8163_v36 = vunpack.i.h.bf16 %v8161_v12  ;;  %v8162_v50 = vunpack.i.l.bf16 %v8161_v12  ;;  %v12204_v59 = vpop.f32.mrf.mxu2 }
 0x68d   : > { %v5558_v8 = vsel %vm380_vm3, %v5526_v29, %v8163_v36  ;;  %v5557_v5 = vsel %vm380_vm3, %v5525_v23, %v8162_v50 }
 0x68e   : > { %v5590_v11 = vsel %vm1911_vm5, %v5558_v8, %v8168_v46  ;;  %v5589_v52 = vsel %vm1911_vm5, %v5557_v5, %v8167_v30 }
 0x68f   : > { %8360 = vrot.lane.b32.xlu2 %v12058_v47, %s8434_s16  ;;  %v5621_v55 = vsel %vm1944_vm6, %v5589_v52, %v8172_v10  ;;  %v5622_v47 = vsel %vm1944_vm6, %v5590_v11, %v8173_v20 }
 0x690   : > { %8385 = vrot.lane.b32.xlu1 %v8384_v3, %s8439_s21  ;;  %s6431_s21 = sshll.u32 %s13161_s10, 7 }
 0x691   : > { %v8196_v16 = vpop.permute.xlu2 %8195  ;;  %v8201_v42 = vpop.permute.xlu0 %8200  ;;  %s12549_s23 = scalar_lea.vmem %s12683_s9, %s6431_s21 }
 0x692   : > { %v8176_v15 = vpop.permute.xlu1 %8175  ;;  %v8198_v0 = vunpack.i.h.bf16 %v8196_v16  ;;  %v8197_v48 = vunpack.i.l.bf16 %v8196_v16  ;;  %v8203_v27 = vunpack.i.h.bf16 %v8201_v42  ;;  %v8202_v60 = vunpack.i.l.bf16 %v8201_v42 }
 0x693   : > { %v8178_v24 = vunpack.i.h.bf16 %v8176_v15  ;;  %v8177_v17 = vunpack.i.l.bf16 %v8176_v15  ;;  %v12210_v45 = vpop.f32.mrf.mxu2 }
 0x694   : > { %v5532_v38 = vsel %vm334_vm0, %v12026_v13, %v8198_v0  ;;  %v5531_v43 = vsel %vm334_vm0, %v12032_v56, %v8197_v48 }
 0x695   : > { %v5653_v35 = vsel %vm1977_vm7, %v5621_v55, %v8177_v17  ;;  %v5654_v25 = vsel %vm1977_vm7, %v5622_v47, %v8178_v24  ;;  %v5564_v12 = vsel %vm380_vm3, %v5532_v38, %v8203_v27  ;;  %v5563_v36 = vsel %vm380_vm3, %v5531_v43, %v8202_v60 }
 0x696   : > { %v5685_v37 = vsel %vm2010_vm8, %v5653_v35, %v8182_v26  ;;  %v5686_v63 = vsel %vm2010_vm8, %v5654_v25, %v8183_v39  ;;  %v4214_v35 = vld [vmem:[#allocation4 + $0x108] sm:$0xff]  ;;  %v4215_v25 = vld [vmem:[#allocation4 + $0x110] sm:$0xff] }
 0x697   : > { %8375 = vrot.lane.b32.xlu2 %v8329_v53, %s8437_s19  ;;  %v5717_v4 = vsel %vm2043_vm9, %v5685_v37, %v8187_v2  ;;  %v5718_v22 = vsel %vm2043_vm9, %v5686_v63, %v8188_v51 }
 0x699   : > { %v8211_v6 = vpop.permute.xlu2 %8210  ;;  %v8216_v44 = vpop.permute.xlu0 %8215 }
 0x69a   : > { %v8191_v40 = vpop.permute.xlu1 %8190  ;;  %v8213_v46 = vunpack.i.h.bf16 %v8211_v6  ;;  %v8212_v56 = vunpack.i.l.bf16 %v8211_v6  ;;  %v8218_v30 = vunpack.i.h.bf16 %v8216_v44  ;;  %v8217_v16 = vunpack.i.l.bf16 %v8216_v44 }
 0x69b   : > { %v8193_v62 = vunpack.i.h.bf16 %v8191_v40  ;;  %v8192_v33 = vunpack.i.l.bf16 %v8191_v40 }
 0x69c   : > { %v5528_v39 = vsel %vm334_vm0, %v4215_v25, %v8218_v30  ;;  %v5527_v26 = vsel %vm334_vm0, %v4214_v35, %v8217_v16 }
 0x69d   : > { %v5749_v53 = vsel %vm2076_vm10, %v5717_v4, %v8192_v33  ;;  %v5750_v34 = vsel %vm2076_vm10, %v5718_v22, %v8193_v62  ;;  %v12228_v62 = vpop.f32.mrf.mxu2 }
 0x69e   : > { %v5771_v31 = vpack.c.bf16 %v5750_v34, %v5749_v53 }
 0x69f   : > { %8390 = vrot.lane.b32.xlu2 %v8389_v19, %s8440_s22 }
 0x6a0   : > { %6416 = vmatmul.msk.bf16.gmra.mxu2 %vm2149_vm11, %v5771_v31 }
 0x6a1   : > { %v8226_v9 = vpop.permute.xlu2 %8225  ;;  %v8231_v18 = vpop.permute.xlu0 %8230 }
 0x6a2   : > { %v8206_v54 = vpop.permute.xlu1 %8205  ;;  %v8228_v52 = vunpack.i.h.bf16 %v8226_v9  ;;  %v8227_v15 = vunpack.i.l.bf16 %v8226_v9  ;;  %v8233_v24 = vunpack.i.h.bf16 %v8231_v18  ;;  %v8232_v17 = vunpack.i.l.bf16 %v8231_v18 }
 0x6a3   : > { %v8208_v57 = vunpack.i.h.bf16 %v8206_v54  ;;  %v8207_v41 = vunpack.i.l.bf16 %v8206_v54 }
 0x6a4   : > { %v5559_v6 = vsel %vm380_vm3, %v5527_v26, %v8227_v15  ;;  %v5560_v44 = vsel %vm380_vm3, %v5528_v39, %v8228_v52 }
 0x6a5   : > { %v5596_v29 = vsel %vm1911_vm5, %v5564_v12, %v8208_v57  ;;  %v5595_v23 = vsel %vm1911_vm5, %v5563_v36, %v8207_v41 }
 0x6a6   : > { %v5627_v42 = vsel %vm1944_vm6, %v5595_v23, %v8212_v56  ;;  %v5628_v11 = vsel %vm1944_vm6, %v5596_v29, %v8213_v46 }
 0x6a9   : > { %v8241_v1 = vpop.permute.xlu2 %8240  ;;  %v8246_v21 = vpop.permute.xlu0 %8245 }
 0x6aa   : > { %v8221_v58 = vpop.permute.xlu1 %8220  ;;  %v8243_v51 = vunpack.i.h.bf16 %v8241_v1  ;;  %v8242_v2 = vunpack.i.l.bf16 %v8241_v1  ;;  %v8248_v53 = vunpack.i.h.bf16 %v8246_v21  ;;  %v8247_v34 = vunpack.i.l.bf16 %v8246_v21 }
 0x6ab   : > { %v8223_v8 = vunpack.i.h.bf16 %v8221_v58  ;;  %v8222_v13 = vunpack.i.l.bf16 %v8221_v58 }
 0x6ad   : > { %v5659_v20 = vsel %vm1977_vm7, %v5627_v42, %v8222_v13  ;;  %v5660_v10 = vsel %vm1977_vm7, %v5628_v11, %v8223_v8 }
 0x6ae   : > { %v5691_v14 = vsel %vm2010_vm8, %v5659_v20, %v8232_v17  ;;  %v5692_v49 = vsel %vm2010_vm8, %v5660_v10, %v8233_v24 }
 0x6af   : > { %v5723_v31 = vsel %vm2043_vm9, %v5691_v14, %v8242_v2  ;;  %v5724_v9 = vsel %vm2043_vm9, %v5692_v49, %v8243_v51 }
 0x6b1   : > { %v8256_v50 = vpop.permute.xlu2 %8255  ;;  %v12214_v3 = vpop.permute.xlu0 %8260 }
 0x6b2   : > { %v8236_v5 = vpop.permute.xlu1 %8235  ;;  %v8258_v58 = vunpack.i.h.bf16 %v8256_v50  ;;  %v8257_v27 = vunpack.i.l.bf16 %v8256_v50  ;;  %v8263_v43 = vunpack.i.h.bf16 %v12214_v3  ;;  %v8262_v57 = vunpack.i.l.bf16 %v12214_v3 }
 0x6b3   : > { %v8238_v55 = vunpack.i.h.bf16 %v8236_v5  ;;  %v8237_v47 = vunpack.i.l.bf16 %v8236_v5  ;;  %v12245_v5 = vpop.f32.mrf.mxu2 }
 0x6b5   : > { %v5592_v33 = vsel %vm1911_vm5, %v5560_v44, %v8238_v55  ;;  %v5591_v19 = vsel %vm1911_vm5, %v5559_v6, %v8237_v47 }
 0x6b6   : > { %v5624_v1 = vsel %vm1944_vm6, %v5592_v33, %v8248_v53  ;;  %v5623_v0 = vsel %vm1944_vm6, %v5591_v19, %v8247_v34 }
 0x6b7   : > { %v5655_v21 = vsel %vm1977_vm7, %v5623_v0, %v8257_v27  ;;  %v5656_v38 = vsel %vm1977_vm7, %v5624_v1, %v8258_v58 }
 0x6b8   : > { %v5687_v13 = vsel %vm2010_vm8, %v5655_v21, %v8262_v57  ;;  %v5688_v50 = vsel %vm2010_vm8, %v5656_v38, %v8263_v43 }
 0x6b9   : > { %v8271_v37 = vpop.permute.xlu2 %8270  ;;  %v8276_v63 = vpop.permute.xlu0 %8275 }
 0x6ba   : > { %v8251_v40 = vpop.permute.xlu1 %8250  ;;  %v8273_v23 = vunpack.i.h.bf16 %v8271_v37  ;;  %v8272_v8 = vunpack.i.l.bf16 %v8271_v37  ;;  %v8278_v15 = vunpack.i.h.bf16 %v8276_v63  ;;  %v8277_v20 = vunpack.i.l.bf16 %v8276_v63 }
 0x6bb   : > { %v8253_v4 = vunpack.i.h.bf16 %v8251_v40  ;;  %v8252_v22 = vunpack.i.l.bf16 %v8251_v40  ;;  %v12252_v10 = vpop.f32.mrf.mxu2 }
 0x6bc   : > { %v5534_v47 = vsel %vm334_vm0, %v11977_v7, %v8278_v15  ;;  %v5533_v35 = vsel %vm334_vm0, %v11985_v32, %v8277_v20 }
 0x6bd   : > { %v5755_v18 = vsel %vm2076_vm10, %v5723_v31, %v8252_v22  ;;  %v5756_v54 = vsel %vm2076_vm10, %v5724_v9, %v8253_v4 }
 0x6be   : > { %v5774_v48 = vpack.c.bf16 %v5756_v54, %v5755_v18 }
 0x6c0   : > { %6419 = vmatmul.msk.bf16.vlgmr.msra.gmra.mxu3 %vm2149_vm11, %v5774_v48 }
 0x6c1   : > { %v8286_v60 = vpop.permute.xlu2 %8285  ;;  %v8291_v41 = vpop.permute.xlu0 %8290 }
 0x6c2   : > { %v8266_v12 = vpop.permute.xlu1 %8265  ;;  %v8288_v14 = vunpack.i.h.bf16 %v8286_v60  ;;  %v8287_v49 = vunpack.i.l.bf16 %v8286_v60  ;;  %v8293_v44 = vunpack.i.h.bf16 %v8291_v41  ;;  %v8292_v51 = vunpack.i.l.bf16 %v8291_v41 }
 0x6c3   : > { %v8268_v36 = vunpack.i.h.bf16 %v8266_v12  ;;  %v8267_v29 = vunpack.i.l.bf16 %v8266_v12  ;;  %v12262_v2 = vpop.f32.mrf.mxu2 }
 0x6c5   : > { %v5719_v46 = vsel %vm2043_vm9, %v5687_v13, %v8267_v29  ;;  %v5720_v56 = vsel %vm2043_vm9, %v5688_v50, %v8268_v36  ;;  %v4216_v36 = vld [vmem:[#allocation4 + $0x120] sm:$0xff]  ;;  %v4217_v29 = vld [vmem:[#allocation4 + $0x128] sm:$0xff] }
 0x6c6   : > { %v5751_v30 = vsel %vm2076_vm10, %v5719_v46, %v8272_v8  ;;  %v5752_v3 = vsel %vm2076_vm10, %v5720_v56, %v8273_v23 }
 0x6c7   : > { %v5772_v16 = vpack.c.bf16 %v5752_v3, %v5751_v30 }
 0x6c9   : > { %6417 = vmatmul.msk.bf16.gmra.mxu2 %vm2149_vm11, %v5772_v16  ;;  %v8301_v42 = vpop.permute.xlu2 %8300  ;;  %v8306_v52 = vpop.permute.xlu0 %8305 }
 0x6ca   : > { %v8281_v11 = vpop.permute.xlu1 %8280  ;;  %v8303_v33 = vunpack.i.h.bf16 %v8301_v42  ;;  %v8302_v19 = vunpack.i.l.bf16 %v8301_v42  ;;  %v8308_v50 = vunpack.i.h.bf16 %v8306_v52  ;;  %v8307_v46 = vunpack.i.l.bf16 %v8306_v52 }
 0x6cb   : > { %v8283_v24 = vunpack.i.h.bf16 %v8281_v11  ;;  %v8282_v17 = vunpack.i.l.bf16 %v8281_v11  ;;  %v12274_v12 = vpop.f32.mrf.mxu2 }
 0x6cd   : > { %v5566_v39 = vsel %vm380_vm3, %v5534_v47, %v8283_v24  ;;  %v5565_v26 = vsel %vm380_vm3, %v5533_v35, %v8282_v17 }
 0x6ce   : > { %v5598_v37 = vsel %vm1911_vm5, %v5566_v39, %v8288_v14  ;;  %v5597_v63 = vsel %vm1911_vm5, %v5565_v26, %v8287_v49 }
 0x6cf   : > { %v5629_v40 = vsel %vm1944_vm6, %v5597_v63, %v8292_v51  ;;  %v5630_v32 = vsel %vm1944_vm6, %v5598_v37, %v8293_v44 }
 0x6d0   : > { %v5661_v9 = vsel %vm1977_vm7, %v5629_v40, %v8302_v19  ;;  %v5662_v18 = vsel %vm1977_vm7, %v5630_v32, %v8303_v33 }
 0x6d1   : > { %v8316_v55 = vpop.permute.xlu2 %8315  ;;  %v8321_v6 = vpop.permute.xlu0 %8320 }
 0x6d2   : > { %v8296_v25 = vpop.permute.xlu1 %8295  ;;  %v8323_v34 = vunpack.i.h.bf16 %v8321_v6  ;;  %v8322_v31 = vunpack.i.l.bf16 %v8321_v6  ;;  %v8318_v11 = vunpack.i.h.bf16 %v8316_v55  ;;  %v8317_v15 = vunpack.i.l.bf16 %v8316_v55 }
 0x6d3   : > { %v8298_v58 = vunpack.i.h.bf16 %v8296_v25  ;;  %v8297_v27 = vunpack.i.l.bf16 %v8296_v25  ;;  %v12285_v26 = vpop.f32.mrf.mxu2 }
 0x6d5   : > { %v5530_v23 = vsel %vm334_vm0, %v4217_v29, %v8298_v58  ;;  %v5529_v8 = vsel %vm334_vm0, %v4216_v36, %v8297_v27 }
 0x6d6   : > { %v5562_v30 = vsel %vm380_vm3, %v5530_v23, %v8308_v50  ;;  %v5561_v3 = vsel %vm380_vm3, %v5529_v8, %v8307_v46 }
 0x6d7   : > { %v5593_v20 = vsel %vm1911_vm5, %v5561_v3, %v8317_v15  ;;  %v5594_v24 = vsel %vm1911_vm5, %v5562_v30, %v8318_v11 }
 0x6d9   : > { %v8331_v7 = vpop.permute.xlu2 %8330  ;;  %v8336_v57 = vpop.permute.xlu0 %8335 }
 0x6da   : > { %v8311_v4 = vpop.permute.xlu1 %8310  ;;  %v8333_v54 = vunpack.i.h.bf16 %v8331_v7  ;;  %v8332_v1 = vunpack.i.l.bf16 %v8331_v7  ;;  %v8338_v35 = vunpack.i.h.bf16 %v8336_v57  ;;  %v8337_v25 = vunpack.i.l.bf16 %v8336_v57 }
 0x6db   : > { %v8313_v22 = vunpack.i.h.bf16 %v8311_v4  ;;  %v8312_v53 = vunpack.i.l.bf16 %v8311_v4 }
 0x6dd   : > { %v5693_v0 = vsel %vm2010_vm8, %v5661_v9, %v8312_v53  ;;  %v5694_v48 = vsel %vm2010_vm8, %v5662_v18, %v8313_v22  ;;  %v12296_v18 = vpop.f32.mrf.mxu2 }
 0x6de   : > { %v5725_v60 = vsel %vm2043_vm9, %v5693_v0, %v8322_v31  ;;  %v5726_v21 = vsel %vm2043_vm9, %v5694_v48, %v8323_v34  ;;  %v4223_v0 = vld [vmem:[#allocation4 + $0x170] sm:$0xff] }
 0x6df   : > { %v5757_v38 = vsel %vm2076_vm10, %v5725_v60, %v8332_v1  ;;  %v5758_v43 = vsel %vm2076_vm10, %v5726_v21, %v8333_v54  ;;  %v4222_v1 = vld [vmem:[#allocation4 + $0x168] sm:$0xff] }
 0x6e0   : > { %v5775_v41 = vpack.c.bf16 %v5758_v43, %v5757_v38 }
 0x6e1   : > { %v8346_v56 = vpop.permute.xlu2 %8345  ;;  %v8351_v52 = vpop.permute.xlu0 %8350 }
 0x6e2   : > { %v8326_v13 = vpop.permute.xlu1 %8325  ;;  %6420 = vmatmul.msk.bf16.gmra.mxu3 %vm2149_vm11, %v5775_v41  ;;  %v8348_v37 = vunpack.i.h.bf16 %v8346_v56  ;;  %v8347_v63 = vunpack.i.l.bf16 %v8346_v56  ;;  %v8353_v44 = vunpack.i.h.bf16 %v8351_v52  ;;  %v8352_v51 = vunpack.i.l.bf16 %v8351_v52 }
 0x6e3   : > { %v8328_v16 = vunpack.i.h.bf16 %v8326_v13  ;;  %v8327_v42 = vunpack.i.l.bf16 %v8326_v13 }
 0x6e5   : > { %v5625_v17 = vsel %vm1944_vm6, %v5593_v20, %v8327_v42  ;;  %v5626_v47 = vsel %vm1944_vm6, %v5594_v24, %v8328_v16  ;;  %v12306_v30 = vpop.f32.mrf.mxu2 }
 0x6e6   : > { %v5657_v55 = vsel %vm1977_vm7, %v5625_v17, %v8337_v25  ;;  %v5658_v6 = vsel %vm1977_vm7, %v5626_v47, %v8338_v35 }
 0x6e9   : > { %v8361_v7 = vpop.permute.xlu2 %8360  ;;  %v8366_v54 = vpop.permute.xlu0 %8365 }
 0x6ea   : > { %v8341_v39 = vpop.permute.xlu1 %8340  ;;  %v8363_v60 = vunpack.i.h.bf16 %v8361_v7  ;;  %v8362_v21 = vunpack.i.l.bf16 %v8361_v7  ;;  %v8368_v41 = vunpack.i.h.bf16 %v8366_v54  ;;  %v8367_v36 = vunpack.i.l.bf16 %v8366_v54 }
 0x6eb   : > { %v8343_v14 = vunpack.i.h.bf16 %v8341_v39  ;;  %v8342_v49 = vunpack.i.l.bf16 %v8341_v39 }
 0x6ed   : > { %v5689_v40 = vsel %vm2010_vm8, %v5657_v55, %v8342_v49  ;;  %v5690_v32 = vsel %vm2010_vm8, %v5658_v6, %v8343_v14 }
 0x6ee   : > { %v5721_v33 = vsel %vm2043_vm9, %v5689_v40, %v8347_v63  ;;  %v5722_v19 = vsel %vm2043_vm9, %v5690_v32, %v8348_v37 }
 0x6ef   : > { %v5753_v4 = vsel %vm2076_vm10, %v5721_v33, %v8352_v51  ;;  %v5754_v22 = vsel %vm2076_vm10, %v5722_v19, %v8353_v44  ;;  %v5891_v44 = vpop.f32.mrf.mxu2 }
 0x6f0   : > { %v5773_v53 = vpack.c.bf16 %v5754_v22, %v5753_v4  ;;  %v12320_v22 = vld [vmem:[%s12680_s6] ss:$0 sm:$0xff] }
 0x6f1   : > { %v8376_v48 = vpop.permute.xlu2 %8375  ;;  %v8381_v50 = vpop.permute.xlu0 %8380  ;;  %v12338_v54 = vadd.f32 %v12320_v22, %v12210_v45 }
 0x6f2   : > { %v8356_v34 = vpop.permute.xlu1 %8355  ;;  %6418 = vmatmul.msk.bf16.gmra.mxu2 %vm2149_vm11, %v5773_v53  ;;  %v8378_v3 = vunpack.i.h.bf16 %v8376_v48  ;;  %v8377_v16 = vunpack.i.l.bf16 %v8376_v48  ;;  %v8383_v11 = vunpack.i.h.bf16 %v8381_v50  ;;  %v8382_v15 = vunpack.i.l.bf16 %v8381_v50 }
 0x6f3   : > { %v8358_v31 = vunpack.i.h.bf16 %v8356_v34  ;;  %v8357_v9 = vunpack.i.l.bf16 %v8356_v34  ;;  %v12324_v53 = vadd.f32 %v12320_v22, %v12200_v28  ;;  %v12328_v34 = vadd.f32 %v12320_v22, %v12187_v61 }
 0x6f4   : > { %v12346_v61 = vadd.f32 %v12320_v22, %v12228_v62  ;;  %v5946_v48 = vsel %vm334_vm0, %v12338_v54, 0.0  ;;  %v12386_v50 = vadd.f32 %v12320_v22, %v12296_v18 }
 0x6f5   : > { %v5536_v58 = vsel %vm334_vm0, %v4223_v0, %v8358_v31  ;;  %v5535_v27 = vsel %vm334_vm0, %v4222_v1, %v8357_v9  ;;  %v12332_v31 = vadd.f32 %v12320_v22, %v12204_v59  ;;  %v5942_v9 = vsel %vm334_vm0, %v12324_v53, 0.0 }
 0x6f6   : > { %v5568_v38 = vsel %vm380_vm3, %v5536_v58, %v8363_v60  ;;  %v5567_v43 = vsel %vm380_vm3, %v5535_v27, %v8362_v21  ;;  %v5941_v28 = vsel %vm334_vm0, %v12328_v34, 0.0  ;;  %v12352_v58 = vadd.f32 %v12320_v22, %v12245_v5  ;;  %v6019_v5 = vld [vmem:[%s12681_s7] sm:$0x3] }
 0x6f7   : > { %v5599_v8 = vsel %vm1911_vm5, %v5567_v43, %v8367_v36  ;;  %v5600_v13 = vsel %vm1911_vm5, %v5568_v38, %v8368_v41  ;;  %v5893_v51 = vpop.f32.mrf.mxu2  ;;  %v5944_v0 = vsel %vm334_vm0, %v12332_v31, 0.0  ;;  %v5943_v59 = vadd.f32 %v5942_v9, %v5941_v28 }
 0x6f8   : > { %v5948_v27 = vsel %vm334_vm0, %v12346_v61, 0.0  ;;  %v12358_v60 = vadd.f32 %v12320_v22, %v12252_v10  ;;  %v5950_v62 = vsel %vm334_vm0, %v12352_v58, 0.0  ;;  %v12364_v38 = vadd.f32 %v12320_v22, %v12262_v2 }
 0x6f9   : > { %v8391_v42 = vpop.permute.xlu2 %8390  ;;  %v5945_v45 = vadd.f32 %v5944_v0, %v5943_v59  ;;  %v12374_v10 = vadd.f32 %v12320_v22, %v12274_v12 }
 0x6fa   : > { %v8371_v57 = vpop.permute.xlu1 %8370  ;;  %v8393_v47 = vunpack.i.h.bf16 %v8391_v42  ;;  %v8392_v35 = vunpack.i.l.bf16 %v8391_v42  ;;  %v5952_v41 = vsel %vm334_vm0, %v12358_v60, 0.0  ;;  %v5954_v2 = vsel %vm334_vm0, %v12364_v38, 0.0 }
 0x6fb   : > { %v8373_v29 = vunpack.i.h.bf16 %v8371_v57  ;;  %v8372_v23 = vunpack.i.l.bf16 %v8371_v57  ;;  %v5947_v21 = vadd.f32 %v5946_v48, %v5945_v45  ;;  %v6024_v57 = vsel %vm2198_vm4, %v6019_v5, 0 }
 0x6fc   : > { %6033 = vmatpush.bf16.msrb.mxu3 %v6024_v57 }
 0x6fd   : > { %v5631_v46 = vsel %vm1944_vm6, %v5599_v8, %v8372_v23  ;;  %v5632_v56 = vsel %vm1944_vm6, %v5600_v13, %v8373_v29  ;;  %v5949_v43 = vadd.f32 %v5948_v27, %v5947_v21  ;;  %v12380_v23 = vadd.f32 %v12320_v22, %v12285_v26 }
 0x6fe   : > { %v5663_v20 = vsel %vm1977_vm7, %v5631_v46, %v8377_v16  ;;  %v5664_v24 = vsel %vm1977_vm7, %v5632_v56, %v8378_v3  ;;  %v5956_v13 = vsel %vm334_vm0, %v12374_v10, 0.0  ;;  %v12392_v56 = vadd.f32 %v12320_v22, %v12306_v30 }
 0x6ff   : > { %v5695_v39 = vsel %vm2010_vm8, %v5663_v20, %v8382_v15  ;;  %v5696_v14 = vsel %vm2010_vm8, %v5664_v24, %v8383_v11  ;;  %v5896_v7 = vpop.f32.mrf.mxu2  ;;  %v5951_v29 = vadd.f32 %v5950_v62, %v5949_v43  ;;  %v5958_v46 = vsel %vm334_vm0, %v12380_v23, 0.0 }
 0x700   : > { %v5960_v26 = vsel %vm334_vm0, %v12386_v50, 0.0  ;;  %v12397_v16 = vadd.f32 %v12320_v22, %v5891_v44  ;;  %v5962_v18 = vsel %vm334_vm0, %v12392_v56, 0.0  ;;  %v12402_v15 = vadd.f32 %v12320_v22, %v5893_v51 }
 0x701   : > { %v5953_v8 = vadd.f32 %v5952_v41, %v5951_v29  ;;  %v12407_v24 = vadd.f32 %v12320_v22, %v5896_v7  ;;  %vm6245_vm7 = vcmask 27648  }
 0x702   : > { %v8386_v17 = vpop.permute.xlu1 %8385  ;;  %v5964_v30 = vsel %vm334_vm0, %v12397_v16, 0.0 }
 0x703   : > { %v8388_v25 = vunpack.i.h.bf16 %v8386_v17  ;;  %v8387_v52 = vunpack.i.l.bf16 %v8386_v17  ;;  %v5955_v12 = vadd.f32 %v5954_v2, %v5953_v8 }
 0x705   : > { %v5727_v49 = vsel %vm2043_vm9, %v5695_v39, %v8387_v52  ;;  %v5728_v37 = vsel %vm2043_vm9, %v5696_v14, %v8388_v25  ;;  %v5957_v3 = vadd.f32 %v5956_v13, %v5955_v12  ;;  %v5968_v39 = vsel %vm334_vm0, %v12407_v24, 0.0 }
 0x706   : > { %v5759_v63 = vsel %vm2076_vm10, %v5727_v49, %v8392_v35  ;;  %v5760_v55 = vsel %vm2076_vm10, %v5728_v37, %v8393_v47  ;;  %v5966_v35 = vsel %vm334_vm0, %v12402_v15, 0.0 }
 0x707   : > { %v5776_v6 = vpack.c.bf16 %v5760_v55, %v5759_v63  ;;  %v5898_v40 = vpop.f32.mrf.mxu2  ;;  %v5959_v11 = vadd.f32 %v5958_v46, %v5957_v3 }
 0x708   : > { %v12412_v25 = vadd.f32 %v12320_v22, %v5898_v40 }
 0x709   : > { %6421 = vmatmul.msk.bf16.gmra.mxu3 %vm2149_vm11, %v5776_v6  ;;  %v5961_v20 = vadd.f32 %v5960_v26, %v5959_v11 }
 0x70a   : > { %v5970_v37 = vsel %vm334_vm0, %v12412_v25, 0.0 }
 0x70b   : > { %v5963_v17 = vadd.f32 %v5962_v18, %v5961_v20 }
 0x70d   : > { %v5965_v52 = vadd.f32 %v5964_v30, %v5963_v17 }
 0x70f   : > { %v5901_v32 = vpop.f32.mrf.mxu2  ;;  %v5967_v49 = vadd.f32 %v5966_v35, %v5965_v52  ;;  %v8445_v52 = vmov 256.0  }
 0x710   : > { %v12417_v14 = vadd.f32 %v12320_v22, %v5901_v32  ;;  %8397 = vrcp.f32 %v8445_v52 }
 0x711   : > { %v5969_v6 = vadd.f32 %v5968_v39, %v5967_v49  ;;  %v6440_v39 = vld [vmem:[%s12682_s8] sm:$0xff] }
 0x712   : > { %v5972_v44 = vsel %vm334_vm0, %v12417_v14, 0.0  ;;  %6059 = vmatpush.bf16.msra.mxu3 %v6440_v39 }
 0x713   : > { %v5971_v7 = vadd.f32 %v5970_v37, %v5969_v6 }
 0x715   : > { %v5973_v9 = vadd.f32 %v5972_v44, %v5971_v7 }
 0x717   : > { %v5903_v33 = vpop.f32.mrf.mxu2 }
 0x718   : > { %v12422_v63 = vadd.f32 %v12320_v22, %v5903_v33 }
 0x71a   : > { %v5974_v40 = vsel %vm334_vm0, %v12422_v63, 0.0 }
 0x71b   : > { %v5975_v59 = vadd.f32 %v5974_v40, %v5973_v9  ;;  %v8398_v40 = vpop.eup %8397 }
 0x71c   : > { %vm6015_vm3 = vweird.f32 %v8398_v40 }
 0x71f   : > { %v5906_v19 = vpop.f32.mrf.mxu2 }
 0x720   : > { %v12427_v51 = vadd.f32 %v12320_v22, %v5906_v19 }
 0x722   : > { %v5976_v33 = vsel %vm334_vm0, %v12427_v51, 0.0 }
 0x723   : > { %v5977_v27 = vadd.f32 %v5976_v33, %v5975_v59  ;;  %v6011_v59 = vmul.f32 256.0, %v8398_v40 }
 0x727   : > { %v5908_v4 = vpop.f32.mrf.mxu2 }
 0x728   : > { %v12432_v32 = vadd.f32 %v12320_v22, %v5908_v4 }
 0x72a   : > { %v5978_v19 = vsel %vm334_vm0, %v12432_v32, 0.0 }
 0x72b   : > { %v5979_v62 = vadd.f32 %v5978_v19, %v5977_v27 }
 0x72f   : > { %v5911_v1 = vpop.f32.mrf.mxu2 }
 0x730   : > { %v12437_v0 = vadd.f32 %v12320_v22, %v5911_v1 }
 0x732   : > { %v5980_v4 = vsel %vm334_vm0, %v12437_v0, 0.0 }
 0x733   : > { %v5981_v43 = vadd.f32 %v5980_v4, %v5979_v62 }
 0x737   : > { %v5913_v36 = vpop.f32.mrf.mxu2 }
 0x738   : > { %v12442_v48 = vadd.f32 %v12320_v22, %v5913_v36 }
 0x73a   : > { %v5982_v1 = vsel %vm334_vm0, %v12442_v48, 0.0 }
 0x73b   : > { %v5983_v29 = vadd.f32 %v5982_v1, %v5981_v43  ;;  %v6012_v1 = vsub.f32 1.0, %v6011_v59 }
 0x743   : > { %v5926_v47 = vpop.f32.mrf.mxu3 }
 0x744   : > { %v12469_v11 = vadd.f32 %v12320_v22, %v5926_v47 }
 0x746   : > { %v5992_v30 = vsel %vm334_vm0, %v12469_v11, 0.0 }
 0x74b   : > { %v5928_v28 = vpop.f32.mrf.mxu3 }
 0x74c   : > { %v5916_v42 = vpop.f32.mrf.mxu2  ;;  %v12474_v17 = vadd.f32 %v12320_v22, %v5928_v28 }
 0x74d   : > { %v12447_v21 = vadd.f32 %v12320_v22, %v5916_v42 }
 0x74e   : > { %v5994_v49 = vsel %vm334_vm0, %v12474_v17, 0.0 }
 0x74f   : > { %v5984_v41 = vsel %vm334_vm0, %v12447_v21, 0.0 }
 0x750   : > { %v5985_v13 = vadd.f32 %v5984_v41, %v5983_v29  ;;  %v6013_v41 = vmul.f32 %v8398_v40, %v6012_v1 }
 0x754   : > { %v5918_v55 = vpop.f32.mrf.mxu2 }
 0x755   : > { %v12452_v5 = vadd.f32 %v12320_v22, %v5918_v55 }
 0x757   : > { %v5986_v2 = vsel %vm334_vm0, %v12452_v5, 0.0 }
 0x758   : > { %v5987_v3 = vadd.f32 %v5986_v2, %v5985_v13 }
 0x765   : > { %v5931_v57 = vpop.f32.mrf.mxu3 }
 0x766   : > { %v12482_v47 = vadd.f32 %v12320_v22, %v5931_v57 }
 0x768   : > { %v5996_v6 = vsel %vm334_vm0, %v12482_v47, 0.0 }
 0x76d   : > { %v5933_v18 = vpop.f32.mrf.mxu3 }
 0x76e   : > { %v12487_v44 = vadd.f32 %v12320_v22, %v5933_v18 }
 0x770   : > { %v5998_v28 = vsel %vm334_vm0, %v12487_v44, 0.0 }
 0x775   : > { %v5921_v45 = vpop.f32.mrf.mxu2 }
 0x776   : > { %v12457_v36 = vadd.f32 %v12320_v22, %v5921_v45 }
 0x778   : > { %v5988_v46 = vsel %vm334_vm0, %v12457_v36, 0.0 }
 0x779   : > { %v5989_v42 = vadd.f32 %v5988_v46, %v5987_v3 }
 0x77d   : > { %v5923_v8 = vpop.f32.mrf.mxu2 }
 0x77e   : > { %v12462_v12 = vadd.f32 %v12320_v22, %v5923_v8  ;;  %v6014_v8 = vadd.f32 %v8398_v40, %v6013_v41 }
 0x780   : > { %v5990_v26 = vsel %vm334_vm0, %v12462_v12, 0.0  ;;  %v6016_v3 = vsel %vm6015_vm3, %v8398_v40, %v6014_v8  ;;  %v6085_v8 = vld [vmem:[%s8661_s15 + $0x8] sm:$0xff] }
 0x781   : > { %v5991_v20 = vadd.f32 %v5990_v26, %v5989_v42 }
 0x783   : > { %v5993_v35 = vadd.f32 %v5992_v30, %v5991_v20 }
 0x785   : > { %v5995_v37 = vadd.f32 %v5994_v49, %v5993_v35 }
 0x787   : > { %v5997_v9 = vadd.f32 %v5996_v6, %v5995_v37 }
 0x789   : > { %v5999_v19 = vadd.f32 %v5998_v28, %v5997_v9 }
 0x78c   : > { %v5936_v55 = vpop.f32.mrf.mxu3 }
 0x78d   : > { %v12490_v7 = vadd.f32 %v12320_v22, %v5936_v55 }
 0x78f   : > { %v6000_v33 = vsel %vm334_vm0, %v12490_v7, 0.0 }
 0x790   : > { %v6001_v4 = vadd.f32 %v6000_v33, %v5999_v19 }
 0x794   : > { %v5938_v45 = vpop.f32.mrf.mxu3 }
 0x795   : > { %v12497_v27 = vadd.f32 %v12320_v22, %v5938_v45 }
 0x797   : > { %v6002_v62 = vsel %vm334_vm0, %v12497_v27, 0.0 }
 0x798   : > { %v6003_v43 = vadd.f32 %v6002_v62, %v6001_v4 }
 0x79a   : > { %v6004_v57 = vrot.slane %v6003_v43, 4 }
 0x79c   : > { %v6005_v29 = vadd.f32 %v6004_v57, %v6003_v43 }
 0x79e   : > { %v6006_v2 = vrot.slane %v6005_v29, 2 }
 0x7a0   : > { %v6007_v13 = vadd.f32 %v6006_v2, %v6005_v29  ;;  %v6084_v2 = vld [vmem:[%s8661_s15] sm:$0xff] }
 0x7a2   : > { %v6008_v46 = vrot.slane %v6007_v13, 1 }
 0x7a4   : > { %v6009_v26 = vadd.f32 %v6008_v46, %v6007_v13  ;;  %v6086_v13 = vld [vmem:[%s8661_s15 + $0x10] sm:$0xff] }
 0x7a6   : > { %v6017_v42 = vmul.f32 %v6016_v3, %v6009_v26  ;;  %v6087_v3 = vld [vmem:[%s8661_s15 + $0x18] sm:$0xff] }
 0x7a8   : > { %v6018_v18 = vpack.c.bf16 %v6017_v42, %v6017_v42 }
 0x7aa   : > { %6422 = vmatmul.msk.bf16.vlgmr.msrb.gmra.mxu3 %vm334_vm0, %v6018_v18 }
 0x82d   : > { %v6035_v22 = vpop.f32.mrf.mxu3 }
 0x82e   : > { %v6039_v20 = vmax.f32 %v6035_v22, 0.0 }
 0x830   : > { %v6040_v30 = vpack.c.bf16 %v6039_v20, %v6039_v20 }
 0x832   : > { %6427 = vmatmul.msk.bf16.vlgmr.msra.gmra.mxu3 %vm1944_vm6, %v6040_v30 }
 0x835   : > { %v6037_v35 = vpop.f32.mrf.mxu3 }
 0x8b5   : > { %v6061_v52 = vpop.f32.mrf.mxu3 }
 0x8b6   : > { %v6065_v39 = vsub.f32 0.0, %v6061_v52 }
 0x8b8   : > { %v6066_v49 = vmul.f32 1.442695, %v6065_v39  ;;  %v6092_v39 = vld [vmem:[%s8661_s15 + $0x40] sm:$0xff] }
 0x8ba   : > { %8399 = vpow2.f32 %v6066_v49 }
 0x8bd   : > { %v6063_v37 = vpop.f32.mrf.mxu3 }
 0x8c0   : > { %v8400_v55 = vpop.eup %8399 }
 0x8c1   : > { %v6068_v6 = vadd.f32 1.0, %v8400_v55  ;;  %v6093_v55 = vld [vmem:[%s8661_s15 + $0x48] sm:$0xff] }
 0x8c3   : > { %8401 = vrcp.f32 %v6068_v6  ;;  %v6080_v19 = vand.u32 2147483648, %v6068_v6  ;;  %vm6074_vm4 = vweird.f32 %v6068_v6  ;;  %v6078_v45 = vand.u32 2147483647, %v6068_v6 }
 0x8c5   : > { %v6081_v62 = vor.u32 1.1754944e-38, %v6080_v19  ;;  %vm6079_vm6 = vcmp.eq.f32.partialorder %v6078_v45, 8.507059e+37 }
 0x8c9   : > { %v8402_v40 = vpop.eup %8401 }
 0x8ca   : > { %v6070_v9 = vmul.f32 %v8402_v40, %v6068_v6  ;;  %vm6075_vm0 = vweird.f32 %v8402_v40  ;;  %v6094_v6 = vld [vmem:[%s8661_s15 + $0x50] sm:$0xff] }
 0x8cb   : > { %vm6076_vm5 = vmor %vm6074_vm4, %vm6075_vm0 }
 0x8cc   : > { %v6071_v28 = vsub.f32 1.0, %v6070_v9 }
 0x8ce   : > { %v6072_v33 = vmul.f32 %v8402_v40, %v6071_v28 }
 0x8d0   : > { %v6073_v59 = vadd.f32 %v8402_v40, %v6072_v33 }
 0x8d2   : > { %v6077_v4 = vsel %vm6076_vm5, %v8402_v40, %v6073_v59 }
 0x8d3   : > { %v6082_v1 = vsel %vm6079_vm6, %v6081_v62, %v6077_v4 }
 0x8d4   : > { %v12503_v43 = vperm.slane %v6082_v1, 0 }
 0x8d6   : > { %v6117_v57 = vmul.f32 %v12503_v43, %v12328_v34  ;;  %v6118_v41 = vmul.f32 %v12503_v43, %v12324_v53  ;;  %v6119_v29 = vmul.f32 %v12503_v43, %v12332_v31  ;;  %v6120_v46 = vmul.f32 %v12503_v43, %v12338_v54  ;;  %v6088_v34 = vld [vmem:[%s8661_s15 + $0x20] sm:$0xff]  ;;  %v6089_v53 = vld [vmem:[%s8661_s15 + $0x28] sm:$0xff]  ;;  %v6090_v54 = vld [vmem:[%s8661_s15 + $0x30] sm:$0xff] }
 0x8d7   : > { %v6121_v26 = vmul.f32 %v12503_v43, %v12346_v61  ;;  %v6122_v42 = vmul.f32 %v12503_v43, %v12352_v58  ;;  %v6123_v31 = vmul.f32 %v12503_v43, %v12358_v60  ;;  %v6124_v30 = vmul.f32 %v12503_v43, %v12364_v38  ;;  %v6091_v61 = vld [vmem:[%s8661_s15 + $0x38] sm:$0xff] }
 0x8d8   : > { %v6149_v18 = vadd.f32 %v6117_v57, %v6084_v2  ;;  %v6150_v22 = vadd.f32 %v6118_v41, %v6085_v8  ;;  %v6151_v20 = vadd.f32 %v6119_v29, %v6086_v13  ;;  %v6152_v35 = vadd.f32 %v6120_v46, %v6087_v3  ;;  %v6098_v13 = vld [vmem:[%s8661_s15 + $0x70] sm:$0xff] }
 0x8d9   : > { %v6125_v52 = vmul.f32 %v12503_v43, %v12374_v10  ;;  %v6153_v58 = vadd.f32 %v6121_v26, %v6088_v34  ;;  %v6126_v49 = vmul.f32 %v12503_v43, %v12380_v23  ;;  %v6127_v60 = vmul.f32 %v12503_v43, %v12386_v50  ;;  %v6095_v23 = vld [vmem:[%s8661_s15 + $0x58] sm:$0xff] }
 0x8da   : > { %v6154_v37 = vadd.f32 %v6122_v42, %v6089_v53  ;;  %v6155_v38 = vadd.f32 %v6123_v31, %v6090_v54  ;;  %v6181_v40 = vmax.f32 %v6149_v18, 0.0  ;;  %v6182_v9 = vmax.f32 %v6150_v22, 0.0  ;;  %v6100_v22 = vld [vmem:[%s8661_s15 + $0x80] sm:$0xff] }
 0x8db   : > { %v6183_v28 = vmax.f32 %v6151_v20, 0.0  ;;  %v6128_v10 = vmul.f32 %v12503_v43, %v12392_v56  ;;  %v6156_v33 = vadd.f32 %v6124_v30, %v6091_v61  ;;  %v6184_v59 = vmax.f32 %v6152_v35, 0.0  ;;  %v6096_v56 = vld [vmem:[%s8661_s15 + $0x60] sm:$0xff]  ;;  %v6101_v35 = vld [vmem:[%s8661_s15 + $0x88] sm:$0xff] }
 0x8dc   : > { %v6129_v50 = vmul.f32 %v12503_v43, %v12397_v16  ;;  %v6130_v19 = vmul.f32 %v12503_v43, %v12402_v15  ;;  %v6157_v45 = vadd.f32 %v6125_v52, %v6092_v39  ;;  %v6185_v4 = vmax.f32 %v6153_v58, 0.0  ;;  %v6097_v16 = vld [vmem:[%s8661_s15 + $0x68] sm:$0xff]  ;;  %v6102_v39 = vld [vmem:[%s8661_s15 + $0x90] sm:$0xff] }
 0x8dd   : > { %v6131_v62 = vmul.f32 %v12503_v43, %v12407_v24  ;;  %v6158_v1 = vadd.f32 %v6126_v49, %v6093_v55  ;;  %v6159_v57 = vadd.f32 %v6127_v60, %v6094_v6  ;;  %v6186_v41 = vmax.f32 %v6154_v37, 0.0  ;;  %v6099_v24 = vld [vmem:[%s8661_s15 + $0x78] sm:$0xff] }
 0x8de   : > { %v6187_v29 = vmax.f32 %v6155_v38, 0.0  ;;  %v6213_v15 = vpack.c.bf16 %v6181_v40, %v6181_v40  ;;  %v6214_v2 = vpack.c.bf16 %v6182_v9, %v6182_v9  ;;  %v6215_v8 = vpack.c.bf16 %v6183_v28, %v6183_v28  ;;  %v6103_v55 = vld [vmem:[%s8661_s15 + $0x98] sm:$0xff]  ;;  %v6104_v9 = vld [vmem:[%s8661_s15 + $0xa0] sm:$0xff] }
 0x8df   : > { %v6132_v46 = vmul.f32 %v12503_v43, %v12412_v25  ;;  %v6160_v3 = vadd.f32 %v6128_v10, %v6095_v23  ;;  %v6188_v26 = vmax.f32 %v6156_v33, 0.0  ;;  %v6216_v34 = vpack.c.bf16 %v6184_v59, %v6184_v59  ;;  %v6105_v59 = vld [vmem:[%s8661_s15 + $0xa8] sm:$0xff] }
 0x8e0   : > { %v6133_v42 = vmul.f32 %v12503_v43, %v12417_v14  ;;  %v6161_v53 = vadd.f32 %v6129_v50, %v6096_v56  ;;  %v6189_v31 = vmax.f32 %v6157_v45, 0.0  ;;  %v6217_v18 = vpack.c.bf16 %v6185_v4, %v6185_v4  ;;  %6246 = vst.msk [vmem:[%s12549_s23] sm:$0xf] %vm6245_vm7, %v6213_v15  ;;  %v6106_v45 = vld [vmem:[%s8661_s15 + $0xb0] sm:$0xff] }
 0x8e1   : > { %v6134_v20 = vmul.f32 %v12503_v43, %v12422_v63  ;;  %v6162_v25 = vadd.f32 %v6130_v19, %v6097_v16  ;;  %v6190_v54 = vmax.f32 %v6158_v1, 0.0  ;;  %v6218_v30 = vpack.c.bf16 %v6186_v41, %v6186_v41  ;;  %6247 = vst.msk [vmem:[%s12549_s23 + $0x4] sm:$0xf] %vm6245_vm7, %v6214_v2  ;;  %v6107_v1 = vld [vmem:[%s8661_s15 + $0xb8] sm:$0xff] }
 0x8e2   : > { %v6135_v14 = vmul.f32 %v12503_v43, %v12427_v51  ;;  %v6163_v61 = vadd.f32 %v6131_v62, %v6098_v13  ;;  %v6191_v52 = vmax.f32 %v6159_v57, 0.0  ;;  %v6219_v58 = vpack.c.bf16 %v6187_v29, %v6187_v29  ;;  %6248 = vst.msk [vmem:[%s12549_s23 + $0x8] sm:$0xf] %vm6245_vm7, %v6215_v8  ;;  %v6108_v29 = vld [vmem:[%s8661_s15 + $0xc0] sm:$0xff]  ;;  %v6109_v13 = vld [vmem:[%s8661_s15 + $0xc8] sm:$0xff] }
 0x8e3   : > { %v6136_v63 = vmul.f32 %v12503_v43, %v12432_v32  ;;  %v6164_v49 = vadd.f32 %v6132_v46, %v6099_v24  ;;  %v6192_v60 = vmax.f32 %v6160_v3, 0.0  ;;  %v6220_v37 = vpack.c.bf16 %v6188_v26, %v6188_v26  ;;  %6249 = vst.msk [vmem:[%s12549_s23 + $0xc] sm:$0xf] %vm6245_vm7, %v6216_v34  ;;  %v6110_v34 = vld [vmem:[%s8661_s15 + $0xd0] sm:$0xff] }
 0x8e4   : > { %v6137_v51 = vmul.f32 %v12503_v43, %v12437_v0  ;;  %v6165_v6 = vadd.f32 %v6133_v42, %v6100_v22  ;;  %v6193_v38 = vmax.f32 %v6161_v53, 0.0  ;;  %v6221_v40 = vpack.c.bf16 %v6189_v31, %v6189_v31  ;;  %6250 = vst.msk [vmem:[%s12549_s23 + $0x10] sm:$0xf] %vm6245_vm7, %v6217_v18  ;;  %v6111_v31 = vld [vmem:[%s8661_s15 + $0xd8] sm:$0xff] }
 0x8e5   : > { %v6138_v32 = vmul.f32 %v12503_v43, %v12442_v48  ;;  %v6166_v28 = vadd.f32 %v6134_v20, %v6101_v35  ;;  %v6194_v10 = vmax.f32 %v6162_v25, 0.0  ;;  %v6222_v33 = vpack.c.bf16 %v6190_v54, %v6190_v54  ;;  %6251 = vst.msk [vmem:[%s12549_s23 + $0x14] sm:$0xf] %vm6245_vm7, %v6218_v30  ;;  %v6112_v25 = vld [vmem:[%s8661_s15 + $0xe0] sm:$0xff] }
 0x8e6   : > { %v6139_v0 = vmul.f32 %v12503_v43, %v12447_v21  ;;  %v6167_v23 = vadd.f32 %v6135_v14, %v6102_v39  ;;  %v6195_v50 = vmax.f32 %v6163_v61, 0.0  ;;  %v6223_v19 = vpack.c.bf16 %v6191_v52, %v6191_v52  ;;  %6252 = vst.msk [vmem:[%s12549_s23 + $0x18] sm:$0xf] %vm6245_vm7, %v6219_v58  ;;  %v6113_v14 = vld [vmem:[%s8661_s15 + $0xe8] sm:$0xff]  ;;  %v6114_v39 = vld [vmem:[%s8661_s15 + $0xf0] sm:$0xff] }
 0x8e7   : > { %v6140_v48 = vmul.f32 %v12503_v43, %v12452_v5  ;;  %v6168_v4 = vadd.f32 %v6136_v63, %v6103_v55  ;;  %v6196_v56 = vmax.f32 %v6164_v49, 0.0  ;;  %v6224_v62 = vpack.c.bf16 %v6192_v60, %v6192_v60  ;;  %6253 = vst.msk [vmem:[%s12549_s23 + $0x1c] sm:$0xf] %vm6245_vm7, %v6220_v37  ;;  %v6115_v37 = vld [vmem:[%s8661_s15 + $0xf8] sm:$0xff] }
 0x8e8   : > { %v6141_v21 = vmul.f32 %v12503_v43, %v12457_v36  ;;  %v6169_v57 = vadd.f32 %v6137_v51, %v6104_v9  ;;  %v6197_v41 = vmax.f32 %v6165_v6, 0.0  ;;  %v6225_v16 = vpack.c.bf16 %v6193_v38, %v6193_v38  ;;  %6254 = vst.msk [vmem:[%s12549_s23 + $0x20] sm:$0xf] %vm6245_vm7, %v6221_v40 }
 0x8e9   : > { %v6142_v5 = vmul.f32 %v12503_v43, %v12462_v12  ;;  %v6170_v15 = vadd.f32 %v6138_v32, %v6105_v59  ;;  %v6198_v2 = vmax.f32 %v6166_v28, 0.0  ;;  %v6226_v8 = vpack.c.bf16 %v6194_v10, %v6194_v10  ;;  %6255 = vst.msk [vmem:[%s12549_s23 + $0x24] sm:$0xf] %vm6245_vm7, %v6222_v33 }
 0x8ea   : > { %v6143_v36 = vmul.f32 %v12503_v43, %v12469_v11  ;;  %v6171_v46 = vadd.f32 %v6139_v0, %v6106_v45  ;;  %v6199_v3 = vmax.f32 %v6167_v23, 0.0  ;;  %v6227_v26 = vpack.c.bf16 %v6195_v50, %v6195_v50  ;;  %6256 = vst.msk [vmem:[%s12549_s23 + $0x28] sm:$0xf] %vm6245_vm7, %v6223_v19 }
 0x8eb   : > { %v6144_v12 = vmul.f32 %v12503_v43, %v12474_v17  ;;  %v6172_v24 = vadd.f32 %v6140_v48, %v6107_v1  ;;  %v6200_v42 = vmax.f32 %v6168_v4, 0.0  ;;  %v6228_v53 = vpack.c.bf16 %v6196_v56, %v6196_v56  ;;  %6257 = vst.msk [vmem:[%s12549_s23 + $0x2c] sm:$0xf] %vm6245_vm7, %v6224_v62 }
 0x8ec   : > { %v6145_v11 = vmul.f32 %v12503_v43, %v12482_v47  ;;  %v6173_v18 = vadd.f32 %v6141_v21, %v6108_v29  ;;  %v6201_v22 = vmax.f32 %v6169_v57, 0.0  ;;  %v6229_v20 = vpack.c.bf16 %v6197_v41, %v6197_v41  ;;  %6258 = vst.msk [vmem:[%s12549_s23 + $0x30] sm:$0xf] %vm6245_vm7, %v6225_v16 }
 0x8ed   : > { %v6146_v17 = vmul.f32 %v12503_v43, %v12487_v44  ;;  %v6174_v54 = vadd.f32 %v6142_v5, %v6109_v13  ;;  %v6202_v30 = vmax.f32 %v6170_v15, 0.0  ;;  %v6230_v35 = vpack.c.bf16 %v6198_v2, %v6198_v2  ;;  %6259 = vst.msk [vmem:[%s12549_s23 + $0x34] sm:$0xf] %vm6245_vm7, %v6226_v8 }
 0x8ee   : > { %v6147_v47 = vmul.f32 %v12503_v43, %v12490_v7  ;;  %v6175_v61 = vadd.f32 %v6143_v36, %v6110_v34  ;;  %v6203_v52 = vmax.f32 %v6171_v46, 0.0  ;;  %v6231_v58 = vpack.c.bf16 %v6199_v3, %v6199_v3  ;;  %6260 = vst.msk [vmem:[%s12549_s23 + $0x38] sm:$0xf] %vm6245_vm7, %v6227_v26 }
 0x8ef   : > { %v6148_v44 = vmul.f32 %v12503_v43, %v12497_v27  ;;  %v6176_v63 = vadd.f32 %v6144_v12, %v6111_v31  ;;  %v6204_v49 = vmax.f32 %v6172_v24, 0.0  ;;  %v6232_v60 = vpack.c.bf16 %v6200_v42, %v6200_v42  ;;  %6261 = vst.msk [vmem:[%s12549_s23 + $0x3c] sm:$0xf] %vm6245_vm7, %v6228_v53 }
 0x8f0   : > { %v6177_v55 = vadd.f32 %v6145_v11, %v6112_v25  ;;  %v6205_v7 = vmax.f32 %v6173_v18, 0.0  ;;  %v6233_v51 = vpack.c.bf16 %v6201_v22, %v6201_v22  ;;  %6262 = vst.msk [vmem:[%s12549_s23 + $0x40] sm:$0xf] %vm6245_vm7, %v6229_v20  ;;  %v6178_v6 = vadd.f32 %v6146_v17, %v6113_v14 }
 0x8f1   : > { %v6206_v38 = vmax.f32 %v6174_v54, 0.0  ;;  %v6234_v40 = vpack.c.bf16 %v6202_v30, %v6202_v30  ;;  %6263 = vst.msk [vmem:[%s12549_s23 + $0x44] sm:$0xf] %vm6245_vm7, %v6230_v35  ;;  %v6179_v27 = vadd.f32 %v6147_v47, %v6114_v39  ;;  %v6207_v43 = vmax.f32 %v6175_v61, 0.0 }
 0x8f2   : > { %v6235_v9 = vpack.c.bf16 %v6203_v52, %v6203_v52  ;;  %6264 = vst.msk [vmem:[%s12549_s23 + $0x48] sm:$0xf] %vm6245_vm7, %v6231_v58  ;;  %v6180_v32 = vadd.f32 %v6148_v44, %v6115_v37  ;;  %v6208_v28 = vmax.f32 %v6176_v63, 0.0  ;;  %v6236_v10 = vpack.c.bf16 %v6204_v49, %v6204_v49 }
 0x8f3   : > { %6265 = vst.msk [vmem:[%s12549_s23 + $0x4c] sm:$0xf] %vm6245_vm7, %v6232_v60  ;;  %v6209_v33 = vmax.f32 %v6177_v55, 0.0  ;;  %v6237_v59 = vpack.c.bf16 %v6205_v7, %v6205_v7  ;;  %v6210_v0 = vmax.f32 %v6178_v6, 0.0  ;;  %v6238_v23 = vpack.c.bf16 %v6206_v38, %v6206_v38 }
 0x8f4   : > { %6266 = vst.msk [vmem:[%s12549_s23 + $0x50] sm:$0xf] %vm6245_vm7, %v6233_v51  ;;  %v6211_v50 = vmax.f32 %v6179_v27, 0.0  ;;  %v6239_v19 = vpack.c.bf16 %v6207_v43, %v6207_v43  ;;  %v6212_v45 = vmax.f32 %v6180_v32, 0.0  ;;  %v6240_v48 = vpack.c.bf16 %v6208_v28, %v6208_v28 }
 0x8f5   : > { %6267 = vst.msk [vmem:[%s12549_s23 + $0x54] sm:$0xf] %vm6245_vm7, %v6234_v40  ;;  %v6241_v4 = vpack.c.bf16 %v6209_v33, %v6209_v33  ;;  %v6242_v56 = vpack.c.bf16 %v6210_v0, %v6210_v0 }
 0x8f6   : > { %6268 = vst.msk [vmem:[%s12549_s23 + $0x58] sm:$0xf] %vm6245_vm7, %v6235_v9  ;;  %v6243_v62 = vpack.c.bf16 %v6211_v50, %v6211_v50  ;;  %v6244_v1 = vpack.c.bf16 %v6212_v45, %v6212_v45 }
 0x8f7   : > { %6269 = vst.msk [vmem:[%s12549_s23 + $0x5c] sm:$0xf] %vm6245_vm7, %v6236_v10 }
 0x8f8   : > { %6270 = vst.msk [vmem:[%s12549_s23 + $0x60] sm:$0xf] %vm6245_vm7, %v6237_v59 }
 0x8f9   : > { %6271 = vst.msk [vmem:[%s12549_s23 + $0x64] sm:$0xf] %vm6245_vm7, %v6238_v23 }
 0x8fa   : > { %6272 = vst.msk [vmem:[%s12549_s23 + $0x68] sm:$0xf] %vm6245_vm7, %v6239_v19 }
 0x8fb   : > { %6273 = vst.msk [vmem:[%s12549_s23 + $0x6c] sm:$0xf] %vm6245_vm7, %v6240_v48 }
 0x8fc   : > { %6274 = vst.msk [vmem:[%s12549_s23 + $0x70] sm:$0xf] %vm6245_vm7, %v6241_v4 }
 0x8fd   : > { %6275 = vst.msk [vmem:[%s12549_s23 + $0x74] sm:$0xf] %vm6245_vm7, %v6242_v56 }
 0x8fe   : > { %6276 = vst.msk [vmem:[%s12549_s23 + $0x78] sm:$0xf] %vm6245_vm7, %v6243_v62 }
 0x8ff   : > { %6277 = vst.msk [vmem:[%s12549_s23 + $0x7c] sm:$0xf] %vm6245_vm7, %v6244_v1 }
 0x900 PF: > { %s19_s30 = sadd.s32 1, %s8430_s30  }
 0x901   : > { %p16_p4 = scmp.ge.s32.totalorder %s19_s30, 4  }
 0x903   :  { %18 = sbr.rel (!%p16_p4) target bundleno = 1 (0x1), region = 95 }

</bundles_post_ra>
